<compile_context>
chip_gen: v5e
topology: v5e:2x2
jax: 0.10.0
libtpu: 0.0.40
codegen_flags: <defaults>
</compile_context>

<pallas_src>
import functools

import jax
import jax.numpy as jnp
from jax.experimental import pallas as pl
from jax.experimental.pallas import tpu as pltpu


def _mish(x):
    # mish(x) = x * tanh(softplus(x)) = x - 2x / (1 + (1 + e^x)^2)
    # -> one EUP exp + one approx reciprocal (instead of exp + log + tanh).
    # Clamp: for x > 20 the correction term is < 1e-16 * x, i.e. mish(x) == x
    # to fp32 precision, so clamping only avoids inf intermediates.
    e = jnp.exp(jnp.minimum(x, 20.0))
    n = (1.0 + e) * (1.0 + e)
    return x - 2.0 * x * pl.reciprocal(n + 1.0, approx=True)


# --------------------------------------------------------------------------
# Stage 1: fused 1x1 chain   conv1 -> m0  (left)   and   conv2  (right)
# --------------------------------------------------------------------------
def _csp_stem_kernel(x_ref, w1_ref, b1_ref, wm0_ref, bm0_ref, w2_ref, b2_ref,
                     left_ref, right_ref):
    f32 = jnp.float32
    x = x_ref[...]
    # conv1 (BN folded into w1) + mish, kept in f32 for the next matmul.
    h = _mish(jnp.dot(x, w1_ref[...], preferred_element_type=f32) + b1_ref[...])
    # m0 (1x1) + mish on the same VMEM tile (no HBM round trip).
    left = _mish(jnp.dot(h, wm0_ref[...], preferred_element_type=f32)
                 + bm0_ref[...])
    # conv2 (right branch) reuses the same input tile.
    right = _mish(jnp.dot(x, w2_ref[...], preferred_element_type=f32)
                  + b2_ref[...])
    left_ref[...] = left.astype(left_ref.dtype)
    right_ref[...] = right.astype(right_ref.dtype)


def csp_stem(x2d, p_conv1, p_m0, p_conv2, *, block_rows):
    P, cin = x2d.shape
    cout = p_conv1["w"].shape[-1]
    assert P % block_rows == 0  # caller pads with pl.cdiv

    w1 = p_conv1["w"].reshape(cin, cout)
    wm0 = p_m0["w"].reshape(cout, cout)
    w2 = p_conv2["w"].reshape(cin, cout)
    b1 = p_conv1["bias"].reshape(1, cout)
    bm0 = p_m0["bias"].reshape(1, cout)
    b2 = p_conv2["bias"].reshape(1, cout)

    flops = 2 * P * cout * (2 * cin + cout)
    transcendentals = 3 * P * cout
    bytes_accessed = 4 * (P * cin + 2 * P * cout
                          + 2 * cin * cout + cout * cout + 3 * cout)

    return pl.pallas_call(
        _csp_stem_kernel,
        out_shape=(jax.ShapeDtypeStruct((P, cout), x2d.dtype),
                   jax.ShapeDtypeStruct((P, cout), x2d.dtype)),
        grid_spec=pltpu.PrefetchScalarGridSpec(
            num_scalar_prefetch=0,
            grid=(P // block_rows,),
            in_specs=[
                pl.BlockSpec((block_rows, cin), lambda i: (i, 0)),
                pl.BlockSpec((cin, cout), lambda i: (0, 0)),
                pl.BlockSpec((1, cout), lambda i: (0, 0)),
                pl.BlockSpec((cout, cout), lambda i: (0, 0)),
                pl.BlockSpec((1, cout), lambda i: (0, 0)),
                pl.BlockSpec((cin, cout), lambda i: (0, 0)),
                pl.BlockSpec((1, cout), lambda i: (0, 0)),
            ],
            out_specs=[
                pl.BlockSpec((block_rows, cout), lambda i: (i, 0)),
                pl.BlockSpec((block_rows, cout), lambda i: (i, 0)),
            ],
        ),
        compiler_params=pltpu.CompilerParams(
            dimension_semantics=("parallel",),
            vmem_limit_bytes=32 * 1024 * 1024),
        cost_estimate=pl.CostEstimate(flops=flops,
                                      transcendentals=transcendentals,
                                      bytes_accessed=bytes_accessed),
    )(x2d, w1, b1, wm0, bm0, w2, b2)


# --------------------------------------------------------------------------
# Stage 2: fused 3x3 (m1) + channel concat + conv3 (1x1)
# --------------------------------------------------------------------------
def _csp_head_kernel(lpad_ref, rw_ref, wm1_ref, bm1_ref, w3t_ref, w3b_ref,
                     b3_ref, out_ref, *, tap_offsets, out_rows):
    f32 = jnp.float32
    # 3x3 conv as 9 shifted matmuls on the row-major "wide" (width W+2)
    # pixel layout: tap (dy, dx) is a constant row offset dy*(W+2)+dx.
    acc = jnp.dot(lpad_ref[tap_offsets[0]:tap_offsets[0] + out_rows, :],
                  wm1_ref[0], preferred_element_type=f32)
    for t in range(1, 9):                       # static unroll over the taps
        off = tap_offsets[t]
        acc = acc + jnp.dot(lpad_ref[off:off + out_rows, :], wm1_ref[t],
                            preferred_element_type=f32)
    left3 = _mish(acc + bm1_ref[...])
    # conv3 on the (left3 || right) concat, without materializing the concat:
    # split conv3 weight into top/bottom K-halves.
    y = jnp.dot(left3, w3t_ref[...], preferred_element_type=f32)
    y = y + jnp.dot(rw_ref[...], w3b_ref[...], preferred_element_type=f32)
    out_ref[...] = _mish(y + b3_ref[...]).astype(out_ref.dtype)


def csp_head(lpadw, rightw, p_m1, p_conv3, *, H, W):
    N, PL, c = lpadw.shape
    _, PR, _ = rightw.shape
    c2 = p_conv3["w"].shape[-1]       # 2 * ch_out
    Wp = W + 2
    assert PR == H * Wp and PL == (H + 2) * Wp + 2

    wm1 = p_m1["w"].reshape(9, c, c)              # HWIO taps, dy-major
    bm1 = p_m1["bias"].reshape(1, c)
    w3 = p_conv3["w"].reshape(2 * c, c2)
    w3t, w3b = w3[:c], w3[c:]
    b3 = p_conv3["bias"].reshape(1, c2)
    tap_offsets = tuple(dy * Wp + dx for dy in range(3) for dx in range(3))

    kernel = functools.partial(_csp_head_kernel,
                               tap_offsets=tap_offsets, out_rows=PR)

    flops = N * (18 * PR * c * c + 4 * PR * c * c2)
    transcendentals = N * PR * (c + c2)
    bytes_accessed = 4 * (N * (PL * c + PR * c + PR * c2)
                          + 9 * c * c + 2 * c * c2 + c + c2)

    return pl.pallas_call(
        kernel,
        out_shape=jax.ShapeDtypeStruct((N, PR, c2), rightw.dtype),
        grid_spec=pltpu.PrefetchScalarGridSpec(
            num_scalar_prefetch=0,
            grid=(N,),
            in_specs=[
                pl.BlockSpec((None, PL, c), lambda n: (n, 0, 0)),
                pl.BlockSpec((None, PR, c), lambda n: (n, 0, 0)),
                pl.BlockSpec((9, c, c), lambda n: (0, 0, 0)),
                pl.BlockSpec((1, c), lambda n: (0, 0)),
                pl.BlockSpec((c, c2), lambda n: (0, 0)),
                pl.BlockSpec((c, c2), lambda n: (0, 0)),
                pl.BlockSpec((1, c2), lambda n: (0, 0)),
            ],
            out_specs=pl.BlockSpec((None, PR, c2), lambda n: (n, 0, 0)),
        ),
        compiler_params=pltpu.CompilerParams(
            dimension_semantics=("parallel",),
            vmem_limit_bytes=32 * 1024 * 1024),
        cost_estimate=pl.CostEstimate(flops=flops,
                                      transcendentals=transcendentals,
                                      bytes_accessed=bytes_accessed),
    )(lpadw, rightw, wm1, bm1, w3t, w3b, b3)


# --------------------------------------------------------------------------
# Parameter init (Conv2d no-bias + BatchNorm2d eval, BN folded into weights)
# --------------------------------------------------------------------------
def init_conv_bn(key, cin, cout, ksize):
    k_w, k_g, k_b, k_m, k_v = jax.random.split(key, 5)
    w = 0.1 * jax.random.normal(k_w, (ksize, ksize, cin, cout), jnp.float32)
    gamma = 1.0 + 0.1 * jax.random.normal(k_g, (cout,), jnp.float32)
    beta = 0.1 * jax.random.normal(k_b, (cout,), jnp.float32)
    mean = 0.1 * jax.random.normal(k_m, (cout,), jnp.float32)
    var = 1.0 + 0.1 * jnp.abs(jax.random.normal(k_v, (cout,), jnp.float32))
    eps = 1e-5                                    # torch BatchNorm2d default
    scale = gamma / jnp.sqrt(var + eps)
    bias = beta - mean * scale
    # Fold BN scale into the conv weight so kernels only do `y + bias`.
    return {"w": w * scale, "bias": bias}


def init_ppyolo_det_block_csp_params(key, ch_in, ch_out):
    ks = jax.random.split(key, 5)
    return {
        "conv1": init_conv_bn(ks[0], ch_in, ch_out, 1),       # name + '.left'
        "conv2": init_conv_bn(ks[1], ch_in, ch_out, 1),       # name + '.right'
        "m0": init_conv_bn(ks[2], ch_out, ch_out, 1),         # cfg '.0' 1x1
        "m1": init_conv_bn(ks[3], ch_out, ch_out, 3),         # cfg '.1' 3x3
        "conv3": init_conv_bn(ks[4], 2 * ch_out, 2 * ch_out, 1),
    }


# --------------------------------------------------------------------------
# Forward pass (NCHW in / NCHW out, matching the PyTorch module)
# --------------------------------------------------------------------------
def ppyolo_det_block_csp(x_nchw, params, *, block_rows=256):
    N, cin, H, W = x_nchw.shape
    cout = params["conv1"]["w"].shape[-1]
    x = jnp.transpose(x_nchw, (0, 2, 3, 1))       # NHWC
    P = N * H * W
    x2d = x.reshape(P, cin)

    # ---- stage 1: fused 1x1 chain (conv1 -> m0) + conv2 ----
    # cdiv + zero padding instead of a hard divisibility assert, so
    # block_rows can be tuned freely (padded rows are sliced off below).
    Ppad = block_rows * pl.cdiv(P, block_rows)
    if Ppad != P:
        x2d = jnp.pad(x2d, ((0, Ppad - P), (0, 0)))
    left_mid, right = csp_stem(x2d, params["conv1"], params["m0"],
                               params["conv2"], block_rows=block_rows)
    left_mid = left_mid[:P].reshape(N, H, W, cout)
    right = right[:P].reshape(N, H, W, cout)

    # ---- stage 2: fused 3x3 (m1) + concat + conv3, no HBM im2col ----
    Wp = W + 2
    # Zero-pad the left branch spatially, flatten each image row-major with
    # the padded width so every 3x3 tap is a constant row offset in-kernel.
    lpadw = jnp.pad(left_mid, ((0, 0), (1, 1), (1, 1), (0, 0)))
    lpadw = lpadw.reshape(N, (H + 2) * Wp, cout)
    lpadw = jnp.pad(lpadw, ((0, 0), (0, 2), (0, 0)))   # tail guard rows
    # Right branch in the same "wide" row layout (garbage columns are zero
    # and get sliced away after the kernel).
    rightw = jnp.pad(right, ((0, 0), (0, 0), (0, 2), (0, 0)))
    rightw = rightw.reshape(N, H * Wp, cout)

    outw = csp_head(lpadw, rightw, params["m1"], params["conv3"], H=H, W=W)
    out = outw.reshape(N, H, Wp, 2 * cout)[:, :, :W, :]
    out = jnp.transpose(out, (0, 3, 1, 2))             # back to NCHW
    # Module returns the same tensor twice.
    return out, out


if __name__ == "__main__":
    key = jax.random.PRNGKey(0)
    k_x, k_p = jax.random.split(key)

    N, CH_IN, H, W = 2, 4, 16, 16
    CH_OUT = 4

    x = jax.random.normal(k_x, (N, CH_IN, H, W), jnp.float32)
    params = init_ppyolo_det_block_csp_params(k_p, CH_IN, CH_OUT)

    fwd = jax.jit(ppyolo_det_block_csp)
    out1, out2 = fwd(x, params)
    jax.block_until_ready((out1, out2))

    assert out1.shape == (N, 2 * CH_OUT, H, W)
    assert out2.shape == (N, 2 * CH_OUT, H, W)
    assert bool(jnp.all(jnp.isfinite(out1)))
    assert bool(jnp.all(jnp.isfinite(out2)))
    print("KERNEL_OK")
</pallas_src>

<mosaic_0001>
module attributes {stable_mosaic.version = 11 : i64} {
  func.func @_csp_stem_kernel(%arg0: i32, %arg1: memref<256x4xf32, #tpu.memory_space<vmem>>, %arg2: memref<4x4xf32, #tpu.memory_space<vmem>>, %arg3: memref<1x4xf32, #tpu.memory_space<vmem>>, %arg4: memref<4x4xf32, #tpu.memory_space<vmem>>, %arg5: memref<1x4xf32, #tpu.memory_space<vmem>>, %arg6: memref<4x4xf32, #tpu.memory_space<vmem>>, %arg7: memref<1x4xf32, #tpu.memory_space<vmem>>, %arg8: memref<256x4xf32, #tpu.memory_space<vmem>>, %arg9: memref<256x4xf32, #tpu.memory_space<vmem>>) attributes {dimension_semantics = [#tpu.dimension_semantics<parallel>], iteration_bounds = array<i64: 2>, scalar_prefetch = 0 : i64, scratch_operands = 0 : i64, tpu.core_type = #tpu.core_type<tc>, window_params = [{transform_indices = @transform_0, window_bounds = array<i64: 256, 4>}, {pipeline_mode = #tpu.pipeline_mode<synchronous>, transform_indices = @transform_1, window_bounds = array<i64: 4, 4>}, {pipeline_mode = #tpu.pipeline_mode<synchronous>, transform_indices = @transform_2, window_bounds = array<i64: 1, 4>}, {pipeline_mode = #tpu.pipeline_mode<synchronous>, transform_indices = @transform_3, window_bounds = array<i64: 4, 4>}, {pipeline_mode = #tpu.pipeline_mode<synchronous>, transform_indices = @transform_4, window_bounds = array<i64: 1, 4>}, {pipeline_mode = #tpu.pipeline_mode<synchronous>, transform_indices = @transform_5, window_bounds = array<i64: 4, 4>}, {pipeline_mode = #tpu.pipeline_mode<synchronous>, transform_indices = @transform_6, window_bounds = array<i64: 1, 4>}, {transform_indices = @transform_7, window_bounds = array<i64: 256, 4>}, {transform_indices = @transform_8, window_bounds = array<i64: 256, 4>}]} {
    %c0 = arith.constant 0 : index
    %c0_0 = arith.constant 0 : index
    %0 = vector.load %arg1[%c0, %c0_0] : memref<256x4xf32, #tpu.memory_space<vmem>>, vector<256x4xf32>
    %c0_1 = arith.constant 0 : index
    %c0_2 = arith.constant 0 : index
    %1 = vector.load %arg2[%c0_1, %c0_2] : memref<4x4xf32, #tpu.memory_space<vmem>>, vector<4x4xf32>
    %cst = arith.constant dense<0.000000e+00> : vector<256x4xf32>
    %2 = tpu.matmul %0, %1, %cst {dimension_numbers = #tpu.dot_dimension_numbers<[1], [0], [0], [1], [0, 0, 1, 1], [], []>} : vector<256x4xf32>, vector<4x4xf32>, vector<256x4xf32> -> vector<256x4xf32>
    %c0_3 = arith.constant 0 : index
    %c0_4 = arith.constant 0 : index
    %3 = vector.load %arg3[%c0_3, %c0_4] : memref<1x4xf32, #tpu.memory_space<vmem>>, vector<1x4xf32>
    %4 = vector.broadcast %3 : vector<1x4xf32> to vector<256x4xf32>
    %5 = arith.addf %2, %4 : vector<256x4xf32>
    %cst_5 = arith.constant 2.000000e+01 : f32
    %6 = vector.broadcast %cst_5 : f32 to vector<256x4xf32>
    %7 = arith.minimumf %5, %6 : vector<256x4xf32>
    %8 = math.exp %7 : vector<256x4xf32>
    %cst_6 = arith.constant 1.000000e+00 : f32
    %9 = vector.broadcast %cst_6 : f32 to vector<256x4xf32>
    %10 = arith.addf %9, %8 : vector<256x4xf32>
    %cst_7 = arith.constant 1.000000e+00 : f32
    %11 = vector.broadcast %cst_7 : f32 to vector<256x4xf32>
    %12 = arith.addf %11, %8 : vector<256x4xf32>
    %13 = arith.mulf %10, %12 : vector<256x4xf32>
    %cst_8 = arith.constant 2.000000e+00 : f32
    %14 = vector.broadcast %cst_8 : f32 to vector<256x4xf32>
    %15 = arith.mulf %14, %5 : vector<256x4xf32>
    %cst_9 = arith.constant 1.000000e+00 : f32
    %16 = vector.broadcast %cst_9 : f32 to vector<256x4xf32>
    %17 = arith.addf %13, %16 : vector<256x4xf32>
    %18 = tpu.reciprocal %17 {approx = true} : vector<256x4xf32> -> vector<256x4xf32>
    %19 = arith.mulf %15, %18 : vector<256x4xf32>
    %20 = arith.subf %5, %19 : vector<256x4xf32>
    %c0_10 = arith.constant 0 : index
    %c0_11 = arith.constant 0 : index
    %21 = vector.load %arg4[%c0_10, %c0_11] : memref<4x4xf32, #tpu.memory_space<vmem>>, vector<4x4xf32>
    %cst_12 = arith.constant dense<0.000000e+00> : vector<256x4xf32>
    %22 = tpu.matmul %20, %21, %cst_12 {dimension_numbers = #tpu.dot_dimension_numbers<[1], [0], [0], [1], [0, 0, 1, 1], [], []>} : vector<256x4xf32>, vector<4x4xf32>, vector<256x4xf32> -> vector<256x4xf32>
    %c0_13 = arith.constant 0 : index
    %c0_14 = arith.constant 0 : index
    %23 = vector.load %arg5[%c0_13, %c0_14] : memref<1x4xf32, #tpu.memory_space<vmem>>, vector<1x4xf32>
    %24 = vector.broadcast %23 : vector<1x4xf32> to vector<256x4xf32>
    %25 = arith.addf %22, %24 : vector<256x4xf32>
    %cst_15 = arith.constant 2.000000e+01 : f32
    %26 = vector.broadcast %cst_15 : f32 to vector<256x4xf32>
    %27 = arith.minimumf %25, %26 : vector<256x4xf32>
    %28 = math.exp %27 : vector<256x4xf32>
    %cst_16 = arith.constant 1.000000e+00 : f32
    %29 = vector.broadcast %cst_16 : f32 to vector<256x4xf32>
    %30 = arith.addf %29, %28 : vector<256x4xf32>
    %cst_17 = arith.constant 1.000000e+00 : f32
    %31 = vector.broadcast %cst_17 : f32 to vector<256x4xf32>
    %32 = arith.addf %31, %28 : vector<256x4xf32>
    %33 = arith.mulf %30, %32 : vector<256x4xf32>
    %cst_18 = arith.constant 2.000000e+00 : f32
    %34 = vector.broadcast %cst_18 : f32 to vector<256x4xf32>
    %35 = arith.mulf %34, %25 : vector<256x4xf32>
    %cst_19 = arith.constant 1.000000e+00 : f32
    %36 = vector.broadcast %cst_19 : f32 to vector<256x4xf32>
    %37 = arith.addf %33, %36 : vector<256x4xf32>
    %38 = tpu.reciprocal %37 {approx = true} : vector<256x4xf32> -> vector<256x4xf32>
    %39 = arith.mulf %35, %38 : vector<256x4xf32>
    %40 = arith.subf %25, %39 : vector<256x4xf32>
    %c0_20 = arith.constant 0 : index
    %c0_21 = arith.constant 0 : index
    %41 = vector.load %arg6[%c0_20, %c0_21] : memref<4x4xf32, #tpu.memory_space<vmem>>, vector<4x4xf32>
    %cst_22 = arith.constant dense<0.000000e+00> : vector<256x4xf32>
    %42 = tpu.matmul %0, %41, %cst_22 {dimension_numbers = #tpu.dot_dimension_numbers<[1], [0], [0], [1], [0, 0, 1, 1], [], []>} : vector<256x4xf32>, vector<4x4xf32>, vector<256x4xf32> -> vector<256x4xf32>
    %c0_23 = arith.constant 0 : index
    %c0_24 = arith.constant 0 : index
    %43 = vector.load %arg7[%c0_23, %c0_24] : memref<1x4xf32, #tpu.memory_space<vmem>>, vector<1x4xf32>
    %44 = vector.broadcast %43 : vector<1x4xf32> to vector<256x4xf32>
    %45 = arith.addf %42, %44 : vector<256x4xf32>
    %cst_25 = arith.constant 2.000000e+01 : f32
    %46 = vector.broadcast %cst_25 : f32 to vector<256x4xf32>
    %47 = arith.minimumf %45, %46 : vector<256x4xf32>
    %48 = math.exp %47 : vector<256x4xf32>
    %cst_26 = arith.constant 1.000000e+00 : f32
    %49 = vector.broadcast %cst_26 : f32 to vector<256x4xf32>
    %50 = arith.addf %49, %48 : vector<256x4xf32>
    %cst_27 = arith.constant 1.000000e+00 : f32
    %51 = vector.broadcast %cst_27 : f32 to vector<256x4xf32>
    %52 = arith.addf %51, %48 : vector<256x4xf32>
    %53 = arith.mulf %50, %52 : vector<256x4xf32>
    %cst_28 = arith.constant 2.000000e+00 : f32
    %54 = vector.broadcast %cst_28 : f32 to vector<256x4xf32>
    %55 = arith.mulf %54, %45 : vector<256x4xf32>
    %cst_29 = arith.constant 1.000000e+00 : f32
    %56 = vector.broadcast %cst_29 : f32 to vector<256x4xf32>
    %57 = arith.addf %53, %56 : vector<256x4xf32>
    %58 = tpu.reciprocal %57 {approx = true} : vector<256x4xf32> -> vector<256x4xf32>
    %59 = arith.mulf %55, %58 : vector<256x4xf32>
    %60 = arith.subf %45, %59 : vector<256x4xf32>
    %c0_30 = arith.constant 0 : index
    %c0_31 = arith.constant 0 : index
    %61 = vector.load %arg8[%c0_30, %c0_31] : memref<256x4xf32, #tpu.memory_space<vmem>>, vector<256x4xf32>
    tpu.vector_store %arg8[%c0_30, %c0_31], %40 {strides = array<i32>} : memref<256x4xf32, #tpu.memory_space<vmem>>, vector<256x4xf32>,
    %c0_32 = arith.constant 0 : index
    %c0_33 = arith.constant 0 : index
    %62 = vector.load %arg9[%c0_32, %c0_33] : memref<256x4xf32, #tpu.memory_space<vmem>>, vector<256x4xf32>
    tpu.vector_store %arg9[%c0_32, %c0_33], %60 {strides = array<i32>} : memref<256x4xf32, #tpu.memory_space<vmem>>, vector<256x4xf32>,
    return
  }
  func.func @transform_0(%arg0: i32) -> (i32, i32) {
    %c0_i32 = arith.constant 0 : i32
    %c0_i32_0 = arith.constant 0 : i32
    return %arg0, %c0_i32 : i32, i32
  }
  func.func @transform_1(%arg0: i32) -> (i32, i32) {
    %c0_i32 = arith.constant 0 : i32
    %c0_i32_0 = arith.constant 0 : i32
    %c0_i32_1 = arith.constant 0 : i32
    return %c0_i32, %c0_i32_0 : i32, i32
  }
  func.func @transform_2(%arg0: i32) -> (i32, i32) {
    %c0_i32 = arith.constant 0 : i32
    %c0_i32_0 = arith.constant 0 : i32
    %c0_i32_1 = arith.constant 0 : i32
    return %c0_i32, %c0_i32_0 : i32, i32
  }
  func.func @transform_3(%arg0: i32) -> (i32, i32) {
    %c0_i32 = arith.constant 0 : i32
    %c0_i32_0 = arith.constant 0 : i32
    %c0_i32_1 = arith.constant 0 : i32
    return %c0_i32, %c0_i32_0 : i32, i32
  }
  func.func @transform_4(%arg0: i32) -> (i32, i32) {
    %c0_i32 = arith.constant 0 : i32
    %c0_i32_0 = arith.constant 0 : i32
    %c0_i32_1 = arith.constant 0 : i32
    return %c0_i32, %c0_i32_0 : i32, i32
  }
  func.func @transform_5(%arg0: i32) -> (i32, i32) {
    %c0_i32 = arith.constant 0 : i32
    %c0_i32_0 = arith.constant 0 : i32
    %c0_i32_1 = arith.constant 0 : i32
    return %c0_i32, %c0_i32_0 : i32, i32
  }
  func.func @transform_6(%arg0: i32) -> (i32, i32) {
    %c0_i32 = arith.constant 0 : i32
    %c0_i32_0 = arith.constant 0 : i32
    %c0_i32_1 = arith.constant 0 : i32
    return %c0_i32, %c0_i32_0 : i32, i32
  }
  func.func @transform_7(%arg0: i32) -> (i32, i32) {
    %c0_i32 = arith.constant 0 : i32
    %c0_i32_0 = arith.constant 0 : i32
    return %arg0, %c0_i32 : i32, i32
  }
  func.func @transform_8(%arg0: i32) -> (i32, i32) {
    %c0_i32 = arith.constant 0 : i32
    %c0_i32_0 = arith.constant 0 : i32
    return %arg0, %c0_i32 : i32, i32
  }
}

module attributes {stable_mosaic.version = 11 : i64} {
  func.func @_csp_head_kernel(%arg0: i32, %arg1: memref<1x326x4xf32, #tpu.memory_space<vmem>>, %arg2: memref<1x288x4xf32, #tpu.memory_space<vmem>>, %arg3: memref<9x4x4xf32, #tpu.memory_space<vmem>>, %arg4: memref<1x4xf32, #tpu.memory_space<vmem>>, %arg5: memref<4x8xf32, #tpu.memory_space<vmem>>, %arg6: memref<4x8xf32, #tpu.memory_space<vmem>>, %arg7: memref<1x8xf32, #tpu.memory_space<vmem>>, %arg8: memref<1x288x8xf32, #tpu.memory_space<vmem>>) attributes {dimension_semantics = [#tpu.dimension_semantics<parallel>], iteration_bounds = array<i64: 2>, scalar_prefetch = 0 : i64, scratch_operands = 0 : i64, tpu.core_type = #tpu.core_type<tc>, window_params = [{transform_indices = @transform_0, window_bounds = array<i64: 1, 326, 4>}, {transform_indices = @transform_1, window_bounds = array<i64: 1, 288, 4>}, {pipeline_mode = #tpu.pipeline_mode<synchronous>, transform_indices = @transform_2, window_bounds = array<i64: 9, 4, 4>}, {pipeline_mode = #tpu.pipeline_mode<synchronous>, transform_indices = @transform_3, window_bounds = array<i64: 1, 4>}, {pipeline_mode = #tpu.pipeline_mode<synchronous>, transform_indices = @transform_4, window_bounds = array<i64: 4, 8>}, {pipeline_mode = #tpu.pipeline_mode<synchronous>, transform_indices = @transform_5, window_bounds = array<i64: 4, 8>}, {pipeline_mode = #tpu.pipeline_mode<synchronous>, transform_indices = @transform_6, window_bounds = array<i64: 1, 8>}, {transform_indices = @transform_7, window_bounds = array<i64: 1, 288, 8>}]} {
    %c0 = arith.constant 0 : index
    %c0_0 = arith.constant 0 : index
    %c0_1 = arith.constant 0 : index
    %0 = vector.load %arg1[%c0, %c0_0, %c0_1] : memref<1x326x4xf32, #tpu.memory_space<vmem>>, vector<1x288x4xf32>
    %1 = vector.shape_cast %0 : vector<1x288x4xf32> to vector<288x4xf32>
    %c0_2 = arith.constant 0 : index
    %c0_3 = arith.constant 0 : index
    %c0_4 = arith.constant 0 : index
    %2 = vector.load %arg3[%c0_2, %c0_3, %c0_4] : memref<9x4x4xf32, #tpu.memory_space<vmem>>, vector<1x4x4xf32>
    %3 = vector.shape_cast %2 : vector<1x4x4xf32> to vector<4x4xf32>
    %cst = arith.constant dense<0.000000e+00> : vector<288x4xf32>
    %4 = tpu.matmul %1, %3, %cst {dimension_numbers = #tpu.dot_dimension_numbers<[1], [0], [0], [1], [0, 0, 1, 1], [], []>} : vector<288x4xf32>, vector<4x4xf32>, vector<288x4xf32> -> vector<288x4xf32>
    %c0_5 = arith.constant 0 : index
    %c1 = arith.constant 1 : index
    %c0_6 = arith.constant 0 : index
    %5 = vector.load %arg1[%c0_5, %c1, %c0_6] : memref<1x326x4xf32, #tpu.memory_space<vmem>>, vector<1x288x4xf32>
    %6 = vector.shape_cast %5 : vector<1x288x4xf32> to vector<288x4xf32>
    %c1_7 = arith.constant 1 : index
    %c0_8 = arith.constant 0 : index
    %c0_9 = arith.constant 0 : index
    %7 = vector.load %arg3[%c1_7, %c0_8, %c0_9] : memref<9x4x4xf32, #tpu.memory_space<vmem>>, vector<1x4x4xf32>
    %8 = vector.shape_cast %7 : vector<1x4x4xf32> to vector<4x4xf32>
    %cst_10 = arith.constant dense<0.000000e+00> : vector<288x4xf32>
    %9 = tpu.matmul %6, %8, %cst_10 {dimension_numbers = #tpu.dot_dimension_numbers<[1], [0], [0], [1], [0, 0, 1, 1], [], []>} : vector<288x4xf32>, vector<4x4xf32>, vector<288x4xf32> -> vector<288x4xf32>
    %10 = arith.addf %4, %9 : vector<288x4xf32>
    %c0_11 = arith.constant 0 : index
    %c2 = arith.constant 2 : index
    %c0_12 = arith.constant 0 : index
    %11 = vector.load %arg1[%c0_11, %c2, %c0_12] : memref<1x326x4xf32, #tpu.memory_space<vmem>>, vector<1x288x4xf32>
    %12 = vector.shape_cast %11 : vector<1x288x4xf32> to vector<288x4xf32>
    %c2_13 = arith.constant 2 : index
    %c0_14 = arith.constant 0 : index
    %c0_15 = arith.constant 0 : index
    %13 = vector.load %arg3[%c2_13, %c0_14, %c0_15] : memref<9x4x4xf32, #tpu.memory_space<vmem>>, vector<1x4x4xf32>
    %14 = vector.shape_cast %13 : vector<1x4x4xf32> to vector<4x4xf32>
    %cst_16 = arith.constant dense<0.000000e+00> : vector<288x4xf32>
    %15 = tpu.matmul %12, %14, %cst_16 {dimension_numbers = #tpu.dot_dimension_numbers<[1], [0], [0], [1], [0, 0, 1, 1], [], []>} : vector<288x4xf32>, vector<4x4xf32>, vector<288x4xf32> -> vector<288x4xf32>
    %16 = arith.addf %10, %15 : vector<288x4xf32>
    %c0_17 = arith.constant 0 : index
    %c18 = arith.constant 18 : index
    %c0_18 = arith.constant 0 : index
    %17 = vector.load %arg1[%c0_17, %c18, %c0_18] : memref<1x326x4xf32, #tpu.memory_space<vmem>>, vector<1x288x4xf32>
    %18 = vector.shape_cast %17 : vector<1x288x4xf32> to vector<288x4xf32>
    %c3 = arith.constant 3 : index
    %c0_19 = arith.constant 0 : index
    %c0_20 = arith.constant 0 : index
    %19 = vector.load %arg3[%c3, %c0_19, %c0_20] : memref<9x4x4xf32, #tpu.memory_space<vmem>>, vector<1x4x4xf32>
    %20 = vector.shape_cast %19 : vector<1x4x4xf32> to vector<4x4xf32>
    %cst_21 = arith.constant dense<0.000000e+00> : vector<288x4xf32>
    %21 = tpu.matmul %18, %20, %cst_21 {dimension_numbers = #tpu.dot_dimension_numbers<[1], [0], [0], [1], [0, 0, 1, 1], [], []>} : vector<288x4xf32>, vector<4x4xf32>, vector<288x4xf32> -> vector<288x4xf32>
    %22 = arith.addf %16, %21 : vector<288x4xf32>
    %c0_22 = arith.constant 0 : index
    %c19 = arith.constant 19 : index
    %c0_23 = arith.constant 0 : index
    %23 = vector.load %arg1[%c0_22, %c19, %c0_23] : memref<1x326x4xf32, #tpu.memory_space<vmem>>, vector<1x288x4xf32>
    %24 = vector.shape_cast %23 : vector<1x288x4xf32> to vector<288x4xf32>
    %c4 = arith.constant 4 : index
    %c0_24 = arith.constant 0 : index
    %c0_25 = arith.constant 0 : index
    %25 = vector.load %arg3[%c4, %c0_24, %c0_25] : memref<9x4x4xf32, #tpu.memory_space<vmem>>, vector<1x4x4xf32>
    %26 = vector.shape_cast %25 : vector<1x4x4xf32> to vector<4x4xf32>
    %cst_26 = arith.constant dense<0.000000e+00> : vector<288x4xf32>
    %27 = tpu.matmul %24, %26, %cst_26 {dimension_numbers = #tpu.dot_dimension_numbers<[1], [0], [0], [1], [0, 0, 1, 1], [], []>} : vector<288x4xf32>, vector<4x4xf32>, vector<288x4xf32> -> vector<288x4xf32>
    %28 = arith.addf %22, %27 : vector<288x4xf32>
    %c0_27 = arith.constant 0 : index
    %c20 = arith.constant 20 : index
    %c0_28 = arith.constant 0 : index
    %29 = vector.load %arg1[%c0_27, %c20, %c0_28] : memref<1x326x4xf32, #tpu.memory_space<vmem>>, vector<1x288x4xf32>
    %30 = vector.shape_cast %29 : vector<1x288x4xf32> to vector<288x4xf32>
    %c5 = arith.constant 5 : index
    %c0_29 = arith.constant 0 : index
    %c0_30 = arith.constant 0 : index
    %31 = vector.load %arg3[%c5, %c0_29, %c0_30] : memref<9x4x4xf32, #tpu.memory_space<vmem>>, vector<1x4x4xf32>
    %32 = vector.shape_cast %31 : vector<1x4x4xf32> to vector<4x4xf32>
    %cst_31 = arith.constant dense<0.000000e+00> : vector<288x4xf32>
    %33 = tpu.matmul %30, %32, %cst_31 {dimension_numbers = #tpu.dot_dimension_numbers<[1], [0], [0], [1], [0, 0, 1, 1], [], []>} : vector<288x4xf32>, vector<4x4xf32>, vector<288x4xf32> -> vector<288x4xf32>
    %34 = arith.addf %28, %33 : vector<288x4xf32>
    %c0_32 = arith.constant 0 : index
    %c36 = arith.constant 36 : index
    %c0_33 = arith.constant 0 : index
    %35 = vector.load %arg1[%c0_32, %c36, %c0_33] : memref<1x326x4xf32, #tpu.memory_space<vmem>>, vector<1x288x4xf32>
    %36 = vector.shape_cast %35 : vector<1x288x4xf32> to vector<288x4xf32>
    %c6 = arith.constant 6 : index
    %c0_34 = arith.constant 0 : index
    %c0_35 = arith.constant 0 : index
    %37 = vector.load %arg3[%c6, %c0_34, %c0_35] : memref<9x4x4xf32, #tpu.memory_space<vmem>>, vector<1x4x4xf32>
    %38 = vector.shape_cast %37 : vector<1x4x4xf32> to vector<4x4xf32>
    %cst_36 = arith.constant dense<0.000000e+00> : vector<288x4xf32>
    %39 = tpu.matmul %36, %38, %cst_36 {dimension_numbers = #tpu.dot_dimension_numbers<[1], [0], [0], [1], [0, 0, 1, 1], [], []>} : vector<288x4xf32>, vector<4x4xf32>, vector<288x4xf32> -> vector<288x4xf32>
    %40 = arith.addf %34, %39 : vector<288x4xf32>
    %c0_37 = arith.constant 0 : index
    %c37 = arith.constant 37 : index
    %c0_38 = arith.constant 0 : index
    %41 = vector.load %arg1[%c0_37, %c37, %c0_38] : memref<1x326x4xf32, #tpu.memory_space<vmem>>, vector<1x288x4xf32>
    %42 = vector.shape_cast %41 : vector<1x288x4xf32> to vector<288x4xf32>
    %c7 = arith.constant 7 : index
    %c0_39 = arith.constant 0 : index
    %c0_40 = arith.constant 0 : index
    %43 = vector.load %arg3[%c7, %c0_39, %c0_40] : memref<9x4x4xf32, #tpu.memory_space<vmem>>, vector<1x4x4xf32>
    %44 = vector.shape_cast %43 : vector<1x4x4xf32> to vector<4x4xf32>
    %cst_41 = arith.constant dense<0.000000e+00> : vector<288x4xf32>
    %45 = tpu.matmul %42, %44, %cst_41 {dimension_numbers = #tpu.dot_dimension_numbers<[1], [0], [0], [1], [0, 0, 1, 1], [], []>} : vector<288x4xf32>, vector<4x4xf32>, vector<288x4xf32> -> vector<288x4xf32>
    %46 = arith.addf %40, %45 : vector<288x4xf32>
    %c0_42 = arith.constant 0 : index
    %c38 = arith.constant 38 : index
    %c0_43 = arith.constant 0 : index
    %47 = vector.load %arg1[%c0_42, %c38, %c0_43] : memref<1x326x4xf32, #tpu.memory_space<vmem>>, vector<1x288x4xf32>
    %48 = vector.shape_cast %47 : vector<1x288x4xf32> to vector<288x4xf32>
    %c8 = arith.constant 8 : index
    %c0_44 = arith.constant 0 : index
    %c0_45 = arith.constant 0 : index
    %49 = vector.load %arg3[%c8, %c0_44, %c0_45] : memref<9x4x4xf32, #tpu.memory_space<vmem>>, vector<1x4x4xf32>
    %50 = vector.shape_cast %49 : vector<1x4x4xf32> to vector<4x4xf32>
    %cst_46 = arith.constant dense<0.000000e+00> : vector<288x4xf32>
    %51 = tpu.matmul %48, %50, %cst_46 {dimension_numbers = #tpu.dot_dimension_numbers<[1], [0], [0], [1], [0, 0, 1, 1], [], []>} : vector<288x4xf32>, vector<4x4xf32>, vector<288x4xf32> -> vector<288x4xf32>
    %52 = arith.addf %46, %51 : vector<288x4xf32>
    %c0_47 = arith.constant 0 : index
    %c0_48 = arith.constant 0 : index
    %53 = vector.load %arg4[%c0_47, %c0_48] : memref<1x4xf32, #tpu.memory_space<vmem>>, vector<1x4xf32>
    %54 = vector.broadcast %53 : vector<1x4xf32> to vector<288x4xf32>
    %55 = arith.addf %52, %54 : vector<288x4xf32>
    %cst_49 = arith.constant 2.000000e+01 : f32
    %56 = vector.broadcast %cst_49 : f32 to vector<288x4xf32>
    %57 = arith.minimumf %55, %56 : vector<288x4xf32>
    %58 = math.exp %57 : vector<288x4xf32>
    %cst_50 = arith.constant 1.000000e+00 : f32
    %59 = vector.broadcast %cst_50 : f32 to vector<288x4xf32>
    %60 = arith.addf %59, %58 : vector<288x4xf32>
    %cst_51 = arith.constant 1.000000e+00 : f32
    %61 = vector.broadcast %cst_51 : f32 to vector<288x4xf32>
    %62 = arith.addf %61, %58 : vector<288x4xf32>
    %63 = arith.mulf %60, %62 : vector<288x4xf32>
    %cst_52 = arith.constant 2.000000e+00 : f32
    %64 = vector.broadcast %cst_52 : f32 to vector<288x4xf32>
    %65 = arith.mulf %64, %55 : vector<288x4xf32>
    %cst_53 = arith.constant 1.000000e+00 : f32
    %66 = vector.broadcast %cst_53 : f32 to vector<288x4xf32>
    %67 = arith.addf %63, %66 : vector<288x4xf32>
    %68 = tpu.reciprocal %67 {approx = true} : vector<288x4xf32> -> vector<288x4xf32>
    %69 = arith.mulf %65, %68 : vector<288x4xf32>
    %70 = arith.subf %55, %69 : vector<288x4xf32>
    %c0_54 = arith.constant 0 : index
    %c0_55 = arith.constant 0 : index
    %71 = vector.load %arg5[%c0_54, %c0_55] : memref<4x8xf32, #tpu.memory_space<vmem>>, vector<4x8xf32>
    %cst_56 = arith.constant dense<0.000000e+00> : vector<288x8xf32>
    %72 = tpu.matmul %70, %71, %cst_56 {dimension_numbers = #tpu.dot_dimension_numbers<[1], [0], [0], [1], [0, 0, 1, 1], [], []>} : vector<288x4xf32>, vector<4x8xf32>, vector<288x8xf32> -> vector<288x8xf32>
    %c0_57 = arith.constant 0 : index
    %c0_58 = arith.constant 0 : index
    %c0_59 = arith.constant 0 : index
    %73 = vector.load %arg2[%c0_57, %c0_58, %c0_59] : memref<1x288x4xf32, #tpu.memory_space<vmem>>, vector<1x288x4xf32>
    %74 = vector.shape_cast %73 : vector<1x288x4xf32> to vector<288x4xf32>
    %c0_60 = arith.constant 0 : index
    %c0_61 = arith.constant 0 : index
    %75 = vector.load %arg6[%c0_60, %c0_61] : memref<4x8xf32, #tpu.memory_space<vmem>>, vector<4x8xf32>
    %cst_62 = arith.constant dense<0.000000e+00> : vector<288x8xf32>
    %76 = tpu.matmul %74, %75, %cst_62 {dimension_numbers = #tpu.dot_dimension_numbers<[1], [0], [0], [1], [0, 0, 1, 1], [], []>} : vector<288x4xf32>, vector<4x8xf32>, vector<288x8xf32> -> vector<288x8xf32>
    %77 = arith.addf %72, %76 : vector<288x8xf32>
    %c0_63 = arith.constant 0 : index
    %c0_64 = arith.constant 0 : index
    %78 = vector.load %arg7[%c0_63, %c0_64] : memref<1x8xf32, #tpu.memory_space<vmem>>, vector<1x8xf32>
    %79 = vector.broadcast %78 : vector<1x8xf32> to vector<288x8xf32>
    %80 = arith.addf %77, %79 : vector<288x8xf32>
    %cst_65 = arith.constant 2.000000e+01 : f32
    %81 = vector.broadcast %cst_65 : f32 to vector<288x8xf32>
    %82 = arith.minimumf %80, %81 : vector<288x8xf32>
    %83 = math.exp %82 : vector<288x8xf32>
    %cst_66 = arith.constant 1.000000e+00 : f32
    %84 = vector.broadcast %cst_66 : f32 to vector<288x8xf32>
    %85 = arith.addf %84, %83 : vector<288x8xf32>
    %cst_67 = arith.constant 1.000000e+00 : f32
    %86 = vector.broadcast %cst_67 : f32 to vector<288x8xf32>
    %87 = arith.addf %86, %83 : vector<288x8xf32>
    %88 = arith.mulf %85, %87 : vector<288x8xf32>
    %cst_68 = arith.constant 2.000000e+00 : f32
    %89 = vector.broadcast %cst_68 : f32 to vector<288x8xf32>
    %90 = arith.mulf %89, %80 : vector<288x8xf32>
    %cst_69 = arith.constant 1.000000e+00 : f32
    %91 = vector.broadcast %cst_69 : f32 to vector<288x8xf32>
    %92 = arith.addf %88, %91 : vector<288x8xf32>
    %93 = tpu.reciprocal %92 {approx = true} : vector<288x8xf32> -> vector<288x8xf32>
    %94 = arith.mulf %90, %93 : vector<288x8xf32>
    %95 = arith.subf %80, %94 : vector<288x8xf32>
    %c0_70 = arith.constant 0 : index
    %c0_71 = arith.constant 0 : index
    %c0_72 = arith.constant 0 : index
    %96 = vector.load %arg8[%c0_70, %c0_71, %c0_72] : memref<1x288x8xf32, #tpu.memory_space<vmem>>, vector<1x288x8xf32>
    %97 = vector.shape_cast %96 : vector<1x288x8xf32> to vector<288x8xf32>
    %98 = vector.shape_cast %95 : vector<288x8xf32> to vector<1x288x8xf32>
    tpu.vector_store %arg8[%c0_70, %c0_71, %c0_72], %98 {strides = array<i32>} : memref<1x288x8xf32, #tpu.memory_space<vmem>>, vector<1x288x8xf32>,
    return
  }
  func.func @transform_0(%arg0: i32) -> (i32, i32, i32) {
    %c0_i32 = arith.constant 0 : i32
    %c0_i32_0 = arith.constant 0 : i32
    %c0_i32_1 = arith.constant 0 : i32
    return %arg0, %c0_i32, %c0_i32_0 : i32, i32, i32
  }
  func.func @transform_1(%arg0: i32) -> (i32, i32, i32) {
    %c0_i32 = arith.constant 0 : i32
    %c0_i32_0 = arith.constant 0 : i32
    %c0_i32_1 = arith.constant 0 : i32
    return %arg0, %c0_i32, %c0_i32_0 : i32, i32, i32
  }
  func.func @transform_2(%arg0: i32) -> (i32, i32, i32) {
    %c0_i32 = arith.constant 0 : i32
    %c0_i32_0 = arith.constant 0 : i32
    %c0_i32_1 = arith.constant 0 : i32
    %c0_i32_2 = arith.constant 0 : i32
    return %c0_i32, %c0_i32_0, %c0_i32_1 : i32, i32, i32
  }
  func.func @transform_3(%arg0: i32) -> (i32, i32) {
    %c0_i32 = arith.constant 0 : i32
    %c0_i32_0 = arith.constant 0 : i32
    %c0_i32_1 = arith.constant 0 : i32
    return %c0_i32, %c0_i32_0 : i32, i32
  }
  func.func @transform_4(%arg0: i32) -> (i32, i32) {
    %c0_i32 = arith.constant 0 : i32
    %c0_i32_0 = arith.constant 0 : i32
    %c0_i32_1 = arith.constant 0 : i32
    return %c0_i32, %c0_i32_0 : i32, i32
  }
  func.func @transform_5(%arg0: i32) -> (i32, i32) {
    %c0_i32 = arith.constant 0 : i32
    %c0_i32_0 = arith.constant 0 : i32
    %c0_i32_1 = arith.constant 0 : i32
    return %c0_i32, %c0_i32_0 : i32, i32
  }
  func.func @transform_6(%arg0: i32) -> (i32, i32) {
    %c0_i32 = arith.constant 0 : i32
    %c0_i32_0 = arith.constant 0 : i32
    %c0_i32_1 = arith.constant 0 : i32
    return %c0_i32, %c0_i32_0 : i32, i32
  }
  func.func @transform_7(%arg0: i32) -> (i32, i32, i32) {
    %c0_i32 = arith.constant 0 : i32
    %c0_i32_0 = arith.constant 0 : i32
    %c0_i32_1 = arith.constant 0 : i32
    return %arg0, %c0_i32, %c0_i32_0 : i32, i32, i32
  }
}

</mosaic_0001>

<bundles_post_ra>
// kernel: ppyolo_det_block_csp.2
= control target key start
LH: loop header
LB: loop body
LE: loop exit
PB: predicated region body
PF: predicated region fallthrough
CT: control target
= control target key end

     0   :  { %s2594_s27 = smov 0   ;;  %s3626_s0 = inlined_call_operand.vmem [shape: f32[512,4], index: 0, kind: input, shape index: {}]   ;;  %s3627_s1 = inlined_call_operand.vmem [shape: f32[4,4], index: 1, kind: input, shape index: {}]   ;;  %s3628_s2 = inlined_call_operand.vmem [shape: f32[1,4], index: 2, kind: input, shape index: {}]   ;;  %s3629_s3 = inlined_call_operand.vmem [shape: f32[4,4], index: 3, kind: input, shape index: {}]   ;;  %s3630_s4 = inlined_call_operand.vmem [shape: f32[1,4], index: 4, kind: input, shape index: {}]   ;;  %s3631_s5 = inlined_call_operand.vmem [shape: f32[4,4], index: 5, kind: input, shape index: {}]   ;;  %s3632_s6 = inlined_call_operand.vmem [shape: f32[1,4], index: 6, kind: input, shape index: {}]   ;;  %s3633_s7 = inlined_call_operand.vmem [shape: f32[512,4], index: 7, kind: output, shape index: {0}]   ;;  %s3634_s8 = inlined_call_operand.vmem [shape: f32[512,4], index: 8, kind: output, shape index: {1}]  }
   0x1 LB: > { %s2026_s28 = sadd.s32 4294967295, %s2547_s27   ;;  %p2030_p0 = scmp.ge.s32.totalorder %s2547_s27, 1  ;;  %s2547_s27 = sphi %s2594_s27, %s19_s27  }
   0x2   : > { %p266_p1 = scmp.lt.s32.totalorder %s2547_s27, 3 }
   0x4   : > { %p267_p2 = pnand %p2030_p0, %p266_p1 }
   0x5   : > { %s2031_s9 = sshll.u32 (!%p267_p2), %s2026_s28, 5 }
   0x6   : > { %270 = sbr.rel (%p267_p2) target bundleno = 514 (0x202), region = 48  ;;  %p306_p3 = scmp.lt.s32.totalorder (!%p267_p2), %s2031_s9, 63 }
   0xb   : > { %v355_v0 = vld [vmem:[%s3627_s1] sm:$0xf]  ;;  %vm457_vm0 = vcmask 1043456   ;;  %s3636_s9 = smov (!%p306_p3, %s2031_s9), 63  ;;  %vm360_vm1 = vcmask 31744  }
   0xc   : > { %2037 = vmatpush.msk.msra.mxu0 %vm457_vm0, %v355_v0  ;;  %2138 = vmatpush.msk.msra.mxu3 %vm457_vm0, %v355_v0  ;;  %s2607_s10 = sshll.u32 %s3636_s9, 3  ;;  %v1431_v21 = vld [vmem:[%s3631_s5] sm:$0xf] }
   0xd   : > { %s2613_s13 = scalar_lea.vmem %s3626_s0, %s2607_s10  ;;  %2103 = vmatpush.msk.msra.mxu2 %vm457_vm0, %v1431_v21  ;;  %v2719_v26 = vld [vmem:[%s3628_s2] ss:$0 sm:$0xff]  ;;  %s2991_s24 = scalar_lea.vmem %s3634_s8, %s2607_s10 }
   0xe   : > { %v323_v1 = vld [vmem:[%s2613_s13] sm:$0xff]  ;;  %v324_v3 = vld [vmem:[%s2613_s13 + $0x8] sm:$0xff]  ;;  %v325_v5 = vld [vmem:[%s2613_s13 + $0x10] sm:$0xff]  ;;  %s3153_s11 = scalar_lea.vmem %s3633_s7, %s2607_s10 }
   0xf   : > { %v2617_v2 = vld [vmem:[%s2613_s13 + $0xc0] sm:$0xff]  ;;  %2038 = vmatmul.msk.f32.vlgmr.msra.gmra.mxu0 %vm360_vm1, %v323_v1  ;;  %v2624_v4 = vld [vmem:[%s2613_s13 + $0xc8] sm:$0xff]  ;;  %v2631_v6 = vld [vmem:[%s2613_s13 + $0xd0] sm:$0xff]  ;;  %2104 = vmatmul.msk.f32.vlgmr.msra.gmra.mxu2 %vm360_vm1, %v323_v1 }
  0x10   : > { %2062 = vmatmul.msk.f32.vlgmr.msra.gmra.mxu3 %vm360_vm1, %v2617_v2  ;;  %v326_v7 = vld [vmem:[%s2613_s13 + $0x18] sm:$0xff]  ;;  %v327_v9 = vld [vmem:[%s2613_s13 + $0x20] sm:$0xff]  ;;  %v328_v11 = vld [vmem:[%s2613_s13 + $0x28] sm:$0xff] }
  0x11   : > { %v2638_v8 = vld [vmem:[%s2613_s13 + $0xd8] sm:$0xff]  ;;  %v2645_v10 = vld [vmem:[%s2613_s13 + $0xe0] sm:$0xff]  ;;  %v2652_v12 = vld [vmem:[%s2613_s13 + $0xe8] sm:$0xff] }
  0x12   : > { %v329_v13 = vld [vmem:[%s2613_s13 + $0x30] sm:$0xff]  ;;  %v2662_v15 = vld [vmem:[%s2613_s13 + $0x38] sm:$0xff]  ;;  %v2669_v17 = vld [vmem:[%s2613_s13 + $0x40] sm:$0xff] }
  0x13   : > { %v353_v14 = vld [vmem:[%s2613_s13 + $0xf0] sm:$0xff]  ;;  %v354_v16 = vld [vmem:[%s2613_s13 + $0xf8] sm:$0xff]  ;;  %v2674_v18 = vld [vmem:[%s2613_s13 + $0x48] sm:$0xff] }
  0x14   : > { %v2679_v19 = vld [vmem:[%s2613_s13 + $0x50] sm:$0xff]  ;;  %v2684_v20 = vld [vmem:[%s2613_s13 + $0x58] sm:$0xff]  ;;  %v2694_v22 = vld [vmem:[%s2613_s13 + $0x60] sm:$0xff] }
  0x15   : > { %v2700_v23 = vld [vmem:[%s2613_s13 + $0x68] sm:$0xff]  ;;  %v2706_v24 = vld [vmem:[%s2613_s13 + $0x70] sm:$0xff]  ;;  %v2712_v25 = vld [vmem:[%s2613_s13 + $0x78] sm:$0xff] }
  0x16   : > { %v894_v27 = vld [vmem:[%s3629_s3] sm:$0xf]  ;;  %v2742_v36 = vld [vmem:[%s2613_s13 + $0x88] sm:$0xff]  ;;  %v2756_v48 = vld [vmem:[%s2613_s13 + $0x90] sm:$0xff] }
  0x17   : > { %2039 = vmatmul.msk.f32.gmra.mxu0 %vm360_vm1, %v324_v3  ;;  %2105 = vmatmul.msk.f32.gmra.mxu2 %vm360_vm1, %v324_v3  ;;  %v2729_v29 = vld [vmem:[%s2613_s13 + $0x80] sm:$0xff]  ;;  %v2771_v1 = vld [vmem:[%s2613_s13 + $0x98] sm:$0xff] }
  0x18   : > { %2063 = vmatmul.msk.f32.gmra.mxu3 %vm360_vm1, %v2624_v4  ;;  %2070 = vmatpush.msk.msra.mxu1 %vm457_vm0, %v894_v27 }
  0x19   : > { %2139 = vmatpush.msk.msrb.mxu3 %vm457_vm0, %v894_v27 }
  0x1b   : > { %2140 = vmatpush.msk.msra.mxu3 %vm457_vm0, %v1431_v21 }
  0x1f   : > { %2040 = vmatmul.msk.f32.gmra.mxu0 %vm360_vm1, %v325_v5  ;;  %2106 = vmatmul.msk.f32.gmra.mxu2 %vm360_vm1, %v325_v5 }
  0x20   : > { %2064 = vmatmul.msk.f32.gmra.mxu3 %vm360_vm1, %v2631_v6 }
  0x27   : > { %2041 = vmatmul.msk.f32.gmra.mxu0 %vm360_vm1, %v326_v7  ;;  %2107 = vmatmul.msk.f32.gmra.mxu2 %vm360_vm1, %v326_v7 }
  0x28   : > { %2065 = vmatmul.msk.f32.gmra.mxu3 %vm360_vm1, %v2638_v8 }
  0x2f   : > { %2042 = vmatmul.msk.f32.gmra.mxu0 %vm360_vm1, %v327_v9  ;;  %2108 = vmatmul.msk.f32.gmra.mxu2 %vm360_vm1, %v327_v9 }
  0x30   : > { %2066 = vmatmul.msk.f32.gmra.mxu3 %vm360_vm1, %v2645_v10 }
  0x37   : > { %2043 = vmatmul.msk.f32.gmra.mxu0 %vm360_vm1, %v328_v11  ;;  %2109 = vmatmul.msk.f32.gmra.mxu2 %vm360_vm1, %v328_v11 }
  0x38   : > { %2067 = vmatmul.msk.f32.gmra.mxu3 %vm360_vm1, %v2652_v12 }
  0x3f   : > { %2044 = vmatmul.msk.f32.gmra.mxu0 %vm360_vm1, %v329_v13  ;;  %2110 = vmatmul.msk.f32.gmra.mxu2 %vm360_vm1, %v329_v13 }
  0x40   : > { %2068 = vmatmul.msk.f32.gmra.mxu3 %vm360_vm1, %v353_v14 }
  0x47   : > { %2045 = vmatmul.msk.f32.gmra.mxu0 %vm360_vm1, %v2662_v15  ;;  %2111 = vmatmul.msk.f32.gmra.mxu2 %vm360_vm1, %v2662_v15 }
  0x48   : > { %2069 = vmatmul.msk.f32.gmra.mxu3 %vm360_vm1, %v354_v16 }
  0x4f   : > { %2046 = vmatmul.msk.f32.gmra.mxu0 %vm360_vm1, %v2669_v17  ;;  %2112 = vmatmul.msk.f32.gmra.mxu2 %vm360_vm1, %v2669_v17 }
  0x57   : > { %2047 = vmatmul.msk.f32.gmra.mxu0 %vm360_vm1, %v2674_v18  ;;  %2113 = vmatmul.msk.f32.gmra.mxu2 %vm360_vm1, %v2674_v18 }
  0x5f   : > { %2048 = vmatmul.msk.f32.gmra.mxu0 %vm360_vm1, %v2679_v19  ;;  %2114 = vmatmul.msk.f32.gmra.mxu2 %vm360_vm1, %v2679_v19 }
  0x67   : > { %2049 = vmatmul.msk.f32.gmra.mxu0 %vm360_vm1, %v2684_v20  ;;  %2115 = vmatmul.msk.f32.gmra.mxu2 %vm360_vm1, %v2684_v20 }
  0x6f   : > { %2050 = vmatmul.msk.f32.gmra.mxu0 %vm360_vm1, %v2694_v22  ;;  %2116 = vmatmul.msk.f32.gmra.mxu2 %vm360_vm1, %v2694_v22 }
  0x77   : > { %2051 = vmatmul.msk.f32.gmra.mxu0 %vm360_vm1, %v2700_v23  ;;  %2117 = vmatmul.msk.f32.gmra.mxu2 %vm360_vm1, %v2700_v23 }
  0x7f   : > { %2052 = vmatmul.msk.f32.gmra.mxu0 %vm360_vm1, %v2706_v24  ;;  %2118 = vmatmul.msk.f32.gmra.mxu2 %vm360_vm1, %v2706_v24 }
  0x87   : > { %2053 = vmatmul.msk.f32.gmra.mxu0 %vm360_vm1, %v2712_v25  ;;  %2119 = vmatmul.msk.f32.gmra.mxu2 %vm360_vm1, %v2712_v25 }
  0x8c   : > { %v478_v28 = vpop.f32.mrf.mxu0 }
  0x8d   : > { %v2732_v30 = vadd.f32 %v2719_v26, %v478_v28 }
  0x8f   : > { %v574_v31 = vmin.f32 %v2732_v30, 20.0  ;;  %2054 = vmatmul.msk.f32.gmra.mxu0 %vm360_vm1, %v2729_v29  ;;  %v734_v3 = vmul.f32 2.0, %v2732_v30  ;;  %2120 = vmatmul.msk.f32.gmra.mxu2 %vm360_vm1, %v2729_v29 }
  0x91   : > { %v606_v32 = vmul.f32 1.442695, %v574_v31 }
  0x93   : > { %v550_v33 = vpop.f32.mrf.mxu3  ;;  %2152 = vpow2.f32 %v606_v32 }
  0x94   : > { %v2739_v34 = vadd.f32 %v2719_v26, %v550_v33  ;;  %v481_v35 = vpop.f32.mrf.mxu0 }
  0x95   : > { %v2746_v38 = vadd.f32 %v2719_v26, %v481_v35 }
  0x96   : > { %v598_v37 = vmin.f32 %v2739_v34, 20.0  ;;  %v758_v28 = vmul.f32 2.0, %v2739_v34 }
  0x97   : > { %v575_v40 = vmin.f32 %v2746_v38, 20.0  ;;  %2055 = vmatmul.msk.f32.gmra.mxu0 %vm360_vm1, %v2742_v36  ;;  %2121 = vmatmul.msk.f32.gmra.mxu2 %vm360_vm1, %v2742_v36 }
  0x98   : > { %v654_v39 = vmul.f32 1.442695, %v598_v37 }
  0x99   : > { %v2153_v41 = vpop.eup %2152  ;;  %v608_v42 = vmul.f32 1.442695, %v575_v40 }
  0x9a   : > { %2154 = vpow2.f32 %v654_v39  ;;  %v670_v43 = vadd.f32 1.0, %v2153_v41 }
  0x9b   : > { %v553_v44 = vpop.f32.mrf.mxu3  ;;  %2156 = vpow2.f32 %v608_v42 }
  0x9c   : > { %v2753_v45 = vadd.f32 %v2719_v26, %v553_v44  ;;  %v702_v46 = vmul.f32 %v670_v43, %v670_v43  ;;  %v484_v47 = vpop.f32.mrf.mxu0  ;;  %v2790_v44 = vld [vmem:[%s2613_s13 + $0xa0] sm:$0xff] }
  0x9d   : > { %v2760_v50 = vadd.f32 %v2719_v26, %v484_v47 }
  0x9e   : > { %v599_v49 = vmin.f32 %v2753_v45, 20.0  ;;  %v766_v51 = vadd.f32 1.0, %v702_v46 }
  0x9f   : > { %v576_v54 = vmin.f32 %v2760_v50, 20.0  ;;  %2056 = vmatmul.msk.f32.gmra.mxu0 %vm360_vm1, %v2756_v48  ;;  %2122 = vmatmul.msk.f32.gmra.mxu2 %vm360_vm1, %v2756_v48 }
  0xa0   : > { %v2155_v52 = vpop.eup %2154  ;;  %v656_v53 = vmul.f32 1.442695, %v599_v49  ;;  %2158 = vrcp.f32 %v766_v51  ;;  %v735_v49 = vmul.f32 2.0, %v2746_v38 }
  0xa1   : > { %v694_v55 = vadd.f32 1.0, %v2155_v52  ;;  %v2157_v56 = vpop.eup %2156  ;;  %v610_v57 = vmul.f32 1.442695, %v576_v54 }
  0xa2   : > { %2160 = vpow2.f32 %v656_v53  ;;  %v671_v59 = vadd.f32 1.0, %v2157_v56 }
  0xa3   : > { %v726_v58 = vmul.f32 %v694_v55, %v694_v55  ;;  %v556_v60 = vpop.f32.mrf.mxu3  ;;  %2162 = vpow2.f32 %v610_v57 }
  0xa4   : > { %v2768_v61 = vadd.f32 %v2719_v26, %v556_v60  ;;  %v703_v63 = vmul.f32 %v671_v59, %v671_v59  ;;  %v487_v0 = vpop.f32.mrf.mxu0  ;;  %v759_v59 = vmul.f32 2.0, %v2753_v45 }
  0xa5   : > { %v790_v62 = vadd.f32 1.0, %v726_v58  ;;  %v2776_v7 = vadd.f32 %v2719_v26, %v487_v0 }
  0xa6   : > { %v600_v5 = vmin.f32 %v2768_v61, 20.0  ;;  %v2159_v9 = vpop.eup %2158  ;;  %v767_v11 = vadd.f32 1.0, %v703_v63 }
  0xa7   : > { %2164 = vrcp.f32 %v790_v62  ;;  %v577_v15 = vmin.f32 %v2776_v7, 20.0  ;;  %2057 = vmatmul.msk.f32.gmra.mxu0 %vm360_vm1, %v2771_v1  ;;  %v830_v16 = vmul.f32 %v2159_v9, %v734_v3  ;;  %2123 = vmatmul.msk.f32.gmra.mxu2 %vm360_vm1, %v2771_v1 }
  0xa8   : > { %v2161_v13 = vpop.eup %2160  ;;  %v658_v14 = vmul.f32 1.442695, %v600_v5  ;;  %2166 = vrcp.f32 %v767_v11 }
  0xa9   : > { %v695_v21 = vadd.f32 1.0, %v2161_v13  ;;  %v2163_v27 = vpop.eup %2162  ;;  %v612_v31 = vmul.f32 1.442695, %v577_v15  ;;  %v862_v32 = vsub.f32 %v2732_v30, %v830_v16 }
  0xaa   : > { %2168 = vpow2.f32 %v658_v14  ;;  %v672_v35 = vadd.f32 1.0, %v2163_v27  ;;  %v2811_v14 = vld [vmem:[%s2613_s13 + $0xa8] sm:$0xff] }
  0xab   : > { %v727_v33 = vmul.f32 %v695_v21, %v695_v21  ;;  %v559_v37 = vpop.f32.mrf.mxu3  ;;  %2170 = vpow2.f32 %v612_v31  ;;  %2071 = vmatmul.msk.f32.vlgmr.msra.gmra.mxu1 %vm360_vm1, %v862_v32 }
  0xac   : > { %v2786_v39 = vadd.f32 %v2719_v26, %v559_v37  ;;  %v704_v42 = vmul.f32 %v672_v35, %v672_v35  ;;  %v490_v43 = vpop.f32.mrf.mxu0 }
  0xad   : > { %v2165_v40 = vpop.eup %2164  ;;  %v791_v41 = vadd.f32 1.0, %v727_v33  ;;  %v2794_v17 = vadd.f32 %v2719_v26, %v490_v43 }
  0xae   : > { %v854_v46 = vmul.f32 %v2165_v40, %v758_v28  ;;  %v601_v30 = vmin.f32 %v2786_v39, 20.0  ;;  %v2167_v47 = vpop.eup %2166  ;;  %v768_v51 = vadd.f32 1.0, %v704_v42 }
  0xaf   : > { %2172 = vrcp.f32 %v791_v41  ;;  %v578_v55 = vmin.f32 %v2794_v17, 20.0  ;;  %2058 = vmatmul.msk.f32.gmra.mxu0 %vm360_vm1, %v2790_v44  ;;  %v831_v57 = vmul.f32 %v2167_v47, %v735_v49  ;;  %v760_v41 = vmul.f32 2.0, %v2768_v61  ;;  %2124 = vmatmul.msk.f32.gmra.mxu2 %vm360_vm1, %v2790_v44 }
  0xb0   : > { %v2169_v52 = vpop.eup %2168  ;;  %v886_v53 = vsub.f32 %v2739_v34, %v854_v46  ;;  %v660_v54 = vmul.f32 1.442695, %v601_v30  ;;  %2174 = vrcp.f32 %v768_v51 }
  0xb1   : > { %v696_v56 = vadd.f32 1.0, %v2169_v52  ;;  %v2171_v58 = vpop.eup %2170  ;;  %v614_v60 = vmul.f32 1.442695, %v578_v55  ;;  %v863_v0 = vsub.f32 %v2746_v38, %v831_v57  ;;  %v736_v38 = vmul.f32 2.0, %v2760_v50 }
  0xb2   : > { %2176 = vpow2.f32 %v660_v54  ;;  %2095 = vmatmul.msk.f32.vlgmr.msrb.gmra.mxu3 %vm360_vm1, %v886_v53  ;;  %v673_v62 = vadd.f32 1.0, %v2171_v58  ;;  %v2832_v54 = vld [vmem:[%s2613_s13 + $0xb0] sm:$0xff] }
  0xb3   : > { %v728_v34 = vmul.f32 %v696_v56, %v696_v56  ;;  %v562_v63 = vpop.f32.mrf.mxu3  ;;  %2178 = vpow2.f32 %v614_v60  ;;  %2072 = vmatmul.msk.f32.gmra.mxu1 %vm360_vm1, %v863_v0 }
  0xb4   : > { %v2807_v3 = vadd.f32 %v2719_v26, %v562_v63  ;;  %v705_v11 = vmul.f32 %v673_v62, %v673_v62  ;;  %v493_v13 = vpop.f32.mrf.mxu0 }
  0xb5   : > { %v2173_v5 = vpop.eup %2172  ;;  %v792_v9 = vadd.f32 1.0, %v728_v34  ;;  %v2815_v18 = vadd.f32 %v2719_v26, %v493_v13 }
  0xb6   : > { %v602_v15 = vmin.f32 %v2807_v3, 20.0  ;;  %v855_v16 = vmul.f32 %v2173_v5, %v759_v59  ;;  %v2175_v21 = vpop.eup %2174  ;;  %v769_v27 = vadd.f32 1.0, %v705_v11 }
  0xb7   : > { %2180 = vrcp.f32 %v792_v9  ;;  %v579_v32 = vmin.f32 %v2815_v18, 20.0  ;;  %2059 = vmatmul.msk.f32.gmra.mxu0 %vm360_vm1, %v2811_v14  ;;  %v832_v37 = vmul.f32 %v2175_v21, %v736_v38  ;;  %v761_v9 = vmul.f32 2.0, %v2786_v39  ;;  %2125 = vmatmul.msk.f32.gmra.mxu2 %vm360_vm1, %v2811_v14 }
  0xb8   : > { %v2177_v28 = vpop.eup %2176  ;;  %v662_v31 = vmul.f32 1.442695, %v602_v15  ;;  %v887_v33 = vsub.f32 %v2753_v45, %v855_v16  ;;  %2182 = vrcp.f32 %v769_v27 }
  0xb9   : > { %v697_v35 = vadd.f32 1.0, %v2177_v28  ;;  %v2179_v40 = vpop.eup %2178  ;;  %v616_v42 = vmul.f32 1.442695, %v579_v32  ;;  %v864_v47 = vsub.f32 %v2760_v50, %v832_v37  ;;  %v737_v50 = vmul.f32 2.0, %v2776_v7  ;;  %v2853_v32 = vld [vmem:[%s2613_s13 + $0xb8] sm:$0xff] }
  0xba   : > { %2184 = vpow2.f32 %v662_v31  ;;  %2096 = vmatmul.msk.f32.gmra.mxu3 %vm360_vm1, %v887_v33  ;;  %v674_v46 = vadd.f32 1.0, %v2179_v40 }
  0xbb   : > { %v729_v43 = vmul.f32 %v697_v35, %v697_v35  ;;  %v565_v30 = vpop.f32.mrf.mxu3  ;;  %2186 = vpow2.f32 %v616_v42  ;;  %2073 = vmatmul.msk.f32.gmra.mxu1 %vm360_vm1, %v864_v47 }
  0xbc   : > { %v2828_v45 = vadd.f32 %v2719_v26, %v565_v30  ;;  %v706_v52 = vmul.f32 %v674_v46, %v674_v46  ;;  %v496_v53 = vpop.f32.mrf.mxu0 }
  0xbd   : > { %v2181_v49 = vpop.eup %2180  ;;  %v793_v51 = vadd.f32 1.0, %v729_v43  ;;  %v2836_v19 = vadd.f32 %v2719_v26, %v496_v53 }
  0xbe   : > { %v603_v55 = vmin.f32 %v2828_v45, 20.0  ;;  %v856_v56 = vmul.f32 %v2181_v49, %v760_v41  ;;  %v2183_v57 = vpop.eup %2182  ;;  %v770_v58 = vadd.f32 1.0, %v706_v52 }
  0xbf   : > { %2188 = vrcp.f32 %v793_v51  ;;  %v580_v34 = vmin.f32 %v2836_v19, 20.0  ;;  %2060 = vmatmul.msk.f32.gmra.mxu0 %vm360_vm1, %v2832_v54  ;;  %v833_v0 = vmul.f32 %v2183_v57, %v737_v50  ;;  %v762_v51 = vmul.f32 2.0, %v2807_v3  ;;  %2126 = vmatmul.msk.f32.gmra.mxu2 %vm360_vm1, %v2832_v54 }
  0xc0   : > { %v2185_v59 = vpop.eup %2184  ;;  %v664_v60 = vmul.f32 1.442695, %v603_v55  ;;  %v888_v62 = vsub.f32 %v2768_v61, %v856_v56  ;;  %2190 = vrcp.f32 %v770_v58 }
  0xc1   : > { %v698_v63 = vadd.f32 1.0, %v2185_v59  ;;  %v2187_v5 = vpop.eup %2186  ;;  %v618_v11 = vmul.f32 1.442695, %v580_v34  ;;  %v865_v21 = vsub.f32 %v2776_v7, %v833_v0  ;;  %v738_v7 = vmul.f32 2.0, %v2794_v17 }
  0xc2   : > { %2192 = vpow2.f32 %v664_v60  ;;  %2097 = vmatmul.msk.f32.gmra.mxu3 %vm360_vm1, %v888_v62  ;;  %v675_v15 = vadd.f32 1.0, %v2187_v5  ;;  %v739_v0 = vmul.f32 2.0, %v2815_v18 }
  0xc3   : > { %v730_v13 = vmul.f32 %v698_v63, %v698_v63  ;;  %v568_v16 = vpop.f32.mrf.mxu3  ;;  %2194 = vpow2.f32 %v618_v11  ;;  %2074 = vmatmul.msk.f32.gmra.mxu1 %vm360_vm1, %v865_v21 }
  0xc4   : > { %v2849_v61 = vadd.f32 %v2719_v26, %v568_v16  ;;  %v707_v28 = vmul.f32 %v675_v15, %v675_v15  ;;  %v499_v31 = vpop.f32.mrf.mxu0 }
  0xc5   : > { %v2189_v38 = vpop.eup %2188  ;;  %v794_v27 = vadd.f32 1.0, %v730_v13  ;;  %v2857_v20 = vadd.f32 %v2719_v26, %v499_v31 }
  0xc6   : > { %v604_v33 = vmin.f32 %v2849_v61, 20.0  ;;  %v857_v35 = vmul.f32 %v2189_v38, %v761_v9  ;;  %v2191_v37 = vpop.eup %2190  ;;  %v771_v40 = vadd.f32 1.0, %v707_v28  ;;  %v763_v38 = vmul.f32 2.0, %v2828_v45 }
  0xc7   : > { %2196 = vrcp.f32 %v794_v27  ;;  %v581_v43 = vmin.f32 %v2857_v20, 20.0  ;;  %2061 = vmatmul.msk.f32.gmra.mxu0 %vm360_vm1, %v2853_v32  ;;  %v834_v47 = vmul.f32 %v2191_v37, %v738_v7  ;;  %2127 = vmatmul.msk.f32.gmra.mxu2 %vm360_vm1, %v2853_v32 }
  0xc8   : > { %v2193_v41 = vpop.eup %2192  ;;  %v666_v42 = vmul.f32 1.442695, %v604_v33  ;;  %v889_v46 = vsub.f32 %v2786_v39, %v857_v35  ;;  %2198 = vrcp.f32 %v771_v40  ;;  %v740_v40 = vmul.f32 2.0, %v2836_v19 }
  0xc9   : > { %v699_v30 = vadd.f32 1.0, %v2193_v41  ;;  %v2195_v49 = vpop.eup %2194  ;;  %v620_v52 = vmul.f32 1.442695, %v581_v43  ;;  %v866_v57 = vsub.f32 %v2794_v17, %v834_v47 }
  0xca   : > { %2200 = vpow2.f32 %v666_v42  ;;  %2098 = vmatmul.msk.f32.gmra.mxu3 %vm360_vm1, %v889_v46  ;;  %v676_v55 = vadd.f32 1.0, %v2195_v49 }
  0xcb   : > { %v731_v53 = vmul.f32 %v699_v30, %v699_v30  ;;  %v571_v56 = vpop.f32.mrf.mxu3  ;;  %2202 = vpow2.f32 %v620_v52  ;;  %2075 = vmatmul.msk.f32.gmra.mxu1 %vm360_vm1, %v866_v57  ;;  %v764_v52 = vmul.f32 2.0, %v2849_v61 }
  0xcc   : > { %v2870_v39 = vadd.f32 %v2719_v26, %v571_v56  ;;  %v708_v59 = vmul.f32 %v676_v55, %v676_v55  ;;  %v502_v60 = vpop.f32.mrf.mxu0 }
  0xcd   : > { %v2197_v50 = vpop.eup %2196  ;;  %v795_v58 = vadd.f32 1.0, %v731_v53  ;;  %v2875_v62 = vadd.f32 %v2719_v26, %v502_v60  ;;  %v741_v60 = vmul.f32 2.0, %v2857_v20 }
  0xce   : > { %v605_v34 = vmin.f32 %v2870_v39, 20.0  ;;  %v858_v22 = vmul.f32 %v2197_v50, %v762_v51  ;;  %v2199_v63 = vpop.eup %2198  ;;  %v772_v17 = vadd.f32 1.0, %v708_v59 }
  0xcf   : > { %2204 = vrcp.f32 %v795_v58  ;;  %v582_v11 = vmin.f32 %v2875_v62, 20.0  ;;  %v835_v16 = vmul.f32 %v2199_v63, %v739_v0 }
  0xd0   : > { %v2201_v5 = vpop.eup %2200  ;;  %v668_v9 = vmul.f32 1.442695, %v605_v34  ;;  %v890_v13 = vsub.f32 %v2807_v3, %v858_v22  ;;  %2206 = vrcp.f32 %v772_v17 }
  0xd1   : > { %v700_v15 = vadd.f32 1.0, %v2201_v5  ;;  %v2203_v21 = vpop.eup %2202  ;;  %v622_v27 = vmul.f32 1.442695, %v582_v11  ;;  %v867_v33 = vsub.f32 %v2815_v18, %v835_v16 }
  0xd2   : > { %2208 = vpow2.f32 %v668_v9  ;;  %2099 = vmatmul.msk.f32.gmra.mxu3 %vm360_vm1, %v890_v13  ;;  %v677_v31 = vadd.f32 1.0, %v2203_v21  ;;  %v765_v9 = vmul.f32 2.0, %v2870_v39 }
  0xd3   : > { %v732_v28 = vmul.f32 %v700_v15, %v700_v15  ;;  %2210 = vpow2.f32 %v622_v27  ;;  %2076 = vmatmul.msk.f32.gmra.mxu1 %vm360_vm1, %v867_v33 }
  0xd4   : > { %v709_v37 = vmul.f32 %v677_v31, %v677_v31  ;;  %v505_v7 = vpop.f32.mrf.mxu0 }
  0xd5   : > { %v2205_v35 = vpop.eup %2204  ;;  %v796_v3 = vadd.f32 1.0, %v732_v28  ;;  %v2888_v41 = vadd.f32 %v2719_v26, %v505_v7 }
  0xd6   : > { %v859_v42 = vmul.f32 %v2205_v35, %v763_v38  ;;  %v2207_v43 = vpop.eup %2206  ;;  %v773_v23 = vadd.f32 1.0, %v709_v37  ;;  %v742_v38 = vmul.f32 2.0, %v2875_v62 }
  0xd7   : > { %2212 = vrcp.f32 %v796_v3  ;;  %v583_v30 = vmin.f32 %v2888_v41, 20.0  ;;  %v836_v47 = vmul.f32 %v2207_v43, %v740_v40 }
  0xd8   : > { %v2209_v46 = vpop.eup %2208  ;;  %v891_v18 = vsub.f32 %v2828_v45, %v859_v42  ;;  %2214 = vrcp.f32 %v773_v23  ;;  %v743_v23 = vmul.f32 2.0, %v2888_v41 }
  0xd9   : > { %v701_v49 = vadd.f32 1.0, %v2209_v46  ;;  %v2211_v51 = vpop.eup %2210  ;;  %v624_v53 = vmul.f32 1.442695, %v583_v30  ;;  %v868_v55 = vsub.f32 %v2836_v19, %v836_v47  ;;  %v1456_v47 = vpop.f32.mrf.mxu2 }
  0xda   : > { %2100 = vmatmul.msk.f32.gmra.mxu3 %vm360_vm1, %v891_v18  ;;  %v678_v57 = vadd.f32 1.0, %v2211_v51 }
  0xdb   : > { %v733_v56 = vmul.f32 %v701_v49, %v701_v49  ;;  %2216 = vpow2.f32 %v624_v53  ;;  %2077 = vmatmul.msk.f32.gmra.mxu1 %vm360_vm1, %v868_v55 }
  0xdc   : > { %v710_v45 = vmul.f32 %v678_v57, %v678_v57  ;;  %v508_v59 = vpop.f32.mrf.mxu0 }
  0xdd   : > { %v2213_v50 = vpop.eup %2212  ;;  %v797_v58 = vadd.f32 1.0, %v733_v56  ;;  %v2900_v34 = vadd.f32 %v2719_v26, %v508_v59 }
  0xde   : > { %v860_v22 = vmul.f32 %v2213_v50, %v764_v52  ;;  %v2215_v63 = vpop.eup %2214  ;;  %v774_v19 = vadd.f32 1.0, %v710_v45 }
  0xdf   : > { %2218 = vrcp.f32 %v797_v58  ;;  %v584_v24 = vmin.f32 %v2900_v34, 20.0  ;;  %v837_v17 = vmul.f32 %v2215_v63, %v741_v60  ;;  %v744_v45 = vmul.f32 2.0, %v2900_v34 }
  0xe0   : > { %v892_v0 = vsub.f32 %v2849_v61, %v860_v22  ;;  %2220 = vrcp.f32 %v774_v19 }
  0xe1   : > { %v2217_v5 = vpop.eup %2216  ;;  %v626_v11 = vmul.f32 1.442695, %v584_v24  ;;  %v869_v13 = vsub.f32 %v2857_v20, %v837_v17  ;;  %v1459_v22 = vpop.f32.mrf.mxu2 }
  0xe2   : > { %2101 = vmatmul.msk.f32.gmra.mxu3 %vm360_vm1, %v892_v0  ;;  %v679_v15 = vadd.f32 1.0, %v2217_v5 }
  0xe3   : > { %2222 = vpow2.f32 %v626_v11  ;;  %2078 = vmatmul.msk.f32.gmra.mxu1 %vm360_vm1, %v869_v13 }
  0xe4   : > { %v711_v21 = vmul.f32 %v679_v15, %v679_v15  ;;  %v511_v61 = vpop.f32.mrf.mxu0 }
  0xe5   : > { %v2219_v16 = vpop.eup %2218  ;;  %v2912_v27 = vadd.f32 %v2719_v26, %v511_v61 }
  0xe6   : > { %v861_v28 = vmul.f32 %v2219_v16, %v765_v9  ;;  %v2221_v31 = vpop.eup %2220  ;;  %v775_v33 = vadd.f32 1.0, %v711_v21 }
  0xe7   : > { %v585_v20 = vmin.f32 %v2912_v27, 20.0  ;;  %v838_v25 = vmul.f32 %v2221_v31, %v742_v38  ;;  %v745_v16 = vmul.f32 2.0, %v2912_v27 }
  0xe8   : > { %v893_v35 = vsub.f32 %v2870_v39, %v861_v28  ;;  %2224 = vrcp.f32 %v775_v33 }
  0xe9   : > { %v2223_v3 = vpop.eup %2222  ;;  %v628_v37 = vmul.f32 1.442695, %v585_v20  ;;  %v870_v7 = vsub.f32 %v2875_v62, %v838_v25  ;;  %v2928_v62 = vld [vmem:[%s3632_s6] ss:$0 sm:$0xff]  ;;  %v1462_v31 = vpop.f32.mrf.mxu2 }
  0xea   : > { %2102 = vmatmul.msk.f32.gmra.mxu3 %vm360_vm1, %v893_v35  ;;  %v680_v40 = vadd.f32 1.0, %v2223_v3  ;;  %v2932_v49 = vadd.f32 %v2928_v62, %v1456_v47  ;;  %v2947_v63 = vadd.f32 %v2928_v62, %v1459_v22  ;;  %v2962_v33 = vadd.f32 %v2928_v62, %v1462_v31 }
  0xeb   : > { %2226 = vpow2.f32 %v628_v37  ;;  %2079 = vmatmul.msk.f32.gmra.mxu1 %vm360_vm1, %v870_v7 }
  0xec   : > { %v712_v42 = vmul.f32 %v680_v40, %v680_v40  ;;  %v514_v43 = vpop.f32.mrf.mxu0  ;;  %v1552_v56 = vmin.f32 %v2932_v49, 20.0  ;;  %v1553_v5 = vmin.f32 %v2947_v63, 20.0  ;;  %v1554_v7 = vmin.f32 %v2962_v33, 20.0 }
  0xed   : > { %v2923_v39 = vadd.f32 %v2719_v26, %v514_v43  ;;  %v1712_v47 = vmul.f32 2.0, %v2932_v49 }
  0xee   : > { %v2225_v46 = vpop.eup %2224  ;;  %v776_v30 = vadd.f32 1.0, %v712_v42  ;;  %v1584_v58 = vmul.f32 1.442695, %v1552_v56  ;;  %v1586_v15 = vmul.f32 1.442695, %v1553_v5 }
  0xef   : > { %v586_v29 = vmin.f32 %v2923_v39, 20.0  ;;  %v839_v18 = vmul.f32 %v2225_v46, %v743_v23  ;;  %v1588_v23 = vmul.f32 1.442695, %v1554_v7 }
  0xf0   : > { %2228 = vrcp.f32 %v776_v30 }
  0xf1   : > { %v2227_v51 = vpop.eup %2226  ;;  %v630_v52 = vmul.f32 1.442695, %v586_v29  ;;  %v871_v53 = vsub.f32 %v2888_v41, %v839_v18 }
  0xf2   : > { %2128 = vmatmul.msk.f32.vlgmr.msra.gmra.mxu3 %vm360_vm1, %v2617_v2  ;;  %v681_v55 = vadd.f32 1.0, %v2227_v51 }
  0xf3   : > { %2230 = vpow2.f32 %v630_v52  ;;  %2080 = vmatmul.msk.f32.gmra.mxu1 %vm360_vm1, %v871_v53  ;;  %v1465_v52 = vpop.f32.mrf.mxu2 }
  0xf4   : > { %v713_v57 = vmul.f32 %v681_v55, %v681_v55  ;;  %v517_v50 = vpop.f32.mrf.mxu0  ;;  %2232 = vpow2.f32 %v1584_v58  ;;  %v2978_v53 = vadd.f32 %v2928_v62, %v1465_v52 }
  0xf5   : > { %v2943_v59 = vadd.f32 %v2719_v26, %v517_v50 }
  0xf6   : > { %v2229_v41 = vpop.eup %2228  ;;  %v777_v60 = vadd.f32 1.0, %v713_v57 }
  0xf7   : > { %v587_v2 = vmin.f32 %v2943_v59, 20.0  ;;  %v840_v36 = vmul.f32 %v2229_v41, %v744_v45  ;;  %v1555_v41 = vmin.f32 %v2978_v53, 20.0  ;;  %v747_v44 = vmul.f32 2.0, %v2943_v59 }
  0xf8   : > { %2234 = vrcp.f32 %v777_v60 }
  0xf9   : > { %v2231_v19 = vpop.eup %2230  ;;  %v632_v24 = vmul.f32 1.442695, %v587_v2  ;;  %v872_v0 = vsub.f32 %v2900_v34, %v840_v36 }
  0xfa   : > { %2129 = vmatmul.msk.f32.gmra.mxu3 %vm360_vm1, %v2624_v4  ;;  %v682_v17 = vadd.f32 1.0, %v2231_v19  ;;  %v2233_v9 = vpop.eup %2232 }
  0xfb   : > { %2236 = vpow2.f32 %v632_v24  ;;  %2081 = vmatmul.msk.f32.gmra.mxu1 %vm360_vm1, %v872_v0  ;;  %v1648_v21 = vadd.f32 1.0, %v2233_v9 }
  0xfc   : > { %v714_v11 = vmul.f32 %v682_v17, %v682_v17  ;;  %v520_v13 = vpop.f32.mrf.mxu0  ;;  %2238 = vpow2.f32 %v1586_v15  ;;  %v1468_v15 = vpop.f32.mrf.mxu2 }
  0xfd   : > { %v2958_v34 = vadd.f32 %v2719_v26, %v520_v13  ;;  %v1680_v28 = vmul.f32 %v1648_v21, %v1648_v21 }
  0xfe   : > { %v2235_v4 = vpop.eup %2234  ;;  %v778_v61 = vadd.f32 1.0, %v714_v11  ;;  %v1713_v11 = vmul.f32 2.0, %v2947_v63 }
  0xff   : > { %v588_v48 = vmin.f32 %v2958_v34, 20.0  ;;  %v841_v38 = vmul.f32 %v2235_v4, %v745_v16  ;;  %v1744_v3 = vadd.f32 1.0, %v1680_v28  ;;  %v3003_v16 = vadd.f32 %v2928_v62, %v1468_v15 }
 0x100   : > { %2240 = vrcp.f32 %v778_v61 }
 0x101   : > { %v2237_v20 = vpop.eup %2236  ;;  %v634_v35 = vmul.f32 1.442695, %v588_v48  ;;  %v873_v25 = vsub.f32 %v2912_v27, %v841_v38  ;;  %v746_v27 = vmul.f32 2.0, %v2923_v39  ;;  %v1556_v28 = vmin.f32 %v3003_v16, 20.0 }
 0x102   : > { %2130 = vmatmul.msk.f32.gmra.mxu3 %vm360_vm1, %v2631_v6  ;;  %v683_v37 = vadd.f32 1.0, %v2237_v20  ;;  %v2239_v40 = vpop.eup %2238 }
 0x103   : > { %2242 = vpow2.f32 %v634_v35  ;;  %2082 = vmatmul.msk.f32.gmra.mxu1 %vm360_vm1, %v873_v25  ;;  %v1649_v6 = vadd.f32 1.0, %v2239_v40 }
 0x104   : > { %v715_v42 = vmul.f32 %v683_v37, %v683_v37  ;;  %v523_v43 = vpop.f32.mrf.mxu0  ;;  %2244 = vrcp.f32 %v1744_v3  ;;  %v748_v3 = vmul.f32 2.0, %v2958_v34 }
 0x105   : > { %v2973_v46 = vadd.f32 %v2719_v26, %v523_v43  ;;  %2246 = vpow2.f32 %v1588_v23  ;;  %v1681_v51 = vmul.f32 %v1649_v6, %v1649_v6  ;;  %v1714_v23 = vmul.f32 2.0, %v2962_v33  ;;  %v1471_v6 = vpop.f32.mrf.mxu2 }
 0x106   : > { %v2241_v30 = vpop.eup %2240  ;;  %v779_v29 = vadd.f32 1.0, %v715_v42 }
 0x107   : > { %v589_v1 = vmin.f32 %v2973_v46, 20.0  ;;  %v842_v18 = vmul.f32 %v2241_v30, %v746_v27  ;;  %v1745_v50 = vadd.f32 1.0, %v1681_v51 }
 0x108   : > { %2248 = vrcp.f32 %v779_v29 }
 0x109   : > { %v2243_v55 = vpop.eup %2242  ;;  %v636_v56 = vmul.f32 1.442695, %v589_v1  ;;  %v874_v57 = vsub.f32 %v2923_v39, %v842_v18 }
 0x10a   : > { %2131 = vmatmul.msk.f32.gmra.mxu3 %vm360_vm1, %v2638_v8  ;;  %v2245_v58 = vpop.eup %2244  ;;  %v684_v45 = vadd.f32 1.0, %v2243_v55  ;;  %v1590_v8 = vmul.f32 1.442695, %v1555_v41 }
 0x10b   : > { %2250 = vpow2.f32 %v636_v56  ;;  %v1808_v60 = vmul.f32 %v2245_v58, %v1712_v47  ;;  %v2247_v2 = vpop.eup %2246  ;;  %2083 = vmatmul.msk.f32.gmra.mxu1 %vm360_vm1, %v874_v57 }
 0x10c   : > { %v716_v36 = vmul.f32 %v684_v45, %v684_v45  ;;  %v526_v22 = vpop.f32.mrf.mxu0  ;;  %2252 = vrcp.f32 %v1745_v50  ;;  %v1650_v24 = vadd.f32 1.0, %v2247_v2 }
 0x10d   : > { %v2995_v39 = vadd.f32 %v2719_v26, %v526_v22  ;;  %v1840_v19 = vsub.f32 %v2932_v49, %v1808_v60  ;;  %2254 = vpow2.f32 %v1590_v8  ;;  %v1715_v22 = vmul.f32 2.0, %v2978_v53 }
 0x10e   : > { %v2249_v0 = vpop.eup %2248  ;;  %v780_v17 = vadd.f32 1.0, %v716_v36  ;;  %v1682_v13 = vmul.f32 %v1650_v24, %v1650_v24 }
 0x10f   : > { %v590_v5 = vmin.f32 %v2995_v39, 20.0  ;;  %1904 = vst.msk [vmem:[%s2991_s24] sm:$0xff] %vm360_vm1, %v1840_v19  ;;  %v843_v9 = vmul.f32 %v2249_v0, %v747_v44  ;;  %v1474_v44 = vpop.f32.mrf.mxu2 }
 0x110   : > { %2256 = vrcp.f32 %v780_v17  ;;  %v1746_v61 = vadd.f32 1.0, %v1682_v13  ;;  %v2536_v17 = vld [vmem:[%s2613_s13 + $0xf0] sm:$0xff] }
 0x111   : > { %v2251_v21 = vpop.eup %2250  ;;  %v638_v4 = vmul.f32 1.442695, %v590_v5  ;;  %v875_v49 = vsub.f32 %v2943_v59, %v843_v9  ;;  %v1592_v59 = vmul.f32 1.442695, %v1556_v28 }
 0x112   : > { %2132 = vmatmul.msk.f32.gmra.mxu3 %vm360_vm1, %v2645_v10  ;;  %v2253_v48 = vpop.eup %2252  ;;  %v685_v38 = vadd.f32 1.0, %v2251_v21 }
 0x113   : > { %2258 = vpow2.f32 %v638_v4  ;;  %v1809_v31 = vmul.f32 %v2253_v48, %v1713_v11  ;;  %v2255_v20 = vpop.eup %2254  ;;  %2084 = vmatmul.msk.f32.gmra.mxu1 %vm360_vm1, %v875_v49  ;;  %v3046_v11 = vadd.f32 %v2928_v62, %v1474_v44  ;;  %v750_v4 = vmul.f32 2.0, %v2995_v39 }
 0x114   : > { %v717_v35 = vmul.f32 %v685_v38, %v685_v38  ;;  %v529_v25 = vpop.f32.mrf.mxu0  ;;  %2260 = vrcp.f32 %v1746_v61  ;;  %v1651_v37 = vadd.f32 1.0, %v2255_v20  ;;  %v3058_v61 = vld [vmem:[%s3630_s4] ss:$0 sm:$0xff] }
 0x115   : > { %v3014_v10 = vadd.f32 %v2719_v26, %v529_v25  ;;  %v1841_v14 = vsub.f32 %v2947_v63, %v1809_v31  ;;  %2262 = vpow2.f32 %v1592_v59  ;;  %v3025_v63 = vadd.f32 %v2928_v62, %v1471_v6 }
 0x116   : > { %v2257_v7 = vpop.eup %2256  ;;  %v781_v40 = vadd.f32 1.0, %v717_v35  ;;  %v1683_v27 = vmul.f32 %v1651_v37, %v1651_v37  ;;  %v1558_v21 = vmin.f32 %v3046_v11, 20.0 }
 0x117   : > { %v591_v42 = vmin.f32 %v3014_v10, 20.0  ;;  %1905 = vst.msk [vmem:[%s2991_s24 + $0x8] sm:$0xff] %vm360_vm1, %v1841_v14  ;;  %v844_v43 = vmul.f32 %v2257_v7, %v748_v3  ;;  %v1557_v55 = vmin.f32 %v3025_v63, 20.0  ;;  %v1477_v59 = vpop.f32.mrf.mxu2 }
 0x118   : > { %2264 = vrcp.f32 %v781_v40  ;;  %v1747_v18 = vadd.f32 1.0, %v1683_v27  ;;  %v1596_v28 = vmul.f32 1.442695, %v1558_v21  ;;  %v2537_v40 = vld [vmem:[%s2613_s13 + $0xf8] sm:$0xff]  ;;  %v3071_v27 = vadd.f32 %v2928_v62, %v1477_v59 }
 0x119   : > { %v2259_v30 = vpop.eup %2258  ;;  %v640_v29 = vmul.f32 1.442695, %v591_v42  ;;  %v876_v1 = vsub.f32 %v2958_v34, %v844_v43  ;;  %v749_v34 = vmul.f32 2.0, %v2973_v46  ;;  %v1594_v45 = vmul.f32 1.442695, %v1557_v55 }
 0x11a   : > { %2133 = vmatmul.msk.f32.gmra.mxu3 %vm360_vm1, %v2652_v12  ;;  %v2261_v47 = vpop.eup %2260  ;;  %v686_v51 = vadd.f32 1.0, %v2259_v30 }
 0x11b   : > { %2266 = vpow2.f32 %v640_v29  ;;  %v1810_v52 = vmul.f32 %v2261_v47, %v1714_v23  ;;  %v2263_v56 = vpop.eup %2262  ;;  %2085 = vmatmul.msk.f32.gmra.mxu1 %vm360_vm1, %v876_v1  ;;  %v751_v47 = vmul.f32 2.0, %v3014_v10 }
 0x11c   : > { %v718_v57 = vmul.f32 %v686_v51, %v686_v51  ;;  %v532_v12 = vpop.f32.mrf.mxu0  ;;  %2268 = vrcp.f32 %v1747_v18  ;;  %v1652_v58 = vadd.f32 1.0, %v2263_v56  ;;  %v1559_v18 = vmin.f32 %v3071_v27, 20.0 }
 0x11d   : > { %v3033_v50 = vadd.f32 %v2719_v26, %v532_v12  ;;  %v1842_v54 = vsub.f32 %v2962_v33, %v1810_v52  ;;  %v3080_v52 = vld [vmem:[%s3628_s2] ss:$0 sm:$0xff] }
 0x11e   : > { %v2265_v41 = vpop.eup %2264  ;;  %v782_v60 = vadd.f32 1.0, %v718_v57  ;;  %v1684_v8 = vmul.f32 %v1652_v58, %v1652_v58  ;;  %v1598_v12 = vmul.f32 1.442695, %v1559_v18 }
 0x11f   : > { %v592_v2 = vmin.f32 %v3033_v50, 20.0  ;;  %1906 = vst.msk [vmem:[%s2991_s24 + $0x10] sm:$0xff] %vm360_vm1, %v1842_v54  ;;  %v845_v36 = vmul.f32 %v2265_v41, %v749_v34 }
 0x120   : > { %2270 = vrcp.f32 %v782_v60  ;;  %v1748_v33 = vadd.f32 1.0, %v1684_v8  ;;  %v1480_v8 = vpop.f32.mrf.mxu2 }
 0x121   : > { %v2267_v19 = vpop.eup %2266  ;;  %v642_v24 = vmul.f32 1.442695, %v592_v2  ;;  %v877_v0 = vsub.f32 %v2973_v46, %v845_v36  ;;  %2272 = vpow2.f32 %v1594_v45 }
 0x122   : > { %2134 = vmatmul.msk.f32.gmra.mxu3 %vm360_vm1, %v2536_v17  ;;  %v2269_v5 = vpop.eup %2268  ;;  %v687_v9 = vadd.f32 1.0, %v2267_v19 }
 0x123   : > { %2274 = vpow2.f32 %v642_v24  ;;  %v1811_v13 = vmul.f32 %v2269_v5, %v1715_v22  ;;  %2086 = vmatmul.msk.f32.gmra.mxu1 %vm360_vm1, %v877_v0  ;;  %v3095_v0 = vadd.f32 %v2928_v62, %v1480_v8 }
 0x124   : > { %v719_v15 = vmul.f32 %v687_v9, %v687_v9  ;;  %v535_v46 = vpop.f32.mrf.mxu0  ;;  %2276 = vrcp.f32 %v1748_v33 }
 0x125   : > { %v3052_v49 = vadd.f32 %v2719_v26, %v535_v46  ;;  %v1843_v32 = vsub.f32 %v2978_v53, %v1811_v13  ;;  %v1716_v26 = vmul.f32 2.0, %v3003_v16  ;;  %v752_v46 = vmul.f32 2.0, %v3033_v50 }
 0x126   : > { %v2271_v48 = vpop.eup %2270  ;;  %v783_v38 = vadd.f32 1.0, %v719_v15 }
 0x127   : > { %v2273_v31 = vpop.eup %2272  ;;  %v593_v20 = vmin.f32 %v3052_v49, 20.0  ;;  %1907 = vst.msk [vmem:[%s2991_s24 + $0x18] sm:$0xff] %vm360_vm1, %v1843_v32  ;;  %v846_v35 = vmul.f32 %v2271_v48, %v750_v4 }
 0x128   : > { %2278 = vrcp.f32 %v783_v38  ;;  %v1015_v25 = vpop.f32.mrf.mxu1  ;;  %v1653_v53 = vadd.f32 1.0, %v2273_v31 }
 0x129   : > { %v2275_v3 = vpop.eup %2274  ;;  %v644_v14 = vmul.f32 1.442695, %v593_v20  ;;  %v3065_v37 = vadd.f32 %v3058_v61, %v1015_v25  ;;  %v878_v7 = vsub.f32 %v2995_v39, %v846_v35  ;;  %2280 = vpow2.f32 %v1596_v28 }
 0x12a   : > { %2135 = vmatmul.msk.f32.gmra.mxu3 %vm360_vm1, %v2537_v40  ;;  %v2277_v42 = vpop.eup %2276  ;;  %v688_v43 = vadd.f32 1.0, %v2275_v3  ;;  %v1685_v23 = vmul.f32 %v1653_v53, %v1653_v53 }
 0x12b   : > { %2282 = vpow2.f32 %v644_v14  ;;  %v1111_v6 = vmin.f32 %v3065_v37, 20.0  ;;  %v1812_v30 = vmul.f32 %v2277_v42, %v1716_v26  ;;  %2087 = vmatmul.msk.f32.gmra.mxu1 %vm360_vm1, %v878_v7  ;;  %v1560_v26 = vmin.f32 %v3095_v0, 20.0 }
 0x12c   : > { %v720_v29 = vmul.f32 %v688_v43, %v688_v43  ;;  %v538_v1 = vpop.f32.mrf.mxu0  ;;  %v1749_v39 = vadd.f32 1.0, %v1685_v23  ;;  %v1718_v43 = vmul.f32 2.0, %v3046_v11 }
 0x12d   : > { %v1143_v51 = vmul.f32 1.442695, %v1111_v6  ;;  %v3083_v55 = vadd.f32 %v3080_v52, %v538_v1  ;;  %v1844_v56 = vsub.f32 %v3003_v16, %v1812_v30  ;;  %v1717_v16 = vmul.f32 2.0, %v3025_v63 }
 0x12e   : > { %v2279_v34 = vpop.eup %2278  ;;  %v784_v57 = vadd.f32 1.0, %v720_v29  ;;  %2284 = vrcp.f32 %v1749_v39  ;;  %v3117_v39 = vpop.f32.mrf.mxu2 }
 0x12f   : > { %v2281_v54 = vpop.eup %2280  ;;  %2286 = vpow2.f32 %v1143_v51  ;;  %v594_v58 = vmin.f32 %v3083_v55, 20.0  ;;  %1908 = vst.msk [vmem:[%s2991_s24 + $0x20] sm:$0xff] %vm360_vm1, %v1844_v56  ;;  %v847_v45 = vmul.f32 %v2279_v34, %v751_v47  ;;  %v753_v47 = vmul.f32 2.0, %v3052_v49 }
 0x130   : > { %2288 = vrcp.f32 %v784_v57  ;;  %v1654_v41 = vadd.f32 1.0, %v2281_v54  ;;  %v1018_v36 = vpop.f32.mrf.mxu1 }
 0x131   : > { %v2283_v60 = vpop.eup %2282  ;;  %v646_v2 = vmul.f32 1.442695, %v594_v58  ;;  %v879_v22 = vsub.f32 %v3014_v10, %v847_v45  ;;  %v3092_v19 = vadd.f32 %v3058_v61, %v1018_v36  ;;  %2290 = vpow2.f32 %v1598_v12 }
 0x132   : > { %v689_v44 = vadd.f32 1.0, %v2283_v60  ;;  %v1686_v24 = vmul.f32 %v1654_v41, %v1654_v41  ;;  %v1271_v45 = vmul.f32 2.0, %v3065_v37  ;;  %v3130_v41 = vmul.f32 2.0, %v3083_v55 }
 0x133   : > { %2292 = vpow2.f32 %v646_v2  ;;  %v1112_v5 = vmin.f32 %v3092_v19, 20.0  ;;  %2088 = vmatmul.msk.f32.gmra.mxu1 %vm360_vm1, %v879_v22 }
 0x134   : > { %v2285_v33 = vpop.eup %2284  ;;  %v721_v17 = vmul.f32 %v689_v44, %v689_v44  ;;  %v541_v10 = vpop.f32.mrf.mxu0  ;;  %v1750_v13 = vadd.f32 1.0, %v1686_v24 }
 0x135   : > { %v1087_v9 = vpop.f32.mrf.mxu3  ;;  %v2287_v15 = vpop.eup %2286  ;;  %v3101_v21 = vadd.f32 %v3080_v52, %v541_v10  ;;  %v1813_v32 = vmul.f32 %v2285_v33, %v1717_v16  ;;  %v1145_v31 = vmul.f32 1.442695, %v1112_v5  ;;  %v3136_v5 = vmul.f32 2.0, %v3092_v19 }
 0x136   : > { %v3104_v4 = vadd.f32 %v3058_v61, %v1087_v9  ;;  %v2289_v48 = vpop.eup %2288  ;;  %v785_v38 = vadd.f32 1.0, %v721_v17  ;;  %v1207_v28 = vadd.f32 1.0, %v2287_v15  ;;  %2294 = vrcp.f32 %v1750_v13 }
 0x137   : > { %v595_v20 = vmin.f32 %v3101_v21, 20.0  ;;  %v2291_v25 = vpop.eup %2290  ;;  %v1845_v59 = vsub.f32 %v3025_v63, %v1813_v32  ;;  %v848_v3 = vmul.f32 %v2289_v48, %v752_v46  ;;  %v1600_v63 = vmul.f32 1.442695, %v1560_v26 }
 0x138   : > { %v1135_v35 = vmin.f32 %v3104_v4, 20.0  ;;  %2296 = vrcp.f32 %v785_v38  ;;  %v1239_v53 = vmul.f32 %v1207_v28, %v1207_v28  ;;  %v1021_v42 = vpop.f32.mrf.mxu1  ;;  %v1655_v1 = vadd.f32 1.0, %v2291_v25 }
 0x139   : > { %v2293_v14 = vpop.eup %2292  ;;  %2298 = vpow2.f32 %v1145_v31  ;;  %v648_v7 = vmul.f32 1.442695, %v595_v20  ;;  %1909 = vst.msk [vmem:[%s2991_s24 + $0x28] sm:$0xff] %vm360_vm1, %v1845_v59  ;;  %v3114_v30 = vadd.f32 %v3058_v61, %v1021_v42  ;;  %v880_v29 = vsub.f32 %v3033_v50, %v848_v3 }
 0x13a   : > { %v1191_v40 = vmul.f32 1.442695, %v1135_v35  ;;  %v1303_v23 = vadd.f32 1.0, %v1239_v53  ;;  %v690_v6 = vadd.f32 1.0, %v2293_v14  ;;  %v1687_v8 = vmul.f32 %v1655_v1, %v1655_v1  ;;  %v3147_v35 = vpop.f32.mrf.mxu2 }
 0x13b   : > { %2300 = vpow2.f32 %v648_v7  ;;  %v1113_v56 = vmin.f32 %v3114_v30, 20.0  ;;  %2089 = vmatmul.msk.f32.gmra.mxu1 %vm360_vm1, %v880_v29  ;;  %v3145_v31 = vmul.f32 2.0, %v3101_v21  ;;  %v3158_v7 = vmul.f32 2.0, %v3104_v4 }
 0x13c   : > { %v2295_v18 = vpop.eup %2294  ;;  %2302 = vrcp.f32 %v1303_v23  ;;  %v722_v51 = vmul.f32 %v690_v6, %v690_v6  ;;  %v544_v34 = vpop.f32.mrf.mxu0  ;;  %v1751_v20 = vadd.f32 1.0, %v1687_v8 }
 0x13d   : > { %v1090_v57 = vpop.f32.mrf.mxu3  ;;  %2304 = vpow2.f32 %v1191_v40  ;;  %v3123_v12 = vadd.f32 %v3080_v52, %v544_v34  ;;  %v1814_v54 = vmul.f32 %v2295_v18, %v1718_v43  ;;  %v1147_v2 = vmul.f32 1.442695, %v1113_v56 }
 0x13e   : > { %v3126_v50 = vadd.f32 %v3058_v61, %v1090_v57  ;;  %v2297_v58 = vpop.eup %2296  ;;  %v786_v60 = vadd.f32 1.0, %v722_v51  ;;  %2306 = vpow2.f32 %v1600_v63  ;;  %v1719_v57 = vmul.f32 2.0, %v3071_v27 }
 0x13f   : > { %v2299_v36 = vpop.eup %2298  ;;  %v596_v22 = vmin.f32 %v3123_v12, 20.0  ;;  %v1846_v24 = vsub.f32 %v3046_v11, %v1814_v54  ;;  %v849_v33 = vmul.f32 %v2297_v58, %v753_v47 }
 0x140   : > { %v1136_v16 = vmin.f32 %v3126_v50, 20.0  ;;  %2308 = vrcp.f32 %v786_v60  ;;  %v1208_v44 = vadd.f32 1.0, %v2299_v36  ;;  %v1024_v13 = vpop.f32.mrf.mxu1 }
 0x141   : > { %v2301_v17 = vpop.eup %2300  ;;  %2310 = vpow2.f32 %v1147_v2  ;;  %v650_v10 = vmul.f32 1.442695, %v596_v22  ;;  %1910 = vst.msk [vmem:[%s2991_s24 + $0x30] sm:$0xff] %vm360_vm1, %v1846_v24  ;;  %v3141_v48 = vadd.f32 %v3058_v61, %v1024_v13  ;;  %v881_v11 = vsub.f32 %v3052_v49, %v849_v33 }
 0x142   : > { %v1193_v9 = vmul.f32 1.442695, %v1136_v16  ;;  %v2303_v15 = vpop.eup %2302  ;;  %v1240_v46 = vmul.f32 %v1208_v44, %v1208_v44  ;;  %v691_v32 = vadd.f32 1.0, %v2301_v17  ;;  %v3180_v44 = vpop.f32.mrf.mxu2 }
 0x143   : > { %v2305_v38 = vpop.eup %2304  ;;  %v1367_v28 = vmul.f32 %v2303_v15, %v1271_v45  ;;  %2312 = vpow2.f32 %v650_v10  ;;  %2090 = vmatmul.msk.f32.gmra.mxu1 %vm360_vm1, %v881_v11  ;;  %v1114_v40 = vmin.f32 %v3141_v48, 20.0  ;;  %v3184_v15 = vmul.f32 2.0, %v3123_v12 }
 0x144   : > { %v1304_v26 = vadd.f32 1.0, %v1240_v46  ;;  %v723_v25 = vmul.f32 %v691_v32, %v691_v32  ;;  %v1231_v53 = vadd.f32 1.0, %v2305_v38  ;;  %2314 = vpow2.f32 %v1193_v9  ;;  %v547_v49 = vpop.f32.mrf.mxu0  ;;  %v2307_v3 = vpop.eup %2306 }
 0x145   : > { %v1093_v59 = vpop.f32.mrf.mxu3  ;;  %v1399_v14 = vsub.f32 %v3065_v37, %v1367_v28  ;;  %v3162_v42 = vadd.f32 %v3080_v52, %v547_v49  ;;  %v3170_v37 = vmul.f32 2.0, %v3114_v30  ;;  %v1149_v63 = vmul.f32 1.442695, %v1114_v40 }
 0x146   : > { %v2309_v43 = vpop.eup %2308  ;;  %2316 = vrcp.f32 %v1304_v26  ;;  %v787_v23 = vadd.f32 1.0, %v723_v25  ;;  %v1263_v6 = vmul.f32 %v1231_v53, %v1231_v53  ;;  %v3165_v29 = vadd.f32 %v3058_v61, %v1093_v59 }
 0x147   : > { %v2311_v1 = vpop.eup %2310  ;;  %1872 = vst.msk [vmem:[%s3153_s11] sm:$0xff] %vm360_vm1, %v1399_v14  ;;  %v597_v18 = vmin.f32 %v3162_v42, 20.0  ;;  %2318 = vrcp.f32 %v1751_v20  ;;  %v850_v58 = vmul.f32 %v2309_v43, %v3130_v41  ;;  %v1656_v41 = vadd.f32 1.0, %v2307_v3 }
 0x148   : > { %2320 = vrcp.f32 %v787_v23  ;;  %v1327_v52 = vadd.f32 1.0, %v1263_v6  ;;  %v1209_v47 = vadd.f32 1.0, %v2311_v1  ;;  %v1137_v51 = vmin.f32 %v3165_v29, 20.0  ;;  %v1027_v54 = vpop.f32.mrf.mxu1 }
 0x149   : > { %v2313_v56 = vpop.eup %2312  ;;  %2322 = vpow2.f32 %v1149_v63  ;;  %v652_v34 = vmul.f32 1.442695, %v597_v18  ;;  %v3177_v16 = vadd.f32 %v3058_v61, %v1027_v54  ;;  %v882_v8 = vsub.f32 %v3083_v55, %v850_v58 }
 0x14a   : > { %v2315_v45 = vpop.eup %2314  ;;  %2324 = vrcp.f32 %v1327_v52  ;;  %v1241_v60 = vmul.f32 %v1209_v47, %v1209_v47  ;;  %v692_v2 = vadd.f32 1.0, %v2313_v56  ;;  %v1195_v36 = vmul.f32 1.442695, %v1137_v51  ;;  %v3208_v56 = vpop.f32.mrf.mxu2 }
 0x14b   : > { %v1232_v22 = vadd.f32 1.0, %v2315_v45  ;;  %2326 = vpow2.f32 %v652_v34  ;;  %v1115_v32 = vmin.f32 %v3177_v16, 20.0  ;;  %2091 = vmatmul.msk.f32.gmra.mxu1 %vm360_vm1, %v882_v8  ;;  %v1688_v53 = vmul.f32 %v1656_v41, %v1656_v41 }
 0x14c   : > { %v2317_v24 = vpop.eup %2316  ;;  %v1305_v33 = vadd.f32 1.0, %v1241_v60  ;;  %v724_v17 = vmul.f32 %v692_v2, %v692_v2  ;;  %2328 = vpow2.f32 %v1195_v36  ;;  %v1296_v23 = vmul.f32 2.0, %v3126_v50 }
 0x14d   : > { %v1096_v10 = vpop.f32.mrf.mxu3  ;;  %v2319_v9 = vpop.eup %2318  ;;  %v1368_v13 = vmul.f32 %v2317_v24, %v3136_v5  ;;  %v1264_v46 = vmul.f32 %v1232_v22, %v1232_v22  ;;  %v1151_v25 = vmul.f32 1.442695, %v1115_v32  ;;  %v3200_v6 = vadd.f32 %v2928_v62, %v3117_v39 }
 0x14e   : > { %v2321_v55 = vpop.eup %2320  ;;  %2330 = vrcp.f32 %v1305_v33  ;;  %v788_v11 = vadd.f32 1.0, %v724_v17  ;;  %v1815_v38 = vmul.f32 %v2319_v9, %v1719_v57  ;;  %v3189_v28 = vadd.f32 %v3058_v61, %v1096_v10 }
 0x14f   : > { %v2323_v20 = vpop.eup %2322  ;;  %v1400_v26 = vsub.f32 %v3092_v19, %v1368_v13  ;;  %v1328_v5 = vadd.f32 1.0, %v1264_v46  ;;  %v851_v54 = vmul.f32 %v2321_v55, %v3145_v31  ;;  %v1274_v36 = vmul.f32 2.0, %v3141_v48 }
 0x150   : > { %v2325_v49 = vpop.eup %2324  ;;  %2332 = vrcp.f32 %v788_v11  ;;  %v1210_v59 = vadd.f32 1.0, %v2323_v20  ;;  %v1847_v3 = vsub.f32 %v3071_v27, %v1815_v38  ;;  %v1138_v14 = vmin.f32 %v3189_v28, 20.0  ;;  %v1030_v19 = vpop.f32.mrf.mxu1 }
 0x151   : > { %v2327_v40 = vpop.eup %2326  ;;  %1873 = vst.msk [vmem:[%s3153_s11 + $0x8] sm:$0xff] %vm360_vm1, %v1400_v26  ;;  %v1391_v43 = vmul.f32 %v2325_v49, %v3158_v7  ;;  %2334 = vrcp.f32 %v1328_v5  ;;  %v1752_v7 = vadd.f32 1.0, %v1688_v53  ;;  %v3206_v51 = vadd.f32 %v3058_v61, %v1030_v19 }
 0x152   : > { %v2329_v1 = vpop.eup %2328  ;;  %v1242_v63 = vmul.f32 %v1210_v59, %v1210_v59  ;;  %v693_v18 = vadd.f32 1.0, %v2327_v40  ;;  %1911 = vst.msk [vmem:[%s2991_s24 + $0x38] sm:$0xff] %vm360_vm1, %v1847_v3  ;;  %2336 = vpow2.f32 %v1151_v25  ;;  %v1197_v27 = vmul.f32 1.442695, %v1138_v14  ;;  %v3233_v59 = vpop.f32.mrf.mxu2 }
 0x153   : > { %v1423_v52 = vsub.f32 %v3104_v4, %v1391_v43  ;;  %v1233_v47 = vadd.f32 1.0, %v2329_v1  ;;  %v1116_v4 = vmin.f32 %v3206_v51, 20.0  ;;  %v883_v8 = vsub.f32 %v3101_v21, %v851_v54 }
 0x154   : > { %v2331_v34 = vpop.eup %2330  ;;  %v1306_v39 = vadd.f32 1.0, %v1242_v63  ;;  %v725_v57 = vmul.f32 %v693_v18, %v693_v18  ;;  %2338 = vpow2.f32 %v1197_v27  ;;  %v1720_v9 = vmul.f32 2.0, %v3095_v0 }
 0x155   : > { %v1099_v58 = vpop.f32.mrf.mxu3  ;;  %1896 = vst.msk [vmem:[%s3153_s11 + $0xc0] sm:$0xff] %vm360_vm1, %v1423_v52  ;;  %v1369_v45 = vmul.f32 %v2331_v34, %v3170_v37  ;;  %v1265_v60 = vmul.f32 %v1233_v47, %v1233_v47  ;;  %2340 = vrcp.f32 %v1752_v7  ;;  %v1153_v17 = vmul.f32 1.442695, %v1116_v4  ;;  %2092 = vmatmul.msk.f32.gmra.mxu1 %vm360_vm1, %v883_v8 }
 0x156   : > { %v2333_v2 = vpop.eup %2332  ;;  %2342 = vrcp.f32 %v1306_v39  ;;  %v789_v22 = vadd.f32 1.0, %v725_v57  ;;  %v3219_v10 = vadd.f32 %v3058_v61, %v1099_v58  ;;  %v1561_v13 = vmin.f32 %v3200_v6, 20.0 }
 0x157   : > { %v2335_v24 = vpop.eup %2334  ;;  %v1401_v31 = vsub.f32 %v3114_v30, %v1369_v45  ;;  %v1329_v33 = vadd.f32 1.0, %v1265_v60  ;;  %v757_v21 = vmul.f32 2.0, %v3162_v42  ;;  %v852_v49 = vmul.f32 %v2333_v2, %v3184_v15 }
 0x158   : > { %v2337_v37 = vpop.eup %2336  ;;  %v1392_v41 = vmul.f32 %v2335_v24, %v1296_v23  ;;  %2344 = vrcp.f32 %v789_v22  ;;  %v1139_v46 = vmin.f32 %v3219_v10, 20.0  ;;  %v1033_v32 = vpop.f32.mrf.mxu1  ;;  %v1602_v38 = vmul.f32 1.442695, %v1561_v13 }
 0x159   : > { %1874 = vst.msk [vmem:[%s3153_s11 + $0x10] sm:$0xff] %vm360_vm1, %v1401_v31  ;;  %2346 = vrcp.f32 %v1329_v33  ;;  %v1211_v30 = vadd.f32 1.0, %v2337_v37  ;;  %v3230_v20 = vadd.f32 %v3058_v61, %v1033_v32  ;;  %v1297_v14 = vmul.f32 2.0, %v3165_v29  ;;  %v3265_v33 = vld [vmem:[%s3632_s6] ss:$0 sm:$0xff] }
 0x15a   : > { %v2339_v55 = vpop.eup %2338  ;;  %v1424_v11 = vsub.f32 %v3126_v50, %v1392_v41  ;;  %2348 = vpow2.f32 %v1153_v17  ;;  %v1199_v53 = vmul.f32 1.442695, %v1139_v46  ;;  %v884_v27 = vsub.f32 %v3123_v12, %v852_v49  ;;  %v3271_v37 = vpop.f32.mrf.mxu2 }
 0x15b   : > { %v2341_v26 = vpop.eup %2340  ;;  %v1243_v5 = vmul.f32 %v1211_v30, %v1211_v30  ;;  %v1234_v25 = vadd.f32 1.0, %v2339_v55  ;;  %2350 = vpow2.f32 %v1602_v38  ;;  %v1117_v50 = vmin.f32 %v3230_v20, 20.0 }
 0x15c   : > { %v2343_v3 = vpop.eup %2342  ;;  %1897 = vst.msk [vmem:[%s3153_s11 + $0xc8] sm:$0xff] %vm360_vm1, %v1424_v11  ;;  %v1816_v40 = vmul.f32 %v2341_v26, %v1720_v9  ;;  %2352 = vpow2.f32 %v1199_v53  ;;  %v3247_v39 = vadd.f32 %v2928_v62, %v3147_v35  ;;  %v3269_v17 = vadd.f32 %v3265_v33, %v3180_v44 }
 0x15d   : > { %v1102_v43 = vpop.f32.mrf.mxu3  ;;  %v1370_v23 = vmul.f32 %v2343_v3, %v1274_v36  ;;  %v1307_v19 = vadd.f32 1.0, %v1243_v5  ;;  %v1266_v1 = vmul.f32 %v1234_v25, %v1234_v25  ;;  %v1155_v18 = vmul.f32 1.442695, %v1117_v50  ;;  %2093 = vmatmul.msk.f32.gmra.mxu1 %vm360_vm1, %v884_v27 }
 0x15e   : > { %v2345_v63 = vpop.eup %2344  ;;  %v1848_v15 = vsub.f32 %v3095_v0, %v1816_v40  ;;  %v3242_v52 = vadd.f32 %v3058_v61, %v1102_v43  ;;  %v1275_v0 = vmul.f32 2.0, %v3177_v16  ;;  %v1562_v62 = vmin.f32 %v3247_v39, 20.0 }
 0x15f   : > { %v2347_v47 = vpop.eup %2346  ;;  %v1402_v7 = vsub.f32 %v3141_v48, %v1370_v23  ;;  %2354 = vrcp.f32 %v1307_v19  ;;  %v1330_v34 = vadd.f32 1.0, %v1266_v1  ;;  %v1298_v48 = vmul.f32 2.0, %v3189_v28 }
 0x160   : > { %v2349_v57 = vpop.eup %2348  ;;  %v1393_v54 = vmul.f32 %v2347_v47, %v1297_v14  ;;  %1912 = vst.msk [vmem:[%s2991_s24 + $0x40] sm:$0xff] %vm360_vm1, %v1848_v15  ;;  %2356 = vpow2.f32 %v1155_v18  ;;  %v1140_v12 = vmin.f32 %v3242_v52, 20.0  ;;  %v1036_v35 = vpop.f32.mrf.mxu1  ;;  %v853_v36 = vmul.f32 %v2345_v63, %v757_v21 }
 0x161   : > { %1875 = vst.msk [vmem:[%s3153_s11 + $0x18] sm:$0xff] %vm360_vm1, %v1402_v7  ;;  %2358 = vrcp.f32 %v1330_v34  ;;  %v1212_v58 = vadd.f32 1.0, %v2349_v57  ;;  %v2351_v45 = vpop.eup %2350  ;;  %v3260_v2 = vadd.f32 %v3058_v61, %v1036_v35  ;;  %v1604_v31 = vmul.f32 1.442695, %v1562_v62 }
 0x162   : > { %v1425_v60 = vsub.f32 %v3165_v29, %v1393_v54  ;;  %v1201_v4 = vmul.f32 1.442695, %v1140_v12  ;;  %v2353_v22 = vpop.eup %2352  ;;  %v1657_v24 = vadd.f32 1.0, %v2351_v45  ;;  %v1276_v29 = vmul.f32 2.0, %v3206_v51  ;;  %v3293_v34 = vpop.f32.mrf.mxu2 }
 0x163   : > { %v1244_v8 = vmul.f32 %v1212_v58, %v1212_v58  ;;  %v1235_v41 = vadd.f32 1.0, %v2353_v22  ;;  %v1118_v9 = vmin.f32 %v3260_v2, 20.0  ;;  %v885_v32 = vsub.f32 %v3162_v42, %v853_v36 }
 0x164   : > { %1898 = vst.msk [vmem:[%s3153_s11 + $0xd0] sm:$0xff] %vm360_vm1, %v1425_v60  ;;  %2360 = vpow2.f32 %v1201_v4  ;;  %v1689_v46 = vmul.f32 %v1657_v24, %v1657_v24  ;;  %v1563_v49 = vmin.f32 %v3269_v17, 20.0  ;;  %v1721_v42 = vmul.f32 2.0, %v3200_v6 }
 0x165   : > { %v1105_v13 = vpop.f32.mrf.mxu3  ;;  %v2355_v21 = vpop.eup %2354  ;;  %v1308_v30 = vadd.f32 1.0, %v1244_v8  ;;  %2362 = vpow2.f32 %v1604_v31  ;;  %v1267_v11 = vmul.f32 %v1235_v41, %v1235_v41  ;;  %v1157_v38 = vmul.f32 1.442695, %v1118_v9  ;;  %2094 = vmatmul.msk.f32.gmra.mxu1 %vm360_vm1, %v885_v32 }
 0x166   : > { %v2357_v55 = vpop.eup %2356  ;;  %v1371_v44 = vmul.f32 %v2355_v21, %v1275_v0  ;;  %v3279_v26 = vadd.f32 %v3058_v61, %v1105_v13  ;;  %v1753_v25 = vadd.f32 1.0, %v1689_v46  ;;  %v1606_v63 = vmul.f32 1.442695, %v1563_v49 }
 0x167   : > { %v2359_v5 = vpop.eup %2358  ;;  %2364 = vrcp.f32 %v1308_v30  ;;  %v1213_v53 = vadd.f32 1.0, %v2357_v55  ;;  %v1331_v40 = vadd.f32 1.0, %v1267_v11  ;;  %v1277_v57 = vmul.f32 2.0, %v3230_v20 }
 0x168   : > { %v1403_v3 = vsub.f32 %v3177_v16, %v1371_v44  ;;  %v1394_v14 = vmul.f32 %v2359_v5, %v1298_v48  ;;  %2366 = vpow2.f32 %v1157_v38  ;;  %v1141_v43 = vmin.f32 %v3279_v26, 20.0  ;;  %v1039_v23 = vpop.f32.mrf.mxu1 }
 0x169   : > { %2368 = vrcp.f32 %v1753_v25  ;;  %v1245_v50 = vmul.f32 %v1213_v53, %v1213_v53  ;;  %v1299_v16 = vmul.f32 2.0, %v3219_v10  ;;  %v3291_v7 = vadd.f32 %v3058_v61, %v1039_v23 }
 0x16a   : > { %v2361_v19 = vpop.eup %2360  ;;  %1876 = vst.msk [vmem:[%s3153_s11 + $0x20] sm:$0xff] %vm360_vm1, %v1403_v3  ;;  %v1426_v1 = vsub.f32 %v3189_v28, %v1394_v14  ;;  %2370 = vrcp.f32 %v1331_v40  ;;  %v1203_v47 = vmul.f32 1.442695, %v1141_v43  ;;  %v3300_v0 = vadd.f32 %v3265_v33, %v3208_v56  ;;  %v1504_v49 = vpop.f32.mrf.mxu2 }
 0x16b   : > { %v2363_v15 = vpop.eup %2362  ;;  %v1309_v18 = vadd.f32 1.0, %v1245_v50  ;;  %v1236_v27 = vadd.f32 1.0, %v2361_v19  ;;  %2372 = vpow2.f32 %v1606_v63  ;;  %v1300_v58 = vmul.f32 2.0, %v3242_v52 }
 0x16c   : > { %1899 = vst.msk [vmem:[%s3153_s11 + $0xd8] sm:$0xff] %vm360_vm1, %v1426_v1  ;;  %v1658_v54 = vadd.f32 1.0, %v2363_v15  ;;  %v1119_v62 = vmin.f32 %v3291_v7, 20.0  ;;  %v1564_v24 = vmin.f32 %v3300_v0, 20.0  ;;  %v3312_v32 = vadd.f32 %v3265_v33, %v3233_v59 }
 0x16d   : > { %v1108_v28 = vpop.f32.mrf.mxu3  ;;  %v2365_v12 = vpop.eup %2364  ;;  %2374 = vrcp.f32 %v1309_v18  ;;  %v1268_v48 = vmul.f32 %v1236_v27, %v1236_v27  ;;  %v1722_v14 = vmul.f32 2.0, %v3247_v39  ;;  %v1278_v23 = vmul.f32 2.0, %v3260_v2 }
 0x16e   : > { %v2367_v35 = vpop.eup %2366  ;;  %v1372_v45 = vmul.f32 %v2365_v12, %v1276_v29  ;;  %v1690_v60 = vmul.f32 %v1658_v54, %v1658_v54  ;;  %2376 = vpow2.f32 %v1203_v47  ;;  %v3305_v4 = vadd.f32 %v3058_v61, %v1108_v28 }
 0x16f   : > { %v2369_v36 = vpop.eup %2368  ;;  %v1332_v22 = vadd.f32 1.0, %v1268_v48  ;;  %v1214_v8 = vadd.f32 1.0, %v2367_v35  ;;  %v1159_v56 = vmul.f32 1.442695, %v1119_v62  ;;  %v1608_v11 = vmul.f32 1.442695, %v1564_v24 }
 0x170   : > { %v2371_v31 = vpop.eup %2370  ;;  %v1404_v41 = vsub.f32 %v3206_v51, %v1372_v45  ;;  %v1817_v9 = vmul.f32 %v2369_v36, %v1721_v42  ;;  %v1754_v13 = vadd.f32 1.0, %v1690_v60  ;;  %v1142_v21 = vmin.f32 %v3305_v4, 20.0  ;;  %v1042_v46 = vpop.f32.mrf.mxu1 }
 0x171   : > { %v1395_v29 = vmul.f32 %v2371_v31, %v1299_v16  ;;  %2378 = vrcp.f32 %v1332_v22  ;;  %v1246_v30 = vmul.f32 %v1214_v8, %v1214_v8  ;;  %v2373_v55 = vpop.eup %2372  ;;  %v1565_v42 = vmin.f32 %v3312_v32, 20.0 }
 0x172   : > { %1877 = vst.msk [vmem:[%s3153_s11 + $0x28] sm:$0xff] %vm360_vm1, %v1404_v41  ;;  %v1849_v44 = vsub.f32 %v3200_v6, %v1817_v9  ;;  %2380 = vrcp.f32 %v1754_v13  ;;  %v1205_v51 = vmul.f32 1.442695, %v1142_v21  ;;  %v1659_v53 = vadd.f32 1.0, %v2373_v55  ;;  %v1507_v21 = vpop.f32.mrf.mxu2 }
 0x173   : > { %v2375_v38 = vpop.eup %2374  ;;  %v1427_v5 = vsub.f32 %v3219_v10, %v1395_v29  ;;  %v1310_v25 = vadd.f32 1.0, %v1246_v30  ;;  %2382 = vpow2.f32 %v1159_v56  ;;  %v3322_v6 = vadd.f32 %v3058_v61, %v1042_v46 }
 0x174   : > { %v2377_v3 = vpop.eup %2376  ;;  %1913 = vst.msk [vmem:[%s2991_s24 + $0x48] sm:$0xff] %vm360_vm1, %v1849_v44  ;;  %v1373_v59 = vmul.f32 %v2375_v38, %v1277_v57  ;;  %2384 = vpow2.f32 %v1205_v51  ;;  %v1691_v10 = vmul.f32 %v1659_v53, %v1659_v53  ;;  %v1723_v63 = vmul.f32 2.0, %v3269_v17 }
 0x175   : > { %1900 = vst.msk [vmem:[%s3153_s11 + $0xe0] sm:$0xff] %vm360_vm1, %v1427_v5  ;;  %2386 = vrcp.f32 %v1310_v25  ;;  %v1237_v40 = vadd.f32 1.0, %v2377_v3  ;;  %v3327_v50 = vpop.f32.mrf.mxu3  ;;  %v1120_v19 = vmin.f32 %v3322_v6, 20.0  ;;  %v1610_v18 = vmul.f32 1.442695, %v1565_v42 }
 0x176   : > { %v1405_v43 = vsub.f32 %v3230_v20, %v1373_v59  ;;  %2388 = vpow2.f32 %v1608_v11  ;;  %v1755_v15 = vadd.f32 1.0, %v1691_v10  ;;  %v3337_v54 = vadd.f32 %v3265_v33, %v3271_v37 }
 0x177   : > { %v2379_v1 = vpop.eup %2378  ;;  %v1269_v16 = vmul.f32 %v1237_v40, %v1237_v40  ;;  %v1161_v57 = vmul.f32 1.442695, %v1120_v19  ;;  %v3341_v20 = vadd.f32 %v3265_v33, %v3293_v34  ;;  %v3344_v35 = vadd.f32 %v3265_v33, %v1504_v49 }
 0x178   : > { %v2381_v27 = vpop.eup %2380  ;;  %1878 = vst.msk [vmem:[%s3153_s11 + $0x30] sm:$0xff] %vm360_vm1, %v1405_v43  ;;  %v1396_v47 = vmul.f32 %v2379_v1, %v1300_v58  ;;  %2390 = vrcp.f32 %v1755_v15  ;;  %v1045_v62 = vpop.f32.mrf.mxu1  ;;  %v1566_v8 = vmin.f32 %v3337_v54, 20.0  ;;  %v1301_v41 = vmul.f32 2.0, %v3279_v26 }
 0x179   : > { %v2383_v28 = vpop.eup %2382  ;;  %v1818_v12 = vmul.f32 %v2381_v27, %v1722_v14  ;;  %v1333_v48 = vadd.f32 1.0, %v1269_v16  ;;  %2392 = vpow2.f32 %v1161_v57  ;;  %v3348_v37 = vadd.f32 %v3058_v61, %v1045_v62 }
 0x17a   : > { %v2385_v45 = vpop.eup %2384  ;;  %v1428_v58 = vsub.f32 %v3242_v52, %v1396_v47  ;;  %v1215_v60 = vadd.f32 1.0, %v2383_v28  ;;  %v1279_v30 = vmul.f32 2.0, %v3291_v7  ;;  %v1567_v38 = vmin.f32 %v3341_v20, 20.0 }
 0x17b   : > { %v2387_v34 = vpop.eup %2386  ;;  %v1850_v36 = vsub.f32 %v3247_v39, %v1818_v12  ;;  %2394 = vrcp.f32 %v1333_v48  ;;  %v1238_v22 = vadd.f32 1.0, %v2385_v45  ;;  %v1121_v52 = vmin.f32 %v3348_v37, 20.0 }
 0x17c   : > { %v2389_v56 = vpop.eup %2388  ;;  %1901 = vst.msk [vmem:[%s3153_s11 + $0xe8] sm:$0xff] %vm360_vm1, %v1428_v58  ;;  %v1374_v24 = vmul.f32 %v2387_v34, %v1278_v23  ;;  %v1247_v31 = vmul.f32 %v1215_v60, %v1215_v60  ;;  %2396 = vpow2.f32 %v1610_v18  ;;  %v1612_v39 = vmul.f32 1.442695, %v1566_v8 }
 0x17d   : > { %1914 = vst.msk [vmem:[%s2991_s24 + $0x50] sm:$0xff] %vm360_vm1, %v1850_v36  ;;  %v1270_v9 = vmul.f32 %v1238_v22, %v1238_v22  ;;  %v1660_v13 = vadd.f32 1.0, %v2389_v56  ;;  %v1163_v55 = vmul.f32 1.442695, %v1121_v52  ;;  %v1531_v5 = vpop.f32.mrf.mxu3  ;;  %v1302_v49 = vmul.f32 2.0, %v3305_v4  ;;  %v1510_v36 = vpop.f32.mrf.mxu2 }
 0x17e   : > { %v1406_v29 = vsub.f32 %v3260_v2, %v1374_v24  ;;  %v1311_v46 = vadd.f32 1.0, %v1247_v31  ;;  %v2391_v44 = vpop.eup %2390  ;;  %2398 = vpow2.f32 %v1612_v39  ;;  %v1568_v2 = vmin.f32 %v3344_v35, 20.0 }
 0x17f   : > { %v1334_v51 = vadd.f32 1.0, %v1270_v9  ;;  %v1692_v11 = vmul.f32 %v1660_v13, %v1660_v13  ;;  %v2393_v25 = vpop.eup %2392  ;;  %v1819_v53 = vmul.f32 %v2391_v44, %v1723_v63  ;;  %v1614_v10 = vmul.f32 1.442695, %v1567_v38 }
 0x180   : > { %1879 = vst.msk [vmem:[%s3153_s11 + $0x38] sm:$0xff] %vm360_vm1, %v1406_v29  ;;  %2400 = vrcp.f32 %v1311_v46  ;;  %v1216_v14 = vadd.f32 1.0, %v2393_v25  ;;  %v1048_v40 = vpop.f32.mrf.mxu1  ;;  %v1616_v63 = vmul.f32 1.442695, %v1568_v2  ;;  %v1724_v18 = vmul.f32 2.0, %v3300_v0 }
 0x181   : > { %v2395_v3 = vpop.eup %2394  ;;  %2402 = vrcp.f32 %v1334_v51  ;;  %v1756_v59 = vadd.f32 1.0, %v1692_v11  ;;  %v1851_v23 = vsub.f32 %v3269_v17, %v1819_v53  ;;  %v3367_v19 = vadd.f32 %v3058_v61, %v1048_v40  ;;  %v3395_v46 = vld [vmem:[%s3630_s4] ss:$0 sm:$0xff] }
 0x182   : > { %v2397_v42 = vpop.eup %2396  ;;  %v1397_v43 = vmul.f32 %v2395_v3, %v1301_v41  ;;  %2404 = vpow2.f32 %v1163_v55  ;;  %v1248_v1 = vmul.f32 %v1216_v14, %v1216_v14  ;;  %v3376_v61 = vadd.f32 %v3265_v33, %v3327_v50 }
 0x183   : > { %2406 = vrcp.f32 %v1756_v59  ;;  %v1661_v16 = vadd.f32 1.0, %v2397_v42  ;;  %1915 = vst.msk [vmem:[%s2991_s24 + $0x58] sm:$0xff] %vm360_vm1, %v1851_v23  ;;  %v1122_v27 = vmin.f32 %v3367_v19, 20.0  ;;  %v3382_v62 = vadd.f32 %v3265_v33, %v1507_v21 }
 0x184   : > { %v1429_v15 = vsub.f32 %v3279_v26, %v1397_v43  ;;  %2408 = vpow2.f32 %v1614_v10  ;;  %v2399_v47 = vpop.eup %2398  ;;  %v1312_v17 = vadd.f32 1.0, %v1248_v1  ;;  %v1280_v26 = vmul.f32 2.0, %v3322_v6 }
 0x185   : > { %v1693_v57 = vmul.f32 %v1661_v16, %v1661_v16  ;;  %2410 = vpow2.f32 %v1616_v63  ;;  %v1662_v12 = vadd.f32 1.0, %v2399_v47  ;;  %v1165_v48 = vmul.f32 1.442695, %v1122_v27  ;;  %v3389_v13 = vpop.f32.mrf.mxu3 }
 0x186   : > { %v2401_v28 = vpop.eup %2400  ;;  %1902 = vst.msk [vmem:[%s3153_s11 + $0xf0] sm:$0xff] %vm360_vm1, %v1429_v15  ;;  %2412 = vrcp.f32 %v1312_v17  ;;  %v1576_v34 = vmin.f32 %v3376_v61, 20.0  ;;  %v3386_v56 = vadd.f32 %v3265_v33, %v1531_v5  ;;  %v1725_v44 = vmul.f32 2.0, %v3312_v32 }
 0x187   : > { %v2403_v45 = vpop.eup %2402  ;;  %v1375_v58 = vmul.f32 %v2401_v28, %v1279_v30  ;;  %v1757_v60 = vadd.f32 1.0, %v1693_v57  ;;  %v1694_v8 = vmul.f32 %v1662_v12, %v1662_v12  ;;  %2414 = vpow2.f32 %v1165_v48  ;;  %v1513_v28 = vpop.f32.mrf.mxu2 }
 0x188   : > { %v2405_v22 = vpop.eup %2404  ;;  %v1398_v50 = vmul.f32 %v2403_v45, %v1302_v49  ;;  %v1051_v41 = vpop.f32.mrf.mxu1  ;;  %v1632_v9 = vmul.f32 1.442695, %v1576_v34  ;;  %v1281_v38 = vmul.f32 2.0, %v3348_v37  ;;  %v1569_v3 = vmin.f32 %v3382_v62, 20.0 }
 0x189   : > { %v2407_v24 = vpop.eup %2406  ;;  %v1407_v31 = vsub.f32 %v3291_v7, %v1375_v58  ;;  %2416 = vrcp.f32 %v1757_v60  ;;  %v1217_v52 = vadd.f32 1.0, %v2405_v22  ;;  %v1758_v30 = vadd.f32 1.0, %v1694_v8 }
 0x18a   : > { %v2409_v39 = vpop.eup %2408  ;;  %v1430_v21 = vsub.f32 %v3305_v4, %v1398_v50  ;;  %v1820_v29 = vmul.f32 %v2407_v24, %v1724_v18  ;;  %v3398_v55 = vadd.f32 %v3395_v46, %v1051_v41  ;;  %2418 = vpow2.f32 %v1632_v9 }
 0x18b   : > { %v2411_v7 = vpop.eup %2410  ;;  %1880 = vst.msk [vmem:[%s3153_s11 + $0x40] sm:$0xff] %vm360_vm1, %v1407_v31  ;;  %v1249_v51 = vmul.f32 %v1217_v52, %v1217_v52  ;;  %v1663_v11 = vadd.f32 1.0, %v2409_v39  ;;  %2420 = vrcp.f32 %v1758_v30  ;;  %v1726_v40 = vmul.f32 2.0, %v3337_v54 }
 0x18c   : > { %1903 = vst.msk [vmem:[%s3153_s11 + $0xf8] sm:$0xff] %vm360_vm1, %v1430_v21  ;;  %v1852_v4 = vsub.f32 %v3300_v0, %v1820_v29  ;;  %v1123_v5 = vmin.f32 %v3398_v55, 20.0  ;;  %v2413_v25 = vpop.eup %2412  ;;  %v1664_v2 = vadd.f32 1.0, %v2411_v7  ;;  %v1577_v0 = vmin.f32 %v3386_v56, 20.0 }
 0x18d   : > { %v1313_v53 = vadd.f32 1.0, %v1249_v51  ;;  %v1695_v49 = vmul.f32 %v1663_v11, %v1663_v11  ;;  %v2415_v59 = vpop.eup %2414  ;;  %v1376_v14 = vmul.f32 %v2413_v25, %v1280_v26  ;;  %v1618_v15 = vmul.f32 1.442695, %v1569_v3  ;;  %v1537_v34 = vpop.f32.mrf.mxu3 }
 0x18e   : > { %1916 = vst.msk [vmem:[%s2991_s24 + $0x60] sm:$0xff] %vm360_vm1, %v1852_v4  ;;  %v1167_v10 = vmul.f32 1.442695, %v1123_v5  ;;  %v1218_v43 = vadd.f32 1.0, %v2415_v59  ;;  %v1696_v1 = vmul.f32 %v1664_v2, %v1664_v2  ;;  %v3415_v57 = vadd.f32 %v3265_v33, %v1510_v36 }
 0x18f   : > { %v2417_v42 = vpop.eup %2416  ;;  %2422 = vrcp.f32 %v1313_v53  ;;  %v1759_v23 = vadd.f32 1.0, %v1695_v49  ;;  %v1408_v16 = vsub.f32 %v3322_v6, %v1376_v14  ;;  %v1634_v60 = vmul.f32 1.442695, %v1577_v0  ;;  %v1516_v0 = vpop.f32.mrf.mxu2 }
 0x190   : > { %v1821_v63 = vmul.f32 %v2417_v42, %v1725_v44  ;;  %2424 = vpow2.f32 %v1167_v10  ;;  %v2419_v18 = vpop.eup %2418  ;;  %v1250_v27 = vmul.f32 %v1218_v43, %v1218_v43  ;;  %v1760_v47 = vadd.f32 1.0, %v1696_v1  ;;  %v1054_v17 = vpop.f32.mrf.mxu1 }
 0x191   : > { %2426 = vrcp.f32 %v1759_v23  ;;  %v2421_v26 = vpop.eup %2420  ;;  %1881 = vst.msk [vmem:[%s3153_s11 + $0x48] sm:$0xff] %vm360_vm1, %v1408_v16  ;;  %v1672_v48 = vadd.f32 1.0, %v2419_v18  ;;  %v3421_v6 = vadd.f32 %v3395_v46, %v1054_v17  ;;  %v1727_v36 = vmul.f32 2.0, %v3341_v20 }
 0x192   : > { %v1853_v12 = vsub.f32 %v3312_v32, %v1821_v63  ;;  %2428 = vpow2.f32 %v1618_v15  ;;  %v1822_v45 = vmul.f32 %v2421_v26, %v1726_v40  ;;  %v1314_v58 = vadd.f32 1.0, %v1250_v27 }
 0x193   : > { %2430 = vrcp.f32 %v1760_v47  ;;  %v1728_v22 = vmul.f32 2.0, %v3344_v35  ;;  %v1704_v50 = vmul.f32 %v1672_v48, %v1672_v48  ;;  %v1124_v32 = vmin.f32 %v3421_v6, 20.0 }
 0x194   : > { %1917 = vst.msk [vmem:[%s2991_s24 + $0x68] sm:$0xff] %vm360_vm1, %v1853_v12  ;;  %v1854_v24 = vsub.f32 %v3337_v54, %v1822_v45  ;;  %2432 = vrcp.f32 %v1314_v58  ;;  %v1570_v31 = vmin.f32 %v3415_v57, 20.0  ;;  %v3432_v52 = vadd.f32 %v3265_v33, %v3389_v13 }
 0x195   : > { %v2423_v8 = vpop.eup %2422  ;;  %v1768_v39 = vadd.f32 1.0, %v1704_v50  ;;  %v1169_v21 = vmul.f32 1.442695, %v1124_v32  ;;  %2434 = vpow2.f32 %v1634_v60  ;;  %v1282_v30 = vmul.f32 2.0, %v3367_v19  ;;  %v1540_v18 = vpop.f32.mrf.mxu3 }
 0x196   : > { %v2425_v41 = vpop.eup %2424  ;;  %v1377_v9 = vmul.f32 %v2423_v8, %v1281_v38  ;;  %1918 = vst.msk [vmem:[%s2991_s24 + $0x70] sm:$0xff] %vm360_vm1, %v1854_v24  ;;  %v1620_v54 = vmul.f32 1.442695, %v1570_v31  ;;  %v1578_v44 = vmin.f32 %v3432_v52, 20.0  ;;  %v3440_v4 = vadd.f32 %v3265_v33, %v1513_v28 }
 0x197   : > { %v2427_v29 = vpop.eup %2426  ;;  %v1219_v7 = vadd.f32 1.0, %v2425_v41  ;;  %2436 = vrcp.f32 %v1768_v39  ;;  %v1736_v40 = vmul.f32 2.0, %v3376_v61  ;;  %v1283_v23 = vmul.f32 2.0, %v3398_v55 }
 0x198   : > { %v2429_v51 = vpop.eup %2428  ;;  %v1409_v11 = vsub.f32 %v3348_v37, %v1377_v9  ;;  %v1823_v13 = vmul.f32 %v2427_v29, %v1727_v36  ;;  %2438 = vpow2.f32 %v1169_v21  ;;  %v1057_v53 = vpop.f32.mrf.mxu1  ;;  %v1636_v49 = vmul.f32 1.442695, %v1578_v44 }
 0x199   : > { %v2431_v38 = vpop.eup %2430  ;;  %v1251_v5 = vmul.f32 %v1219_v7, %v1219_v7  ;;  %v1665_v25 = vadd.f32 1.0, %v2429_v51  ;;  %v3446_v59 = vadd.f32 %v3395_v46, %v1057_v53  ;;  %2440 = vpow2.f32 %v1620_v54 }
 0x19a   : > { %1882 = vst.msk [vmem:[%s3153_s11 + $0x50] sm:$0xff] %vm360_vm1, %v1409_v11  ;;  %v1855_v2 = vsub.f32 %v3341_v20, %v1823_v13  ;;  %v1824_v3 = vmul.f32 %v2431_v38, %v1728_v22  ;;  %v2433_v37 = vpop.eup %2432  ;;  %2442 = vpow2.f32 %v1636_v49  ;;  %v1571_v15 = vmin.f32 %v3440_v4, 20.0 }
 0x19b   : > { %v1315_v14 = vadd.f32 1.0, %v1251_v5  ;;  %v1697_v10 = vmul.f32 %v1665_v25, %v1665_v25  ;;  %v2435_v42 = vpop.eup %2434  ;;  %v1378_v43 = vmul.f32 %v2433_v37, %v1282_v30  ;;  %v1125_v1 = vmin.f32 %v3446_v59, 20.0 }
 0x19c   : > { %1919 = vst.msk [vmem:[%s2991_s24 + $0x78] sm:$0xff] %vm360_vm1, %v1855_v2  ;;  %v1856_v20 = vsub.f32 %v3344_v35, %v1824_v3  ;;  %v1673_v63 = vadd.f32 1.0, %v2435_v42  ;;  %v3459_v28 = vadd.f32 %v3265_v33, %v1537_v34  ;;  %v3462_v35 = vadd.f32 %v3265_v33, %v1516_v0  ;;  %v1519_v2 = vpop.f32.mrf.mxu2 }
 0x19d   : > { %2444 = vrcp.f32 %v1315_v14  ;;  %v1761_v16 = vadd.f32 1.0, %v1697_v10  ;;  %v2437_v27 = vpop.eup %2436  ;;  %v1410_v47 = vsub.f32 %v3367_v19, %v1378_v43  ;;  %v1171_v17 = vmul.f32 1.442695, %v1125_v1  ;;  %v1543_v10 = vpop.f32.mrf.mxu3 }
 0x19e   : > { %1920 = vst.msk [vmem:[%s2991_s24 + $0x80] sm:$0xff] %vm360_vm1, %v1856_v20  ;;  %v2439_v26 = vpop.eup %2438  ;;  %v1832_v12 = vmul.f32 %v2437_v27, %v1736_v40  ;;  %v1705_v48 = vmul.f32 %v1673_v63, %v1673_v63  ;;  %v1622_v45 = vmul.f32 1.442695, %v1571_v15  ;;  %v1579_v19 = vmin.f32 %v3459_v28, 20.0 }
 0x19f   : > { %2446 = vrcp.f32 %v1761_v16  ;;  %v2441_v58 = vpop.eup %2440  ;;  %1883 = vst.msk [vmem:[%s3153_s11 + $0x58] sm:$0xff] %vm360_vm1, %v1410_v47  ;;  %v1220_v60 = vadd.f32 1.0, %v2439_v26  ;;  %v1572_v36 = vmin.f32 %v3462_v35, 20.0  ;;  %v1729_v31 = vmul.f32 2.0, %v3382_v62 }
 0x1a0   : > { %2448 = vpow2.f32 %v1171_v17  ;;  %v2443_v34 = vpop.eup %2442  ;;  %v1864_v22 = vsub.f32 %v3376_v61, %v1832_v12  ;;  %v1769_v50 = vadd.f32 1.0, %v1705_v48  ;;  %v1666_v32 = vadd.f32 1.0, %v2441_v58  ;;  %v1060_v8 = vpop.f32.mrf.mxu1 }
 0x1a1   : > { %2450 = vpow2.f32 %v1622_v45  ;;  %v1252_v24 = vmul.f32 %v1220_v60, %v1220_v60  ;;  %v1674_v41 = vadd.f32 1.0, %v2443_v34  ;;  %v3471_v9 = vadd.f32 %v3395_v46, %v1060_v8 }
 0x1a2   : > { %1928 = vst.msk [vmem:[%s2991_s24 + $0xc0] sm:$0xff] %vm360_vm1, %v1864_v22  ;;  %v1284_v21 = vmul.f32 2.0, %v3421_v6  ;;  %2452 = vrcp.f32 %v1769_v50  ;;  %v1698_v29 = vmul.f32 %v1666_v32, %v1666_v32  ;;  %v1638_v30 = vmul.f32 1.442695, %v1579_v19 }
 0x1a3   : > { %v2445_v39 = vpop.eup %2444  ;;  %v1316_v7 = vadd.f32 1.0, %v1252_v24  ;;  %v1706_v54 = vmul.f32 %v1674_v41, %v1674_v41  ;;  %v1126_v44 = vmin.f32 %v3471_v9, 20.0  ;;  %v1737_v11 = vmul.f32 2.0, %v3386_v56 }
 0x1a4   : > { %v1379_v61 = vmul.f32 %v2445_v39, %v1283_v23  ;;  %v1762_v13 = vadd.f32 1.0, %v1698_v29  ;;  %2454 = vpow2.f32 %v1638_v30  ;;  %v1624_v38 = vmul.f32 1.442695, %v1572_v36 }
 0x1a5   : > { %v2447_v51 = vpop.eup %2446  ;;  %2456 = vrcp.f32 %v1316_v7  ;;  %v1770_v49 = vadd.f32 1.0, %v1706_v54  ;;  %v1173_v14 = vmul.f32 1.442695, %v1126_v44  ;;  %v3480_v40 = vadd.f32 %v3265_v33, %v1540_v18  ;;  %v1522_v7 = vpop.f32.mrf.mxu2 }
 0x1a6   : > { %v2449_v5 = vpop.eup %2448  ;;  %v1411_v25 = vsub.f32 %v3398_v55, %v1379_v61  ;;  %v1825_v53 = vmul.f32 %v2447_v51, %v1729_v31  ;;  %2458 = vrcp.f32 %v1762_v13  ;;  %v1730_v42 = vmul.f32 2.0, %v3415_v57 }
 0x1a7   : > { %v2451_v3 = vpop.eup %2450  ;;  %v1221_v37 = vadd.f32 1.0, %v2449_v5  ;;  %2460 = vrcp.f32 %v1770_v49  ;;  %v1738_v20 = vmul.f32 2.0, %v3432_v52  ;;  %v1580_v16 = vmin.f32 %v3480_v40, 20.0 }
 0x1a8   : > { %1884 = vst.msk [vmem:[%s3153_s11 + $0x60] sm:$0xff] %vm360_vm1, %v1411_v25  ;;  %v1857_v0 = vsub.f32 %v3382_v62, %v1825_v53  ;;  %v1667_v55 = vadd.f32 1.0, %v2451_v3  ;;  %v2453_v43 = vpop.eup %2452  ;;  %2462 = vpow2.f32 %v1173_v14  ;;  %v1063_v1 = vpop.f32.mrf.mxu1  ;;  %v1285_v27 = vmul.f32 2.0, %v3446_v59 }
 0x1a9   : > { %v1253_v23 = vmul.f32 %v1221_v37, %v1221_v37  ;;  %v1833_v63 = vmul.f32 %v2453_v43, %v1737_v11  ;;  %v3491_v18 = vadd.f32 %v3395_v46, %v1063_v1  ;;  %2464 = vpow2.f32 %v1624_v38  ;;  %v1546_v11 = vpop.f32.mrf.mxu3 }
 0x1aa   : > { %1921 = vst.msk [vmem:[%s2991_s24 + $0x88] sm:$0xff] %vm360_vm1, %v1857_v0  ;;  %v1699_v15 = vmul.f32 %v1667_v55, %v1667_v55  ;;  %v2455_v62 = vpop.eup %2454  ;;  %v1640_v17 = vmul.f32 1.442695, %v1580_v16  ;;  %v3495_v26 = vadd.f32 %v3265_v33, %v1519_v2  ;;  %v3501_v22 = vadd.f32 %v3265_v33, %v1543_v10 }
 0x1ab   : > { %v1317_v47 = vadd.f32 1.0, %v1253_v23  ;;  %v2457_v12 = vpop.eup %2456  ;;  %v1865_v48 = vsub.f32 %v3386_v56, %v1833_v63  ;;  %v1675_v58 = vadd.f32 1.0, %v2455_v62  ;;  %v1127_v60 = vmin.f32 %v3491_v18, 20.0 }
 0x1ac   : > { %v1763_v45 = vadd.f32 1.0, %v1699_v15  ;;  %v2459_v19 = vpop.eup %2458  ;;  %v1380_v36 = vmul.f32 %v2457_v12, %v1284_v21  ;;  %v1573_v34 = vmin.f32 %v3495_v26, 20.0  ;;  %v1731_v44 = vmul.f32 2.0, %v3440_v4 }
 0x1ad   : > { %2466 = vrcp.f32 %v1317_v47  ;;  %v2461_v50 = vpop.eup %2460  ;;  %1929 = vst.msk [vmem:[%s2991_s24 + $0xc8] sm:$0xff] %vm360_vm1, %v1865_v48  ;;  %v1826_v32 = vmul.f32 %v2459_v19, %v1730_v42  ;;  %v1707_v8 = vmul.f32 %v1675_v58, %v1675_v58  ;;  %v1175_v56 = vmul.f32 1.442695, %v1127_v60 }
 0x1ae   : > { %2468 = vrcp.f32 %v1763_v45  ;;  %v2463_v24 = vpop.eup %2462  ;;  %v1412_v31 = vsub.f32 %v3421_v6, %v1380_v36  ;;  %v1834_v41 = vmul.f32 %v2461_v50, %v1738_v20  ;;  %v1626_v39 = vmul.f32 1.442695, %v1573_v34  ;;  %v1525_v34 = vpop.f32.mrf.mxu2 }
 0x1af   : > { %2470 = vpow2.f32 %v1640_v17  ;;  %v2465_v21 = vpop.eup %2464  ;;  %v1858_v29 = vsub.f32 %v3415_v57, %v1826_v32  ;;  %v1222_v30 = vadd.f32 1.0, %v2463_v24  ;;  %v1771_v61 = vadd.f32 1.0, %v1707_v8 }
 0x1b0   : > { %2472 = vpow2.f32 %v1175_v56  ;;  %1885 = vst.msk [vmem:[%s3153_s11 + $0x68] sm:$0xff] %vm360_vm1, %v1412_v31  ;;  %v1866_v54 = vsub.f32 %v3432_v52, %v1834_v41  ;;  %v1668_v51 = vadd.f32 1.0, %v2465_v21  ;;  %v1066_v6 = vpop.f32.mrf.mxu1  ;;  %v1581_v38 = vmin.f32 %v3501_v22, 20.0 }
 0x1b1   : > { %2474 = vpow2.f32 %v1626_v39  ;;  %1922 = vst.msk [vmem:[%s2991_s24 + $0x90] sm:$0xff] %vm360_vm1, %v1858_v29  ;;  %v1254_v13 = vmul.f32 %v1222_v30, %v1222_v30  ;;  %v3514_v57 = vadd.f32 %v3395_v46, %v1066_v6  ;;  %v1739_v52 = vmul.f32 2.0, %v3459_v28  ;;  %v1549_v24 = vpop.f32.mrf.mxu3 }
 0x1b2   : > { %2476 = vrcp.f32 %v1771_v61  ;;  %1930 = vst.msk [vmem:[%s2991_s24 + $0xd0] sm:$0xff] %vm360_vm1, %v1866_v54  ;;  %v1700_v25 = vmul.f32 %v1668_v51, %v1668_v51  ;;  %v3521_v53 = vadd.f32 %v3265_v33, %v1522_v7  ;;  %v3525_v14 = vadd.f32 %v3265_v33, %v1546_v11 }
 0x1b3   : > { %v2467_v5 = vpop.eup %2466  ;;  %v1318_v3 = vadd.f32 1.0, %v1254_v13  ;;  %v1128_v37 = vmin.f32 %v3514_v57, 20.0  ;;  %v1642_v55 = vmul.f32 1.442695, %v1581_v38  ;;  %v1732_v17 = vmul.f32 2.0, %v3462_v35 }
 0x1b4   : > { %v2469_v49 = vpop.eup %2468  ;;  %v1381_v2 = vmul.f32 %v2467_v5, %v1285_v27  ;;  %v1764_v42 = vadd.f32 1.0, %v1700_v25  ;;  %v1574_v43 = vmin.f32 %v3521_v53, 20.0  ;;  %v1582_v60 = vmin.f32 %v3525_v14, 20.0 }
 0x1b5   : > { %v2471_v10 = vpop.eup %2470  ;;  %v1827_v0 = vmul.f32 %v2469_v49, %v1731_v44  ;;  %2478 = vrcp.f32 %v1318_v3  ;;  %v1177_v16 = vmul.f32 1.442695, %v1128_v37  ;;  %v1286_v50 = vmul.f32 2.0, %v3471_v9 }
 0x1b6   : > { %v2473_v23 = vpop.eup %2472  ;;  %v1413_v20 = vsub.f32 %v3446_v59, %v1381_v2  ;;  %v1676_v1 = vadd.f32 1.0, %v2471_v10  ;;  %2480 = vrcp.f32 %v1764_v42  ;;  %v1628_v27 = vmul.f32 1.442695, %v1574_v43 }
 0x1b7   : > { %v2475_v63 = vpop.eup %2474  ;;  %v1859_v15 = vsub.f32 %v3440_v4, %v1827_v0  ;;  %v1223_v62 = vadd.f32 1.0, %v2473_v23  ;;  %2482 = vpow2.f32 %v1177_v16  ;;  %v1644_v56 = vmul.f32 1.442695, %v1582_v60 }
 0x1b8   : > { %v2477_v47 = vpop.eup %2476  ;;  %1886 = vst.msk [vmem:[%s3153_s11 + $0x70] sm:$0xff] %vm360_vm1, %v1413_v20  ;;  %v1708_v12 = vmul.f32 %v1676_v1, %v1676_v1  ;;  %v1669_v48 = vadd.f32 1.0, %v2475_v63  ;;  %2484 = vpow2.f32 %v1642_v55  ;;  %v1069_v58 = vpop.f32.mrf.mxu1  ;;  %v1740_v30 = vmul.f32 2.0, %v3480_v40 }
 0x1b9   : > { %1923 = vst.msk [vmem:[%s2991_s24 + $0x98] sm:$0xff] %vm360_vm1, %v1859_v15  ;;  %v1835_v59 = vmul.f32 %v2477_v47, %v1739_v52  ;;  %v1255_v45 = vmul.f32 %v1223_v62, %v1223_v62  ;;  %v3537_v36 = vadd.f32 %v3395_v46, %v1069_v58  ;;  %2486 = vpow2.f32 %v1628_v27 }
 0x1ba   : > { %v1772_v4 = vadd.f32 1.0, %v1708_v12  ;;  %v1701_v19 = vmul.f32 %v1669_v48, %v1669_v48  ;;  %v3546_v61 = vadd.f32 %v3265_v33, %v1525_v34  ;;  %v3549_v44 = vadd.f32 %v3265_v33, %v1549_v24 }
 0x1bb   : > { %v1867_v32 = vsub.f32 %v3459_v28, %v1835_v59  ;;  %v1319_v8 = vadd.f32 1.0, %v1255_v45  ;;  %v2479_v31 = vpop.eup %2478  ;;  %v1129_v39 = vmin.f32 %v3537_v36, 20.0  ;;  %v1733_v49 = vmul.f32 2.0, %v3495_v26 }
 0x1bc   : > { %2488 = vrcp.f32 %v1772_v4  ;;  %v1765_v41 = vadd.f32 1.0, %v1701_v19  ;;  %v2481_v21 = vpop.eup %2480  ;;  %v1382_v29 = vmul.f32 %v2479_v31, %v1286_v50  ;;  %v1575_v13 = vmin.f32 %v3546_v61, 20.0 }
 0x1bd   : > { %1931 = vst.msk [vmem:[%s2991_s24 + $0xd8] sm:$0xff] %vm360_vm1, %v1867_v32  ;;  %2490 = vrcp.f32 %v1319_v8  ;;  %v2483_v28 = vpop.eup %2482  ;;  %v1828_v7 = vmul.f32 %v2481_v21, %v1732_v17  ;;  %v1179_v54 = vmul.f32 1.442695, %v1129_v39  ;;  %v1741_v19 = vmul.f32 2.0, %v3501_v22 }
 0x1be   : > { %2492 = vrcp.f32 %v1765_v41  ;;  %v2485_v51 = vpop.eup %2484  ;;  %v1414_v6 = vsub.f32 %v3471_v9, %v1382_v29  ;;  %v1224_v11 = vadd.f32 1.0, %v2483_v28  ;;  %v1630_v3 = vmul.f32 1.442695, %v1575_v13 }
 0x1bf   : > { %2494 = vpow2.f32 %v1644_v56  ;;  %v2487_v38 = vpop.eup %2486  ;;  %v1860_v5 = vsub.f32 %v3462_v35, %v1828_v7  ;;  %v1677_v52 = vadd.f32 1.0, %v2485_v51  ;;  %v1287_v9 = vmul.f32 2.0, %v3491_v18 }
 0x1c0   : > { %2496 = vpow2.f32 %v1179_v54  ;;  %1887 = vst.msk [vmem:[%s3153_s11 + $0x78] sm:$0xff] %vm360_vm1, %v1414_v6  ;;  %v1256_v25 = vmul.f32 %v1224_v11, %v1224_v11  ;;  %v1670_v33 = vadd.f32 1.0, %v2487_v38  ;;  %v1072_v2 = vpop.f32.mrf.mxu1  ;;  %v1583_v35 = vmin.f32 %v3549_v44, 20.0 }
 0x1c1   : > { %1924 = vst.msk [vmem:[%s2991_s24 + $0xa0] sm:$0xff] %vm360_vm1, %v1860_v5  ;;  %v1709_v10 = vmul.f32 %v1677_v52, %v1677_v52  ;;  %v3561_v0 = vadd.f32 %v3395_v46, %v1072_v2  ;;  %2498 = vpow2.f32 %v1630_v3  ;;  %v1288_v34 = vmul.f32 2.0, %v3514_v57 }
 0x1c2   : > { %v2489_v37 = vpop.eup %2488  ;;  %v1320_v43 = vadd.f32 1.0, %v1256_v25  ;;  %v1702_v23 = vmul.f32 %v1670_v33, %v1670_v33  ;;  %v1646_v60 = vmul.f32 1.442695, %v1583_v35  ;;  %v1734_v50 = vmul.f32 2.0, %v3521_v53 }
 0x1c3   : > { %v2491_v42 = vpop.eup %2490  ;;  %v1836_v55 = vmul.f32 %v2489_v37, %v1740_v30  ;;  %v1773_v16 = vadd.f32 1.0, %v1709_v10  ;;  %v1130_v63 = vmin.f32 %v3561_v0, 20.0  ;;  %v1742_v38 = vmul.f32 2.0, %v3525_v14 }
 0x1c4   : > { %v2493_v20 = vpop.eup %2492  ;;  %v1383_v1 = vmul.f32 %v2491_v42, %v1287_v9  ;;  %2500 = vrcp.f32 %v1320_v43  ;;  %v1766_v47 = vadd.f32 1.0, %v1702_v23  ;;  %v1289_v2 = vmul.f32 2.0, %v3537_v36 }
 0x1c5   : > { %v2495_v15 = vpop.eup %2494  ;;  %v1868_v62 = vsub.f32 %v3480_v40, %v1836_v55  ;;  %v1829_v27 = vmul.f32 %v2493_v20, %v1733_v49  ;;  %2502 = vrcp.f32 %v1773_v16  ;;  %v1181_v59 = vmul.f32 1.442695, %v1130_v63 }
 0x1c6   : > { %v2497_v17 = vpop.eup %2496  ;;  %v1415_v12 = vsub.f32 %v3491_v18, %v1383_v1  ;;  %v1678_v48 = vadd.f32 1.0, %v2495_v15  ;;  %2504 = vrcp.f32 %v1766_v47  ;;  %v1735_v10 = vmul.f32 2.0, %v3546_v61 }
 0x1c7   : > { %1932 = vst.msk [vmem:[%s2991_s24 + $0xe0] sm:$0xff] %vm360_vm1, %v1868_v62  ;;  %v1861_v45 = vsub.f32 %v3495_v26, %v1829_v27  ;;  %v1225_v58 = vadd.f32 1.0, %v2497_v17  ;;  %2506 = vpow2.f32 %v1181_v59  ;;  %v2499_v4 = vpop.eup %2498  ;;  %v1290_v27 = vmul.f32 2.0, %v3561_v0 }
 0x1c8   : > { %1888 = vst.msk [vmem:[%s3153_s11 + $0x80] sm:$0xff] %vm360_vm1, %v1415_v12  ;;  %v1710_v40 = vmul.f32 %v1678_v48, %v1678_v48  ;;  %2508 = vpow2.f32 %v1646_v60  ;;  %v1671_v26 = vadd.f32 1.0, %v2499_v4  ;;  %v1075_v8 = vpop.f32.mrf.mxu1 }
 0x1c9   : > { %1925 = vst.msk [vmem:[%s2991_s24 + $0xa8] sm:$0xff] %vm360_vm1, %v1861_v45  ;;  %v1257_v18 = vmul.f32 %v1225_v58, %v1225_v58  ;;  %v3578_v31 = vadd.f32 %v3395_v46, %v1075_v8 }
 0x1ca   : > { %v1774_v32 = vadd.f32 1.0, %v1710_v40  ;;  %v2501_v56 = vpop.eup %2500  ;;  %v1703_v21 = vmul.f32 %v1671_v26, %v1671_v26 }
 0x1cb   : > { %v1321_v24 = vadd.f32 1.0, %v1257_v18  ;;  %v2503_v41 = vpop.eup %2502  ;;  %v1384_v39 = vmul.f32 %v2501_v56, %v1288_v34  ;;  %v1131_v28 = vmin.f32 %v3578_v31, 20.0  ;;  %v1291_v34 = vmul.f32 2.0, %v3578_v31 }
 0x1cc   : > { %2510 = vrcp.f32 %v1774_v32  ;;  %v2505_v29 = vpop.eup %2504  ;;  %v1837_v30 = vmul.f32 %v2503_v41, %v1741_v19  ;;  %v1767_v6 = vadd.f32 1.0, %v1703_v21 }
 0x1cd   : > { %2512 = vrcp.f32 %v1321_v24  ;;  %v2507_v7 = vpop.eup %2506  ;;  %v1416_v54 = vsub.f32 %v3514_v57, %v1384_v39  ;;  %v1830_v51 = vmul.f32 %v2505_v29, %v1734_v50  ;;  %v1183_v52 = vmul.f32 1.442695, %v1131_v28 }
 0x1ce   : > { %v2509_v11 = vpop.eup %2508  ;;  %v1869_v13 = vsub.f32 %v3501_v22, %v1837_v30  ;;  %v1226_v5 = vadd.f32 1.0, %v2507_v7  ;;  %2514 = vrcp.f32 %v1767_v6 }
 0x1cf   : > { %1889 = vst.msk [vmem:[%s3153_s11 + $0x88] sm:$0xff] %vm360_vm1, %v1416_v54  ;;  %v1862_v25 = vsub.f32 %v3521_v53, %v1830_v51  ;;  %v1679_v49 = vadd.f32 1.0, %v2509_v11  ;;  %2516 = vpow2.f32 %v1183_v52 }
 0x1d0   : > { %1933 = vst.msk [vmem:[%s2991_s24 + $0xe8] sm:$0xff] %vm360_vm1, %v1869_v13  ;;  %v1258_v33 = vmul.f32 %v1226_v5, %v1226_v5 }
 0x1d1   : > { %1926 = vst.msk [vmem:[%s2991_s24 + $0xb0] sm:$0xff] %vm360_vm1, %v1862_v25  ;;  %v1711_v22 = vmul.f32 %v1679_v49, %v1679_v49 }
 0x1d2   : > { %v2511_v57 = vpop.eup %2510  ;;  %v1322_v9 = vadd.f32 1.0, %v1258_v33  ;;  %v1078_v55 = vpop.f32.mrf.mxu1 }
 0x1d3   : > { %v2513_v3 = vpop.eup %2512  ;;  %v1838_v37 = vmul.f32 %v2511_v57, %v1742_v38  ;;  %v1775_v35 = vadd.f32 1.0, %v1711_v22  ;;  %v1079_v20 = vadd.f32 %v3395_v46, %v1078_v55 }
 0x1d4   : > { %v1385_v53 = vmul.f32 %v2513_v3, %v1289_v2  ;;  %2518 = vrcp.f32 %v1322_v9  ;;  %v2515_v43 = vpop.eup %2514 }
 0x1d5   : > { %v1870_v42 = vsub.f32 %v3525_v14, %v1838_v37  ;;  %2520 = vrcp.f32 %v1775_v35  ;;  %v2517_v1 = vpop.eup %2516  ;;  %v1831_v16 = vmul.f32 %v2515_v43, %v1735_v10  ;;  %v1132_v15 = vmin.f32 %v1079_v20, 20.0 }
 0x1d6   : > { %v1417_v23 = vsub.f32 %v3537_v36, %v1385_v53  ;;  %v1227_v63 = vadd.f32 1.0, %v2517_v1  ;;  %v1743_v14 = vmul.f32 2.0, %v3549_v44  ;;  %v1292_v28 = vmul.f32 2.0, %v1079_v20 }
 0x1d7   : > { %1934 = vst.msk [vmem:[%s2991_s24 + $0xf0] sm:$0xff] %vm360_vm1, %v1870_v42  ;;  %v1863_v62 = vsub.f32 %v3546_v61, %v1831_v16  ;;  %v1185_v36 = vmul.f32 1.442695, %v1132_v15 }
 0x1d8   : > { %1890 = vst.msk [vmem:[%s3153_s11 + $0x90] sm:$0xff] %vm360_vm1, %v1417_v23  ;;  %v1259_v47 = vmul.f32 %v1227_v63, %v1227_v63 }
 0x1d9   : > { %1927 = vst.msk [vmem:[%s2991_s24 + $0xb8] sm:$0xff] %vm360_vm1, %v1863_v62  ;;  %2522 = vpow2.f32 %v1185_v36 }
 0x1da   : > { %v2519_v17 = vpop.eup %2518  ;;  %v1323_v59 = vadd.f32 1.0, %v1259_v47  ;;  %v1081_v58 = vpop.f32.mrf.mxu1 }
 0x1db   : > { %v2521_v12 = vpop.eup %2520  ;;  %v1386_v48 = vmul.f32 %v2519_v17, %v1290_v27  ;;  %v1082_v61 = vadd.f32 %v3395_v46, %v1081_v58 }
 0x1dc   : > { %v1839_v45 = vmul.f32 %v2521_v12, %v1743_v14  ;;  %2524 = vrcp.f32 %v1323_v59 }
 0x1dd   : > { %v1418_v60 = vsub.f32 %v3561_v0, %v1386_v48  ;;  %v1133_v4 = vmin.f32 %v1082_v61, 20.0  ;;  %v1293_v13 = vmul.f32 2.0, %v1082_v61 }
 0x1de   : > { %v1871_v40 = vsub.f32 %v3549_v44, %v1839_v45 }
 0x1df   : > { %1891 = vst.msk [vmem:[%s3153_s11 + $0x98] sm:$0xff] %vm360_vm1, %v1418_v60  ;;  %v2523_v19 = vpop.eup %2522  ;;  %v1187_v18 = vmul.f32 1.442695, %v1133_v4 }
 0x1e0   : > { %1935 = vst.msk [vmem:[%s2991_s24 + $0xf8] sm:$0xff] %vm360_vm1, %v1871_v40  ;;  %v1228_v50 = vadd.f32 1.0, %v2523_v19 }
 0x1e1   : > { %2526 = vpow2.f32 %v1187_v18 }
 0x1e2   : > { %v2525_v32 = vpop.eup %2524  ;;  %v1260_v0 = vmul.f32 %v1228_v50, %v1228_v50  ;;  %v1084_v8 = vpop.f32.mrf.mxu1 }
 0x1e3   : > { %v1387_v26 = vmul.f32 %v2525_v32, %v1291_v34  ;;  %v1085_v56 = vadd.f32 %v3395_v46, %v1084_v8 }
 0x1e4   : > { %v1324_v24 = vadd.f32 1.0, %v1260_v0 }
 0x1e5   : > { %v1419_v44 = vsub.f32 %v3578_v31, %v1387_v26  ;;  %v1134_v41 = vmin.f32 %v1085_v56, 20.0  ;;  %v1294_v49 = vmul.f32 2.0, %v1085_v56 }
 0x1e6   : > { %2528 = vrcp.f32 %v1324_v24 }
 0x1e7   : > { %1892 = vst.msk [vmem:[%s3153_s11 + $0xa0] sm:$0xff] %vm360_vm1, %v1419_v44  ;;  %v2527_v39 = vpop.eup %2526  ;;  %v1189_v21 = vmul.f32 1.442695, %v1134_v41 }
 0x1e8   : > { %v1229_v29 = vadd.f32 1.0, %v2527_v39 }
 0x1e9   : > { %2530 = vpow2.f32 %v1189_v21 }
 0x1ea   : > { %v1261_v30 = vmul.f32 %v1229_v29, %v1229_v29 }
 0x1ec   : > { %v2529_v7 = vpop.eup %2528  ;;  %v1325_v54 = vadd.f32 1.0, %v1261_v30 }
 0x1ed   : > { %v1388_v51 = vmul.f32 %v2529_v7, %v1292_v28 }
 0x1ee   : > { %2532 = vrcp.f32 %v1325_v54 }
 0x1ef   : > { %v2531_v46 = vpop.eup %2530  ;;  %v1420_v31 = vsub.f32 %v1079_v20, %v1388_v51 }
 0x1f0   : > { %v1230_v6 = vadd.f32 1.0, %v2531_v46 }
 0x1f1   : > { %1893 = vst.msk [vmem:[%s3153_s11 + $0xa8] sm:$0xff] %vm360_vm1, %v1420_v31 }
 0x1f2   : > { %v1262_v11 = vmul.f32 %v1230_v6, %v1230_v6 }
 0x1f4   : > { %v2533_v38 = vpop.eup %2532  ;;  %v1326_v5 = vadd.f32 1.0, %v1262_v11 }
 0x1f5   : > { %v1389_v52 = vmul.f32 %v2533_v38, %v1293_v13 }
 0x1f6   : > { %2534 = vrcp.f32 %v1326_v5 }
 0x1f7   : > { %v1421_v25 = vsub.f32 %v1082_v61, %v1389_v52 }
 0x1f9   : > { %1894 = vst.msk [vmem:[%s3153_s11 + $0xb0] sm:$0xff] %vm360_vm1, %v1421_v25 }
 0x1fc   : > { %v2535_v33 = vpop.eup %2534 }
 0x1fd   : > { %v1390_v57 = vmul.f32 %v2535_v33, %v1294_v49 }
 0x1ff   : > { %v1422_v2 = vsub.f32 %v1085_v56, %v1390_v57 }
 0x201   : > { %1895 = vst.msk [vmem:[%s3153_s11 + $0xb8] sm:$0xff] %vm360_vm1, %v1422_v2 }
 0x202 PF: > { %s19_s27 = sadd.s32 1, %s2547_s27  }
 0x203   : > { %p16_p4 = scmp.ge.s32.totalorder %s19_s27, 4  }
 0x205   :  { %18 = sbr.rel (!%p16_p4) target bundleno = 1 (0x1), region = 90 }

// kernel: ppyolo_det_block_csp.3
= control target key start
LH: loop header
LB: loop body
LE: loop exit
PB: predicated region body
PF: predicated region fallthrough
CT: control target
= control target key end

     0   :  { %s5211_s24 = smov 0   ;;  %s7206_s0 = inlined_call_operand.vmem [shape: f32[2,326,4], index: 0, kind: input, shape index: {}]   ;;  %s7207_s1 = inlined_call_operand.vmem [shape: f32[2,288,4], index: 1, kind: input, shape index: {}]   ;;  %s7208_s2 = inlined_call_operand.vmem [shape: f32[9,4,4], index: 2, kind: input, shape index: {}]   ;;  %s7209_s3 = inlined_call_operand.vmem [shape: f32[1,4], index: 3, kind: input, shape index: {}]   ;;  %s7210_s4 = inlined_call_operand.vmem [shape: f32[4,8], index: 4, kind: input, shape index: {}]   ;;  %s7211_s5 = inlined_call_operand.vmem [shape: f32[4,8], index: 5, kind: input, shape index: {}]   ;;  %s7212_s6 = inlined_call_operand.vmem [shape: f32[1,8], index: 6, kind: input, shape index: {}]   ;;  %s7213_s7 = inlined_call_operand.vmem [shape: f32[2,288,8], index: 7, kind: output, shape index: {}]  }
   0x1 LB: > { %s4432_s25 = sadd.s32 4294967295, %s5169_s24   ;;  %p4436_p0 = scmp.ge.s32.totalorder %s5169_s24, 1  ;;  %s5169_s24 = sphi %s5211_s24, %s17_s24  }
   0x2   : > { %p247_p1 = scmp.lt.s32.totalorder %s5169_s24, 3 }
   0x4   : > { %p248_p2 = pnand %p4436_p0, %p247_p1 }
   0x6   : > { %251 = sbr.rel (%p248_p2) target bundleno = 1134 (0x46e), region = 48 }
   0xb   : > { %v4440_v0 = vld [vmem:[%s7208_s2 + $0x4] sm:$0xf]  ;;  %vm483_vm0 = vcmask 1043456   ;;  %p284_p3 = scmp.lt.s32.totalorder %s4432_s25, 1  ;;  %v335_v1 = vld [vmem:[%s7208_s2] sm:$0xf] }
   0xc   : > { %4857 = vmatpush.msk.msra.mxu3 %vm483_vm0, %v4440_v0  ;;  %v4515_v2 = vld [vmem:[%s7208_s2 + $0x8] sm:$0xf]  ;;  %4441 = vmatpush.msk.msra.mxu0 %vm483_vm0, %v4440_v0  ;;  %v4591_v3 = vld [vmem:[%s7208_s2 + $0x10] sm:$0xf]  ;;  %vm374_vm1 = vcmask 31744   ;;  %vm4328_vm2 = vcmask 64512  }
   0xd   : > { %s7354_s25 = smov (!%p284_p3, %s4432_s25), 1  ;;  %4516 = vmatpush.msk.msra.mxu2 %vm483_vm0, %v4515_v2  ;;  %4478 = vmatpush.msk.msra.mxu1 %vm483_vm0, %v335_v1  ;;  %v4553_v0 = vld [vmem:[%s7208_s2 + $0xc] sm:$0xf] }
   0xe   : > { %4858 = vmatpush.msk.msrb.mxu3 %vm483_vm0, %v335_v1  ;;  %4592 = vmatpush.msk.msrb.mxu0 %vm483_vm0, %v4591_v3  ;;  %s4860_s11 = smul.u32 328, %s7354_s25 }
   0xf   : > { %s4861_s10 = smul.u32 288, %s7354_s25 }
  0x10   : > { %s5243_s14 = scalar_lea.vmem %s7206_s0, %s4860_s11 }
  0x11   : > { %v363_v4 = vld [vmem:[%s5243_s14 + $0xd9] sm:$0xff]  ;;  %v848_v5 = vld [vmem:[%s5243_s14 + $0x2] sm:$0xff]  ;;  %v849_v9 = vld [vmem:[%s5243_s14 + $0xa] sm:$0xff]  ;;  %s6339_s13 = scalar_lea.vmem %s7207_s1, %s4861_s10  ;;  %s6780_s20 = scalar_lea.vmem %s7213_s7, %s4861_s10 }
  0x12   : > { %v336_v6 = vld [vmem:[%s5243_s14 + $0x1] sm:$0xff]  ;;  %4469 = vmatmul.msk.f32.vlgmr.msra.gmra.mxu3 %vm374_vm1, %v363_v4  ;;  %4517 = vmatmul.msk.f32.vlgmr.msra.gmra.mxu2 %vm374_vm1, %v848_v5  ;;  %v337_v10 = vld [vmem:[%s5243_s14 + $0x9] sm:$0xff]  ;;  %v5264_v13 = vld [vmem:[%s5243_s14 + $0x12] sm:$0xff] }
  0x13   : > { %v299_v7 = vld [vmem:[%s5243_s14] sm:$0xff]  ;;  %4442 = vmatmul.msk.f32.vlgmr.msra.gmra.mxu0 %vm374_vm1, %v336_v6  ;;  %4859 = vmatpush.msk.msra.mxu3 %vm483_vm0, %v4515_v2  ;;  %v300_v11 = vld [vmem:[%s5243_s14 + $0x8] sm:$0xff]  ;;  %v338_v14 = vld [vmem:[%s5243_s14 + $0x11] sm:$0xff] }
  0x14   : > { %4479 = vmatmul.msk.f32.vlgmr.msra.gmra.mxu1 %vm374_vm1, %v299_v7  ;;  %v364_v8 = vld [vmem:[%s5243_s14 + $0xe1] sm:$0xff]  ;;  %v365_v12 = vld [vmem:[%s5243_s14 + $0xe9] sm:$0xff]  ;;  %v366_v16 = vld [vmem:[%s5243_s14 + $0xf1] sm:$0xff] }
  0x15   : > { %v301_v15 = vld [vmem:[%s5243_s14 + $0x10] sm:$0xff]  ;;  %v5275_v17 = vld [vmem:[%s5243_s14 + $0x1a] sm:$0xff]  ;;  %v5286_v21 = vld [vmem:[%s5243_s14 + $0x22] sm:$0xff] }
  0x16   : > { %v339_v18 = vld [vmem:[%s5243_s14 + $0x19] sm:$0xff]  ;;  %v340_v22 = vld [vmem:[%s5243_s14 + $0x21] sm:$0xff]  ;;  %v5297_v25 = vld [vmem:[%s5243_s14 + $0x2a] sm:$0xff] }
  0x17   : > { %v302_v19 = vld [vmem:[%s5243_s14 + $0x18] sm:$0xff]  ;;  %v303_v23 = vld [vmem:[%s5243_s14 + $0x20] sm:$0xff]  ;;  %v341_v26 = vld [vmem:[%s5243_s14 + $0x29] sm:$0xff] }
  0x18   : > { %v367_v20 = vld [vmem:[%s5243_s14 + $0xf9] sm:$0xff]  ;;  %v368_v24 = vld [vmem:[%s5243_s14 + $0x101] sm:$0xff]  ;;  %v369_v28 = vld [vmem:[%s5243_s14 + $0x109] sm:$0xff] }
  0x19   : > { %v304_v27 = vld [vmem:[%s5243_s14 + $0x28] sm:$0xff]  ;;  %v5308_v29 = vld [vmem:[%s5243_s14 + $0x32] sm:$0xff]  ;;  %v5319_v33 = vld [vmem:[%s5243_s14 + $0x3a] sm:$0xff] }
  0x1a   : > { %4470 = vmatmul.msk.f32.gmra.mxu3 %vm374_vm1, %v364_v8  ;;  %4518 = vmatmul.msk.f32.gmra.mxu2 %vm374_vm1, %v849_v9  ;;  %v342_v30 = vld [vmem:[%s5243_s14 + $0x31] sm:$0xff]  ;;  %v343_v34 = vld [vmem:[%s5243_s14 + $0x39] sm:$0xff]  ;;  %v5330_v37 = vld [vmem:[%s5243_s14 + $0x42] sm:$0xff] }
  0x1b   : > { %4443 = vmatmul.msk.f32.gmra.mxu0 %vm374_vm1, %v337_v10  ;;  %v305_v31 = vld [vmem:[%s5243_s14 + $0x30] sm:$0xff]  ;;  %v306_v35 = vld [vmem:[%s5243_s14 + $0x38] sm:$0xff]  ;;  %v344_v38 = vld [vmem:[%s5243_s14 + $0x41] sm:$0xff] }
  0x1c   : > { %4480 = vmatmul.msk.f32.gmra.mxu1 %vm374_vm1, %v300_v11  ;;  %v370_v32 = vld [vmem:[%s5243_s14 + $0x111] sm:$0xff]  ;;  %v371_v36 = vld [vmem:[%s5243_s14 + $0x119] sm:$0xff]  ;;  %v345_v42 = vld [vmem:[%s5243_s14 + $0x49] sm:$0xff] }
  0x1d   : > { %v307_v39 = vld [vmem:[%s5243_s14 + $0x40] sm:$0xff]  ;;  %v326_v40 = vld [vmem:[%s5243_s14 + $0xd8] sm:$0xff]  ;;  %v5341_v41 = vld [vmem:[%s5243_s14 + $0x4a] sm:$0xff] }
  0x1e   : > { %v308_v43 = vld [vmem:[%s5243_s14 + $0x48] sm:$0xff]  ;;  %v327_v44 = vld [vmem:[%s5243_s14 + $0xe0] sm:$0xff]  ;;  %v5352_v45 = vld [vmem:[%s5243_s14 + $0x52] sm:$0xff] }
  0x1f   : > { %v346_v46 = vld [vmem:[%s5243_s14 + $0x51] sm:$0xff]  ;;  %v328_v48 = vld [vmem:[%s5243_s14 + $0xe8] sm:$0xff]  ;;  %v5363_v49 = vld [vmem:[%s5243_s14 + $0x5a] sm:$0xff] }
  0x20   : > { %v309_v47 = vld [vmem:[%s5243_s14 + $0x50] sm:$0xff]  ;;  %v347_v50 = vld [vmem:[%s5243_s14 + $0x59] sm:$0xff]  ;;  %v5374_v53 = vld [vmem:[%s5243_s14 + $0x62] sm:$0xff] }
  0x21   : > { %v310_v51 = vld [vmem:[%s5243_s14 + $0x58] sm:$0xff]  ;;  %v329_v52 = vld [vmem:[%s5243_s14 + $0xf0] sm:$0xff]  ;;  %v348_v54 = vld [vmem:[%s5243_s14 + $0x61] sm:$0xff] }
  0x22   : > { %4471 = vmatmul.msk.f32.gmra.mxu3 %vm374_vm1, %v365_v12  ;;  %4519 = vmatmul.msk.f32.gmra.mxu2 %vm374_vm1, %v5264_v13  ;;  %v311_v55 = vld [vmem:[%s5243_s14 + $0x60] sm:$0xff]  ;;  %v330_v56 = vld [vmem:[%s5243_s14 + $0xf8] sm:$0xff]  ;;  %v5385_v57 = vld [vmem:[%s5243_s14 + $0x6a] sm:$0xff] }
  0x23   : > { %4444 = vmatmul.msk.f32.gmra.mxu0 %vm374_vm1, %v338_v14  ;;  %v349_v58 = vld [vmem:[%s5243_s14 + $0x69] sm:$0xff]  ;;  %v331_v60 = vld [vmem:[%s5243_s14 + $0x100] sm:$0xff]  ;;  %v5396_v61 = vld [vmem:[%s5243_s14 + $0x72] sm:$0xff] }
  0x24   : > { %4481 = vmatmul.msk.f32.gmra.mxu1 %vm374_vm1, %v301_v15  ;;  %v312_v59 = vld [vmem:[%s5243_s14 + $0x68] sm:$0xff]  ;;  %v350_v62 = vld [vmem:[%s5243_s14 + $0x71] sm:$0xff]  ;;  %v5411_v2 = vld [vmem:[%s5243_s14 + $0x7a] sm:$0xff] }
  0x25   : > { %v313_v63 = vld [vmem:[%s5243_s14 + $0x70] sm:$0xff]  ;;  %v332_v1 = vld [vmem:[%s5243_s14 + $0x108] sm:$0xff]  ;;  %v351_v3 = vld [vmem:[%s5243_s14 + $0x79] sm:$0xff] }
  0x26   : > { %v314_v4 = vld [vmem:[%s5243_s14 + $0x78] sm:$0xff]  ;;  %v333_v5 = vld [vmem:[%s5243_s14 + $0x110] sm:$0xff]  ;;  %v5422_v6 = vld [vmem:[%s5243_s14 + $0x82] sm:$0xff] }
  0x27   : > { %v352_v9 = vld [vmem:[%s5243_s14 + $0x81] sm:$0xff]  ;;  %v4667_v14 = vld [vmem:[%s7208_s2 + $0x18] sm:$0xf] }
  0x28   : > { %v315_v10 = vld [vmem:[%s5243_s14 + $0x80] sm:$0xff]  ;;  %4668 = vmatpush.msk.msrb.mxu2 %vm483_vm0, %v4667_v14  ;;  %v334_v15 = vld [vmem:[%s5243_s14 + $0x118] sm:$0xff] }
  0x2a   : > { %4472 = vmatmul.msk.f32.gmra.mxu3 %vm374_vm1, %v366_v16  ;;  %4520 = vmatmul.msk.f32.gmra.mxu2 %vm374_vm1, %v5275_v17  ;;  %v5445_v16 = vld [vmem:[%s5243_s14 + $0x8a] sm:$0xff] }
  0x2b   : > { %4445 = vmatmul.msk.f32.gmra.mxu0 %vm374_vm1, %v339_v18 }
  0x2c   : > { %4482 = vmatmul.msk.f32.gmra.mxu1 %vm374_vm1, %v302_v19 }
  0x32   : > { %4473 = vmatmul.msk.f32.gmra.mxu3 %vm374_vm1, %v367_v20  ;;  %4521 = vmatmul.msk.f32.gmra.mxu2 %vm374_vm1, %v5286_v21  ;;  %v353_v20 = vld [vmem:[%s5243_s14 + $0x89] sm:$0xff] }
  0x33   : > { %4446 = vmatmul.msk.f32.gmra.mxu0 %vm374_vm1, %v340_v22  ;;  %v316_v22 = vld [vmem:[%s5243_s14 + $0x88] sm:$0xff] }
  0x34   : > { %4483 = vmatmul.msk.f32.gmra.mxu1 %vm374_vm1, %v303_v23 }
  0x3a   : > { %4474 = vmatmul.msk.f32.gmra.mxu3 %vm374_vm1, %v368_v24  ;;  %4522 = vmatmul.msk.f32.gmra.mxu2 %vm374_vm1, %v5297_v25 }
  0x3b   : > { %4447 = vmatmul.msk.f32.gmra.mxu0 %vm374_vm1, %v341_v26  ;;  %v4629_v26 = vld [vmem:[%s7208_s2 + $0x14] sm:$0xf] }
  0x3c   : > { %4484 = vmatmul.msk.f32.gmra.mxu1 %vm374_vm1, %v304_v27  ;;  %v875_v27 = vld [vmem:[%s5243_s14 + $0xda] sm:$0xff] }
  0x3d   : > { %4630 = vmatpush.msk.msrb.mxu1 %vm483_vm0, %v4629_v26 }
  0x42   : > { %4475 = vmatmul.msk.f32.gmra.mxu3 %vm374_vm1, %v369_v28  ;;  %4523 = vmatmul.msk.f32.gmra.mxu2 %vm374_vm1, %v5308_v29  ;;  %v5468_v28 = vld [vmem:[%s5243_s14 + $0x92] sm:$0xff] }
  0x43   : > { %4448 = vmatmul.msk.f32.gmra.mxu0 %vm374_vm1, %v342_v30 }
  0x44   : > { %4485 = vmatmul.msk.f32.gmra.mxu1 %vm374_vm1, %v305_v31 }
  0x4a   : > { %4476 = vmatmul.msk.f32.gmra.mxu3 %vm374_vm1, %v370_v32  ;;  %4524 = vmatmul.msk.f32.gmra.mxu2 %vm374_vm1, %v5319_v33  ;;  %v354_v32 = vld [vmem:[%s5243_s14 + $0x91] sm:$0xff] }
  0x4b   : > { %4449 = vmatmul.msk.f32.gmra.mxu0 %vm374_vm1, %v343_v34  ;;  %v317_v34 = vld [vmem:[%s5243_s14 + $0x90] sm:$0xff] }
  0x4c   : > { %4486 = vmatmul.msk.f32.gmra.mxu1 %vm374_vm1, %v306_v35 }
  0x52   : > { %4477 = vmatmul.msk.f32.gmra.mxu3 %vm374_vm1, %v371_v36  ;;  %4525 = vmatmul.msk.f32.gmra.mxu2 %vm374_vm1, %v5330_v37 }
  0x53   : > { %4450 = vmatmul.msk.f32.gmra.mxu0 %vm374_vm1, %v344_v38  ;;  %v876_v38 = vld [vmem:[%s5243_s14 + $0xe2] sm:$0xff] }
  0x54   : > { %4487 = vmatmul.msk.f32.gmra.mxu1 %vm374_vm1, %v307_v39  ;;  %v5487_v39 = vld [vmem:[%s5243_s14 + $0x9a] sm:$0xff] }
  0x5a   : > { %4506 = vmatmul.msk.f32.vlgmr.msrb.gmra.mxu3 %vm374_vm1, %v326_v40  ;;  %4526 = vmatmul.msk.f32.gmra.mxu2 %vm374_vm1, %v5341_v41 }
  0x5b   : > { %4451 = vmatmul.msk.f32.gmra.mxu0 %vm374_vm1, %v345_v42  ;;  %4554 = vmatpush.msk.msrb.mxu3 %vm483_vm0, %v4553_v0  ;;  %v357_v0 = vld [vmem:[%s5243_s14 + $0xa9] sm:$0xff] }
  0x5c   : > { %4488 = vmatmul.msk.f32.gmra.mxu1 %vm374_vm1, %v308_v43  ;;  %v355_v43 = vld [vmem:[%s5243_s14 + $0x99] sm:$0xff] }
  0x62   : > { %4507 = vmatmul.msk.f32.gmra.mxu3 %vm374_vm1, %v327_v44  ;;  %4527 = vmatmul.msk.f32.gmra.mxu2 %vm374_vm1, %v5352_v45  ;;  %v318_v44 = vld [vmem:[%s5243_s14 + $0x98] sm:$0xff] }
  0x63   : > { %4452 = vmatmul.msk.f32.gmra.mxu0 %vm374_vm1, %v346_v46 }
  0x64   : > { %4489 = vmatmul.msk.f32.gmra.mxu1 %vm374_vm1, %v309_v47 }
  0x6a   : > { %4508 = vmatmul.msk.f32.gmra.mxu3 %vm374_vm1, %v328_v48  ;;  %4528 = vmatmul.msk.f32.gmra.mxu2 %vm374_vm1, %v5363_v49  ;;  %v877_v48 = vld [vmem:[%s5243_s14 + $0xea] sm:$0xff] }
  0x6b   : > { %4453 = vmatmul.msk.f32.gmra.mxu0 %vm374_vm1, %v347_v50  ;;  %v5506_v50 = vld [vmem:[%s5243_s14 + $0xa2] sm:$0xff] }
  0x6c   : > { %4490 = vmatmul.msk.f32.gmra.mxu1 %vm374_vm1, %v310_v51 }
  0x72   : > { %4509 = vmatmul.msk.f32.gmra.mxu3 %vm374_vm1, %v329_v52  ;;  %4529 = vmatmul.msk.f32.gmra.mxu2 %vm374_vm1, %v5374_v53 }
  0x73   : > { %4454 = vmatmul.msk.f32.gmra.mxu0 %vm374_vm1, %v348_v54  ;;  %v356_v54 = vld [vmem:[%s5243_s14 + $0xa1] sm:$0xff] }
  0x74   : > { %4491 = vmatmul.msk.f32.gmra.mxu1 %vm374_vm1, %v311_v55  ;;  %v319_v55 = vld [vmem:[%s5243_s14 + $0xa0] sm:$0xff] }
  0x7a   : > { %4510 = vmatmul.msk.f32.gmra.mxu3 %vm374_vm1, %v330_v56  ;;  %4530 = vmatmul.msk.f32.gmra.mxu2 %vm374_vm1, %v5385_v57 }
  0x7b   : > { %4455 = vmatmul.msk.f32.gmra.mxu0 %vm374_vm1, %v349_v58 }
  0x7c   : > { %4492 = vmatmul.msk.f32.gmra.mxu1 %vm374_vm1, %v312_v59  ;;  %v878_v59 = vld [vmem:[%s5243_s14 + $0xf2] sm:$0xff] }
  0x82   : > { %4511 = vmatmul.msk.f32.gmra.mxu3 %vm374_vm1, %v331_v60  ;;  %4531 = vmatmul.msk.f32.gmra.mxu2 %vm374_vm1, %v5396_v61  ;;  %v5525_v60 = vld [vmem:[%s5243_s14 + $0xaa] sm:$0xff] }
  0x83   : > { %4456 = vmatmul.msk.f32.gmra.mxu0 %vm374_vm1, %v350_v62 }
  0x84   : > { %4493 = vmatmul.msk.f32.gmra.mxu1 %vm374_vm1, %v313_v63 }
  0x8a   : > { %4512 = vmatmul.msk.f32.gmra.mxu3 %vm374_vm1, %v332_v1  ;;  %4532 = vmatmul.msk.f32.gmra.mxu2 %vm374_vm1, %v5411_v2  ;;  %v320_v1 = vld [vmem:[%s5243_s14 + $0xa8] sm:$0xff] }
  0x8b   : > { %4457 = vmatmul.msk.f32.gmra.mxu0 %vm374_vm1, %v351_v3 }
  0x8c   : > { %4494 = vmatmul.msk.f32.gmra.mxu1 %vm374_vm1, %v314_v4 }
  0x90   : > { %v5424_v7 = vpop.f32.mrf.mxu0 }
  0x91   : > { %v5426_v8 = vpop.f32.mrf.mxu1 }
  0x92   : > { %4513 = vmatmul.msk.f32.gmra.mxu3 %vm374_vm1, %v333_v5  ;;  %4533 = vmatmul.msk.f32.gmra.mxu2 %vm374_vm1, %v5422_v6  ;;  %v879_v5 = vld [vmem:[%s5243_s14 + $0xfa] sm:$0xff] }
  0x93   : > { %4458 = vmatmul.msk.f32.gmra.mxu0 %vm374_vm1, %v352_v9  ;;  %v5544_v9 = vld [vmem:[%s5243_s14 + $0xb2] sm:$0xff] }
  0x94   : > { %4495 = vmatmul.msk.f32.gmra.mxu1 %vm374_vm1, %v315_v10 }
  0x95   : > { %v5435_v11 = vpop.f32.mrf.mxu3  ;;  %v5437_v12 = vpop.f32.mrf.mxu2 }
  0x98   : > { %v5447_v18 = vpop.f32.mrf.mxu0 }
  0x99   : > { %v5449_v19 = vpop.f32.mrf.mxu1 }
  0x9a   : > { %4514 = vmatmul.msk.f32.gmra.mxu3 %vm374_vm1, %v334_v15  ;;  %4534 = vmatmul.msk.f32.gmra.mxu2 %vm374_vm1, %v5445_v16  ;;  %v358_v15 = vld [vmem:[%s5243_s14 + $0xb1] sm:$0xff] }
  0x9b   : > { %4459 = vmatmul.msk.f32.gmra.mxu0 %vm374_vm1, %v353_v20  ;;  %v321_v20 = vld [vmem:[%s5243_s14 + $0xb0] sm:$0xff] }
  0x9c   : > { %4496 = vmatmul.msk.f32.gmra.mxu1 %vm374_vm1, %v316_v22 }
  0x9d   : > { %v5458_v23 = vpop.f32.mrf.mxu3  ;;  %v5460_v24 = vpop.f32.mrf.mxu2 }
  0xa0   : > { %v5470_v30 = vpop.f32.mrf.mxu0 }
  0xa1   : > { %v5472_v31 = vpop.f32.mrf.mxu1 }
  0xa2   : > { %4544 = vmatmul.msk.f32.vlgmr.msra.gmra.mxu3 %vm374_vm1, %v875_v27  ;;  %4535 = vmatmul.msk.f32.gmra.mxu2 %vm374_vm1, %v5468_v28  ;;  %v880_v27 = vld [vmem:[%s5243_s14 + $0x102] sm:$0xff] }
  0xa3   : > { %4460 = vmatmul.msk.f32.gmra.mxu0 %vm374_vm1, %v354_v32  ;;  %v5563_v32 = vld [vmem:[%s5243_s14 + $0xba] sm:$0xff] }
  0xa4   : > { %4497 = vmatmul.msk.f32.gmra.mxu1 %vm374_vm1, %v317_v34 }
  0xa5   : > { %v5481_v35 = vpop.f32.mrf.mxu3  ;;  %v5483_v36 = vpop.f32.mrf.mxu2 }
  0xa8   : > { %v5489_v40 = vpop.f32.mrf.mxu0 }
  0xa9   : > { %v5491_v42 = vpop.f32.mrf.mxu1 }
  0xaa   : > { %4545 = vmatmul.msk.f32.gmra.mxu3 %vm374_vm1, %v876_v38  ;;  %4536 = vmatmul.msk.f32.gmra.mxu2 %vm374_vm1, %v5487_v39 }
  0xab   : > { %4461 = vmatmul.msk.f32.gmra.mxu0 %vm374_vm1, %v355_v43  ;;  %v359_v43 = vld [vmem:[%s5243_s14 + $0xb9] sm:$0xff] }
  0xac   : > { %4498 = vmatmul.msk.f32.gmra.mxu1 %vm374_vm1, %v318_v44  ;;  %v322_v44 = vld [vmem:[%s5243_s14 + $0xb8] sm:$0xff] }
  0xad   : > { %v5500_v46 = vpop.f32.mrf.mxu3  ;;  %v5502_v47 = vpop.f32.mrf.mxu2 }
  0xb0   : > { %v5508_v51 = vpop.f32.mrf.mxu0 }
  0xb1   : > { %v5510_v52 = vpop.f32.mrf.mxu1 }
  0xb2   : > { %4546 = vmatmul.msk.f32.gmra.mxu3 %vm374_vm1, %v877_v48  ;;  %4537 = vmatmul.msk.f32.gmra.mxu2 %vm374_vm1, %v5506_v50  ;;  %v4705_v48 = vld [vmem:[%s7208_s2 + $0x1c] sm:$0xf] }
  0xb3   : > { %4462 = vmatmul.msk.f32.gmra.mxu0 %vm374_vm1, %v356_v54  ;;  %4706 = vmatpush.msk.msra.mxu3 %vm483_vm0, %v4705_v48  ;;  %v882_v48 = vld [vmem:[%s5243_s14 + $0x112] sm:$0xff] }
  0xb4   : > { %4499 = vmatmul.msk.f32.gmra.mxu1 %vm374_vm1, %v319_v55 }
  0xb5   : > { %v5519_v56 = vpop.f32.mrf.mxu3  ;;  %v5521_v58 = vpop.f32.mrf.mxu2 }
  0xb8   : > { %v5527_v62 = vpop.f32.mrf.mxu0 }
  0xb9   : > { %v5529_v63 = vpop.f32.mrf.mxu1 }
  0xba   : > { %4547 = vmatmul.msk.f32.gmra.mxu3 %vm374_vm1, %v878_v59  ;;  %4538 = vmatmul.msk.f32.gmra.mxu2 %vm374_vm1, %v5525_v60  ;;  %v881_v59 = vld [vmem:[%s5243_s14 + $0x10a] sm:$0xff] }
  0xbb   : > { %4463 = vmatmul.msk.f32.gmra.mxu0 %vm374_vm1, %v357_v0  ;;  %v5586_v0 = vld [vmem:[%s5243_s14 + $0xc2] sm:$0xff] }
  0xbc   : > { %4500 = vmatmul.msk.f32.gmra.mxu1 %vm374_vm1, %v320_v1  ;;  %7221 = vst [vmem:[#allocation6_spill] sm:$0xff] %v5586_v0 }
  0xbd   : > { %v5538_v3 = vpop.f32.mrf.mxu3  ;;  %v5540_v4 = vpop.f32.mrf.mxu2 }
  0xc0   : > { %v5546_v10 = vpop.f32.mrf.mxu0 }
  0xc1   : > { %v5548_v14 = vpop.f32.mrf.mxu1 }
  0xc2   : > { %4548 = vmatmul.msk.f32.gmra.mxu3 %vm374_vm1, %v879_v5  ;;  %4539 = vmatmul.msk.f32.gmra.mxu2 %vm374_vm1, %v5544_v9 }
  0xc3   : > { %4464 = vmatmul.msk.f32.gmra.mxu0 %vm374_vm1, %v358_v15  ;;  %v360_v15 = vld [vmem:[%s5243_s14 + $0xc1] sm:$0xff] }
  0xc4   : > { %4501 = vmatmul.msk.f32.gmra.mxu1 %vm374_vm1, %v321_v20  ;;  %v323_v20 = vld [vmem:[%s5243_s14 + $0xc0] sm:$0xff] }
  0xc5   : > { %v5557_v22 = vpop.f32.mrf.mxu3  ;;  %v5559_v26 = vpop.f32.mrf.mxu2 }
  0xc6   : > { %7217 = vst [vmem:[#allocation2_spill] sm:$0xff] %v5559_v26  ;;  %v1779_v26 = vld [vmem:[%s5243_s14 + $0x1c] sm:$0xff] }
  0xc8   : > { %v5565_v34 = vpop.f32.mrf.mxu0 }
  0xc9   : > { %7218 = vst [vmem:[#allocation3_spill] sm:$0xff] %v5565_v34  ;;  %v5567_v38 = vpop.f32.mrf.mxu1  ;;  %v1778_v34 = vld [vmem:[%s5243_s14 + $0x14] sm:$0xff] }
  0xca   : > { %7219 = vst [vmem:[#allocation4_spill] sm:$0xff] %v5567_v38  ;;  %4549 = vmatmul.msk.f32.gmra.mxu3 %vm374_vm1, %v880_v27  ;;  %4540 = vmatmul.msk.f32.gmra.mxu2 %vm374_vm1, %v5563_v32  ;;  %v4743_v27 = vld [vmem:[%s7208_s2 + $0x20] sm:$0xf]  ;;  %v362_v38 = vld [vmem:[%s5243_s14 + $0xd1] sm:$0xff] }
  0xcb   : > { %4465 = vmatmul.msk.f32.gmra.mxu0 %vm374_vm1, %v359_v43 }
  0xcc   : > { %4502 = vmatmul.msk.f32.gmra.mxu1 %vm374_vm1, %v322_v44  ;;  %4744 = vmatpush.msk.msra.mxu0 %vm483_vm0, %v4743_v27 }
  0xcd   : > { %v5580_v54 = vpop.f32.mrf.mxu3  ;;  %v5582_v55 = vpop.f32.mrf.mxu2 }
  0xce   : > { %7220 = vst [vmem:[#allocation5_spill] sm:$0xff] %v5582_v55  ;;  %v324_v55 = vld [vmem:[%s5243_s14 + $0xc8] sm:$0xff] }
  0xd0   : > { %v5588_v1 = vpop.f32.mrf.mxu0 }
  0xd1   : > { %7222 = vst [vmem:[#allocation7_spill] sm:$0xff] %v5588_v1  ;;  %v5590_v5 = vpop.f32.mrf.mxu1 }
  0xd2   : > { %7223 = vst [vmem:[#allocation8_spill] sm:$0xff] %v5590_v5  ;;  %4550 = vmatmul.msk.f32.gmra.mxu3 %vm374_vm1, %v881_v59  ;;  %4541 = vmatmul.msk.f32.gmra.mxu2 %vm374_vm1, %v5586_v0  ;;  %v5609_v59 = vld [vmem:[%s5243_s14 + $0xca] sm:$0xff]  ;;  %v1476_v0 = vld [vmem:[%s5243_s14 + $0x53] sm:$0xff] }
  0xd3   : > { %4466 = vmatmul.msk.f32.gmra.mxu0 %vm374_vm1, %v360_v15  ;;  %7225 = vst [vmem:[#allocation10_spill] sm:$0xff] %v5609_v59  ;;  %v361_v15 = vld [vmem:[%s5243_s14 + $0xc9] sm:$0xff] }
  0xd4   : > { %4503 = vmatmul.msk.f32.gmra.mxu1 %vm374_vm1, %v323_v20 }
  0xd5   : > { %v5603_v43 = vpop.f32.mrf.mxu3  ;;  %v5605_v44 = vpop.f32.mrf.mxu2 }
  0xd6   : > { %7224 = vst [vmem:[#allocation9_spill] sm:$0xff] %v5605_v44 }
  0xd8   : > { %v5611_v5 = vpop.f32.mrf.mxu0 }
  0xd9   : > { %7226 = vst [vmem:[#allocation11_spill] sm:$0xff] %v5611_v5  ;;  %v5613_v1 = vpop.f32.mrf.mxu1  ;;  %v883_v5 = vld [vmem:[%s5243_s14 + $0x11a] sm:$0xff] }
  0xda   : > { %7227 = vst [vmem:[#allocation12_spill] sm:$0xff] %v5613_v1  ;;  %4551 = vmatmul.msk.f32.gmra.mxu3 %vm374_vm1, %v882_v48  ;;  %4542 = vmatmul.msk.f32.gmra.mxu2 %vm374_vm1, %v5609_v59  ;;  %v5628_v1 = vld [vmem:[%s5243_s14 + $0xd2] sm:$0xff] }
  0xdb   : > { %4467 = vmatmul.msk.f32.gmra.mxu0 %vm374_vm1, %v361_v15  ;;  %7229 = vst [vmem:[#allocation14_spill] sm:$0xff] %v5628_v1  ;;  %v325_v59 = vld [vmem:[%s5243_s14 + $0xd0] sm:$0xff] }
  0xdc   : > { %4504 = vmatmul.msk.f32.gmra.mxu1 %vm374_vm1, %v324_v55 }
  0xdd   : > { %v5622_v20 = vpop.f32.mrf.mxu3  ;;  %v5624_v27 = vpop.f32.mrf.mxu2 }
  0xde   : > { %7228 = vst [vmem:[#allocation13_spill] sm:$0xff] %v5624_v27 }
  0xe0   : > { %v5630_v44 = vpop.f32.mrf.mxu0 }
  0xe1   : > { %7230 = vst [vmem:[#allocation15_spill] sm:$0xff] %v5630_v44  ;;  %v5632_v48 = vpop.f32.mrf.mxu1  ;;  %v2088_v44 = vld [vmem:[%s5243_s14 + $0x24] sm:$0xff] }
  0xe2   : > { %7231 = vst [vmem:[#allocation16_spill] sm:$0xff] %v5632_v48  ;;  %4552 = vmatmul.msk.f32.gmra.mxu3 %vm374_vm1, %v883_v5  ;;  %4543 = vmatmul.msk.f32.gmra.mxu2 %vm374_vm1, %v5628_v1  ;;  %v1468_v5 = vld [vmem:[%s5243_s14 + $0x13] sm:$0xff]  ;;  %v1469_v1 = vld [vmem:[%s5243_s14 + $0x1b] sm:$0xff] }
  0xe3   : > { %4468 = vmatmul.msk.f32.gmra.mxu0 %vm374_vm1, %v362_v38 }
  0xe4   : > { %4505 = vmatmul.msk.f32.gmra.mxu1 %vm374_vm1, %v325_v59 }
  0xe5   : > { %v5641_v55 = vpop.f32.mrf.mxu3  ;;  %v5643_v15 = vpop.f32.mrf.mxu2 }
  0xe6   : > { %7232 = vst [vmem:[#allocation17_spill] sm:$0xff] %v5643_v15 }
  0xe8   : > { %v5646_v48 = vpop.f32.mrf.mxu0 }
  0xe9   : > { %7233 = vst [vmem:[#allocation18_spill] sm:$0xff] %v5646_v48  ;;  %v5648_v27 = vpop.f32.mrf.mxu1  ;;  %v2089_v48 = vld [vmem:[%s5243_s14 + $0x2c] sm:$0xff] }
  0xea   : > { %7234 = vst [vmem:[#allocation19_spill] sm:$0xff] %v5648_v27  ;;  %4555 = vmatmul.msk.f32.vlgmr.msrb.gmra.mxu3 %vm374_vm1, %v5264_v13  ;;  %4669 = vmatmul.msk.f32.vlgmr.msrb.gmra.mxu2 %vm374_vm1, %v2088_v44 }
  0xeb   : > { %4593 = vmatmul.msk.f32.vlgmr.msrb.gmra.mxu0 %vm374_vm1, %v1468_v5  ;;  %v2090_v5 = vld [vmem:[%s5243_s14 + $0x34] sm:$0xff] }
  0xec   : > { %4631 = vmatmul.msk.f32.vlgmr.msrb.gmra.mxu1 %vm374_vm1, %v1778_v34 }
  0xed   : > { %v5657_v38 = vpop.f32.mrf.mxu3  ;;  %v5659_v59 = vpop.f32.mrf.mxu2 }
  0xee   : > { %7235 = vst [vmem:[#allocation20_spill] sm:$0xff] %v5659_v59  ;;  %v1470_v59 = vld [vmem:[%s5243_s14 + $0x23] sm:$0xff] }
  0xf0   : > { %v5662_v15 = vpop.f32.mrf.mxu0 }
  0xf1   : > { %7236 = vst [vmem:[#allocation21_spill] sm:$0xff] %v5662_v15  ;;  %v5664_v27 = vpop.f32.mrf.mxu1 }
  0xf2   : > { %7237 = vst [vmem:[#allocation22_spill] sm:$0xff] %v5664_v27  ;;  %4556 = vmatmul.msk.f32.gmra.mxu3 %vm374_vm1, %v5275_v17  ;;  %4670 = vmatmul.msk.f32.gmra.mxu2 %vm374_vm1, %v2089_v48 }
  0xf3   : > { %4594 = vmatmul.msk.f32.gmra.mxu0 %vm374_vm1, %v1469_v1  ;;  %v2091_v1 = vld [vmem:[%s5243_s14 + $0x3c] sm:$0xff] }
  0xf4   : > { %4632 = vmatmul.msk.f32.gmra.mxu1 %vm374_vm1, %v1779_v26 }
  0xf5   : > { %v5673_v13 = vpop.f32.mrf.mxu3  ;;  %v5675_v34 = vpop.f32.mrf.mxu2 }
  0xf6   : > { %7238 = vst [vmem:[#allocation23_spill] sm:$0xff] %v5675_v34  ;;  %v1471_v34 = vld [vmem:[%s5243_s14 + $0x2b] sm:$0xff] }
  0xf8   : > { %v5678_v15 = vpop.f32.mrf.mxu0 }
  0xf9   : > { %7239 = vst [vmem:[#allocation24_spill] sm:$0xff] %v5678_v15  ;;  %v5680_v27 = vpop.f32.mrf.mxu1 }
  0xfa   : > { %7240 = vst [vmem:[#allocation25_spill] sm:$0xff] %v5680_v27  ;;  %4557 = vmatmul.msk.f32.gmra.mxu3 %vm374_vm1, %v5286_v21  ;;  %4671 = vmatmul.msk.f32.gmra.mxu2 %vm374_vm1, %v2090_v5 }
  0xfb   : > { %4595 = vmatmul.msk.f32.gmra.mxu0 %vm374_vm1, %v1470_v59  ;;  %v2092_v59 = vld [vmem:[%s5243_s14 + $0x44] sm:$0xff] }
  0xfc   : > { %4633 = vmatmul.msk.f32.gmra.mxu1 %vm374_vm1, %v2088_v44 }
  0xfd   : > { %v5688_v17 = vpop.f32.mrf.mxu3  ;;  %v5690_v26 = vpop.f32.mrf.mxu2 }
  0xfe   : > { %7241 = vst [vmem:[#allocation26_spill] sm:$0xff] %v5690_v26  ;;  %v1472_v26 = vld [vmem:[%s5243_s14 + $0x33] sm:$0xff] }
 0x100   : > { %v5693_v15 = vpop.f32.mrf.mxu0 }
 0x101   : > { %7242 = vst [vmem:[#allocation27_spill] sm:$0xff] %v5693_v15  ;;  %v5695_v27 = vpop.f32.mrf.mxu1 }
 0x102   : > { %7243 = vst [vmem:[#allocation28_spill] sm:$0xff] %v5695_v27  ;;  %4558 = vmatmul.msk.f32.gmra.mxu3 %vm374_vm1, %v5297_v25  ;;  %4672 = vmatmul.msk.f32.gmra.mxu2 %vm374_vm1, %v2091_v1 }
 0x103   : > { %4596 = vmatmul.msk.f32.gmra.mxu0 %vm374_vm1, %v1471_v34  ;;  %v2093_v34 = vld [vmem:[%s5243_s14 + $0x4c] sm:$0xff] }
 0x104   : > { %4634 = vmatmul.msk.f32.gmra.mxu1 %vm374_vm1, %v2089_v48 }
 0x105   : > { %v5703_v21 = vpop.f32.mrf.mxu3  ;;  %v5705_v44 = vpop.f32.mrf.mxu2 }
 0x106   : > { %7244 = vst [vmem:[#allocation29_spill] sm:$0xff] %v5705_v44  ;;  %v1473_v44 = vld [vmem:[%s5243_s14 + $0x3b] sm:$0xff] }
 0x108   : > { %v5708_v15 = vpop.f32.mrf.mxu0 }
 0x109   : > { %7245 = vst [vmem:[#allocation30_spill] sm:$0xff] %v5708_v15  ;;  %v5710_v27 = vpop.f32.mrf.mxu1 }
 0x10a   : > { %7246 = vst [vmem:[#allocation31_spill] sm:$0xff] %v5710_v27  ;;  %4559 = vmatmul.msk.f32.gmra.mxu3 %vm374_vm1, %v5308_v29  ;;  %4673 = vmatmul.msk.f32.gmra.mxu2 %vm374_vm1, %v2092_v59 }
 0x10b   : > { %4597 = vmatmul.msk.f32.gmra.mxu0 %vm374_vm1, %v1472_v26  ;;  %v2094_v26 = vld [vmem:[%s5243_s14 + $0x54] sm:$0xff] }
 0x10c   : > { %4635 = vmatmul.msk.f32.gmra.mxu1 %vm374_vm1, %v2090_v5 }
 0x10d   : > { %v5718_v25 = vpop.f32.mrf.mxu3  ;;  %v5720_v48 = vpop.f32.mrf.mxu2 }
 0x10e   : > { %7247 = vst [vmem:[#allocation32_spill] sm:$0xff] %v5720_v48  ;;  %v1474_v48 = vld [vmem:[%s5243_s14 + $0x43] sm:$0xff] }
 0x110   : > { %v5723_v15 = vpop.f32.mrf.mxu0 }
 0x111   : > { %7248 = vst [vmem:[#allocation33_spill] sm:$0xff] %v5723_v15  ;;  %v5725_v27 = vpop.f32.mrf.mxu1 }
 0x112   : > { %7249 = vst [vmem:[#allocation34_spill] sm:$0xff] %v5725_v27  ;;  %4560 = vmatmul.msk.f32.gmra.mxu3 %vm374_vm1, %v5319_v33  ;;  %4674 = vmatmul.msk.f32.gmra.mxu2 %vm374_vm1, %v2093_v34 }
 0x113   : > { %4598 = vmatmul.msk.f32.gmra.mxu0 %vm374_vm1, %v1473_v44  ;;  %v2095_v44 = vld [vmem:[%s5243_s14 + $0x5c] sm:$0xff] }
 0x114   : > { %4636 = vmatmul.msk.f32.gmra.mxu1 %vm374_vm1, %v2091_v1 }
 0x115   : > { %v5733_v29 = vpop.f32.mrf.mxu3  ;;  %v5735_v5 = vpop.f32.mrf.mxu2 }
 0x116   : > { %7250 = vst [vmem:[#allocation35_spill] sm:$0xff] %v5735_v5  ;;  %v1475_v5 = vld [vmem:[%s5243_s14 + $0x4b] sm:$0xff] }
 0x118   : > { %v5738_v15 = vpop.f32.mrf.mxu0 }
 0x119   : > { %7251 = vst [vmem:[#allocation36_spill] sm:$0xff] %v5738_v15  ;;  %v5740_v27 = vpop.f32.mrf.mxu1 }
 0x11a   : > { %7252 = vst [vmem:[#allocation37_spill] sm:$0xff] %v5740_v27  ;;  %4561 = vmatmul.msk.f32.gmra.mxu3 %vm374_vm1, %v5330_v37  ;;  %4675 = vmatmul.msk.f32.gmra.mxu2 %vm374_vm1, %v2094_v26  ;;  %v822_v37 = vadd.f32 %v5622_v20, %v5435_v11  ;;  %v825_v11 = vadd.f32 %v5641_v55, %v5458_v23 }
 0x11b   : > { %4599 = vmatmul.msk.f32.gmra.mxu0 %vm374_vm1, %v1474_v48  ;;  %v828_v23 = vadd.f32 %v5657_v38, %v5481_v35  ;;  %v831_v35 = vadd.f32 %v5673_v13, %v5500_v46  ;;  %v834_v46 = vadd.f32 %v5688_v17, %v5519_v56  ;;  %v837_v56 = vadd.f32 %v5703_v21, %v5538_v3 }
 0x11c   : > { %4637 = vmatmul.msk.f32.gmra.mxu1 %vm374_vm1, %v2092_v59  ;;  %v840_v3 = vadd.f32 %v5718_v25, %v5557_v22  ;;  %v843_v22 = vadd.f32 %v5733_v29, %v5580_v54 }
 0x11d   : > { %v5748_v33 = vpop.f32.mrf.mxu3  ;;  %v5750_v1 = vpop.f32.mrf.mxu2 }
 0x11e   : > { %7253 = vst [vmem:[#allocation38_spill] sm:$0xff] %v5750_v1  ;;  %v846_v54 = vadd.f32 %v5748_v33, %v5603_v43 }
 0x120   : > { %v5753_v15 = vpop.f32.mrf.mxu0 }
 0x121   : > { %7254 = vst [vmem:[#allocation39_spill] sm:$0xff] %v5753_v15  ;;  %v5755_v27 = vpop.f32.mrf.mxu1 }
 0x122   : > { %7255 = vst [vmem:[#allocation40_spill] sm:$0xff] %v5755_v27  ;;  %4562 = vmatmul.msk.f32.gmra.mxu3 %vm374_vm1, %v5341_v41  ;;  %4676 = vmatmul.msk.f32.gmra.mxu2 %vm374_vm1, %v2095_v44  ;;  %v2096_v27 = vld [vmem:[%s5243_s14 + $0x64] sm:$0xff] }
 0x123   : > { %4600 = vmatmul.msk.f32.gmra.mxu0 %vm374_vm1, %v1475_v5 }
 0x124   : > { %4638 = vmatmul.msk.f32.gmra.mxu1 %vm374_vm1, %v2093_v34 }
 0x125   : > { %v1095_v59 = vpop.f32.mrf.mxu3  ;;  %v5765_v48 = vpop.f32.mrf.mxu2 }
 0x126   : > { %v5767_v15 = vadd.f32 %v1095_v59, %v822_v37  ;;  %v2097_v37 = vld [vmem:[%s5243_s14 + $0x6c] sm:$0xff] }
 0x128   : > { %7256 = vst [vmem:[#allocation41_spill] sm:$0xff] %v5767_v15  ;;  %v5770_v1 = vpop.f32.mrf.mxu0  ;;  %v1477_v15 = vld [vmem:[%s5243_s14 + $0x5b] sm:$0xff] }
 0x129   : > { %v5772_v41 = vpop.f32.mrf.mxu1 }
 0x12a   : > { %4563 = vmatmul.msk.f32.gmra.mxu3 %vm374_vm1, %v5352_v45  ;;  %4677 = vmatmul.msk.f32.gmra.mxu2 %vm374_vm1, %v2096_v27 }
 0x12b   : > { %4601 = vmatmul.msk.f32.gmra.mxu0 %vm374_vm1, %v1476_v0 }
 0x12c   : > { %4639 = vmatmul.msk.f32.gmra.mxu1 %vm374_vm1, %v2094_v26 }
 0x12d   : > { %v1098_v20 = vpop.f32.mrf.mxu3  ;;  %v5782_v34 = vpop.f32.mrf.mxu2 }
 0x12e   : > { %v5784_v5 = vadd.f32 %v1098_v20, %v825_v11  ;;  %v2098_v11 = vld [vmem:[%s5243_s14 + $0x74] sm:$0xff] }
 0x130   : > { %7257 = vst [vmem:[#allocation42_spill] sm:$0xff] %v5784_v5  ;;  %v5787_v59 = vpop.f32.mrf.mxu0  ;;  %v1478_v5 = vld [vmem:[%s5243_s14 + $0x63] sm:$0xff] }
 0x131   : > { %v5789_v45 = vpop.f32.mrf.mxu1 }
 0x132   : > { %4564 = vmatmul.msk.f32.gmra.mxu3 %vm374_vm1, %v5363_v49  ;;  %4678 = vmatmul.msk.f32.gmra.mxu2 %vm374_vm1, %v2097_v37 }
 0x133   : > { %4602 = vmatmul.msk.f32.gmra.mxu0 %vm374_vm1, %v1477_v15 }
 0x134   : > { %4640 = vmatmul.msk.f32.gmra.mxu1 %vm374_vm1, %v2095_v44 }
 0x135   : > { %v1101_v0 = vpop.f32.mrf.mxu3  ;;  %v5799_v55 = vpop.f32.mrf.mxu2 }
 0x136   : > { %v5801_v26 = vadd.f32 %v1101_v0, %v828_v23  ;;  %v2099_v23 = vld [vmem:[%s5243_s14 + $0x7c] sm:$0xff] }
 0x138   : > { %7258 = vst [vmem:[#allocation43_spill] sm:$0xff] %v5801_v26  ;;  %v5804_v20 = vpop.f32.mrf.mxu0  ;;  %v1479_v26 = vld [vmem:[%s5243_s14 + $0x6b] sm:$0xff] }
 0x139   : > { %v5806_v49 = vpop.f32.mrf.mxu1 }
 0x13a   : > { %4565 = vmatmul.msk.f32.gmra.mxu3 %vm374_vm1, %v5374_v53  ;;  %4679 = vmatmul.msk.f32.gmra.mxu2 %vm374_vm1, %v2098_v11 }
 0x13b   : > { %4603 = vmatmul.msk.f32.gmra.mxu0 %vm374_vm1, %v1478_v5 }
 0x13c   : > { %4641 = vmatmul.msk.f32.gmra.mxu1 %vm374_vm1, %v2096_v27 }
 0x13d   : > { %v1104_v15 = vpop.f32.mrf.mxu3  ;;  %v5816_v38 = vpop.f32.mrf.mxu2 }
 0x13e   : > { %v5818_v44 = vadd.f32 %v1104_v15, %v831_v35  ;;  %v2100_v35 = vld [vmem:[%s5243_s14 + $0x84] sm:$0xff] }
 0x140   : > { %7259 = vst [vmem:[#allocation44_spill] sm:$0xff] %v5818_v44  ;;  %v5821_v0 = vpop.f32.mrf.mxu0  ;;  %v1480_v44 = vld [vmem:[%s5243_s14 + $0x73] sm:$0xff] }
 0x141   : > { %v5823_v53 = vpop.f32.mrf.mxu1 }
 0x142   : > { %4566 = vmatmul.msk.f32.gmra.mxu3 %vm374_vm1, %v5385_v57  ;;  %4680 = vmatmul.msk.f32.gmra.mxu2 %vm374_vm1, %v2099_v23 }
 0x143   : > { %4604 = vmatmul.msk.f32.gmra.mxu0 %vm374_vm1, %v1479_v26 }
 0x144   : > { %4642 = vmatmul.msk.f32.gmra.mxu1 %vm374_vm1, %v2097_v37 }
 0x145   : > { %v1107_v27 = vpop.f32.mrf.mxu3  ;;  %v5833_v13 = vpop.f32.mrf.mxu2 }
 0x146   : > { %v5835_v5 = vadd.f32 %v1107_v27, %v834_v46  ;;  %v2101_v46 = vld [vmem:[%s5243_s14 + $0x8c] sm:$0xff] }
 0x148   : > { %7260 = vst [vmem:[#allocation45_spill] sm:$0xff] %v5835_v5  ;;  %v5838_v15 = vpop.f32.mrf.mxu0  ;;  %v1481_v5 = vld [vmem:[%s5243_s14 + $0x7b] sm:$0xff] }
 0x149   : > { %v5840_v57 = vpop.f32.mrf.mxu1 }
 0x14a   : > { %4567 = vmatmul.msk.f32.gmra.mxu3 %vm374_vm1, %v5396_v61  ;;  %4681 = vmatmul.msk.f32.gmra.mxu2 %vm374_vm1, %v2100_v35 }
 0x14b   : > { %4605 = vmatmul.msk.f32.gmra.mxu0 %vm374_vm1, %v1480_v44 }
 0x14c   : > { %4643 = vmatmul.msk.f32.gmra.mxu1 %vm374_vm1, %v2098_v11 }
 0x14d   : > { %v1110_v17 = vpop.f32.mrf.mxu3  ;;  %v5850_v37 = vpop.f32.mrf.mxu2 }
 0x14e   : > { %v5852_v26 = vadd.f32 %v1110_v17, %v837_v56  ;;  %v2102_v56 = vld [vmem:[%s5243_s14 + $0x94] sm:$0xff] }
 0x150   : > { %7261 = vst [vmem:[#allocation46_spill] sm:$0xff] %v5852_v26  ;;  %v5855_v27 = vpop.f32.mrf.mxu0  ;;  %v1482_v26 = vld [vmem:[%s5243_s14 + $0x83] sm:$0xff] }
 0x151   : > { %v5857_v61 = vpop.f32.mrf.mxu1 }
 0x152   : > { %4568 = vmatmul.msk.f32.gmra.mxu3 %vm374_vm1, %v5411_v2  ;;  %4682 = vmatmul.msk.f32.gmra.mxu2 %vm374_vm1, %v2101_v46 }
 0x153   : > { %4606 = vmatmul.msk.f32.gmra.mxu0 %vm374_vm1, %v1481_v5 }
 0x154   : > { %4644 = vmatmul.msk.f32.gmra.mxu1 %vm374_vm1, %v2099_v23 }
 0x155   : > { %v1113_v21 = vpop.f32.mrf.mxu3  ;;  %v5867_v11 = vpop.f32.mrf.mxu2 }
 0x156   : > { %v5869_v44 = vadd.f32 %v1113_v21, %v840_v3  ;;  %v2103_v3 = vld [vmem:[%s5243_s14 + $0x9c] sm:$0xff] }
 0x158   : > { %7262 = vst [vmem:[#allocation47_spill] sm:$0xff] %v5869_v44  ;;  %v5872_v17 = vpop.f32.mrf.mxu0  ;;  %v1483_v44 = vld [vmem:[%s5243_s14 + $0x8b] sm:$0xff] }
 0x159   : > { %v5874_v2 = vpop.f32.mrf.mxu1 }
 0x15a   : > { %4569 = vmatmul.msk.f32.gmra.mxu3 %vm374_vm1, %v5422_v6  ;;  %4683 = vmatmul.msk.f32.gmra.mxu2 %vm374_vm1, %v2102_v56 }
 0x15b   : > { %4607 = vmatmul.msk.f32.gmra.mxu0 %vm374_vm1, %v1482_v26 }
 0x15c   : > { %4645 = vmatmul.msk.f32.gmra.mxu1 %vm374_vm1, %v2100_v35 }
 0x15d   : > { %v1116_v25 = vpop.f32.mrf.mxu3  ;;  %v5884_v23 = vpop.f32.mrf.mxu2 }
 0x15e   : > { %v5886_v5 = vadd.f32 %v1116_v25, %v843_v22  ;;  %v2104_v22 = vld [vmem:[%s5243_s14 + $0xa4] sm:$0xff]  ;;  %v741_v25 = vadd.f32 %v5426_v8, %v5424_v7  ;;  %v744_v7 = vadd.f32 %v5449_v19, %v5447_v18 }
 0x160   : > { %7263 = vst [vmem:[#allocation48_spill] sm:$0xff] %v5886_v5  ;;  %v5889_v21 = vpop.f32.mrf.mxu0  ;;  %v1122_v43 = vadd.f32 %v5437_v12, %v741_v25  ;;  %v1123_v12 = vadd.f32 %v5460_v24, %v744_v7  ;;  %v1486_v24 = vld [vmem:[%s5243_s14 + $0xa3] sm:$0xff] }
 0x161   : > { %v5891_v6 = vpop.f32.mrf.mxu1 }
 0x162   : > { %7264 = vst [vmem:[#allocation49_spill] sm:$0xff] %v5891_v6  ;;  %4570 = vmatmul.msk.f32.gmra.mxu3 %vm374_vm1, %v5445_v16  ;;  %4684 = vmatmul.msk.f32.gmra.mxu2 %vm374_vm1, %v2103_v3  ;;  %v1484_v6 = vld [vmem:[%s5243_s14 + $0x93] sm:$0xff] }
 0x163   : > { %4608 = vmatmul.msk.f32.gmra.mxu0 %vm374_vm1, %v1483_v44 }
 0x164   : > { %4646 = vmatmul.msk.f32.gmra.mxu1 %vm374_vm1, %v2101_v46 }
 0x165   : > { %v1119_v29 = vpop.f32.mrf.mxu3  ;;  %v5901_v35 = vpop.f32.mrf.mxu2 }
 0x166   : > { %v5903_v26 = vadd.f32 %v1119_v29, %v846_v54  ;;  %v2105_v54 = vld [vmem:[%s5243_s14 + $0xac] sm:$0xff] }
 0x168   : > { %7265 = vst [vmem:[#allocation50_spill] sm:$0xff] %v5903_v26  ;;  %v1634_v16 = vpop.f32.mrf.mxu0 }
 0x169   : > { %v1944_v5 = vpop.f32.mrf.mxu1 }
 0x16a   : > { %4571 = vmatmul.msk.f32.gmra.mxu3 %vm374_vm1, %v5468_v28  ;;  %4685 = vmatmul.msk.f32.gmra.mxu2 %vm374_vm1, %v2104_v22  ;;  %v1485_v28 = vld [vmem:[%s5243_s14 + $0x9b] sm:$0xff] }
 0x16b   : > { %4609 = vmatmul.msk.f32.gmra.mxu0 %vm374_vm1, %v1484_v6  ;;  %v3418_v6 = vld [vmem:[%s7210_s4] sm:$0xf] }
 0x16c   : > { %4647 = vmatmul.msk.f32.gmra.mxu1 %vm374_vm1, %v2102_v56  ;;  %4818 = vmatpush.msk.msra.mxu2 %vm483_vm0, %v3418_v6 }
 0x16d   : > { %v1324_v33 = vpop.f32.mrf.mxu3  ;;  %v2254_v46 = vpop.f32.mrf.mxu2 }
 0x16e   : > { %v1432_v44 = vadd.f32 %v1324_v33, %v1122_v43  ;;  %v2106_v43 = vld [vmem:[%s5243_s14 + $0xb4] sm:$0xff] }
 0x170   : > { %v1742_v8 = vadd.f32 %v1634_v16, %v1432_v44  ;;  %v1637_v29 = vpop.f32.mrf.mxu0 }
 0x171   : > { %v1947_v26 = vpop.f32.mrf.mxu1 }
 0x172   : > { %v2052_v56 = vadd.f32 %v1944_v5, %v1742_v8  ;;  %4572 = vmatmul.msk.f32.gmra.mxu3 %vm374_vm1, %v5487_v39  ;;  %4686 = vmatmul.msk.f32.gmra.mxu2 %vm374_vm1, %v2105_v54  ;;  %v3455_v5 = vld [vmem:[%s7211_s5] sm:$0xf]  ;;  %v747_v39 = vadd.f32 %v5472_v31, %v5470_v30 }
 0x173   : > { %4610 = vmatmul.msk.f32.gmra.mxu0 %vm374_vm1, %v1485_v28  ;;  %4781 = vmatpush.msk.msra.mxu1 %vm483_vm0, %v3455_v5  ;;  %v2107_v28 = vld [vmem:[%s5243_s14 + $0xbc] sm:$0xff]  ;;  %v753_v5 = vadd.f32 %v5510_v52, %v5508_v51 }
 0x174   : > { %4648 = vmatmul.msk.f32.gmra.mxu1 %vm374_vm1, %v2103_v3  ;;  %v5929_v18 = vadd.f32 %v2254_v46, %v2052_v56  ;;  %v1124_v7 = vadd.f32 %v5483_v36, %v747_v39 }
 0x175   : > { %v1327_v19 = vpop.f32.mrf.mxu3  ;;  %v2257_v25 = vpop.f32.mrf.mxu2 }
 0x176   : > { %v1433_v16 = vadd.f32 %v1327_v19, %v1123_v12  ;;  %v1487_v12 = vld [vmem:[%s5243_s14 + $0xab] sm:$0xff] }
 0x178   : > { %v1743_v33 = vadd.f32 %v1637_v29, %v1433_v16  ;;  %v1640_v3 = vpop.f32.mrf.mxu0  ;;  %v2108_v16 = vld [vmem:[%s5243_s14 + $0xc4] sm:$0xff] }
 0x179   : > { %v1950_v44 = vpop.f32.mrf.mxu1 }
 0x17a   : > { %v2053_v46 = vadd.f32 %v1947_v26, %v1743_v33  ;;  %4573 = vmatmul.msk.f32.gmra.mxu3 %vm374_vm1, %v5506_v50  ;;  %4687 = vmatmul.msk.f32.gmra.mxu2 %vm374_vm1, %v2106_v43  ;;  %v750_v26 = vadd.f32 %v5491_v42, %v5489_v40 }
 0x17b   : > { %4611 = vmatmul.msk.f32.gmra.mxu0 %vm374_vm1, %v1486_v24 }
 0x17c   : > { %4649 = vmatmul.msk.f32.gmra.mxu1 %vm374_vm1, %v2104_v22  ;;  %v5945_v8 = vadd.f32 %v2257_v25, %v2053_v46  ;;  %v1125_v36 = vadd.f32 %v5502_v47, %v750_v26  ;;  %v1126_v47 = vadd.f32 %v5521_v58, %v753_v5  ;;  %v2109_v46 = vld [vmem:[%s5243_s14 + $0xcc] sm:$0xff] }
 0x17d   : > { %v1330_v30 = vpop.f32.mrf.mxu3  ;;  %v2260_v31 = vpop.f32.mrf.mxu2 }
 0x17e   : > { %v1434_v29 = vadd.f32 %v1330_v30, %v1124_v7  ;;  %v756_v7 = vadd.f32 %v5529_v63, %v5527_v62 }
 0x180   : > { %v1744_v6 = vadd.f32 %v1640_v3, %v1434_v29  ;;  %v1643_v50 = vpop.f32.mrf.mxu0  ;;  %v1488_v3 = vld [vmem:[%s5243_s14 + $0xb3] sm:$0xff]  ;;  %v1489_v29 = vld [vmem:[%s5243_s14 + $0xbb] sm:$0xff]  ;;  %v1127_v58 = vadd.f32 %v5540_v4, %v756_v7 }
 0x181   : > { %v1953_v56 = vpop.f32.mrf.mxu1  ;;  %v7267_v4 = vld [vmem:[#allocation2_spill] sm:$0xff] }
 0x182   : > { %v2054_v19 = vadd.f32 %v1950_v44, %v1744_v6  ;;  %4574 = vmatmul.msk.f32.gmra.mxu3 %vm374_vm1, %v5525_v60  ;;  %4688 = vmatmul.msk.f32.gmra.mxu2 %vm374_vm1, %v2107_v28  ;;  %v7270_v7 = vld [vmem:[#allocation10_spill] sm:$0xff] }
 0x183   : > { %4612 = vmatmul.msk.f32.gmra.mxu0 %vm374_vm1, %v1487_v12 }
 0x184   : > { %4650 = vmatmul.msk.f32.gmra.mxu1 %vm374_vm1, %v2105_v54  ;;  %v5957_v22 = vadd.f32 %v2260_v31, %v2054_v19 }
 0x185   : > { %v1333_v40 = vpop.f32.mrf.mxu3  ;;  %v2263_v42 = vpop.f32.mrf.mxu2 }
 0x186   : > { %v1435_v25 = vadd.f32 %v1333_v40, %v1125_v36  ;;  %v1490_v36 = vld [vmem:[%s5243_s14 + $0xc3] sm:$0xff] }
 0x188   : > { %v1745_v39 = vadd.f32 %v1643_v50, %v1435_v25  ;;  %v1646_v60 = vpop.f32.mrf.mxu0  ;;  %v2110_v50 = vld [vmem:[%s5243_s14 + $0xd4] sm:$0xff] }
 0x189   : > { %v1956_v33 = vpop.f32.mrf.mxu1 }
 0x18a   : > { %v2055_v44 = vadd.f32 %v1953_v56, %v1745_v39  ;;  %4575 = vmatmul.msk.f32.gmra.mxu3 %vm374_vm1, %v5544_v9  ;;  %4689 = vmatmul.msk.f32.gmra.mxu2 %vm374_vm1, %v2108_v16  ;;  %v759_v56 = vadd.f32 %v5548_v14, %v5546_v10  ;;  %v2111_v39 = vld [vmem:[%s5243_s14 + $0xdc] sm:$0xff] }
 0x18b   : > { %4613 = vmatmul.msk.f32.gmra.mxu0 %vm374_vm1, %v1488_v3 }
 0x18c   : > { %4651 = vmatmul.msk.f32.gmra.mxu1 %vm374_vm1, %v2106_v43  ;;  %v5969_v54 = vadd.f32 %v2263_v42, %v2055_v44  ;;  %v7266_v42 = vld [vmem:[#allocation6_spill] sm:$0xff] }
 0x18d   : > { %v1336_v51 = vpop.f32.mrf.mxu3  ;;  %v2266_v52 = vpop.f32.mrf.mxu2 }
 0x18e   : > { %v1436_v24 = vadd.f32 %v1336_v51, %v1126_v47 }
 0x190   : > { %v1746_v30 = vadd.f32 %v1646_v60, %v1436_v24  ;;  %v1649_v9 = vpop.f32.mrf.mxu0  ;;  %v7268_v60 = vld [vmem:[#allocation3_spill] sm:$0xff] }
 0x191   : > { %v1959_v31 = vpop.f32.mrf.mxu1 }
 0x192   : > { %v2056_v26 = vadd.f32 %v1956_v33, %v1746_v30  ;;  %4576 = vmatmul.msk.f32.gmra.mxu3 %vm374_vm1, %v5563_v32  ;;  %4690 = vmatmul.msk.f32.gmra.mxu2 %vm374_vm1, %v2109_v46  ;;  %v7269_v33 = vld [vmem:[#allocation4_spill] sm:$0xff] }
 0x193   : > { %4614 = vmatmul.msk.f32.gmra.mxu0 %vm374_vm1, %v1489_v29  ;;  %v762_v3 = vadd.f32 %v7269_v33, %v7268_v60  ;;  %v2113_v60 = vld [vmem:[%s5243_s14 + $0xec] sm:$0xff] }
 0x194   : > { %4652 = vmatmul.msk.f32.gmra.mxu1 %vm374_vm1, %v2107_v28  ;;  %v5981_v43 = vadd.f32 %v2266_v52, %v2056_v26  ;;  %v1128_v28 = vadd.f32 %v7267_v4, %v759_v56  ;;  %v1491_v52 = vld [vmem:[%s5243_s14 + $0xcb] sm:$0xff] }
 0x195   : > { %v1339_v62 = vpop.f32.mrf.mxu3  ;;  %v2269_v63 = vpop.f32.mrf.mxu2  ;;  %v7276_v33 = vld [vmem:[#allocation11_spill] sm:$0xff] }
 0x196   : > { %v1437_v6 = vadd.f32 %v1339_v62, %v1127_v58  ;;  %v2112_v58 = vld [vmem:[%s5243_s14 + $0xe4] sm:$0xff] }
 0x197   : > { %v7272_v62 = vld [vmem:[#allocation7_spill] sm:$0xff] }
 0x198   : > { %v1747_v12 = vadd.f32 %v1649_v9, %v1437_v6  ;;  %v1652_v32 = vpop.f32.mrf.mxu0 }
 0x199   : > { %v1962_v19 = vpop.f32.mrf.mxu1 }
 0x19a   : > { %v2057_v40 = vadd.f32 %v1959_v31, %v1747_v12  ;;  %4577 = vmatmul.msk.f32.gmra.mxu3 %vm374_vm1, %v7266_v42  ;;  %4691 = vmatmul.msk.f32.gmra.mxu2 %vm374_vm1, %v2110_v50 }
 0x19b   : > { %4615 = vmatmul.msk.f32.gmra.mxu0 %vm374_vm1, %v1490_v36 }
 0x19c   : > { %4653 = vmatmul.msk.f32.gmra.mxu1 %vm374_vm1, %v2108_v16  ;;  %v5993_v25 = vadd.f32 %v2269_v63, %v2057_v40  ;;  %v7271_v16 = vld [vmem:[#allocation5_spill] sm:$0xff]  ;;  %v7273_v63 = vld [vmem:[#allocation8_spill] sm:$0xff] }
 0x19d   : > { %v1342_v10 = vpop.f32.mrf.mxu3  ;;  %v2272_v14 = vpop.f32.mrf.mxu2  ;;  %v1129_v30 = vadd.f32 %v7271_v16, %v762_v3  ;;  %v765_v6 = vadd.f32 %v7273_v63, %v7272_v62  ;;  %v7275_v40 = vld [vmem:[#allocation9_spill] sm:$0xff]  ;;  %v7277_v3 = vld [vmem:[#allocation12_spill] sm:$0xff]  ;;  %v1184_v62 = vld [vmem:[%s5243_s14 + $0xe2] sm:$0xff] }
 0x19e   : > { %v1438_v5 = vadd.f32 %v1342_v10, %v1128_v28  ;;  %v2114_v63 = vld [vmem:[%s5243_s14 + $0xf4] sm:$0xff] }
 0x19f   : > { %v1130_v42 = vadd.f32 %v7275_v40, %v765_v6  ;;  %v7279_v6 = vld [vmem:[#allocation15_spill] sm:$0xff] }
 0x1a0   : > { %v1748_v44 = vadd.f32 %v1652_v32, %v1438_v5  ;;  %v1655_v47 = vpop.f32.mrf.mxu0  ;;  %v1492_v32 = vld [vmem:[%s5243_s14 + $0xd3] sm:$0xff] }
 0x1a1   : > { %v1965_v51 = vpop.f32.mrf.mxu1  ;;  %v1183_v5 = vld [vmem:[%s5243_s14 + $0xda] sm:$0xff] }
 0x1a2   : > { %v2058_v24 = vadd.f32 %v1962_v19, %v1748_v44  ;;  %4578 = vmatmul.msk.f32.gmra.mxu3 %vm374_vm1, %v7270_v7  ;;  %4692 = vmatmul.msk.f32.gmra.mxu2 %vm374_vm1, %v2111_v39  ;;  %v768_v44 = vadd.f32 %v7277_v3, %v7276_v33  ;;  %v7278_v7 = vld [vmem:[#allocation13_spill] sm:$0xff] }
 0x1a3   : > { %4616 = vmatmul.msk.f32.gmra.mxu0 %vm374_vm1, %v1491_v52  ;;  %v1493_v52 = vld [vmem:[%s5243_s14 + $0xdb] sm:$0xff] }
 0x1a4   : > { %4654 = vmatmul.msk.f32.gmra.mxu1 %vm374_vm1, %v2109_v46  ;;  %v6005_v9 = vadd.f32 %v2272_v14, %v2058_v24  ;;  %v7274_v46 = vld [vmem:[#allocation14_spill] sm:$0xff]  ;;  %v1131_v16 = vadd.f32 %v7278_v7, %v768_v44  ;;  %v7284_v7 = vld [vmem:[#allocation20_spill] sm:$0xff] }
 0x1a5   : > { %v1345_v31 = vpop.f32.mrf.mxu3  ;;  %v2275_v29 = vpop.f32.mrf.mxu2  ;;  %v2115_v3 = vld [vmem:[%s5243_s14 + $0xfc] sm:$0xff] }
 0x1a6   : > { %v1439_v26 = vadd.f32 %v1345_v31, %v1129_v30  ;;  %v7282_v44 = vld [vmem:[#allocation18_spill] sm:$0xff] }
 0x1a8   : > { %v1749_v56 = vadd.f32 %v1655_v47, %v1439_v26  ;;  %v1658_v12 = vpop.f32.mrf.mxu0 }
 0x1a9   : > { %v1968_v19 = vpop.f32.mrf.mxu1 }
 0x1aa   : > { %v2059_v36 = vadd.f32 %v1965_v51, %v1749_v56  ;;  %4579 = vmatmul.msk.f32.gmra.mxu3 %vm374_vm1, %v7274_v46  ;;  %4693 = vmatmul.msk.f32.gmra.mxu2 %vm374_vm1, %v2112_v58  ;;  %v7280_v56 = vld [vmem:[#allocation16_spill] sm:$0xff] }
 0x1ab   : > { %4617 = vmatmul.msk.f32.gmra.mxu0 %vm374_vm1, %v1492_v32 }
 0x1ac   : > { %4655 = vmatmul.msk.f32.gmra.mxu1 %vm374_vm1, %v2110_v50  ;;  %v6017_v4 = vadd.f32 %v2275_v29, %v2059_v36  ;;  %v1494_v36 = vld [vmem:[%s5243_s14 + $0xe3] sm:$0xff] }
 0x1ad   : > { %v1348_v28 = vpop.f32.mrf.mxu3  ;;  %v2278_v10 = vpop.f32.mrf.mxu2 }
 0x1ae   : > { %v1440_v14 = vadd.f32 %v1348_v28, %v1130_v42 }
 0x1b0   : > { %v1750_v47 = vadd.f32 %v1658_v12, %v1440_v14  ;;  %v1661_v51 = vpop.f32.mrf.mxu0  ;;  %v771_v12 = vadd.f32 %v7280_v56, %v7279_v6  ;;  %v1186_v6 = vld [vmem:[%s5243_s14 + $0xf2] sm:$0xff]  ;;  %v2116_v56 = vld [vmem:[%s5243_s14 + $0x104] sm:$0xff] }
 0x1b1   : > { %v1971_v50 = vpop.f32.mrf.mxu1 }
 0x1b2   : > { %v2060_v24 = vadd.f32 %v1968_v19, %v1750_v47  ;;  %4580 = vmatmul.msk.f32.gmra.mxu3 %vm374_vm1, %v1183_v5  ;;  %4694 = vmatmul.msk.f32.gmra.mxu2 %vm374_vm1, %v2113_v60  ;;  %v1185_v5 = vld [vmem:[%s5243_s14 + $0xea] sm:$0xff] }
 0x1b3   : > { %4618 = vmatmul.msk.f32.gmra.mxu0 %vm374_vm1, %v1493_v52  ;;  %v7283_v47 = vld [vmem:[#allocation19_spill] sm:$0xff] }
 0x1b4   : > { %4656 = vmatmul.msk.f32.gmra.mxu1 %vm374_vm1, %v2111_v39  ;;  %v6029_v30 = vadd.f32 %v2278_v10, %v2060_v24  ;;  %v7281_v39 = vld [vmem:[#allocation17_spill] sm:$0xff] }
 0x1b5   : > { %v1351_v31 = vpop.f32.mrf.mxu3  ;;  %v2281_v29 = vpop.f32.mrf.mxu2  ;;  %v1132_v40 = vadd.f32 %v7281_v39, %v771_v12  ;;  %v7285_v12 = vld [vmem:[#allocation21_spill] sm:$0xff] }
 0x1b6   : > { %v1441_v26 = vadd.f32 %v1351_v31, %v1131_v16  ;;  %v1496_v39 = vld [vmem:[%s5243_s14 + $0xf3] sm:$0xff] }
 0x1b8   : > { %v1751_v32 = vadd.f32 %v1661_v51, %v1441_v26  ;;  %v1664_v19 = vpop.f32.mrf.mxu0  ;;  %v774_v51 = vadd.f32 %v7283_v47, %v7282_v44  ;;  %v1187_v44 = vld [vmem:[%s5243_s14 + $0xfa] sm:$0xff]  ;;  %v2117_v47 = vld [vmem:[%s5243_s14 + $0x10c] sm:$0xff] }
 0x1b9   : > { %v1974_v10 = vpop.f32.mrf.mxu1 }
 0x1ba   : > { %v2061_v46 = vadd.f32 %v1971_v50, %v1751_v32  ;;  %4581 = vmatmul.msk.f32.gmra.mxu3 %vm374_vm1, %v1184_v62  ;;  %4695 = vmatmul.msk.f32.gmra.mxu2 %vm374_vm1, %v2114_v63  ;;  %v1495_v50 = vld [vmem:[%s5243_s14 + $0xeb] sm:$0xff]  ;;  %v1133_v16 = vadd.f32 %v7284_v7, %v774_v51  ;;  %v7286_v32 = vld [vmem:[#allocation22_spill] sm:$0xff] }
 0x1bb   : > { %4619 = vmatmul.msk.f32.gmra.mxu0 %vm374_vm1, %v1494_v36  ;;  %v7288_v51 = vld [vmem:[#allocation24_spill] sm:$0xff]  ;;  %v1497_v7 = vld [vmem:[%s5243_s14 + $0xfb] sm:$0xff] }
 0x1bc   : > { %4657 = vmatmul.msk.f32.gmra.mxu1 %vm374_vm1, %v2112_v58  ;;  %v6041_v42 = vadd.f32 %v2281_v29, %v2061_v46 }
 0x1bd   : > { %v1354_v28 = vpop.f32.mrf.mxu3  ;;  %v2284_v33 = vpop.f32.mrf.mxu2 }
 0x1be   : > { %v1442_v14 = vadd.f32 %v1354_v28, %v1132_v40  ;;  %v7287_v28 = vld [vmem:[#allocation23_spill] sm:$0xff] }
 0x1c0   : > { %v1752_v52 = vadd.f32 %v1664_v19, %v1442_v14  ;;  %v1667_v24 = vpop.f32.mrf.mxu0  ;;  %v777_v19 = vadd.f32 %v7286_v32, %v7285_v12  ;;  %v7291_v12 = vld [vmem:[#allocation27_spill] sm:$0xff]  ;;  %v7292_v32 = vld [vmem:[#allocation28_spill] sm:$0xff] }
 0x1c1   : > { %v1977_v62 = vpop.f32.mrf.mxu1 }
 0x1c2   : > { %v2062_v58 = vadd.f32 %v1974_v10, %v1752_v52  ;;  %4582 = vmatmul.msk.f32.gmra.mxu3 %vm374_vm1, %v1185_v5  ;;  %4696 = vmatmul.msk.f32.gmra.mxu2 %vm374_vm1, %v2115_v3  ;;  %v1134_v10 = vadd.f32 %v7287_v28, %v777_v19  ;;  %v7289_v52 = vld [vmem:[#allocation25_spill] sm:$0xff]  ;;  %v783_v19 = vadd.f32 %v7292_v32, %v7291_v12  ;;  %v7298_v12 = vld [vmem:[#allocation34_spill] sm:$0xff] }
 0x1c3   : > { %4620 = vmatmul.msk.f32.gmra.mxu0 %vm374_vm1, %v1495_v50 }
 0x1c4   : > { %4658 = vmatmul.msk.f32.gmra.mxu1 %vm374_vm1, %v2113_v60  ;;  %v6053_v31 = vadd.f32 %v2284_v33, %v2062_v58 }
 0x1c5   : > { %v1357_v29 = vpop.f32.mrf.mxu3  ;;  %v2287_v40 = vpop.f32.mrf.mxu2 }
 0x1c6   : > { %v1443_v26 = vadd.f32 %v1357_v29, %v1133_v16 }
 0x1c8   : > { %v1753_v36 = vadd.f32 %v1667_v24, %v1443_v26  ;;  %v1670_v46 = vpop.f32.mrf.mxu0  ;;  %v780_v24 = vadd.f32 %v7289_v52, %v7288_v51 }
 0x1ca   : > { %v2063_v60 = vadd.f32 %v1977_v62, %v1753_v36  ;;  %4583 = vmatmul.msk.f32.gmra.mxu3 %vm374_vm1, %v1186_v6  ;;  %4697 = vmatmul.msk.f32.gmra.mxu2 %vm374_vm1, %v2116_v56  ;;  %v1188_v62 = vld [vmem:[%s5243_s14 + $0x102] sm:$0xff]  ;;  %v2118_v6 = vld [vmem:[%s5243_s14 + $0x114] sm:$0xff] }
 0x1cb   : > { %4621 = vmatmul.msk.f32.gmra.mxu0 %vm374_vm1, %v1496_v39  ;;  %v1498_v39 = vld [vmem:[%s5243_s14 + $0x103] sm:$0xff] }
 0x1cc   : > { %4659 = vmatmul.msk.f32.gmra.mxu1 %vm374_vm1, %v2114_v63  ;;  %v6065_v14 = vadd.f32 %v2287_v40, %v2063_v60  ;;  %v7290_v63 = vld [vmem:[#allocation26_spill] sm:$0xff] }
 0x1cd   : > { %v1360_v5 = vpop.f32.mrf.mxu3  ;;  %v1135_v16 = vadd.f32 %v7290_v63, %v780_v24 }
 0x1ce   : > { %v1444_v33 = vadd.f32 %v1360_v5, %v1134_v10  ;;  %v1189_v10 = vld [vmem:[%s5243_s14 + $0x10a] sm:$0xff]  ;;  %v2119_v5 = vld [vmem:[%s5243_s14 + $0x11c] sm:$0xff] }
 0x1d0   : > { %v6071_v50 = vadd.f32 %v1670_v46, %v1444_v33  ;;  %v1673_v58 = vpop.f32.mrf.mxu0  ;;  %v7294_v33 = vld [vmem:[#allocation30_spill] sm:$0xff] }
 0x1d2   : > { %4584 = vmatmul.msk.f32.gmra.mxu3 %vm374_vm1, %v1187_v44  ;;  %4698 = vmatmul.msk.f32.gmra.mxu2 %vm374_vm1, %v2117_v47  ;;  %v7295_v44 = vld [vmem:[#allocation31_spill] sm:$0xff] }
 0x1d3   : > { %4622 = vmatmul.msk.f32.gmra.mxu0 %vm374_vm1, %v1497_v7  ;;  %v786_v51 = vadd.f32 %v7295_v44, %v7294_v33  ;;  %v7300_v33 = vld [vmem:[#allocation36_spill] sm:$0xff]  ;;  %v7301_v44 = vld [vmem:[#allocation37_spill] sm:$0xff] }
 0x1d4   : > { %4660 = vmatmul.msk.f32.gmra.mxu1 %vm374_vm1, %v2115_v3  ;;  %v7293_v3 = vld [vmem:[#allocation29_spill] sm:$0xff] }
 0x1d5   : > { %v1363_v29 = vpop.f32.mrf.mxu3  ;;  %v1136_v40 = vadd.f32 %v7293_v3, %v783_v19 }
 0x1d6   : > { %v1445_v26 = vadd.f32 %v1363_v29, %v1135_v16  ;;  %v1190_v29 = vld [vmem:[%s5243_s14 + $0x112] sm:$0xff] }
 0x1d8   : > { %v6083_v36 = vadd.f32 %v1673_v58, %v1445_v26  ;;  %v1676_v46 = vpop.f32.mrf.mxu0  ;;  %v1499_v58 = vld [vmem:[%s5243_s14 + $0x10b] sm:$0xff] }
 0x1d9   : > { %v2120_v26 = vld [vmem:[%s5243_s14 + $0x124] sm:$0xff] }
 0x1da   : > { %4585 = vmatmul.msk.f32.gmra.mxu3 %vm374_vm1, %v1188_v62  ;;  %4699 = vmatmul.msk.f32.gmra.mxu2 %vm374_vm1, %v2118_v6  ;;  %v7297_v62 = vld [vmem:[#allocation33_spill] sm:$0xff] }
 0x1db   : > { %4623 = vmatmul.msk.f32.gmra.mxu0 %vm374_vm1, %v1498_v39  ;;  %v789_v32 = vadd.f32 %v7298_v12, %v7297_v62  ;;  %v1500_v39 = vld [vmem:[%s5243_s14 + $0x113] sm:$0xff]  ;;  %v7303_v12 = vld [vmem:[#allocation39_spill] sm:$0xff] }
 0x1dc   : > { %4661 = vmatmul.msk.f32.gmra.mxu1 %vm374_vm1, %v2116_v56  ;;  %v7296_v56 = vld [vmem:[#allocation32_spill] sm:$0xff] }
 0x1dd   : > { %v1366_v60 = vpop.f32.mrf.mxu3  ;;  %v1137_v7 = vadd.f32 %v7296_v56, %v786_v51  ;;  %v792_v51 = vadd.f32 %v7301_v44, %v7300_v33  ;;  %v1501_v56 = vld [vmem:[%s5243_s14 + $0x11b] sm:$0xff]  ;;  %v798_v44 = vadd.f32 %v5772_v41, %v5770_v1  ;;  %v801_v1 = vadd.f32 %v5789_v45, %v5787_v59  ;;  %v2709_v45 = vld [vmem:[%s5243_s14 + $0x2e] sm:$0xff] }
 0x1de   : > { %v1446_v28 = vadd.f32 %v1366_v60, %v1136_v40  ;;  %v2122_v62 = vld [vmem:[%s5243_s14 + $0x134] sm:$0xff]  ;;  %v2123_v33 = vld [vmem:[%s5243_s14 + $0x13c] sm:$0xff] }
 0x1e0   : > { %v6095_v52 = vadd.f32 %v1676_v46, %v1446_v28  ;;  %v1679_v24 = vpop.f32.mrf.mxu0  ;;  %v1191_v28 = vld [vmem:[%s5243_s14 + $0x11a] sm:$0xff] }
 0x1e2   : > { %4586 = vmatmul.msk.f32.gmra.mxu3 %vm374_vm1, %v1189_v10  ;;  %4700 = vmatmul.msk.f32.gmra.mxu2 %vm374_vm1, %v2119_v5  ;;  %v2121_v10 = vld [vmem:[%s5243_s14 + $0x12c] sm:$0xff] }
 0x1e3   : > { %4624 = vmatmul.msk.f32.gmra.mxu0 %vm374_vm1, %v1499_v58 }
 0x1e4   : > { %4662 = vmatmul.msk.f32.gmra.mxu1 %vm374_vm1, %v2117_v47  ;;  %v7299_v47 = vld [vmem:[#allocation35_spill] sm:$0xff] }
 0x1e5   : > { %v1369_v63 = vpop.f32.mrf.mxu3  ;;  %v1138_v3 = vadd.f32 %v7299_v47, %v789_v32  ;;  %v7304_v32 = vld [vmem:[#allocation40_spill] sm:$0xff] }
 0x1e6   : > { %v1447_v16 = vadd.f32 %v1369_v63, %v1137_v7 }
 0x1e8   : > { %v6107_v19 = vadd.f32 %v1679_v24, %v1447_v16  ;;  %v1682_v46 = vpop.f32.mrf.mxu0 }
 0x1ea   : > { %4587 = vmatmul.msk.f32.gmra.mxu3 %vm374_vm1, %v1190_v29  ;;  %4701 = vmatmul.msk.f32.gmra.mxu2 %vm374_vm1, %v2120_v26  ;;  %v1192_v29 = vld [vmem:[%s5243_s14 + $0x122] sm:$0xff] }
 0x1eb   : > { %4625 = vmatmul.msk.f32.gmra.mxu0 %vm374_vm1, %v1500_v39 }
 0x1ec   : > { %4663 = vmatmul.msk.f32.gmra.mxu1 %vm374_vm1, %v2118_v6  ;;  %v7302_v6 = vld [vmem:[#allocation38_spill] sm:$0xff] }
 0x1ed   : > { %v1372_v40 = vpop.f32.mrf.mxu3  ;;  %v1139_v7 = vadd.f32 %v7302_v6, %v792_v51 }
 0x1ee   : > { %v1448_v60 = vadd.f32 %v1372_v40, %v1138_v3  ;;  %v1502_v3 = vld [vmem:[%s5243_s14 + $0x123] sm:$0xff] }
 0x1f0   : > { %v6119_v24 = vadd.f32 %v1682_v46, %v1448_v60  ;;  %v1685_v58 = vpop.f32.mrf.mxu0  ;;  %v795_v46 = vadd.f32 %v7304_v32, %v7303_v12  ;;  %v804_v12 = vadd.f32 %v5806_v49, %v5804_v20  ;;  %v2710_v49 = vld [vmem:[%s5243_s14 + $0x36] sm:$0xff] }
 0x1f2   : > { %4588 = vmatmul.msk.f32.gmra.mxu3 %vm374_vm1, %v1191_v28  ;;  %4702 = vmatmul.msk.f32.gmra.mxu2 %vm374_vm1, %v2121_v10  ;;  %v1193_v28 = vld [vmem:[%s5243_s14 + $0x12a] sm:$0xff] }
 0x1f3   : > { %4626 = vmatmul.msk.f32.gmra.mxu0 %vm374_vm1, %v1501_v56  ;;  %v1503_v56 = vld [vmem:[%s5243_s14 + $0x12b] sm:$0xff] }
 0x1f4   : > { %4664 = vmatmul.msk.f32.gmra.mxu1 %vm374_vm1, %v2119_v5  ;;  %v1140_v5 = vadd.f32 %v5765_v48, %v795_v46  ;;  %v1141_v48 = vadd.f32 %v5782_v34, %v798_v44  ;;  %v1143_v46 = vadd.f32 %v5816_v38, %v804_v12  ;;  %v810_v44 = vadd.f32 %v5840_v57, %v5838_v15 }
 0x1f5   : > { %v1375_v63 = vpop.f32.mrf.mxu3  ;;  %v813_v15 = vadd.f32 %v5857_v61, %v5855_v27  ;;  %v816_v27 = vadd.f32 %v5874_v2, %v5872_v17  ;;  %v2714_v2 = vld [vmem:[%s5243_s14 + $0x56] sm:$0xff] }
 0x1f6   : > { %v1449_v16 = vadd.f32 %v1375_v63, %v1139_v7  ;;  %v2398_v7 = vld [vmem:[%s5243_s14 + $0x25] sm:$0xff] }
 0x1f8   : > { %v6131_v39 = vadd.f32 %v1685_v58, %v1449_v16  ;;  %v1688_v47 = vpop.f32.mrf.mxu0  ;;  %v2708_v16 = vld [vmem:[%s5243_s14 + $0x26] sm:$0xff] }
 0x1fa   : > { %4589 = vmatmul.msk.f32.gmra.mxu3 %vm374_vm1, %v1192_v29  ;;  %4703 = vmatmul.msk.f32.gmra.mxu2 %vm374_vm1, %v2122_v62  ;;  %v2399_v62 = vld [vmem:[%s5243_s14 + $0x2d] sm:$0xff] }
 0x1fb   : > { %4627 = vmatmul.msk.f32.gmra.mxu0 %vm374_vm1, %v1502_v3  ;;  %v2400_v3 = vld [vmem:[%s5243_s14 + $0x35] sm:$0xff] }
 0x1fc   : > { %4665 = vmatmul.msk.f32.gmra.mxu1 %vm374_vm1, %v2120_v26 }
 0x1fd   : > { %v1378_v40 = vpop.f32.mrf.mxu3 }
 0x1fe   : > { %v1450_v60 = vadd.f32 %v1378_v40, %v1140_v5  ;;  %v807_v5 = vadd.f32 %v5823_v53, %v5821_v0  ;;  %v2711_v53 = vld [vmem:[%s5243_s14 + $0x3e] sm:$0xff] }
 0x200   : > { %v6143_v51 = vadd.f32 %v1688_v47, %v1450_v60  ;;  %v1691_v58 = vpop.f32.mrf.mxu0  ;;  %v1144_v60 = vadd.f32 %v5833_v13, %v807_v5 }
 0x202   : > { %4590 = vmatmul.msk.f32.gmra.mxu3 %vm374_vm1, %v1193_v28  ;;  %4704 = vmatmul.msk.f32.gmra.mxu2 %vm374_vm1, %v2123_v33  ;;  %v2401_v33 = vld [vmem:[%s5243_s14 + $0x3d] sm:$0xff] }
 0x203   : > { %4628 = vmatmul.msk.f32.gmra.mxu0 %vm374_vm1, %v1503_v56  ;;  %v1145_v56 = vadd.f32 %v5850_v37, %v810_v44  ;;  %v1146_v37 = vadd.f32 %v5867_v11, %v813_v15  ;;  %v1147_v11 = vadd.f32 %v5884_v23, %v816_v27  ;;  %v2717_v27 = vld [vmem:[%s5243_s14 + $0x6e] sm:$0xff] }
 0x204   : > { %4666 = vmatmul.msk.f32.gmra.mxu1 %vm374_vm1, %v2121_v10  ;;  %v1142_v10 = vadd.f32 %v5799_v55, %v801_v1  ;;  %v2712_v1 = vld [vmem:[%s5243_s14 + $0x46] sm:$0xff] }
 0x205   : > { %v1381_v26 = vpop.f32.mrf.mxu3 }
 0x206   : > { %v1451_v6 = vadd.f32 %v1381_v26, %v1141_v48  ;;  %v6187_v48 = vpop.f32.mrf.mxu1 }
 0x208   : > { %v6154_v41 = vadd.f32 %v1691_v58, %v1451_v6  ;;  %v1694_v63 = vpop.f32.mrf.mxu0  ;;  %v2402_v6 = vld [vmem:[%s5243_s14 + $0x45] sm:$0xff] }
 0x20a   : > { %4707 = vmatmul.msk.f32.vlgmr.msra.gmra.mxu3 %vm374_vm1, %v2398_v7 }
 0x20b   : > { %4745 = vmatmul.msk.f32.vlgmr.msra.gmra.mxu0 %vm374_vm1, %v2708_v16 }
 0x20d   : > { %v1384_v29 = vpop.f32.mrf.mxu3 }
 0x20e   : > { %v1452_v34 = vadd.f32 %v1384_v29, %v1142_v10  ;;  %v6198_v10 = vpop.f32.mrf.mxu1  ;;  %v2403_v29 = vld [vmem:[%s5243_s14 + $0x4d] sm:$0xff] }
 0x210   : > { %v6163_v32 = vadd.f32 %v1694_v63, %v1452_v34  ;;  %v1697_v59 = vpop.f32.mrf.mxu0 }
 0x212   : > { %4708 = vmatmul.msk.f32.gmra.mxu3 %vm374_vm1, %v2399_v62  ;;  %v2713_v62 = vld [vmem:[%s5243_s14 + $0x4e] sm:$0xff] }
 0x213   : > { %4746 = vmatmul.msk.f32.gmra.mxu0 %vm374_vm1, %v2709_v45  ;;  %v2404_v45 = vld [vmem:[%s5243_s14 + $0x55] sm:$0xff] }
 0x215   : > { %v1387_v47 = vpop.f32.mrf.mxu3 }
 0x216   : > { %v1453_v55 = vadd.f32 %v1387_v47, %v1143_v46  ;;  %v7306_v46 = vld [vmem:[#allocation49_spill] sm:$0xff] }
 0x217   : > { %v819_v47 = vadd.f32 %v7306_v46, %v5889_v21 }
 0x218   : > { %v6172_v40 = vadd.f32 %v1697_v59, %v1453_v55  ;;  %v1700_v20 = vpop.f32.mrf.mxu0 }
 0x219   : > { %v1148_v23 = vadd.f32 %v5901_v35, %v819_v47  ;;  %v7309_v35 = vld [vmem:[#allocation41_spill] sm:$0xff] }
 0x21a   : > { %4709 = vmatmul.msk.f32.gmra.mxu3 %vm374_vm1, %v2400_v3  ;;  %v6215_v3 = vpop.f32.mrf.mxu1  ;;  %v2718_v47 = vld [vmem:[%s5243_s14 + $0x76] sm:$0xff] }
 0x21b   : > { %4747 = vmatmul.msk.f32.gmra.mxu0 %vm374_vm1, %v2710_v49  ;;  %v2405_v49 = vld [vmem:[%s5243_s14 + $0x5d] sm:$0xff] }
 0x21d   : > { %v1390_v28 = vpop.f32.mrf.mxu3 }
 0x21e   : > { %v1454_v38 = vadd.f32 %v1390_v28, %v1144_v60  ;;  %v2715_v28 = vld [vmem:[%s5243_s14 + $0x5e] sm:$0xff] }
 0x220   : > { %v6181_v58 = vadd.f32 %v1700_v20, %v1454_v38  ;;  %v1703_v0 = vpop.f32.mrf.mxu0 }
 0x222   : > { %4710 = vmatmul.msk.f32.gmra.mxu3 %vm374_vm1, %v2401_v33  ;;  %v6225_v38 = vpop.f32.mrf.mxu1  ;;  %v6228_v33 = vpop.f32.mrf.mxu2 }
 0x223   : > { %4748 = vmatmul.msk.f32.gmra.mxu0 %vm374_vm1, %v2711_v53  ;;  %v2406_v53 = vld [vmem:[%s5243_s14 + $0x65] sm:$0xff] }
 0x225   : > { %v1393_v13 = vpop.f32.mrf.mxu3 }
 0x226   : > { %v1455_v26 = vadd.f32 %v1393_v13, %v1145_v56 }
 0x228   : > { %v6192_v57 = vadd.f32 %v1703_v0, %v1455_v26  ;;  %v1706_v7 = vpop.f32.mrf.mxu0  ;;  %v2716_v26 = vld [vmem:[%s5243_s14 + $0x66] sm:$0xff] }
 0x22a   : > { %4711 = vmatmul.msk.f32.gmra.mxu3 %vm374_vm1, %v2402_v6  ;;  %v6237_v6 = vpop.f32.mrf.mxu1 }
 0x22b   : > { %4749 = vmatmul.msk.f32.gmra.mxu0 %vm374_vm1, %v2712_v1 }
 0x22d   : > { %v1396_v63 = vpop.f32.mrf.mxu3 }
 0x22e   : > { %v1456_v16 = vadd.f32 %v1396_v63, %v1146_v37  ;;  %v6240_v37 = vpop.f32.mrf.mxu2  ;;  %v2407_v63 = vld [vmem:[%s5243_s14 + $0x6d] sm:$0xff] }
 0x230   : > { %v6203_v61 = vadd.f32 %v1706_v7, %v1456_v16  ;;  %v1709_v34 = vpop.f32.mrf.mxu0  ;;  %v7311_v7 = vld [vmem:[#allocation42_spill] sm:$0xff] }
 0x232   : > { %7305 = vst [vmem:[#allocation6_spill] sm:$0xff] %v6203_v61  ;;  %4712 = vmatmul.msk.f32.gmra.mxu3 %vm374_vm1, %v2403_v29  ;;  %v2419_v61 = vld [vmem:[%s5243_s14 + $0xcd] sm:$0xff] }
 0x233   : > { %4750 = vmatmul.msk.f32.gmra.mxu0 %vm374_vm1, %v2713_v62  ;;  %v7313_v62 = vld [vmem:[#allocation43_spill] sm:$0xff] }
 0x235   : > { %v1399_v12 = vpop.f32.mrf.mxu3 }
 0x236   : > { %v1457_v59 = vadd.f32 %v1399_v12, %v1147_v11  ;;  %v6249_v12 = vpop.f32.mrf.mxu1 }
 0x238   : > { %v6212_v55 = vadd.f32 %v1709_v34, %v1457_v59  ;;  %v1712_v17 = vpop.f32.mrf.mxu0  ;;  %v2408_v59 = vld [vmem:[%s5243_s14 + $0x75] sm:$0xff] }
 0x23a   : > { %7307 = vst [vmem:[#allocation2_spill] sm:$0xff] %v6212_v55  ;;  %4713 = vmatmul.msk.f32.gmra.mxu3 %vm374_vm1, %v2404_v45 }
 0x23b   : > { %4751 = vmatmul.msk.f32.gmra.mxu0 %vm374_vm1, %v2714_v2 }
 0x23d   : > { %v1402_v5 = vpop.f32.mrf.mxu3 }
 0x23e   : > { %v1458_v20 = vadd.f32 %v1402_v5, %v1148_v23  ;;  %v7315_v23 = vld [vmem:[#allocation44_spill] sm:$0xff] }
 0x240   : > { %v6221_v60 = vadd.f32 %v1712_v17, %v1458_v20  ;;  %v1715_v21 = vpop.f32.mrf.mxu0  ;;  %v6255_v17 = vpop.f32.mrf.mxu2  ;;  %v2409_v20 = vld [vmem:[%s5243_s14 + $0x7d] sm:$0xff] }
 0x242   : > { %7308 = vst [vmem:[#allocation3_spill] sm:$0xff] %v6221_v60  ;;  %4714 = vmatmul.msk.f32.gmra.mxu3 %vm374_vm1, %v2405_v49 }
 0x243   : > { %4752 = vmatmul.msk.f32.gmra.mxu0 %vm374_vm1, %v2715_v28  ;;  %v2719_v28 = vld [vmem:[%s5243_s14 + $0x7e] sm:$0xff] }
 0x245   : > { %v1405_v44 = vpop.f32.mrf.mxu3 }
 0x246   : > { %v1459_v0 = vadd.f32 %v1405_v44, %v7309_v35  ;;  %v6264_v44 = vpop.f32.mrf.mxu1 }
 0x248   : > { %v6232_v56 = vadd.f32 %v1715_v21, %v1459_v0  ;;  %v1718_v13 = vpop.f32.mrf.mxu0  ;;  %v6267_v35 = vpop.f32.mrf.mxu2 }
 0x24a   : > { %7310 = vst [vmem:[#allocation4_spill] sm:$0xff] %v6232_v56  ;;  %4715 = vmatmul.msk.f32.gmra.mxu3 %vm374_vm1, %v2406_v53  ;;  %v7317_v53 = vld [vmem:[#allocation45_spill] sm:$0xff] }
 0x24b   : > { %4753 = vmatmul.msk.f32.gmra.mxu0 %vm374_vm1, %v2716_v26  ;;  %v2410_v26 = vld [vmem:[%s5243_s14 + $0x85] sm:$0xff] }
 0x24d   : > { %v1408_v15 = vpop.f32.mrf.mxu3 }
 0x24e   : > { %v1460_v1 = vadd.f32 %v1408_v15, %v7311_v7 }
 0x250   : > { %v6243_v16 = vadd.f32 %v1718_v13, %v1460_v1  ;;  %v1721_v29 = vpop.f32.mrf.mxu0  ;;  %v2720_v1 = vld [vmem:[%s5243_s14 + $0x86] sm:$0xff] }
 0x252   : > { %7312 = vst [vmem:[#allocation10_spill] sm:$0xff] %v6243_v16  ;;  %4716 = vmatmul.msk.f32.gmra.mxu3 %vm374_vm1, %v2407_v63  ;;  %v6276_v63 = vpop.f32.mrf.mxu1  ;;  %v2727_v16 = vld [vmem:[%s5243_s14 + $0xbe] sm:$0xff] }
 0x253   : > { %4754 = vmatmul.msk.f32.gmra.mxu0 %vm374_vm1, %v2717_v27 }
 0x255   : > { %v1411_v34 = vpop.f32.mrf.mxu3 }
 0x256   : > { %v1461_v11 = vadd.f32 %v1411_v34, %v7313_v62  ;;  %v7319_v34 = vld [vmem:[#allocation46_spill] sm:$0xff] }
 0x258   : > { %v6252_v45 = vadd.f32 %v1721_v29, %v1461_v11  ;;  %v1724_v46 = vpop.f32.mrf.mxu0  ;;  %v6279_v29 = vpop.f32.mrf.mxu2  ;;  %v2411_v11 = vld [vmem:[%s5243_s14 + $0x8d] sm:$0xff] }
 0x25a   : > { %7314 = vst [vmem:[#allocation5_spill] sm:$0xff] %v6252_v45  ;;  %4717 = vmatmul.msk.f32.gmra.mxu3 %vm374_vm1, %v2408_v59 }
 0x25b   : > { %4755 = vmatmul.msk.f32.gmra.mxu0 %vm374_vm1, %v2718_v47  ;;  %v2721_v47 = vld [vmem:[%s5243_s14 + $0x8e] sm:$0xff] }
 0x25d   : > { %v1414_v2 = vpop.f32.mrf.mxu3 }
 0x25e   : > { %v1462_v5 = vadd.f32 %v1414_v2, %v7315_v23  ;;  %v6288_v2 = vpop.f32.mrf.mxu1 }
 0x260   : > { %v6261_v49 = vadd.f32 %v1724_v46, %v1462_v5  ;;  %v1727_v21 = vpop.f32.mrf.mxu0  ;;  %v7321_v5 = vld [vmem:[#allocation47_spill] sm:$0xff] }
 0x262   : > { %7316 = vst [vmem:[#allocation7_spill] sm:$0xff] %v6261_v49  ;;  %4718 = vmatmul.msk.f32.gmra.mxu3 %vm374_vm1, %v2409_v20 }
 0x263   : > { %4756 = vmatmul.msk.f32.gmra.mxu0 %vm374_vm1, %v2719_v28  ;;  %v2412_v28 = vld [vmem:[%s5243_s14 + $0x95] sm:$0xff] }
 0x265   : > { %v1417_v0 = vpop.f32.mrf.mxu3 }
 0x266   : > { %v1463_v13 = vadd.f32 %v1417_v0, %v7317_v53 }
 0x268   : > { %v6272_v15 = vadd.f32 %v1727_v21, %v1463_v13  ;;  %v1730_v7 = vpop.f32.mrf.mxu0  ;;  %v6291_v21 = vpop.f32.mrf.mxu2  ;;  %v2722_v13 = vld [vmem:[%s5243_s14 + $0x96] sm:$0xff] }
 0x26a   : > { %7318 = vst [vmem:[#allocation8_spill] sm:$0xff] %v6272_v15  ;;  %4719 = vmatmul.msk.f32.gmra.mxu3 %vm374_vm1, %v2410_v26  ;;  %v2726_v15 = vld [vmem:[%s5243_s14 + $0xb6] sm:$0xff] }
 0x26b   : > { %4757 = vmatmul.msk.f32.gmra.mxu0 %vm374_vm1, %v2720_v1 }
 0x26d   : > { %v1420_v27 = vpop.f32.mrf.mxu3 }
 0x26e   : > { %v1464_v62 = vadd.f32 %v1420_v27, %v7319_v34  ;;  %v6300_v27 = vpop.f32.mrf.mxu1  ;;  %v2413_v34 = vld [vmem:[%s5243_s14 + $0x9d] sm:$0xff] }
 0x270   : > { %v6283_v59 = vadd.f32 %v1730_v7, %v1464_v62  ;;  %v1733_v46 = vpop.f32.mrf.mxu0  ;;  %v7323_v7 = vld [vmem:[#allocation48_spill] sm:$0xff] }
 0x272   : > { %7320 = vst [vmem:[#allocation14_spill] sm:$0xff] %v6283_v59  ;;  %4720 = vmatmul.msk.f32.gmra.mxu3 %vm374_vm1, %v2411_v11 }
 0x273   : > { %4758 = vmatmul.msk.f32.gmra.mxu0 %vm374_vm1, %v2721_v47  ;;  %v2723_v47 = vld [vmem:[%s5243_s14 + $0x9e] sm:$0xff] }
 0x275   : > { %v1423_v23 = vpop.f32.mrf.mxu3 }
 0x276   : > { %v1465_v20 = vadd.f32 %v1423_v23, %v7321_v5  ;;  %v7325_v5 = vld [vmem:[#allocation50_spill] sm:$0xff] }
 0x278   : > { %v6294_v0 = vadd.f32 %v1733_v46, %v1465_v20  ;;  %v1736_v53 = vpop.f32.mrf.mxu0  ;;  %v6306_v46 = vpop.f32.mrf.mxu2 }
 0x27a   : > { %7322 = vst [vmem:[#allocation9_spill] sm:$0xff] %v6294_v0  ;;  %4721 = vmatmul.msk.f32.gmra.mxu3 %vm374_vm1, %v2412_v28  ;;  %v2414_v28 = vld [vmem:[%s5243_s14 + $0xa5] sm:$0xff] }
 0x27b   : > { %4759 = vmatmul.msk.f32.gmra.mxu0 %vm374_vm1, %v2722_v13 }
 0x27d   : > { %v1426_v26 = vpop.f32.mrf.mxu3 }
 0x27e   : > { %v1466_v1 = vadd.f32 %v1426_v26, %v7323_v7  ;;  %v6315_v7 = vpop.f32.mrf.mxu1 }
 0x280   : > { %v6303_v62 = vadd.f32 %v1736_v53, %v1466_v1  ;;  %v1739_v11 = vpop.f32.mrf.mxu0  ;;  %v2724_v53 = vld [vmem:[%s5243_s14 + $0xa6] sm:$0xff]  ;;  %v6318_v1 = vpop.f32.mrf.mxu2 }
 0x282   : > { %7324 = vst [vmem:[#allocation11_spill] sm:$0xff] %v6303_v62  ;;  %4722 = vmatmul.msk.f32.gmra.mxu3 %vm374_vm1, %v2413_v34  ;;  %v2416_v62 = vld [vmem:[%s5243_s14 + $0xb5] sm:$0xff] }
 0x283   : > { %4760 = vmatmul.msk.f32.gmra.mxu0 %vm374_vm1, %v2723_v47 }
 0x285   : > { %v1429_v23 = vpop.f32.mrf.mxu3 }
 0x286   : > { %v1467_v20 = vadd.f32 %v1429_v23, %v7325_v5  ;;  %v6325_v23 = vld [vmem:[%s7209_s3] ss:$0 sm:$0xff] }
 0x288   : > { %v6312_v13 = vadd.f32 %v1739_v11, %v1467_v20  ;;  %v2874_v26 = vpop.f32.mrf.mxu0  ;;  %v2415_v11 = vld [vmem:[%s5243_s14 + $0xad] sm:$0xff] }
 0x28a   : > { %7326 = vst [vmem:[#allocation12_spill] sm:$0xff] %v6312_v13  ;;  %4723 = vmatmul.msk.f32.gmra.mxu3 %vm374_vm1, %v2414_v28  ;;  %v2725_v13 = vld [vmem:[%s5243_s14 + $0xae] sm:$0xff] }
 0x28b   : > { %4761 = vmatmul.msk.f32.gmra.mxu0 %vm374_vm1, %v2724_v53  ;;  %v6345_v53 = vpop.f32.mrf.mxu2 }
 0x28d   : > { %v2564_v34 = vpop.f32.mrf.mxu3 }
 0x28e   : > { %v2672_v47 = vadd.f32 %v2564_v34, %v5929_v18  ;;  %v6341_v18 = vpop.f32.mrf.mxu1 }
 0x28f   : > { %7327 = vst [vmem:[#allocation13_spill] sm:$0xff] %v6341_v18 }
 0x290   : > { %v2982_v5 = vadd.f32 %v2874_v26, %v2672_v47  ;;  %v2877_v20 = vpop.f32.mrf.mxu0  ;;  %v3419_v47 = vld [vmem:[%s6339_s13] sm:$0xff] }
 0x291   : > { %4782 = vmatmul.msk.f32.vlgmr.msra.gmra.mxu1 %vm374_vm1, %v3419_v47 }
 0x292   : > { %v6331_v28 = vadd.f32 %v6325_v23, %v2982_v5  ;;  %4724 = vmatmul.msk.f32.gmra.mxu3 %vm374_vm1, %v2415_v11 }
 0x293   : > { %4762 = vmatmul.msk.f32.gmra.mxu0 %vm374_vm1, %v2725_v13 }
 0x294   : > { %v3058_v26 = vmin.f32 %v6331_v28, 20.0 }
 0x295   : > { %v2567_v34 = vpop.f32.mrf.mxu3 }
 0x296   : > { %v3094_v5 = vmul.f32 1.442695, %v3058_v26  ;;  %v2673_v11 = vadd.f32 %v2567_v34, %v5945_v8  ;;  %v6358_v49 = vpop.f32.mrf.mxu1  ;;  %v3420_v34 = vld [vmem:[%s6339_s13 + $0x8] sm:$0xff] }
 0x297   : > { %7328 = vst [vmem:[#allocation15_spill] sm:$0xff] %v6358_v49  ;;  %v3238_v49 = vmul.f32 2.0, %v6331_v28 }
 0x298   : > { %4872 = vpow2.f32 %v3094_v5  ;;  %v2983_v0 = vadd.f32 %v2877_v20, %v2673_v11  ;;  %v2880_v59 = vpop.f32.mrf.mxu0 }
 0x299   : > { %4783 = vmatmul.msk.f32.gmra.mxu1 %vm374_vm1, %v3420_v34  ;;  %v3421_v34 = vld [vmem:[%s6339_s13 + $0x10] sm:$0xff] }
 0x29a   : > { %v6353_v13 = vadd.f32 %v6325_v23, %v2983_v0  ;;  %4725 = vmatmul.msk.f32.gmra.mxu3 %vm374_vm1, %v2416_v62  ;;  %v6363_v0 = vpop.f32.mrf.mxu2  ;;  %v2417_v62 = vld [vmem:[%s5243_s14 + $0xbd] sm:$0xff] }
 0x29b   : > { %4763 = vmatmul.msk.f32.gmra.mxu0 %vm374_vm1, %v2726_v15 }
 0x29c   : > { %v3059_v26 = vmin.f32 %v6353_v13, 20.0  ;;  %v3239_v18 = vmul.f32 2.0, %v6353_v13 }
 0x29d   : > { %v2570_v8 = vpop.f32.mrf.mxu3 }
 0x29e   : > { %v4873_v47 = vpop.eup %4872  ;;  %v3096_v5 = vmul.f32 1.442695, %v3059_v26  ;;  %v2674_v20 = vadd.f32 %v2570_v8, %v5957_v22 }
 0x29f   : > { %v3166_v11 = vadd.f32 1.0, %v4873_v47 }
 0x2a0   : > { %4874 = vpow2.f32 %v3096_v5  ;;  %v2984_v45 = vadd.f32 %v2880_v59, %v2674_v20  ;;  %v2883_v15 = vpop.f32.mrf.mxu0  ;;  %v6376_v20 = vpop.f32.mrf.mxu1 }
 0x2a1   : > { %v3202_v56 = vmul.f32 %v3166_v11, %v3166_v11  ;;  %4784 = vmatmul.msk.f32.gmra.mxu1 %vm374_vm1, %v3421_v34  ;;  %7329 = vst [vmem:[#allocation16_spill] sm:$0xff] %v6376_v20  ;;  %v2418_v11 = vld [vmem:[%s5243_s14 + $0xc5] sm:$0xff] }
 0x2a2   : > { %v6368_v60 = vadd.f32 %v6325_v23, %v2984_v45  ;;  %4726 = vmatmul.msk.f32.gmra.mxu3 %vm374_vm1, %v2417_v62  ;;  %v6380_v55 = vpop.f32.mrf.mxu2 }
 0x2a3   : > { %v3274_v26 = vadd.f32 1.0, %v3202_v56  ;;  %4764 = vmatmul.msk.f32.gmra.mxu0 %vm374_vm1, %v2727_v16  ;;  %v2728_v16 = vld [vmem:[%s5243_s14 + $0xc6] sm:$0xff] }
 0x2a4   : > { %v3060_v22 = vmin.f32 %v6368_v60, 20.0 }
 0x2a5   : > { %4876 = vrcp.f32 %v3274_v26  ;;  %v2573_v8 = vpop.f32.mrf.mxu3 }
 0x2a6   : > { %v4875_v47 = vpop.eup %4874  ;;  %v3098_v59 = vmul.f32 1.442695, %v3060_v22  ;;  %v2675_v5 = vadd.f32 %v2573_v8, %v5969_v54 }
 0x2a7   : > { %v3167_v45 = vadd.f32 1.0, %v4875_v47 }
 0x2a8   : > { %4878 = vpow2.f32 %v3098_v59  ;;  %v2985_v56 = vadd.f32 %v2883_v15, %v2675_v5  ;;  %v2886_v62 = vpop.f32.mrf.mxu0  ;;  %v3422_v59 = vld [vmem:[%s6339_s13 + $0x18] sm:$0xff] }
 0x2a9   : > { %v3203_v26 = vmul.f32 %v3167_v45, %v3167_v45  ;;  %4785 = vmatmul.msk.f32.gmra.mxu1 %vm374_vm1, %v3422_v59  ;;  %v3423_v59 = vld [vmem:[%s6339_s13 + $0x20] sm:$0xff] }
 0x2aa   : > { %v6384_v22 = vadd.f32 %v6325_v23, %v2985_v56  ;;  %4727 = vmatmul.msk.f32.gmra.mxu3 %vm374_vm1, %v2418_v11 }
 0x2ab   : > { %v4877_v54 = vpop.eup %4876  ;;  %v3275_v8 = vadd.f32 1.0, %v3203_v26  ;;  %4765 = vmatmul.msk.f32.gmra.mxu0 %vm374_vm1, %v2728_v16  ;;  %v2729_v16 = vld [vmem:[%s5243_s14 + $0xce] sm:$0xff] }
 0x2ac   : > { %v3346_v34 = vmul.f32 %v4877_v54, %v3238_v49  ;;  %v3061_v15 = vmin.f32 %v6384_v22, 20.0  ;;  %v6396_v54 = vpop.f32.mrf.mxu1 }
 0x2ad   : > { %4880 = vrcp.f32 %v3275_v8  ;;  %v2576_v47 = vpop.f32.mrf.mxu3 }
 0x2ae   : > { %v4879_v5 = vpop.eup %4878  ;;  %v3382_v45 = vsub.f32 %v6331_v28, %v3346_v34  ;;  %v3100_v20 = vmul.f32 1.442695, %v3061_v15  ;;  %v2676_v56 = vadd.f32 %v2576_v47, %v5981_v43  ;;  %v6403_v34 = vpop.f32.mrf.mxu2 }
 0x2af   : > { %v3168_v11 = vadd.f32 1.0, %v4879_v5 }
 0x2b0   : > { %4882 = vpow2.f32 %v3100_v20  ;;  %v2986_v26 = vadd.f32 %v2886_v62, %v2676_v56  ;;  %4819 = vmatmul.msk.f32.vlgmr.msra.gmra.mxu2 %vm374_vm1, %v3382_v45  ;;  %v2889_v49 = vpop.f32.mrf.mxu0 }
 0x2b1   : > { %v3204_v8 = vmul.f32 %v3168_v11, %v3168_v11  ;;  %4786 = vmatmul.msk.f32.gmra.mxu1 %vm374_vm1, %v3423_v59 }
 0x2b2   : > { %v6400_v28 = vadd.f32 %v6325_v23, %v2986_v26  ;;  %4728 = vmatmul.msk.f32.gmra.mxu3 %vm374_vm1, %v2419_v61  ;;  %v2420_v26 = vld [vmem:[%s5243_s14 + $0xd5] sm:$0xff] }
 0x2b3   : > { %v4881_v43 = vpop.eup %4880  ;;  %v3276_v20 = vadd.f32 1.0, %v3204_v8  ;;  %4766 = vmatmul.msk.f32.gmra.mxu0 %vm374_vm1, %v2729_v16 }
 0x2b4   : > { %v3062_v62 = vmin.f32 %v6400_v28, 20.0  ;;  %v3347_v15 = vmul.f32 %v4881_v43, %v3239_v18  ;;  %v2730_v18 = vld [vmem:[%s5243_s14 + $0xd6] sm:$0xff] }
 0x2b5   : > { %4884 = vrcp.f32 %v3276_v20  ;;  %v2579_v47 = vpop.f32.mrf.mxu3  ;;  %v3240_v20 = vmul.f32 2.0, %v6368_v60 }
 0x2b6   : > { %v4883_v5 = vpop.eup %4882  ;;  %v3102_v45 = vmul.f32 1.442695, %v3062_v62  ;;  %v2677_v56 = vadd.f32 %v2579_v47, %v5993_v25  ;;  %v3383_v61 = vsub.f32 %v6353_v13, %v3347_v15  ;;  %v6419_v13 = vpop.f32.mrf.mxu1 }
 0x2b7   : > { %v3169_v11 = vadd.f32 1.0, %v4883_v5  ;;  %7330 = vst [vmem:[#allocation17_spill] sm:$0xff] %v6419_v13  ;;  %v6423_v59 = vpop.f32.mrf.mxu2  ;;  %v3241_v13 = vmul.f32 2.0, %v6384_v22 }
 0x2b8   : > { %4886 = vpow2.f32 %v3102_v45  ;;  %v2987_v8 = vadd.f32 %v2889_v49, %v2677_v56  ;;  %4820 = vmatmul.msk.f32.gmra.mxu2 %vm374_vm1, %v3383_v61  ;;  %v2892_v16 = vpop.f32.mrf.mxu0  ;;  %v3424_v45 = vld [vmem:[%s6339_s13 + $0x28] sm:$0xff] }
 0x2b9   : > { %v3205_v43 = vmul.f32 %v3169_v11, %v3169_v11  ;;  %4787 = vmatmul.msk.f32.gmra.mxu1 %vm374_vm1, %v3424_v45 }
 0x2ba   : > { %v6416_v62 = vadd.f32 %v6325_v23, %v2987_v8  ;;  %4729 = vmatmul.msk.f32.gmra.mxu3 %vm374_vm1, %v2420_v26 }
 0x2bb   : > { %v4885_v25 = vpop.eup %4884  ;;  %v3277_v15 = vadd.f32 1.0, %v3205_v43  ;;  %4767 = vmatmul.msk.f32.gmra.mxu0 %vm374_vm1, %v2730_v18  ;;  %v2421_v43 = vld [vmem:[%s5243_s14 + $0xdd] sm:$0xff] }
 0x2bc   : > { %v3063_v49 = vmin.f32 %v6416_v62, 20.0  ;;  %v3348_v47 = vmul.f32 %v4885_v25, %v3240_v20  ;;  %v2731_v25 = vld [vmem:[%s5243_s14 + $0xde] sm:$0xff] }
 0x2bd   : > { %4888 = vrcp.f32 %v3277_v15  ;;  %v2582_v5 = vpop.f32.mrf.mxu3 }
 0x2be   : > { %v4887_v56 = vpop.eup %4886  ;;  %v3104_v61 = vmul.f32 1.442695, %v3063_v49  ;;  %v2678_v11 = vadd.f32 %v2582_v5, %v6005_v9  ;;  %v3384_v26 = vsub.f32 %v6368_v60, %v3348_v47  ;;  %v6439_v5 = vpop.f32.mrf.mxu1 }
 0x2bf   : > { %v3170_v8 = vadd.f32 1.0, %v4887_v56  ;;  %v3425_v56 = vld [vmem:[%s6339_s13 + $0x30] sm:$0xff] }
 0x2c0   : > { %4890 = vpow2.f32 %v3104_v61  ;;  %v2988_v18 = vadd.f32 %v2892_v16, %v2678_v11  ;;  %4821 = vmatmul.msk.f32.gmra.mxu2 %vm374_vm1, %v3384_v26  ;;  %v2895_v20 = vpop.f32.mrf.mxu0 }
 0x2c1   : > { %v3206_v15 = vmul.f32 %v3170_v8, %v3170_v8  ;;  %4788 = vmatmul.msk.f32.gmra.mxu1 %vm374_vm1, %v3425_v56 }
 0x2c2   : > { %v6434_v49 = vadd.f32 %v6325_v23, %v2988_v18  ;;  %4730 = vmatmul.msk.f32.gmra.mxu3 %vm374_vm1, %v2421_v43  ;;  %v6445_v43 = vpop.f32.mrf.mxu2 }
 0x2c3   : > { %v4889_v9 = vpop.eup %4888  ;;  %v3278_v60 = vadd.f32 1.0, %v3206_v15  ;;  %4768 = vmatmul.msk.f32.gmra.mxu0 %vm374_vm1, %v2731_v25  ;;  %v2422_v25 = vld [vmem:[%s5243_s14 + $0xe5] sm:$0xff] }
 0x2c4   : > { %v3064_v16 = vmin.f32 %v6434_v49, 20.0  ;;  %v3349_v47 = vmul.f32 %v4889_v9, %v3241_v13  ;;  %v2732_v9 = vld [vmem:[%s5243_s14 + $0xe6] sm:$0xff] }
 0x2c5   : > { %4892 = vrcp.f32 %v3278_v60  ;;  %v2585_v45 = vpop.f32.mrf.mxu3 }
 0x2c6   : > { %v4891_v61 = vpop.eup %4890  ;;  %v3106_v11 = vmul.f32 1.442695, %v3064_v16  ;;  %v2679_v26 = vadd.f32 %v2585_v45, %v6017_v4  ;;  %v3385_v8 = vsub.f32 %v6384_v22, %v3349_v47  ;;  %v3242_v16 = vmul.f32 2.0, %v6400_v28 }
 0x2c7   : > { %v3171_v18 = vadd.f32 1.0, %v4891_v61  ;;  %v3426_v61 = vld [vmem:[%s6339_s13 + $0x38] sm:$0xff] }
 0x2c8   : > { %4894 = vpow2.f32 %v3106_v11  ;;  %v2989_v13 = vadd.f32 %v2895_v20, %v2679_v26  ;;  %4822 = vmatmul.msk.f32.gmra.mxu2 %vm374_vm1, %v3385_v8  ;;  %v2898_v15 = vpop.f32.mrf.mxu0 }
 0x2c9   : > { %v3207_v60 = vmul.f32 %v3171_v18, %v3171_v18  ;;  %4789 = vmatmul.msk.f32.gmra.mxu1 %vm374_vm1, %v3426_v61 }
 0x2ca   : > { %v6452_v4 = vadd.f32 %v6325_v23, %v2989_v13  ;;  %4731 = vmatmul.msk.f32.gmra.mxu3 %vm374_vm1, %v2422_v25  ;;  %v6461_v25 = vpop.f32.mrf.mxu1 }
 0x2cb   : > { %v4893_v22 = vpop.eup %4892  ;;  %v3279_v47 = vadd.f32 1.0, %v3207_v60  ;;  %4769 = vmatmul.msk.f32.gmra.mxu0 %vm374_vm1, %v2732_v9  ;;  %7331 = vst [vmem:[#allocation18_spill] sm:$0xff] %v6461_v25  ;;  %v2423_v60 = vld [vmem:[%s5243_s14 + $0xed] sm:$0xff]  ;;  %v2424_v25 = vld [vmem:[%s5243_s14 + $0xf5] sm:$0xff] }
 0x2cc   : > { %v3065_v45 = vmin.f32 %v6452_v4, 20.0  ;;  %v3350_v20 = vmul.f32 %v4893_v22, %v3242_v16  ;;  %v2733_v22 = vld [vmem:[%s5243_s14 + $0xee] sm:$0xff] }
 0x2cd   : > { %4896 = vrcp.f32 %v3279_v47  ;;  %v2588_v56 = vpop.f32.mrf.mxu3  ;;  %v6466_v47 = vpop.f32.mrf.mxu2 }
 0x2ce   : > { %v4895_v11 = vpop.eup %4894  ;;  %v3108_v26 = vmul.f32 1.442695, %v3065_v45  ;;  %v2680_v8 = vadd.f32 %v2588_v56, %v6029_v30  ;;  %v3386_v18 = vsub.f32 %v6400_v28, %v3350_v20  ;;  %v3243_v30 = vmul.f32 2.0, %v6416_v62 }
 0x2cf   : > { %v3172_v13 = vadd.f32 1.0, %v4895_v11 }
 0x2d0   : > { %4898 = vpow2.f32 %v3108_v26  ;;  %v2990_v9 = vadd.f32 %v2898_v15, %v2680_v8  ;;  %4823 = vmatmul.msk.f32.gmra.mxu2 %vm374_vm1, %v3386_v18  ;;  %v2901_v16 = vpop.f32.mrf.mxu0  ;;  %v3427_v26 = vld [vmem:[%s6339_s13 + $0x40] sm:$0xff] }
 0x2d1   : > { %v3208_v45 = vmul.f32 %v3172_v13, %v3172_v13  ;;  %4790 = vmatmul.msk.f32.gmra.mxu1 %vm374_vm1, %v3427_v26 }
 0x2d2   : > { %v6470_v28 = vadd.f32 %v6325_v23, %v2990_v9  ;;  %4732 = vmatmul.msk.f32.gmra.mxu3 %vm374_vm1, %v2423_v60 }
 0x2d3   : > { %v4897_v20 = vpop.eup %4896  ;;  %v3280_v56 = vadd.f32 1.0, %v3208_v45  ;;  %4770 = vmatmul.msk.f32.gmra.mxu0 %vm374_vm1, %v2733_v22 }
 0x2d4   : > { %v3066_v15 = vmin.f32 %v6470_v28, 20.0  ;;  %v3351_v61 = vmul.f32 %v4897_v20, %v3243_v30  ;;  %v2734_v30 = vld [vmem:[%s5243_s14 + $0xf6] sm:$0xff]  ;;  %v6482_v20 = vpop.f32.mrf.mxu1 }
 0x2d5   : > { %4900 = vrcp.f32 %v3280_v56  ;;  %v2591_v11 = vpop.f32.mrf.mxu3  ;;  %7332 = vst [vmem:[#allocation19_spill] sm:$0xff] %v6482_v20  ;;  %v2425_v20 = vld [vmem:[%s5243_s14 + $0xfd] sm:$0xff] }
 0x2d6   : > { %v4899_v8 = vpop.eup %4898  ;;  %v3110_v18 = vmul.f32 1.442695, %v3066_v15  ;;  %v2681_v13 = vadd.f32 %v2591_v11, %v6041_v42  ;;  %v3387_v9 = vsub.f32 %v6416_v62, %v3351_v61  ;;  %v3244_v15 = vmul.f32 2.0, %v6434_v49  ;;  %v6489_v61 = vpop.f32.mrf.mxu2 }
 0x2d7   : > { %v3173_v60 = vadd.f32 1.0, %v4899_v8 }
 0x2d8   : > { %4902 = vpow2.f32 %v3110_v18  ;;  %v2991_v45 = vadd.f32 %v2901_v16, %v2681_v13  ;;  %4824 = vmatmul.msk.f32.gmra.mxu2 %vm374_vm1, %v3387_v9  ;;  %v2904_v22 = vpop.f32.mrf.mxu0  ;;  %v3428_v18 = vld [vmem:[%s6339_s13 + $0x48] sm:$0xff] }
 0x2d9   : > { %v3209_v56 = vmul.f32 %v3173_v60, %v3173_v60  ;;  %4791 = vmatmul.msk.f32.gmra.mxu1 %vm374_vm1, %v3428_v18 }
 0x2da   : > { %v6486_v42 = vadd.f32 %v6325_v23, %v2991_v45  ;;  %4733 = vmatmul.msk.f32.gmra.mxu3 %vm374_vm1, %v2424_v25 }
 0x2db   : > { %v4901_v62 = vpop.eup %4900  ;;  %v3281_v16 = vadd.f32 1.0, %v3209_v56  ;;  %4771 = vmatmul.msk.f32.gmra.mxu0 %vm374_vm1, %v2734_v30 }
 0x2dc   : > { %v3067_v11 = vmin.f32 %v6486_v42, 20.0  ;;  %v3352_v26 = vmul.f32 %v4901_v62, %v3244_v15  ;;  %v2735_v15 = vld [vmem:[%s5243_s14 + $0xfe] sm:$0xff] }
 0x2dd   : > { %4904 = vrcp.f32 %v3281_v16  ;;  %v2594_v8 = vpop.f32.mrf.mxu3  ;;  %v3245_v16 = vmul.f32 2.0, %v6452_v4 }
 0x2de   : > { %v4903_v13 = vpop.eup %4902  ;;  %v3112_v9 = vmul.f32 1.442695, %v3067_v11  ;;  %v2682_v60 = vadd.f32 %v2594_v8, %v6053_v31  ;;  %v3388_v25 = vsub.f32 %v6434_v49, %v3352_v26  ;;  %v6505_v49 = vpop.f32.mrf.mxu1 }
 0x2df   : > { %v3174_v45 = vadd.f32 1.0, %v4903_v13  ;;  %7333 = vst [vmem:[#allocation20_spill] sm:$0xff] %v6505_v49  ;;  %v6509_v18 = vpop.f32.mrf.mxu2 }
 0x2e0   : > { %4906 = vpow2.f32 %v3112_v9  ;;  %v2992_v56 = vadd.f32 %v2904_v22, %v2682_v60  ;;  %4825 = vmatmul.msk.f32.gmra.mxu2 %vm374_vm1, %v3388_v25  ;;  %v2907_v30 = vpop.f32.mrf.mxu0  ;;  %v3429_v9 = vld [vmem:[%s6339_s13 + $0x50] sm:$0xff] }
 0x2e1   : > { %v3210_v62 = vmul.f32 %v3174_v45, %v3174_v45  ;;  %4792 = vmatmul.msk.f32.gmra.mxu1 %vm374_vm1, %v3429_v9 }
 0x2e2   : > { %v6502_v11 = vadd.f32 %v6325_v23, %v2992_v56  ;;  %4734 = vmatmul.msk.f32.gmra.mxu3 %vm374_vm1, %v2425_v20 }
 0x2e3   : > { %v4905_v31 = vpop.eup %4904  ;;  %v3282_v26 = vadd.f32 1.0, %v3210_v62  ;;  %4772 = vmatmul.msk.f32.gmra.mxu0 %vm374_vm1, %v2735_v15  ;;  %v2426_v62 = vld [vmem:[%s5243_s14 + $0x105] sm:$0xff]  ;;  %v2064_v15 = vadd.f32 %v6187_v48, %v6071_v50 }
 0x2e4   : > { %v3068_v22 = vmin.f32 %v6502_v11, 20.0  ;;  %v3353_v8 = vmul.f32 %v4905_v31, %v3245_v16 }
 0x2e5   : > { %4908 = vrcp.f32 %v3282_v26  ;;  %v2597_v13 = vpop.f32.mrf.mxu3  ;;  %v2736_v26 = vld [vmem:[%s5243_s14 + $0x106] sm:$0xff]  ;;  %v2374_v50 = vadd.f32 %v6228_v33, %v2064_v15  ;;  %v2065_v15 = vadd.f32 %v6198_v10, %v6083_v36 }
 0x2e6   : > { %v4907_v60 = vpop.eup %4906  ;;  %v3114_v25 = vmul.f32 1.442695, %v3068_v22  ;;  %v2683_v20 = vadd.f32 %v2597_v13, %v6065_v14  ;;  %v3389_v45 = vsub.f32 %v6452_v4, %v3353_v8  ;;  %v3246_v22 = vmul.f32 2.0, %v6470_v28  ;;  %v6528_v13 = vpop.f32.mrf.mxu1  ;;  %v2427_v33 = vld [vmem:[%s5243_s14 + $0x10d] sm:$0xff] }
 0x2e7   : > { %v3175_v56 = vadd.f32 1.0, %v4907_v60  ;;  %v3430_v60 = vld [vmem:[%s6339_s13 + $0x58] sm:$0xff]  ;;  %v2375_v36 = vadd.f32 %v6240_v37, %v2065_v15  ;;  %v2066_v37 = vadd.f32 %v6215_v3, %v6095_v52 }
 0x2e8   : > { %4910 = vpow2.f32 %v3114_v25  ;;  %v2993_v16 = vadd.f32 %v2907_v30, %v2683_v20  ;;  %4826 = vmatmul.msk.f32.gmra.mxu2 %vm374_vm1, %v3389_v45  ;;  %v2910_v31 = vpop.f32.mrf.mxu0 }
 0x2e9   : > { %v3211_v49 = vmul.f32 %v3175_v56, %v3175_v56  ;;  %4793 = vmatmul.msk.f32.gmra.mxu1 %vm374_vm1, %v3430_v60  ;;  %v2376_v3 = vadd.f32 %v6255_v17, %v2066_v37  ;;  %v2739_v37 = vld [vmem:[%s5243_s14 + $0x11e] sm:$0xff] }
 0x2ea   : > { %v6522_v14 = vadd.f32 %v6325_v23, %v2993_v16  ;;  %4735 = vmatmul.msk.f32.gmra.mxu3 %vm374_vm1, %v2426_v62 }
 0x2eb   : > { %v4909_v4 = vpop.eup %4908  ;;  %v3283_v8 = vadd.f32 1.0, %v3211_v49  ;;  %4773 = vmatmul.msk.f32.gmra.mxu0 %vm374_vm1, %v2736_v26  ;;  %v6533_v49 = vpop.f32.mrf.mxu2 }
 0x2ec   : > { %v3069_v48 = vmin.f32 %v6522_v14, 20.0  ;;  %v3354_v30 = vmul.f32 %v4909_v4, %v3246_v22  ;;  %v2737_v22 = vld [vmem:[%s5243_s14 + $0x10e] sm:$0xff] }
 0x2ed   : > { %4912 = vrcp.f32 %v3283_v8  ;;  %v2600_v9 = vpop.f32.mrf.mxu3  ;;  %v3247_v8 = vmul.f32 2.0, %v6486_v42 }
 0x2ee   : > { %v4911_v25 = vpop.eup %4910  ;;  %v3116_v20 = vmul.f32 1.442695, %v3069_v48  ;;  %v2684_v45 = vadd.f32 %v2600_v9, %v2374_v50  ;;  %v3390_v56 = vsub.f32 %v6470_v28, %v3354_v30  ;;  %v3431_v9 = vld [vmem:[%s6339_s13 + $0x60] sm:$0xff] }
 0x2ef   : > { %v3176_v62 = vadd.f32 1.0, %v4911_v25 }
 0x2f0   : > { %4914 = vpow2.f32 %v3116_v20  ;;  %v2994_v16 = vadd.f32 %v2910_v31, %v2684_v45  ;;  %4827 = vmatmul.msk.f32.gmra.mxu2 %vm374_vm1, %v3390_v56  ;;  %v2913_v26 = vpop.f32.mrf.mxu0  ;;  %v6551_v56 = vpop.f32.mrf.mxu1 }
 0x2f1   : > { %v3212_v4 = vmul.f32 %v3176_v62, %v3176_v62  ;;  %4794 = vmatmul.msk.f32.gmra.mxu1 %vm374_vm1, %v3431_v9 }
 0x2f2   : > { %v6542_v28 = vadd.f32 %v6325_v23, %v2994_v16  ;;  %4736 = vmatmul.msk.f32.gmra.mxu3 %vm374_vm1, %v2427_v33  ;;  %v2428_v33 = vld [vmem:[%s5243_s14 + $0x115] sm:$0xff] }
 0x2f3   : > { %v4913_v50 = vpop.eup %4912  ;;  %v3284_v48 = vadd.f32 1.0, %v3212_v4  ;;  %4774 = vmatmul.msk.f32.gmra.mxu0 %vm374_vm1, %v2737_v22  ;;  %v2738_v22 = vld [vmem:[%s5243_s14 + $0x116] sm:$0xff]  ;;  %v6558_v4 = vpop.f32.mrf.mxu2 }
 0x2f4   : > { %v3070_v10 = vmin.f32 %v6542_v28, 20.0  ;;  %v3355_v31 = vmul.f32 %v4913_v50, %v3247_v8 }
 0x2f5   : > { %4916 = vrcp.f32 %v3284_v48  ;;  %v2603_v30 = vpop.f32.mrf.mxu3 }
 0x2f6   : > { %v4915_v60 = vpop.eup %4914  ;;  %v3118_v25 = vmul.f32 1.442695, %v3070_v10  ;;  %v2685_v20 = vadd.f32 %v2603_v30, %v2375_v36  ;;  %v3391_v45 = vsub.f32 %v6486_v42, %v3355_v31  ;;  %v3248_v42 = vmul.f32 2.0, %v6502_v11  ;;  %v3432_v31 = vld [vmem:[%s6339_s13 + $0x68] sm:$0xff] }
 0x2f7   : > { %v3177_v62 = vadd.f32 1.0, %v4915_v60 }
 0x2f8   : > { %4918 = vpow2.f32 %v3118_v25  ;;  %v2995_v15 = vadd.f32 %v2913_v26, %v2685_v20  ;;  %4828 = vmatmul.msk.f32.gmra.mxu2 %vm374_vm1, %v3391_v45  ;;  %v2916_v16 = vpop.f32.mrf.mxu0  ;;  %v2429_v45 = vld [vmem:[%s5243_s14 + $0x11d] sm:$0xff] }
 0x2f9   : > { %v3213_v8 = vmul.f32 %v3177_v62, %v3177_v62  ;;  %4795 = vmatmul.msk.f32.gmra.mxu1 %vm374_vm1, %v3432_v31  ;;  %v2067_v62 = vadd.f32 %v6225_v38, %v6107_v19 }
 0x2fa   : > { %v6562_v50 = vadd.f32 %v6325_v23, %v2995_v15  ;;  %4737 = vmatmul.msk.f32.gmra.mxu3 %vm374_vm1, %v2428_v33  ;;  %v6576_v15 = vpop.f32.mrf.mxu1 }
 0x2fb   : > { %v4917_v48 = vpop.eup %4916  ;;  %v3285_v52 = vadd.f32 1.0, %v3213_v8  ;;  %4775 = vmatmul.msk.f32.gmra.mxu0 %vm374_vm1, %v2738_v22  ;;  %v3249_v8 = vmul.f32 2.0, %v6522_v14  ;;  %v6583_v19 = vpop.f32.mrf.mxu2 }
 0x2fc   : > { %v3071_v26 = vmin.f32 %v6562_v50, 20.0  ;;  %v3356_v36 = vmul.f32 %v4917_v48, %v3248_v42 }
 0x2fd   : > { %4920 = vrcp.f32 %v3285_v52  ;;  %v2606_v10 = vpop.f32.mrf.mxu3 }
 0x2fe   : > { %v4919_v30 = vpop.eup %4918  ;;  %v3120_v9 = vmul.f32 1.442695, %v3071_v26  ;;  %v2686_v60 = vadd.f32 %v2606_v10, %v2376_v3  ;;  %v3392_v25 = vsub.f32 %v6502_v11, %v3356_v36  ;;  %v3433_v26 = vld [vmem:[%s6339_s13 + $0x70] sm:$0xff] }
 0x2ff   : > { %v3178_v20 = vadd.f32 1.0, %v4919_v30 }
 0x300   : > { %4922 = vpow2.f32 %v3120_v9  ;;  %v2996_v17 = vadd.f32 %v2916_v16, %v2686_v60  ;;  %4829 = vmatmul.msk.f32.gmra.mxu2 %vm374_vm1, %v3392_v25  ;;  %v2919_v33 = vpop.f32.mrf.mxu0  ;;  %v2377_v16 = vadd.f32 %v6267_v35, %v2067_v62  ;;  %v2430_v60 = vld [vmem:[%s5243_s14 + $0x125] sm:$0xff]  ;;  %v2068_v25 = vadd.f32 %v6237_v6, %v6119_v24 }
 0x301   : > { %v3214_v22 = vmul.f32 %v3178_v20, %v3178_v20  ;;  %4796 = vmatmul.msk.f32.gmra.mxu1 %vm374_vm1, %v3433_v26 }
 0x302   : > { %v6580_v11 = vadd.f32 %v6325_v23, %v2996_v17  ;;  %4738 = vmatmul.msk.f32.gmra.mxu3 %vm374_vm1, %v2429_v45  ;;  %v2740_v45 = vld [vmem:[%s5243_s14 + $0x126] sm:$0xff]  ;;  %v3250_v17 = vmul.f32 2.0, %v6542_v28  ;;  %v2378_v6 = vadd.f32 %v6279_v29, %v2068_v25  ;;  %v2069_v29 = vadd.f32 %v6249_v12, %v6131_v39 }
 0x303   : > { %v4921_v42 = vpop.eup %4920  ;;  %v3286_v38 = vadd.f32 1.0, %v3214_v22  ;;  %4776 = vmatmul.msk.f32.gmra.mxu0 %vm374_vm1, %v2739_v37  ;;  %v6601_v22 = vpop.f32.mrf.mxu1  ;;  %v3251_v25 = vmul.f32 2.0, %v6562_v50 }
 0x304   : > { %v3072_v48 = vmin.f32 %v6580_v11, 20.0  ;;  %v3357_v52 = vmul.f32 %v4921_v42, %v3249_v8  ;;  %v6606_v42 = vpop.f32.mrf.mxu2  ;;  %v2379_v12 = vadd.f32 %v6291_v21, %v2069_v29  ;;  %v2070_v21 = vadd.f32 %v6264_v44, %v6143_v51 }
 0x305   : > { %4924 = vrcp.f32 %v3286_v38  ;;  %v2609_v3 = vpop.f32.mrf.mxu3 }
 0x306   : > { %v4923_v36 = vpop.eup %4922  ;;  %v3122_v10 = vmul.f32 1.442695, %v3072_v48  ;;  %v2687_v31 = vadd.f32 %v2609_v3, %v2377_v16  ;;  %v3393_v30 = vsub.f32 %v6522_v14, %v3357_v52  ;;  %v3434_v16 = vld [vmem:[%s6339_s13 + $0x78] sm:$0xff]  ;;  %v2380_v44 = vadd.f32 %v6306_v46, %v2070_v21 }
 0x307   : > { %v3179_v9 = vadd.f32 1.0, %v4923_v36 }
 0x308   : > { %4926 = vpow2.f32 %v3122_v10  ;;  %v2997_v35 = vadd.f32 %v2919_v33, %v2687_v31  ;;  %4830 = vmatmul.msk.f32.gmra.mxu2 %vm374_vm1, %v3393_v30  ;;  %v2922_v20 = vpop.f32.mrf.mxu0  ;;  %v2431_v10 = vld [vmem:[%s5243_s14 + $0x12d] sm:$0xff] }
 0x309   : > { %v3215_v62 = vmul.f32 %v3179_v9, %v3179_v9  ;;  %4797 = vmatmul.msk.f32.gmra.mxu1 %vm374_vm1, %v3434_v16  ;;  %v2741_v9 = vld [vmem:[%s5243_s14 + $0x12e] sm:$0xff] }
 0x30a   : > { %v6598_v37 = vadd.f32 %v6325_v23, %v2997_v35  ;;  %4739 = vmatmul.msk.f32.gmra.mxu3 %vm374_vm1, %v2430_v60 }
 0x30b   : > { %v4925_v14 = vpop.eup %4924  ;;  %v3287_v24 = vadd.f32 1.0, %v3215_v62  ;;  %4777 = vmatmul.msk.f32.gmra.mxu0 %vm374_vm1, %v2740_v45 }
 0x30c   : > { %v3358_v33 = vmul.f32 %v4925_v14, %v3250_v17  ;;  %v3073_v8 = vmin.f32 %v6598_v37, 20.0  ;;  %v3435_v14 = vld [vmem:[%s6339_s13 + $0x80] sm:$0xff] }
 0x30d   : > { %4928 = vrcp.f32 %v3287_v24  ;;  %v2612_v38 = vpop.f32.mrf.mxu3 }
 0x30e   : > { %v4927_v48 = vpop.eup %4926  ;;  %v3394_v52 = vsub.f32 %v6542_v28, %v3358_v33  ;;  %v3124_v3 = vmul.f32 1.442695, %v3073_v8  ;;  %v2688_v26 = vadd.f32 %v2612_v38, %v2378_v6  ;;  %v6622_v39 = vpop.f32.mrf.mxu1 }
 0x30f   : > { %v3180_v36 = vadd.f32 1.0, %v4927_v48  ;;  %v6629_v38 = vpop.f32.mrf.mxu2  ;;  %v2432_v48 = vld [vmem:[%s5243_s14 + $0x135] sm:$0xff] }
 0x310   : > { %4930 = vpow2.f32 %v3124_v3  ;;  %v2998_v31 = vadd.f32 %v2922_v20, %v2688_v26  ;;  %4831 = vmatmul.msk.f32.gmra.mxu2 %vm374_vm1, %v3394_v52  ;;  %v2925_v30 = vpop.f32.mrf.mxu0  ;;  %v2742_v26 = vld [vmem:[%s5243_s14 + $0x136] sm:$0xff] }
 0x311   : > { %v3216_v60 = vmul.f32 %v3180_v36, %v3180_v36  ;;  %4798 = vmatmul.msk.f32.gmra.mxu1 %vm374_vm1, %v3435_v14  ;;  %v2071_v14 = vadd.f32 %v6276_v63, %v6154_v41 }
 0x312   : > { %v6618_v28 = vadd.f32 %v6325_v23, %v2998_v31  ;;  %4740 = vmatmul.msk.f32.gmra.mxu3 %vm374_vm1, %v2431_v10 }
 0x313   : > { %v4929_v35 = vpop.eup %4928  ;;  %v3288_v45 = vadd.f32 1.0, %v3216_v60  ;;  %4778 = vmatmul.msk.f32.gmra.mxu0 %vm374_vm1, %v2741_v9 }
 0x314   : > { %v3359_v20 = vmul.f32 %v4929_v35, %v3251_v25  ;;  %v3074_v62 = vmin.f32 %v6618_v28, 20.0 }
 0x315   : > { %4932 = vrcp.f32 %v3288_v45  ;;  %v2615_v17 = vpop.f32.mrf.mxu3 }
 0x316   : > { %v4931_v24 = vpop.eup %4930  ;;  %v3395_v6 = vsub.f32 %v6562_v50, %v3359_v20  ;;  %v3126_v33 = vmul.f32 1.442695, %v3074_v62  ;;  %v2689_v8 = vadd.f32 %v2615_v17, %v2379_v12  ;;  %v3252_v50 = vmul.f32 2.0, %v6580_v11  ;;  %v6642_v51 = vpop.f32.mrf.mxu1  ;;  %v2433_v62 = vld [vmem:[%s5243_s14 + $0x13d] sm:$0xff]  ;;  %v3436_v17 = vld [vmem:[%s6339_s13 + $0x88] sm:$0xff] }
 0x317   : > { %v3181_v16 = vadd.f32 1.0, %v4931_v24 }
 0x318   : > { %4934 = vpow2.f32 %v3126_v33  ;;  %v2999_v52 = vadd.f32 %v2925_v30, %v2689_v8  ;;  %4832 = vmatmul.msk.f32.gmra.mxu2 %vm374_vm1, %v3395_v6  ;;  %v2928_v3 = vpop.f32.mrf.mxu0  ;;  %v2743_v6 = vld [vmem:[%s5243_s14 + $0x13e] sm:$0xff]  ;;  %v6654_v33 = vpop.f32.mrf.mxu2 }
 0x319   : > { %v3217_v36 = vmul.f32 %v3181_v16, %v3181_v16  ;;  %4799 = vmatmul.msk.f32.gmra.mxu1 %vm374_vm1, %v3436_v17 }
 0x31a   : > { %v6638_v10 = vadd.f32 %v6325_v23, %v2999_v52  ;;  %4741 = vmatmul.msk.f32.gmra.mxu3 %vm374_vm1, %v2432_v48  ;;  %v2381_v48 = vadd.f32 %v6318_v1, %v2071_v14 }
 0x31b   : > { %v4933_v29 = vpop.eup %4932  ;;  %v3289_v31 = vadd.f32 1.0, %v3217_v36  ;;  %4779 = vmatmul.msk.f32.gmra.mxu0 %vm374_vm1, %v2742_v26 }
 0x31c   : > { %v3360_v30 = vmul.f32 %v4933_v29, %v3252_v50  ;;  %v3075_v9 = vmin.f32 %v6638_v10, 20.0 }
 0x31d   : > { %4936 = vrcp.f32 %v3289_v31  ;;  %v2618_v60 = vpop.f32.mrf.mxu3 }
 0x31e   : > { %v4935_v25 = vpop.eup %4934  ;;  %v3396_v35 = vsub.f32 %v6580_v11, %v3360_v30  ;;  %v3128_v45 = vmul.f32 1.442695, %v3075_v9  ;;  %v2690_v12 = vadd.f32 %v2618_v60, %v2380_v44  ;;  %v3253_v11 = vmul.f32 2.0, %v6598_v37  ;;  %v6664_v26 = vpop.f32.mrf.mxu1  ;;  %v3437_v30 = vld [vmem:[%s6339_s13 + $0x90] sm:$0xff] }
 0x31f   : > { %v3182_v20 = vadd.f32 1.0, %v4935_v25  ;;  %v2072_v9 = vadd.f32 %v6288_v2, %v6163_v32 }
 0x320   : > { %4938 = vpow2.f32 %v3128_v45  ;;  %v3000_v24 = vadd.f32 %v2928_v3, %v2690_v12  ;;  %4833 = vmatmul.msk.f32.gmra.mxu2 %vm374_vm1, %v3396_v35  ;;  %v2931_v46 = vpop.f32.mrf.mxu0  ;;  %v3254_v35 = vmul.f32 2.0, %v6618_v28  ;;  %v6676_v12 = vpop.f32.mrf.mxu2 }
 0x321   : > { %v3218_v8 = vmul.f32 %v3182_v20, %v3182_v20  ;;  %4800 = vmatmul.msk.f32.gmra.mxu1 %vm374_vm1, %v3437_v30  ;;  %v2382_v32 = vadd.f32 %v6345_v53, %v2072_v9 }
 0x322   : > { %v6658_v16 = vadd.f32 %v6325_v23, %v3000_v24  ;;  %4742 = vmatmul.msk.f32.gmra.mxu3 %vm374_vm1, %v2433_v62 }
 0x323   : > { %v4937_v41 = vpop.eup %4936  ;;  %v3290_v63 = vadd.f32 1.0, %v3218_v8  ;;  %4780 = vmatmul.msk.f32.gmra.mxu0 %vm374_vm1, %v2743_v6 }
 0x324   : > { %v3361_v21 = vmul.f32 %v4937_v41, %v3253_v11  ;;  %v3076_v52 = vmin.f32 %v6658_v16, 20.0  ;;  %v3438_v11 = vld [vmem:[%s6339_s13 + $0x98] sm:$0xff]  ;;  %v2073_v41 = vadd.f32 %v6300_v27, %v6172_v40  ;;  %v6700_v40 = vld [vmem:[%s7212_s6] ss:$0 sm:$0xff] }
 0x325   : > { %4940 = vrcp.f32 %v3290_v63  ;;  %v2621_v3 = vpop.f32.mrf.mxu3 }
 0x326   : > { %v4939_v36 = vpop.eup %4938  ;;  %v3397_v50 = vsub.f32 %v6598_v37, %v3361_v21  ;;  %v3130_v29 = vmul.f32 1.442695, %v3076_v52  ;;  %v2691_v31 = vadd.f32 %v2621_v3, %v2381_v48  ;;  %v6680_v14 = vpop.f32.mrf.mxu1  ;;  %v3255_v21 = vmul.f32 2.0, %v6638_v10 }
 0x327   : > { %v3183_v44 = vadd.f32 1.0, %v4939_v36 }
 0x328   : > { %4942 = vpow2.f32 %v3130_v29  ;;  %v3001_v60 = vadd.f32 %v2931_v46, %v2691_v31  ;;  %4834 = vmatmul.msk.f32.gmra.mxu2 %vm374_vm1, %v3397_v50  ;;  %v2934_v1 = vpop.f32.mrf.mxu0  ;;  %v2383_v50 = vadd.f32 %v6363_v0, %v2073_v41  ;;  %v2074_v0 = vadd.f32 %v6315_v7, %v6181_v58 }
 0x329   : > { %v3219_v25 = vmul.f32 %v3183_v44, %v3183_v44  ;;  %4801 = vmatmul.msk.f32.gmra.mxu1 %vm374_vm1, %v3438_v11 }
 0x32a   : > { %v6674_v37 = vadd.f32 %v6325_v23, %v3001_v60  ;;  %v2384_v7 = vadd.f32 %v6380_v55, %v2074_v0  ;;  %v3440_v55 = vld [vmem:[%s6339_s13 + $0xa8] sm:$0xff] }
 0x32b   : > { %v4941_v45 = vpop.eup %4940  ;;  %v3291_v20 = vadd.f32 1.0, %v3219_v25 }
 0x32c   : > { %v3362_v2 = vmul.f32 %v4941_v45, %v3254_v35  ;;  %v3077_v62 = vmin.f32 %v6674_v37, 20.0 }
 0x32d   : > { %4944 = vrcp.f32 %v3291_v20  ;;  %v2624_v17 = vpop.f32.mrf.mxu3 }
 0x32e   : > { %v4943_v24 = vpop.eup %4942  ;;  %v3398_v46 = vsub.f32 %v6618_v28, %v3362_v2  ;;  %v3132_v6 = vmul.f32 1.442695, %v3077_v62  ;;  %v2692_v8 = vadd.f32 %v2624_v17, %v2382_v32  ;;  %v6692_v28 = vld [vmem:[%s7209_s3] ss:$0 sm:$0xff]  ;;  %v6705_v9 = vpop.f32.mrf.mxu1  ;;  %v3256_v17 = vmul.f32 2.0, %v6658_v16 }
 0x32f   : > { %v3184_v23 = vadd.f32 1.0, %v4943_v24  ;;  %v3439_v32 = vld [vmem:[%s6339_s13 + $0xa0] sm:$0xff] }
 0x330   : > { %4946 = vpow2.f32 %v3132_v6  ;;  %v3002_v63 = vadd.f32 %v2934_v1, %v2692_v8  ;;  %4835 = vmatmul.msk.f32.gmra.mxu2 %vm374_vm1, %v3398_v46  ;;  %v2937_v53 = vpop.f32.mrf.mxu0 }
 0x331   : > { %v3220_v48 = vmul.f32 %v3184_v23, %v3184_v23  ;;  %4802 = vmatmul.msk.f32.gmra.mxu1 %vm374_vm1, %v3439_v32 }
 0x332   : > { %v6695_v52 = vadd.f32 %v6692_v28, %v3002_v63 }
 0x333   : > { %v4945_v27 = vpop.eup %4944  ;;  %v3292_v3 = vadd.f32 1.0, %v3220_v48  ;;  %v3820_v36 = vpop.f32.mrf.mxu2 }
 0x334   : > { %v3363_v29 = vmul.f32 %v4945_v27, %v3255_v21  ;;  %v3078_v31 = vmin.f32 %v6695_v52, 20.0  ;;  %v3821_v44 = vadd.f32 %v3820_v36, %v6622_v39 }
 0x335   : > { %4948 = vrcp.f32 %v3292_v3  ;;  %v2627_v30 = vpop.f32.mrf.mxu3 }
 0x336   : > { %v4947_v60 = vpop.eup %4946  ;;  %v3399_v1 = vsub.f32 %v6638_v10, %v3363_v29  ;;  %v3134_v25 = vmul.f32 1.442695, %v3078_v31  ;;  %v6709_v35 = vadd.f32 %v6700_v40, %v3821_v44  ;;  %v2693_v45 = vadd.f32 %v2627_v30, %v2383_v50 }
 0x337   : > { %v3185_v20 = vadd.f32 1.0, %v4947_v60 }
 0x338   : > { %4950 = vpow2.f32 %v3134_v25  ;;  %v3968_v39 = vmin.f32 %v6709_v35, 20.0  ;;  %v3003_v2 = vadd.f32 %v2937_v53, %v2693_v45  ;;  %4836 = vmatmul.msk.f32.gmra.mxu2 %vm374_vm1, %v3399_v1  ;;  %v2940_v62 = vpop.f32.mrf.mxu0  ;;  %v6724_v53 = vpop.f32.mrf.mxu1  ;;  %v3257_v1 = vmul.f32 2.0, %v6674_v37 }
 0x339   : > { %v3221_v10 = vmul.f32 %v3185_v20, %v3185_v20  ;;  %4803 = vmatmul.msk.f32.gmra.mxu1 %vm374_vm1, %v3440_v55  ;;  %v3258_v55 = vmul.f32 2.0, %v6695_v52 }
 0x33a   : > { %v4004_v24 = vmul.f32 1.442695, %v3968_v39  ;;  %v6719_v46 = vadd.f32 %v6692_v28, %v3003_v2 }
 0x33b   : > { %v4949_v6 = vpop.eup %4948  ;;  %v3293_v8 = vadd.f32 1.0, %v3221_v10  ;;  %v3823_v58 = vpop.f32.mrf.mxu2 }
 0x33c   : > { %v3364_v23 = vmul.f32 %v4949_v6, %v3256_v17  ;;  %4952 = vpow2.f32 %v4004_v24  ;;  %v3079_v11 = vmin.f32 %v6719_v46, 20.0  ;;  %v3824_v41 = vadd.f32 %v3823_v58, %v6642_v51  ;;  %v7334_v51 = vld [vmem:[#allocation13_spill] sm:$0xff] }
 0x33d   : > { %4954 = vrcp.f32 %v3293_v8  ;;  %v2630_v63 = vpop.f32.mrf.mxu3  ;;  %v2075_v44 = vadd.f32 %v7334_v51, %v6192_v57 }
 0x33e   : > { %v4951_v48 = vpop.eup %4950  ;;  %v3400_v21 = vsub.f32 %v6658_v16, %v3364_v23  ;;  %v3136_v27 = vmul.f32 1.442695, %v3079_v11  ;;  %v2694_v3 = vadd.f32 %v2630_v63, %v2384_v7  ;;  %v6728_v50 = vadd.f32 %v6700_v40, %v3824_v41 }
 0x33f   : > { %v3186_v36 = vadd.f32 1.0, %v4951_v48  ;;  %v2385_v10 = vadd.f32 %v6403_v34, %v2075_v44  ;;  %v3441_v48 = vld [vmem:[%s6339_s13 + $0xb0] sm:$0xff] }
 0x340   : > { %4956 = vpow2.f32 %v3136_v27  ;;  %v3004_v29 = vadd.f32 %v2940_v62, %v2694_v3  ;;  %4837 = vmatmul.msk.f32.gmra.mxu2 %vm374_vm1, %v3400_v21  ;;  %v2943_v31 = vpop.f32.mrf.mxu0  ;;  %v3969_v16 = vmin.f32 %v6728_v50, 20.0  ;;  %v6743_v6 = vpop.f32.mrf.mxu1  ;;  %v7336_v21 = vld [vmem:[#allocation15_spill] sm:$0xff] }
 0x341   : > { %v3222_v30 = vmul.f32 %v3186_v36, %v3186_v36  ;;  %4804 = vmatmul.msk.f32.gmra.mxu1 %vm374_vm1, %v3441_v48 }
 0x342   : > { %v4953_v60 = vpop.eup %4952  ;;  %v6738_v25 = vadd.f32 %v6692_v28, %v3004_v29  ;;  %v4006_v0 = vmul.f32 1.442695, %v3969_v16 }
 0x343   : > { %v4955_v45 = vpop.eup %4954  ;;  %v3294_v20 = vadd.f32 1.0, %v3222_v30  ;;  %v4076_v32 = vadd.f32 1.0, %v4953_v60  ;;  %v3826_v39 = vpop.f32.mrf.mxu2 }
 0x344   : > { %v3365_v2 = vmul.f32 %v4955_v45, %v3257_v1  ;;  %v3080_v62 = vmin.f32 %v6738_v25, 20.0  ;;  %v3827_v57 = vadd.f32 %v3826_v39, %v6664_v26  ;;  %v7335_v26 = vld [vmem:[#allocation6_spill] sm:$0xff] }
 0x345   : > { %4958 = vrcp.f32 %v3294_v20  ;;  %v4112_v17 = vmul.f32 %v4076_v32, %v4076_v32  ;;  %v2633_v24 = vpop.f32.mrf.mxu3  ;;  %v2076_v34 = vadd.f32 %v7336_v21, %v7335_v26 }
 0x346   : > { %v4957_v8 = vpop.eup %4956  ;;  %v3401_v58 = vsub.f32 %v6674_v37, %v3365_v2  ;;  %4960 = vpow2.f32 %v4006_v0  ;;  %v3138_v7 = vmul.f32 1.442695, %v3080_v62  ;;  %v6747_v23 = vadd.f32 %v6700_v40, %v3827_v57 }
 0x347   : > { %v4184_v11 = vadd.f32 1.0, %v4112_v17  ;;  %v3187_v41 = vadd.f32 1.0, %v4957_v8  ;;  %v2695_v63 = vadd.f32 %v2633_v24, %v2385_v10  ;;  %v2386_v1 = vadd.f32 %v6423_v59, %v2076_v34 }
 0x348   : > { %4962 = vpow2.f32 %v3138_v7  ;;  %v3970_v27 = vmin.f32 %v6747_v23, 20.0  ;;  %4838 = vmatmul.msk.f32.gmra.mxu2 %vm374_vm1, %v3401_v58  ;;  %v2946_v3 = vpop.f32.mrf.mxu0  ;;  %v6762_v39 = vpop.f32.mrf.mxu1  ;;  %v4148_v57 = vmul.f32 2.0, %v6709_v35  ;;  %v3442_v58 = vld [vmem:[%s6339_s13 + $0xb8] sm:$0xff]  ;;  %v7337_v7 = vld [vmem:[#allocation2_spill] sm:$0xff] }
 0x349   : > { %4964 = vrcp.f32 %v4184_v11  ;;  %v3223_v37 = vmul.f32 %v3187_v41, %v3187_v41  ;;  %v3005_v36 = vadd.f32 %v2943_v31, %v2695_v63  ;;  %v7338_v11 = vld [vmem:[#allocation16_spill] sm:$0xff]  ;;  %4805 = vmatmul.msk.f32.gmra.mxu1 %vm374_vm1, %v3442_v58 }
 0x34a   : > { %v4008_v29 = vmul.f32 1.442695, %v3970_v27  ;;  %v2077_v41 = vadd.f32 %v7338_v11, %v7337_v7 }
 0x34b   : > { %v4959_v51 = vpop.eup %4958  ;;  %v3295_v44 = vadd.f32 1.0, %v3223_v37  ;;  %v6757_v30 = vadd.f32 %v6692_v28, %v3005_v36  ;;  %v3829_v16 = vpop.f32.mrf.mxu2 }
 0x34c   : > { %v4961_v60 = vpop.eup %4960  ;;  %v3366_v45 = vmul.f32 %v4959_v51, %v3258_v55  ;;  %4966 = vpow2.f32 %v4008_v29  ;;  %v3830_v20 = vadd.f32 %v3829_v16, %v6680_v14 }
 0x34d   : > { %4968 = vrcp.f32 %v3295_v44  ;;  %v4077_v32 = vadd.f32 1.0, %v4961_v60  ;;  %v3081_v31 = vmin.f32 %v6757_v30, 20.0  ;;  %v2636_v0 = vpop.f32.mrf.mxu3  ;;  %v2387_v60 = vadd.f32 %v6445_v43, %v2077_v41  ;;  %v7339_v43 = vld [vmem:[#allocation3_spill] sm:$0xff] }
 0x34e   : > { %v4963_v2 = vpop.eup %4962  ;;  %v3402_v62 = vsub.f32 %v6695_v52, %v3366_v45  ;;  %v6767_v59 = vadd.f32 %v6700_v40, %v3830_v20  ;;  %v2696_v10 = vadd.f32 %v2636_v0, %v2386_v1 }
 0x34f   : > { %v4965_v17 = vpop.eup %4964  ;;  %v4113_v24 = vmul.f32 %v4077_v32, %v4077_v32  ;;  %v3188_v14 = vadd.f32 1.0, %v4963_v2  ;;  %v3140_v8 = vmul.f32 1.442695, %v3081_v31 }
 0x350   : > { %v4256_v63 = vmul.f32 %v4965_v17, %v4148_v57  ;;  %v3971_v48 = vmin.f32 %v6767_v59, 20.0  ;;  %v3006_v26 = vadd.f32 %v2946_v3, %v2696_v10  ;;  %4839 = vmatmul.msk.f32.gmra.mxu2 %vm374_vm1, %v3402_v62  ;;  %v2949_v52 = vpop.f32.mrf.mxu0  ;;  %v3259_v3 = vmul.f32 2.0, %v6719_v46  ;;  %v6792_v31 = vpop.f32.mrf.mxu1 }
 0x351   : > { %v4185_v21 = vadd.f32 1.0, %v4113_v24  ;;  %v3224_v34 = vmul.f32 %v3188_v14, %v3188_v14  ;;  %4970 = vpow2.f32 %v3140_v8  ;;  %v2078_v10 = vadd.f32 %v6396_v54, %v7339_v43  ;;  %v3443_v14 = vld [vmem:[%s6339_s13 + $0xc0] sm:$0xff] }
 0x352   : > { %v4967_v27 = vpop.eup %4966  ;;  %v4292_v37 = vsub.f32 %v6709_v35, %v4256_v63  ;;  %v4010_v36 = vmul.f32 1.442695, %v3971_v48  ;;  %v6785_v55 = vadd.f32 %v6692_v28, %v3006_v26  ;;  %v4149_v8 = vmul.f32 2.0, %v6728_v50  ;;  %4806 = vmatmul.msk.f32.gmra.mxu1 %vm374_vm1, %v3443_v14 }
 0x353   : > { %v4969_v29 = vpop.eup %4968  ;;  %4972 = vrcp.f32 %v4185_v21  ;;  %v3296_v51 = vadd.f32 1.0, %v3224_v34  ;;  %v4078_v44 = vadd.f32 1.0, %v4967_v27  ;;  %v3832_v16 = vpop.f32.mrf.mxu2  ;;  %v3260_v63 = vmul.f32 2.0, %v6738_v25 }
 0x354   : > { %4329 = vst.msk [vmem:[%s6780_s20] sm:$0xff] %vm4328_vm2, %v4292_v37  ;;  %v3367_v1 = vmul.f32 %v4969_v29, %v3259_v3  ;;  %4974 = vpow2.f32 %v4010_v36  ;;  %v3082_v35 = vmin.f32 %v6785_v55, 20.0  ;;  %v3833_v20 = vadd.f32 %v3832_v16, %v6705_v9 }
 0x355   : > { %4976 = vrcp.f32 %v3296_v51  ;;  %v4114_v45 = vmul.f32 %v4078_v44, %v4078_v44  ;;  %v2639_v32 = vpop.f32.mrf.mxu3  ;;  %v4150_v44 = vmul.f32 2.0, %v6747_v23 }
 0x356   : > { %v3403_v0 = vsub.f32 %v6719_v46, %v3367_v1  ;;  %v3142_v2 = vmul.f32 1.442695, %v3082_v35  ;;  %v2697_v62 = vadd.f32 %v2639_v32, %v2387_v60  ;;  %v6798_v24 = vadd.f32 %v6700_v40, %v3833_v20 }
 0x357   : > { %v4971_v57 = vpop.eup %4970  ;;  %v4186_v17 = vadd.f32 1.0, %v4114_v45 }
 0x358   : > { %v3189_v58 = vadd.f32 1.0, %v4971_v57  ;;  %4978 = vpow2.f32 %v3142_v2  ;;  %v3007_v9 = vadd.f32 %v2949_v52, %v2697_v62  ;;  %4840 = vmatmul.msk.f32.gmra.mxu2 %vm374_vm1, %v3403_v0  ;;  %v2952_v7 = vpop.f32.mrf.mxu0  ;;  %v3972_v11 = vmin.f32 %v6798_v24, 20.0  ;;  %v6814_v35 = vpop.f32.mrf.mxu1  ;;  %v3444_v57 = vld [vmem:[%s6339_s13 + $0xc8] sm:$0xff] }
 0x359   : > { %v4973_v46 = vpop.eup %4972  ;;  %4980 = vrcp.f32 %v4186_v17  ;;  %v2388_v52 = vadd.f32 %v6466_v47, %v2078_v10  ;;  %v7341_v17 = vld [vmem:[#allocation17_spill] sm:$0xff] }
 0x35a   : > { %v4975_v54 = vpop.eup %4974  ;;  %v4257_v41 = vmul.f32 %v4973_v46, %v4149_v8  ;;  %v3225_v48 = vmul.f32 %v3189_v58, %v3189_v58  ;;  %v6807_v26 = vadd.f32 %v6692_v28, %v3007_v9  ;;  %v4012_v27 = vmul.f32 1.442695, %v3972_v11  ;;  %4807 = vmatmul.msk.f32.gmra.mxu1 %vm374_vm1, %v3444_v57 }
 0x35b   : > { %v4977_v21 = vpop.eup %4976  ;;  %v4079_v34 = vadd.f32 1.0, %v4975_v54  ;;  %v3835_v37 = vpop.f32.mrf.mxu2 }
 0x35c   : > { %v4293_v3 = vsub.f32 %v6728_v50, %v4257_v41  ;;  %v3368_v36 = vmul.f32 %v4977_v21, %v3260_v63  ;;  %v3297_v29 = vadd.f32 1.0, %v3225_v48  ;;  %v3083_v51 = vmin.f32 %v6807_v26, 20.0 }
 0x35d   : > { %v4115_v16 = vmul.f32 %v4079_v34, %v4079_v34  ;;  %4982 = vpow2.f32 %v4012_v27  ;;  %v3836_v60 = vadd.f32 %v3835_v37, %v6724_v53  ;;  %v2642_v1 = vpop.f32.mrf.mxu3  ;;  %v4151_v37 = vmul.f32 2.0, %v6767_v59 }
 0x35e   : > { %v4979_v47 = vpop.eup %4978  ;;  %4330 = vst.msk [vmem:[%s6780_s20 + $0x8] sm:$0xff] %vm4328_vm2, %v4293_v3  ;;  %v3404_v45 = vsub.f32 %v6738_v25, %v3368_v36  ;;  %4984 = vrcp.f32 %v3297_v29  ;;  %v3144_v50 = vmul.f32 1.442695, %v3083_v51  ;;  %v2698_v20 = vadd.f32 %v2642_v1, %v2388_v52  ;;  %v7340_v25 = vld [vmem:[#allocation4_spill] sm:$0xff]  ;;  %v7342_v1 = vld [vmem:[#allocation10_spill] sm:$0xff] }
 0x35f   : > { %v4981_v32 = vpop.eup %4980  ;;  %v4187_v0 = vadd.f32 1.0, %v4115_v16  ;;  %v3190_v2 = vadd.f32 1.0, %v4979_v47  ;;  %v6820_v62 = vadd.f32 %v6700_v40, %v3836_v60  ;;  %v2079_v14 = vadd.f32 %v7341_v17, %v7340_v25 }
 0x360   : > { %v4258_v43 = vmul.f32 %v4981_v32, %v4150_v44  ;;  %4986 = vpow2.f32 %v3144_v50  ;;  %v3008_v53 = vadd.f32 %v2952_v7, %v2698_v20  ;;  %4841 = vmatmul.msk.f32.gmra.mxu2 %vm374_vm1, %v3404_v45  ;;  %v2955_v10 = vpop.f32.mrf.mxu0  ;;  %v3261_v7 = vmul.f32 2.0, %v6757_v30  ;;  %v6839_v36 = vpop.f32.mrf.mxu1  ;;  %v3445_v50 = vld [vmem:[%s6339_s13 + $0xd0] sm:$0xff] }
 0x361   : > { %4988 = vrcp.f32 %v4187_v0  ;;  %v3226_v8 = vmul.f32 %v3190_v2, %v3190_v2  ;;  %v3973_v58 = vmin.f32 %v6820_v62, 20.0  ;;  %v2389_v27 = vadd.f32 %v6489_v61, %v2079_v14 }
 0x362   : > { %v4294_v9 = vsub.f32 %v6747_v23, %v4258_v43  ;;  %v6830_v46 = vadd.f32 %v6692_v28, %v3008_v53  ;;  %4808 = vmatmul.msk.f32.gmra.mxu1 %vm374_vm1, %v3445_v50 }
 0x363   : > { %v4983_v11 = vpop.eup %4982  ;;  %v3298_v54 = vadd.f32 1.0, %v3226_v8  ;;  %v4014_v41 = vmul.f32 1.442695, %v3973_v58  ;;  %v3838_v63 = vpop.f32.mrf.mxu2 }
 0x364   : > { %v4985_v48 = vpop.eup %4984  ;;  %4331 = vst.msk [vmem:[%s6780_s20 + $0x10] sm:$0xff] %vm4328_vm2, %v4294_v9  ;;  %v4080_v21 = vadd.f32 1.0, %v4983_v11  ;;  %v3084_v52 = vmin.f32 %v6830_v46, 20.0  ;;  %v3839_v34 = vadd.f32 %v3838_v63, %v6743_v6  ;;  %v2080_v6 = vadd.f32 %v6439_v5, %v7342_v1 }
 0x365   : > { %v3369_v23 = vmul.f32 %v4985_v48, %v3261_v7  ;;  %4990 = vrcp.f32 %v3298_v54  ;;  %v2645_v3 = vpop.f32.mrf.mxu3 }
 0x366   : > { %v4987_v29 = vpop.eup %4986  ;;  %v4116_v51 = vmul.f32 %v4080_v21, %v4080_v21  ;;  %4992 = vpow2.f32 %v4014_v41  ;;  %v3146_v44 = vmul.f32 1.442695, %v3084_v52  ;;  %v6842_v16 = vadd.f32 %v6700_v40, %v3839_v34 }
 0x367   : > { %v4989_v60 = vpop.eup %4988  ;;  %v3405_v61 = vsub.f32 %v6757_v30, %v3369_v23  ;;  %v3191_v47 = vadd.f32 1.0, %v4987_v29  ;;  %v2699_v45 = vadd.f32 %v2645_v3, %v2389_v27  ;;  %v3262_v30 = vmul.f32 2.0, %v6785_v55  ;;  %v7343_v3 = vld [vmem:[#allocation5_spill] sm:$0xff]  ;;  %v7344_v29 = vld [vmem:[#allocation18_spill] sm:$0xff] }
 0x368   : > { %v4259_v20 = vmul.f32 %v4989_v60, %v4151_v37  ;;  %v4188_v32 = vadd.f32 1.0, %v4116_v51  ;;  %4994 = vpow2.f32 %v3146_v44  ;;  %v3974_v0 = vmin.f32 %v6842_v16, 20.0  ;;  %v2958_v2 = vpop.f32.mrf.mxu0  ;;  %v6861_v41 = vpop.f32.mrf.mxu1 }
 0x369   : > { %v3227_v57 = vmul.f32 %v3191_v47, %v3191_v47  ;;  %v3009_v43 = vadd.f32 %v2955_v10, %v2699_v45  ;;  %4842 = vmatmul.msk.f32.gmra.mxu2 %vm374_vm1, %v3405_v61  ;;  %v2390_v9 = vadd.f32 %v6509_v18, %v2080_v6  ;;  %v4152_v52 = vmul.f32 2.0, %v6798_v24 }
 0x36a   : > { %v4295_v5 = vsub.f32 %v6767_v59, %v4259_v20  ;;  %4996 = vrcp.f32 %v4188_v32  ;;  %v4016_v53 = vmul.f32 1.442695, %v3974_v0  ;;  %v2081_v51 = vadd.f32 %v7344_v29, %v7343_v3 }
 0x36b   : > { %v4991_v25 = vpop.eup %4990  ;;  %v3299_v17 = vadd.f32 1.0, %v3227_v57  ;;  %v6854_v14 = vadd.f32 %v6692_v28, %v3009_v43  ;;  %v3841_v8 = vpop.f32.mrf.mxu2  ;;  %v3263_v45 = vmul.f32 2.0, %v6807_v26 }
 0x36c   : > { %v4993_v58 = vpop.eup %4992  ;;  %4332 = vst.msk [vmem:[%s6780_s20 + $0x18] sm:$0xff] %vm4328_vm2, %v4295_v5  ;;  %v3370_v10 = vmul.f32 %v4991_v25, %v3262_v30  ;;  %4998 = vpow2.f32 %v4016_v53  ;;  %v3842_v59 = vadd.f32 %v3841_v8, %v6762_v39  ;;  %v3446_v39 = vld [vmem:[%s6339_s13 + $0xd8] sm:$0xff]  ;;  %v2391_v5 = vadd.f32 %v6533_v49, %v2081_v51  ;;  %v7345_v49 = vld [vmem:[#allocation7_spill] sm:$0xff] }
 0x36d   : > { %5000 = vrcp.f32 %v3299_v17  ;;  %v4081_v11 = vadd.f32 1.0, %v4993_v58  ;;  %v3085_v7 = vmin.f32 %v6854_v14, 20.0  ;;  %v2648_v54 = vpop.f32.mrf.mxu3  ;;  %4809 = vmatmul.msk.f32.gmra.mxu1 %vm374_vm1, %v3446_v39 }
 0x36e   : > { %v4995_v63 = vpop.eup %4994  ;;  %v3406_v48 = vsub.f32 %v6785_v55, %v3370_v10  ;;  %v6865_v21 = vadd.f32 %v6700_v40, %v3842_v59  ;;  %v2700_v18 = vadd.f32 %v2648_v54, %v2390_v9 }
 0x36f   : > { %v4117_v34 = vmul.f32 %v4081_v11, %v4081_v11  ;;  %v3192_v27 = vadd.f32 1.0, %v4995_v63  ;;  %v3148_v23 = vmul.f32 1.442695, %v3085_v7  ;;  %v7346_v11 = vld [vmem:[#allocation19_spill] sm:$0xff] }
 0x370   : > { %v4997_v37 = vpop.eup %4996  ;;  %v3975_v44 = vmin.f32 %v6865_v21, 20.0  ;;  %v3010_v60 = vadd.f32 %v2958_v2, %v2700_v18  ;;  %v2961_v1 = vpop.f32.mrf.mxu0  ;;  %v2082_v7 = vadd.f32 %v7346_v11, %v7345_v49  ;;  %v4153_v18 = vmul.f32 2.0, %v6820_v62 }
 0x371   : > { %v4260_v55 = vmul.f32 %v4997_v37, %v4152_v52  ;;  %v4189_v6 = vadd.f32 1.0, %v4117_v34  ;;  %v3228_v61 = vmul.f32 %v3192_v27, %v3192_v27  ;;  %5002 = vpow2.f32 %v3148_v23  ;;  %4843 = vmatmul.msk.f32.gmra.mxu2 %vm374_vm1, %v3406_v48  ;;  %v6884_v58 = vpop.f32.mrf.mxu1  ;;  %v3447_v48 = vld [vmem:[%s6339_s13 + $0xe0] sm:$0xff] }
 0x372   : > { %v4999_v47 = vpop.eup %4998  ;;  %v4018_v50 = vmul.f32 1.442695, %v3975_v44  ;;  %v6876_v20 = vadd.f32 %v6692_v28, %v3010_v60  ;;  %v3264_v37 = vmul.f32 2.0, %v6830_v46  ;;  %v2392_v44 = vadd.f32 %v6558_v4, %v2082_v7 }
 0x373   : > { %v5001_v32 = vpop.eup %5000  ;;  %v4296_v0 = vsub.f32 %v6798_v24, %v4260_v55  ;;  %5004 = vrcp.f32 %v4189_v6  ;;  %v3300_v2 = vadd.f32 1.0, %v3228_v61  ;;  %v4082_v57 = vadd.f32 1.0, %v4999_v47  ;;  %v3844_v43 = vpop.f32.mrf.mxu2 }
 0x374   : > { %v3371_v30 = vmul.f32 %v5001_v32, %v3263_v45  ;;  %5006 = vpow2.f32 %v4018_v50  ;;  %v3086_v53 = vmin.f32 %v6876_v20, 20.0  ;;  %v3845_v17 = vadd.f32 %v3844_v43, %v6792_v31 }
 0x375   : > { %4333 = vst.msk [vmem:[%s6780_s20 + $0x20] sm:$0xff] %vm4328_vm2, %v4296_v0  ;;  %5008 = vrcp.f32 %v3300_v2  ;;  %v4118_v25 = vmul.f32 %v4082_v57, %v4082_v57  ;;  %v2651_v8 = vpop.f32.mrf.mxu3  ;;  %4810 = vmatmul.msk.f32.gmra.mxu1 %vm374_vm1, %v3447_v48  ;;  %v4154_v50 = vmul.f32 2.0, %v6842_v16 }
 0x376   : > { %v3407_v24 = vsub.f32 %v6807_v26, %v3371_v30  ;;  %v3150_v9 = vmul.f32 1.442695, %v3086_v53  ;;  %v2701_v10 = vadd.f32 %v2651_v8, %v2391_v5  ;;  %v6890_v63 = vadd.f32 %v6700_v40, %v3845_v17  ;;  %v3448_v8 = vld [vmem:[%s6339_s13 + $0xe8] sm:$0xff] }
 0x377   : > { %v5003_v59 = vpop.eup %5002  ;;  %v4190_v54 = vadd.f32 1.0, %v4118_v25 }
 0x378   : > { %v3193_v52 = vadd.f32 1.0, %v5003_v59  ;;  %5010 = vpow2.f32 %v3150_v9  ;;  %v3011_v31 = vadd.f32 %v2961_v1, %v2701_v10  ;;  %v2964_v34 = vpop.f32.mrf.mxu0  ;;  %v3976_v27 = vmin.f32 %v6890_v63, 20.0  ;;  %v7347_v10 = vld [vmem:[#allocation8_spill] sm:$0xff] }
 0x379   : > { %v5005_v26 = vpop.eup %5004  ;;  %5012 = vrcp.f32 %v4190_v54  ;;  %4844 = vmatmul.msk.f32.gmra.mxu2 %vm374_vm1, %v3407_v24  ;;  %v6906_v57 = vpop.f32.mrf.mxu1  ;;  %v7348_v59 = vld [vmem:[#allocation20_spill] sm:$0xff] }
 0x37a   : > { %v5007_v23 = vpop.eup %5006  ;;  %v4261_v39 = vmul.f32 %v5005_v26, %v4153_v18  ;;  %v3229_v3 = vmul.f32 %v3193_v52, %v3193_v52  ;;  %v6899_v29 = vadd.f32 %v6692_v28, %v3011_v31  ;;  %v4020_v1 = vmul.f32 1.442695, %v3976_v27 }
 0x37b   : > { %v5009_v51 = vpop.eup %5008  ;;  %v4083_v60 = vadd.f32 1.0, %v5007_v23  ;;  %v3847_v55 = vpop.f32.mrf.mxu2  ;;  %v3265_v18 = vmul.f32 2.0, %v6854_v14 }
 0x37c   : > { %v4297_v6 = vsub.f32 %v6820_v62, %v4261_v39  ;;  %v3372_v61 = vmul.f32 %v5009_v51, %v3264_v37  ;;  %v3301_v47 = vadd.f32 1.0, %v3229_v3  ;;  %v3087_v45 = vmin.f32 %v6899_v29, 20.0 }
 0x37d   : > { %v4119_v32 = vmul.f32 %v4083_v60, %v4083_v60  ;;  %5014 = vpow2.f32 %v4020_v1  ;;  %v3848_v0 = vadd.f32 %v3847_v55, %v6814_v35  ;;  %v2654_v2 = vpop.f32.mrf.mxu3  ;;  %4811 = vmatmul.msk.f32.gmra.mxu1 %vm374_vm1, %v3448_v8  ;;  %v4155_v3 = vmul.f32 2.0, %v6865_v21 }
 0x37e   : > { %v5011_v4 = vpop.eup %5010  ;;  %4334 = vst.msk [vmem:[%s6780_s20 + $0x28] sm:$0xff] %vm4328_vm2, %v4297_v6  ;;  %v3408_v43 = vsub.f32 %v6830_v46, %v3372_v61  ;;  %5016 = vrcp.f32 %v3301_v47  ;;  %v3152_v62 = vmul.f32 1.442695, %v3087_v45  ;;  %v2702_v5 = vadd.f32 %v2654_v2, %v2392_v44  ;;  %v7349_v47 = vld [vmem:[#allocation14_spill] sm:$0xff] }
 0x37f   : > { %v5013_v30 = vpop.eup %5012  ;;  %v4191_v53 = vadd.f32 1.0, %v4119_v32  ;;  %v3194_v25 = vadd.f32 1.0, %v5011_v4  ;;  %v6912_v17 = vadd.f32 %v6700_v40, %v3848_v0  ;;  %v2083_v46 = vadd.f32 %v7348_v59, %v7347_v10  ;;  %v3449_v32 = vld [vmem:[%s6339_s13 + $0xf0] sm:$0xff] }
 0x380   : > { %v4262_v24 = vmul.f32 %v5013_v30, %v4154_v50  ;;  %5018 = vpow2.f32 %v3152_v62  ;;  %v3012_v35 = vadd.f32 %v2964_v34, %v2702_v5  ;;  %v2967_v9 = vpop.f32.mrf.mxu0 }
 0x381   : > { %5020 = vrcp.f32 %v4191_v53  ;;  %v3230_v49 = vmul.f32 %v3194_v25, %v3194_v25  ;;  %v3977_v11 = vmin.f32 %v6912_v17, 20.0  ;;  %4845 = vmatmul.msk.f32.gmra.mxu2 %vm374_vm1, %v3408_v43  ;;  %v2393_v37 = vadd.f32 %v6583_v19, %v2083_v46  ;;  %v6931_v44 = vpop.f32.mrf.mxu1 }
 0x382   : > { %v4298_v7 = vsub.f32 %v6842_v16, %v4262_v24  ;;  %v6922_v54 = vadd.f32 %v6692_v28, %v3012_v35 }
 0x383   : > { %v5015_v48 = vpop.eup %5014  ;;  %v3302_v52 = vadd.f32 1.0, %v3230_v49  ;;  %v4022_v31 = vmul.f32 1.442695, %v3977_v11  ;;  %v3850_v34 = vpop.f32.mrf.mxu2 }
 0x384   : > { %v5017_v26 = vpop.eup %5016  ;;  %4335 = vst.msk [vmem:[%s6780_s20 + $0x30] sm:$0xff] %vm4328_vm2, %v4298_v7  ;;  %v4084_v27 = vadd.f32 1.0, %v5015_v48  ;;  %v3088_v23 = vmin.f32 %v6922_v54, 20.0  ;;  %v3851_v39 = vadd.f32 %v3850_v34, %v6839_v36  ;;  %v2084_v36 = vadd.f32 %v6528_v13, %v7349_v47 }
 0x385   : > { %v3373_v16 = vmul.f32 %v5017_v26, %v3265_v18  ;;  %5022 = vrcp.f32 %v3302_v52  ;;  %v2657_v51 = vpop.f32.mrf.mxu3  ;;  %4812 = vmatmul.msk.f32.gmra.mxu1 %vm374_vm1, %v3449_v32  ;;  %v4156_v52 = vmul.f32 2.0, %v6890_v63 }
 0x386   : > { %v5019_v60 = vpop.eup %5018  ;;  %v4120_v1 = vmul.f32 %v4084_v27, %v4084_v27  ;;  %5024 = vpow2.f32 %v4022_v31  ;;  %v3154_v55 = vmul.f32 1.442695, %v3088_v23  ;;  %v6934_v6 = vadd.f32 %v6700_v40, %v3851_v39  ;;  %v7350_v23 = vld [vmem:[#allocation9_spill] sm:$0xff] }
 0x387   : > { %v5021_v61 = vpop.eup %5020  ;;  %v3409_v19 = vsub.f32 %v6854_v14, %v3373_v16  ;;  %v3195_v45 = vadd.f32 1.0, %v5019_v60  ;;  %v2703_v50 = vadd.f32 %v2657_v51, %v2393_v37  ;;  %v3266_v14 = vmul.f32 2.0, %v6876_v20 }
 0x388   : > { %v4263_v0 = vmul.f32 %v5021_v61, %v4155_v3  ;;  %v4192_v2 = vadd.f32 1.0, %v4120_v1  ;;  %5026 = vpow2.f32 %v3154_v55  ;;  %v3978_v4 = vmin.f32 %v6934_v6, 20.0  ;;  %v2970_v43 = vpop.f32.mrf.mxu0 }
 0x389   : > { %v3231_v62 = vmul.f32 %v3195_v45, %v3195_v45  ;;  %v3013_v5 = vadd.f32 %v2967_v9, %v2703_v50  ;;  %4846 = vmatmul.msk.f32.gmra.mxu2 %vm374_vm1, %v3409_v19  ;;  %v2394_v10 = vadd.f32 %v6606_v42, %v2084_v36  ;;  %v6953_v11 = vpop.f32.mrf.mxu1  ;;  %v2085_v39 = vadd.f32 %v6551_v56, %v7350_v23 }
 0x38a   : > { %v4299_v13 = vsub.f32 %v6865_v21, %v4263_v0  ;;  %5028 = vrcp.f32 %v4192_v2  ;;  %v4024_v30 = vmul.f32 1.442695, %v3978_v4  ;;  %v3267_v1 = vmul.f32 2.0, %v6899_v29 }
 0x38b   : > { %v5023_v53 = vpop.eup %5022  ;;  %v3303_v25 = vadd.f32 1.0, %v3231_v62  ;;  %v6946_v8 = vadd.f32 %v6692_v28, %v3013_v5  ;;  %v3853_v24 = vpop.f32.mrf.mxu2  ;;  %v2395_v32 = vadd.f32 %v6629_v38, %v2085_v39  ;;  %v7351_v38 = vld [vmem:[#allocation11_spill] sm:$0xff] }
 0x38c   : > { %v5025_v35 = vpop.eup %5024  ;;  %4336 = vst.msk [vmem:[%s6780_s20 + $0x38] sm:$0xff] %vm4328_vm2, %v4299_v13  ;;  %v3374_v9 = vmul.f32 %v5023_v53, %v3266_v14  ;;  %5030 = vpow2.f32 %v4024_v30  ;;  %v3854_v21 = vadd.f32 %v3853_v24, %v6861_v41  ;;  %v3450_v41 = vld [vmem:[%s6339_s13 + $0xf8] sm:$0xff]  ;;  %v2086_v53 = vadd.f32 %v6576_v15, %v7351_v38 }
 0x38d   : > { %5032 = vrcp.f32 %v3303_v25  ;;  %v4085_v59 = vadd.f32 1.0, %v5025_v35  ;;  %v3089_v46 = vmin.f32 %v6946_v8, 20.0  ;;  %v2660_v49 = vpop.f32.mrf.mxu3  ;;  %4813 = vmatmul.msk.f32.gmra.mxu1 %vm374_vm1, %v3450_v41  ;;  %v3451_v35 = vld [vmem:[%s6339_s13 + $0x100] sm:$0xff] }
 0x38e   : > { %v5027_v7 = vpop.eup %5026  ;;  %v3410_v48 = vsub.f32 %v6876_v20, %v3374_v9  ;;  %v6957_v18 = vadd.f32 %v6700_v40, %v3854_v21  ;;  %v2704_v42 = vadd.f32 %v2660_v49, %v2394_v10  ;;  %v4157_v10 = vmul.f32 2.0, %v6912_v17 }
 0x38f   : > { %v4121_v31 = vmul.f32 %v4085_v59, %v4085_v59  ;;  %v3196_v34 = vadd.f32 1.0, %v5027_v7  ;;  %v3156_v26 = vmul.f32 1.442695, %v3089_v46  ;;  %v3268_v46 = vmul.f32 2.0, %v6922_v54 }
 0x390   : > { %v5029_v27 = vpop.eup %5028  ;;  %v3979_v37 = vmin.f32 %v6957_v18, 20.0  ;;  %v3014_v16 = vadd.f32 %v2970_v43, %v2704_v42  ;;  %v2973_v56 = vpop.f32.mrf.mxu0  ;;  %v2396_v42 = vadd.f32 %v6654_v33, %v2086_v53 }
 0x391   : > { %v4264_v20 = vmul.f32 %v5029_v27, %v4156_v52  ;;  %v4193_v3 = vadd.f32 1.0, %v4121_v31  ;;  %v3232_v51 = vmul.f32 %v3196_v34, %v3196_v34  ;;  %5034 = vpow2.f32 %v3156_v26  ;;  %4847 = vmatmul.msk.f32.gmra.mxu2 %vm374_vm1, %v3410_v48  ;;  %v6976_v5 = vpop.f32.mrf.mxu1 }
 0x392   : > { %v5031_v60 = vpop.eup %5030  ;;  %v4026_v55 = vmul.f32 1.442695, %v3979_v37  ;;  %v6968_v61 = vadd.f32 %v6692_v28, %v3014_v16  ;;  %v4158_v37 = vmul.f32 2.0, %v6934_v6 }
 0x393   : > { %v5033_v47 = vpop.eup %5032  ;;  %v4300_v36 = vsub.f32 %v6890_v63, %v4264_v20  ;;  %5036 = vrcp.f32 %v4193_v3  ;;  %v3304_v19 = vadd.f32 1.0, %v3232_v51  ;;  %v4086_v45 = vadd.f32 1.0, %v5031_v60  ;;  %v3856_v50 = vpop.f32.mrf.mxu2 }
 0x394   : > { %v3375_v0 = vmul.f32 %v5033_v47, %v3267_v1  ;;  %5038 = vpow2.f32 %v4026_v55  ;;  %v3090_v2 = vmin.f32 %v6968_v61, 20.0  ;;  %v3857_v43 = vadd.f32 %v3856_v50, %v6884_v58 }
 0x395   : > { %4337 = vst.msk [vmem:[%s6780_s20 + $0x40] sm:$0xff] %vm4328_vm2, %v4300_v36  ;;  %5040 = vrcp.f32 %v3304_v19  ;;  %v4122_v4 = vmul.f32 %v4086_v45, %v4086_v45  ;;  %v2663_v62 = vpop.f32.mrf.mxu3  ;;  %4814 = vmatmul.msk.f32.gmra.mxu1 %vm374_vm1, %v3451_v35  ;;  %v3452_v36 = vld [vmem:[%s6339_s13 + $0x108] sm:$0xff]  ;;  %v7352_v45 = vld [vmem:[#allocation12_spill] sm:$0xff] }
 0x396   : > { %v3411_v63 = vsub.f32 %v6899_v29, %v3375_v0  ;;  %v3158_v13 = vmul.f32 1.442695, %v3090_v2  ;;  %v2705_v14 = vadd.f32 %v2663_v62, %v2395_v32  ;;  %v6982_v24 = vadd.f32 %v6700_v40, %v3857_v43 }
 0x397   : > { %v5035_v30 = vpop.eup %5034  ;;  %v4194_v25 = vadd.f32 1.0, %v4122_v4  ;;  %v2087_v50 = vadd.f32 %v6601_v22, %v7352_v45  ;;  %v3269_v43 = vmul.f32 2.0, %v6946_v8  ;;  %v3454_v45 = vld [vmem:[%s6339_s13 + $0x118] sm:$0xff] }
 0x398   : > { %v3197_v9 = vadd.f32 1.0, %v5035_v30  ;;  %5042 = vpow2.f32 %v3158_v13  ;;  %v3015_v58 = vadd.f32 %v2973_v56, %v2705_v14  ;;  %v3980_v29 = vmin.f32 %v6982_v24, 20.0  ;;  %v2976_v39 = vpop.f32.mrf.mxu0 }
 0x399   : > { %v5037_v21 = vpop.eup %5036  ;;  %5044 = vrcp.f32 %v4194_v25  ;;  %4848 = vmatmul.msk.f32.gmra.mxu2 %vm374_vm1, %v3411_v63  ;;  %v6998_v33 = vpop.f32.mrf.mxu1  ;;  %v2397_v38 = vadd.f32 %v6676_v12, %v2087_v50  ;;  %v4159_v25 = vmul.f32 2.0, %v6957_v18 }
 0x39a   : > { %v5039_v59 = vpop.eup %5038  ;;  %v4265_v15 = vmul.f32 %v5037_v21, %v4157_v10  ;;  %v3233_v49 = vmul.f32 %v3197_v9, %v3197_v9  ;;  %v6991_v7 = vadd.f32 %v6692_v28, %v3015_v58  ;;  %v4028_v31 = vmul.f32 1.442695, %v3980_v29  ;;  %v7030_v29 = vld [vmem:[%s7212_s6] ss:$0 sm:$0xff] }
 0x39b   : > { %v5041_v48 = vpop.eup %5040  ;;  %v4087_v52 = vadd.f32 1.0, %v5039_v59  ;;  %v3859_v34 = vpop.f32.mrf.mxu2 }
 0x39c   : > { %v4301_v26 = vsub.f32 %v6912_v17, %v4265_v15  ;;  %v3376_v41 = vmul.f32 %v5041_v48, %v3268_v46  ;;  %v3305_v27 = vadd.f32 1.0, %v3233_v49  ;;  %v3091_v23 = vmin.f32 %v6991_v7, 20.0  ;;  %v3453_v48 = vld [vmem:[%s6339_s13 + $0x110] sm:$0xff] }
 0x39d   : > { %v4123_v16 = vmul.f32 %v4087_v52, %v4087_v52  ;;  %5046 = vpow2.f32 %v4028_v31  ;;  %v3860_v28 = vadd.f32 %v3859_v34, %v6906_v57  ;;  %v2666_v20 = vpop.f32.mrf.mxu3  ;;  %4815 = vmatmul.msk.f32.gmra.mxu1 %vm374_vm1, %v3452_v36 }
 0x39e   : > { %v5043_v3 = vpop.eup %5042  ;;  %4338 = vst.msk [vmem:[%s6780_s20 + $0x48] sm:$0xff] %vm4328_vm2, %v4301_v26  ;;  %v3412_v17 = vsub.f32 %v6922_v54, %v3376_v41  ;;  %5048 = vrcp.f32 %v3305_v27  ;;  %v3160_v51 = vmul.f32 1.442695, %v3091_v23  ;;  %v2706_v60 = vadd.f32 %v2666_v20, %v2396_v42 }
 0x39f   : > { %v5045_v1 = vpop.eup %5044  ;;  %v4195_v55 = vadd.f32 1.0, %v4123_v16  ;;  %v3198_v56 = vadd.f32 1.0, %v5043_v3  ;;  %v7004_v47 = vadd.f32 %v6700_v40, %v3860_v28  ;;  %v5161_v40 = vld [vmem:[%s7209_s3] ss:$0 sm:$0xff]  ;;  %v3270_v27 = vmul.f32 2.0, %v6968_v61 }
 0x3a0   : > { %v4266_v19 = vmul.f32 %v5045_v1, %v4158_v37  ;;  %5050 = vpow2.f32 %v3160_v51  ;;  %v3016_v57 = vadd.f32 %v2976_v39, %v2706_v60  ;;  %v2979_v12 = vpop.f32.mrf.mxu0 }
 0x3a1   : > { %5052 = vrcp.f32 %v4195_v55  ;;  %v3234_v54 = vmul.f32 %v3198_v56, %v3198_v56  ;;  %v3981_v32 = vmin.f32 %v7004_v47, 20.0  ;;  %4849 = vmatmul.msk.f32.gmra.mxu2 %vm374_vm1, %v3412_v17  ;;  %v7025_v10 = vpop.f32.mrf.mxu1  ;;  %v4160_v56 = vmul.f32 2.0, %v6982_v24 }
 0x3a2   : > { %v4302_v0 = vsub.f32 %v6934_v6, %v4266_v19  ;;  %v7016_v2 = vadd.f32 %v5161_v40, %v3016_v57 }
 0x3a3   : > { %v5047_v4 = vpop.eup %5046  ;;  %v3306_v62 = vadd.f32 1.0, %v3234_v54  ;;  %v4030_v63 = vmul.f32 1.442695, %v3981_v32  ;;  %v3862_v22 = vpop.f32.mrf.mxu2 }
 0x3a4   : > { %v5049_v13 = vpop.eup %5048  ;;  %4339 = vst.msk [vmem:[%s6780_s20 + $0x50] sm:$0xff] %vm4328_vm2, %v4302_v0  ;;  %v4088_v14 = vadd.f32 1.0, %v5047_v4  ;;  %v3092_v30 = vmin.f32 %v7016_v2, 20.0  ;;  %v3863_v6 = vadd.f32 %v3862_v22, %v6931_v44 }
 0x3a5   : > { %v3377_v53 = vmul.f32 %v5049_v13, %v3269_v43  ;;  %5054 = vrcp.f32 %v3306_v62  ;;  %v2669_v35 = vpop.f32.mrf.mxu3  ;;  %4816 = vmatmul.msk.f32.gmra.mxu1 %vm374_vm1, %v3453_v48 }
 0x3a6   : > { %v5051_v9 = vpop.eup %5050  ;;  %v4124_v58 = vmul.f32 %v4088_v14, %v4088_v14  ;;  %5056 = vpow2.f32 %v4030_v63  ;;  %v3162_v21 = vmul.f32 1.442695, %v3092_v30  ;;  %v7033_v44 = vadd.f32 %v7030_v29, %v3863_v6 }
 0x3a7   : > { %v5053_v59 = vpop.eup %5052  ;;  %v3413_v15 = vsub.f32 %v6946_v8, %v3377_v53  ;;  %v3199_v46 = vadd.f32 1.0, %v5051_v9  ;;  %v2707_v49 = vadd.f32 %v2669_v35, %v2397_v38  ;;  %v4161_v9 = vmul.f32 2.0, %v7004_v47 }
 0x3a8   : > { %v4267_v42 = vmul.f32 %v5053_v59, %v4159_v25  ;;  %v4196_v52 = vadd.f32 1.0, %v4124_v58  ;;  %5058 = vpow2.f32 %v3162_v21  ;;  %v3982_v31 = vmin.f32 %v7033_v44, 20.0 }
 0x3a9   : > { %v3235_v34 = vmul.f32 %v3199_v46, %v3199_v46  ;;  %v3017_v26 = vadd.f32 %v2979_v12, %v2707_v49  ;;  %4850 = vmatmul.msk.f32.gmra.mxu2 %vm374_vm1, %v3413_v15  ;;  %v7048_v51 = vpop.f32.mrf.mxu1  ;;  %v3272_v15 = vmul.f32 2.0, %v7016_v2 }
 0x3aa   : > { %v4303_v41 = vsub.f32 %v6957_v18, %v4267_v42  ;;  %5060 = vrcp.f32 %v4196_v52  ;;  %v4032_v8 = vmul.f32 1.442695, %v3982_v31 }
 0x3ab   : > { %v5055_v23 = vpop.eup %5054  ;;  %v3307_v39 = vadd.f32 1.0, %v3235_v34  ;;  %v7042_v37 = vadd.f32 %v5161_v40, %v3017_v26  ;;  %v3865_v16 = vpop.f32.mrf.mxu2  ;;  %v3271_v40 = vmul.f32 2.0, %v6991_v7 }
 0x3ac   : > { %v5057_v28 = vpop.eup %5056  ;;  %4340 = vst.msk [vmem:[%s6780_s20 + $0x58] sm:$0xff] %vm4328_vm2, %v4303_v41  ;;  %v3378_v20 = vmul.f32 %v5055_v23, %v3270_v27  ;;  %5062 = vpow2.f32 %v4032_v8  ;;  %v3866_v3 = vadd.f32 %v3865_v16, %v6953_v11  ;;  %v4162_v8 = vmul.f32 2.0, %v7033_v44 }
 0x3ad   : > { %5064 = vrcp.f32 %v3307_v39  ;;  %v4089_v17 = vadd.f32 1.0, %v5057_v28  ;;  %v3093_v18 = vmin.f32 %v7042_v37, 20.0  ;;  %4817 = vmatmul.msk.f32.gmra.mxu1 %vm374_vm1, %v3454_v45 }
 0x3ae   : > { %v5059_v60 = vpop.eup %5058  ;;  %v3414_v1 = vsub.f32 %v6968_v61, %v3378_v20  ;;  %v7052_v55 = vadd.f32 %v7030_v29, %v3866_v3  ;;  %v3273_v3 = vmul.f32 2.0, %v7042_v37 }
 0x3af   : > { %v4125_v36 = vmul.f32 %v4089_v17, %v4089_v17  ;;  %v3200_v19 = vadd.f32 1.0, %v5059_v60  ;;  %v3164_v57 = vmul.f32 1.442695, %v3093_v18 }
 0x3b0   : > { %v5061_v50 = vpop.eup %5060  ;;  %v3983_v11 = vmin.f32 %v7052_v55, 20.0 }
 0x3b1   : > { %v4268_v54 = vmul.f32 %v5061_v50, %v4160_v56  ;;  %v4197_v32 = vadd.f32 1.0, %v4125_v36  ;;  %v3236_v0 = vmul.f32 %v3200_v19, %v3200_v19  ;;  %5066 = vpow2.f32 %v3164_v57  ;;  %4851 = vmatmul.msk.f32.gmra.mxu2 %vm374_vm1, %v3414_v1  ;;  %v7064_v38 = vpop.f32.mrf.mxu1 }
 0x3b2   : > { %v5063_v61 = vpop.eup %5062  ;;  %v4034_v4 = vmul.f32 1.442695, %v3983_v11  ;;  %v4163_v57 = vmul.f32 2.0, %v7052_v55 }
 0x3b3   : > { %v5065_v43 = vpop.eup %5064  ;;  %v4304_v62 = vsub.f32 %v6982_v24, %v4268_v54  ;;  %5068 = vrcp.f32 %v4197_v32  ;;  %v3308_v63 = vadd.f32 1.0, %v3236_v0  ;;  %v4090_v22 = vadd.f32 1.0, %v5063_v61  ;;  %v3868_v13 = vpop.f32.mrf.mxu2 }
 0x3b4   : > { %v3379_v14 = vmul.f32 %v5065_v43, %v3271_v40  ;;  %5070 = vpow2.f32 %v4034_v4  ;;  %v3869_v30 = vadd.f32 %v3868_v13, %v6976_v5 }
 0x3b5   : > { %4341 = vst.msk [vmem:[%s6780_s20 + $0x60] sm:$0xff] %vm4328_vm2, %v4304_v62  ;;  %5072 = vrcp.f32 %v3308_v63  ;;  %v4126_v6 = vmul.f32 %v4090_v22, %v4090_v22 }
 0x3b6   : > { %v3415_v53 = vsub.f32 %v6991_v7, %v3379_v14  ;;  %v7068_v25 = vadd.f32 %v7030_v29, %v3869_v30 }
 0x3b7   : > { %v5067_v24 = vpop.eup %5066  ;;  %v4198_v35 = vadd.f32 1.0, %v4126_v6 }
 0x3b8   : > { %v3201_v58 = vadd.f32 1.0, %v5067_v24  ;;  %v3984_v21 = vmin.f32 %v7068_v25, 20.0  ;;  %v4164_v62 = vmul.f32 2.0, %v7068_v25 }
 0x3b9   : > { %v5069_v12 = vpop.eup %5068  ;;  %5074 = vrcp.f32 %v4198_v35  ;;  %4852 = vmatmul.msk.f32.gmra.mxu2 %vm374_vm1, %v3415_v53  ;;  %v7080_v23 = vpop.f32.mrf.mxu1 }
 0x3ba   : > { %v5071_v5 = vpop.eup %5070  ;;  %v4269_v59 = vmul.f32 %v5069_v12, %v4161_v9  ;;  %v3237_v7 = vmul.f32 %v3201_v58, %v3201_v58  ;;  %v4036_v46 = vmul.f32 1.442695, %v3984_v21 }
 0x3bb   : > { %v5073_v49 = vpop.eup %5072  ;;  %v4091_v48 = vadd.f32 1.0, %v5071_v5  ;;  %v3871_v42 = vpop.f32.mrf.mxu2 }
 0x3bc   : > { %v4305_v52 = vsub.f32 %v7004_v47, %v4269_v59  ;;  %v3380_v31 = vmul.f32 %v5073_v49, %v3272_v15  ;;  %v3309_v34 = vadd.f32 1.0, %v3237_v7  ;;  %5076 = vpow2.f32 %v4036_v46 }
 0x3bd   : > { %v4127_v26 = vmul.f32 %v4091_v48, %v4091_v48  ;;  %v3872_v41 = vadd.f32 %v3871_v42, %v6998_v33 }
 0x3be   : > { %4342 = vst.msk [vmem:[%s6780_s20 + $0x68] sm:$0xff] %vm4328_vm2, %v4305_v52  ;;  %v3416_v27 = vsub.f32 %v7016_v2, %v3380_v31  ;;  %5078 = vrcp.f32 %v3309_v34 }
 0x3bf   : > { %v5075_v39 = vpop.eup %5074  ;;  %v4199_v16 = vadd.f32 1.0, %v4127_v26  ;;  %v7083_v47 = vadd.f32 %v7030_v29, %v3872_v41 }
 0x3c0   : > { %v4270_v28 = vmul.f32 %v5075_v39, %v4162_v8 }
 0x3c1   : > { %5080 = vrcp.f32 %v4199_v16  ;;  %v3985_v20 = vmin.f32 %v7083_v47, 20.0  ;;  %4853 = vmatmul.msk.f32.gmra.mxu2 %vm374_vm1, %v3416_v27  ;;  %v3650_v0 = vpop.f32.mrf.mxu1  ;;  %v4165_v5 = vmul.f32 2.0, %v7083_v47 }
 0x3c2   : > { %v5077_v33 = vpop.eup %5076  ;;  %v4306_v2 = vsub.f32 %v7033_v44, %v4270_v28 }
 0x3c3   : > { %v4092_v17 = vadd.f32 1.0, %v5077_v33  ;;  %v4038_v18 = vmul.f32 1.442695, %v3985_v20  ;;  %v3874_v60 = vpop.f32.mrf.mxu2 }
 0x3c4   : > { %v5079_v1 = vpop.eup %5078  ;;  %4343 = vst.msk [vmem:[%s6780_s20 + $0x70] sm:$0xff] %vm4328_vm2, %v4306_v2  ;;  %v3875_v56 = vadd.f32 %v3874_v60, %v7025_v10 }
 0x3c5   : > { %v3381_v36 = vmul.f32 %v5079_v1, %v3273_v3  ;;  %v4128_v19 = vmul.f32 %v4092_v17, %v4092_v17  ;;  %5082 = vpow2.f32 %v4038_v18 }
 0x3c6   : > { %v7094_v45 = vadd.f32 %v7030_v29, %v3875_v56 }
 0x3c7   : > { %v5081_v44 = vpop.eup %5080  ;;  %v3417_v50 = vsub.f32 %v7042_v37, %v3381_v36  ;;  %v4200_v11 = vadd.f32 1.0, %v4128_v19 }
 0x3c8   : > { %v4271_v54 = vmul.f32 %v5081_v44, %v4163_v57  ;;  %v3986_v32 = vmin.f32 %v7094_v45, 20.0  ;;  %v4166_v26 = vmul.f32 2.0, %v7094_v45 }
 0x3c9   : > { %5084 = vrcp.f32 %v4200_v11  ;;  %4854 = vmatmul.msk.f32.gmra.mxu2 %vm374_vm1, %v3417_v50  ;;  %v3653_v35 = vpop.f32.mrf.mxu1 }
 0x3ca   : > { %v4307_v10 = vsub.f32 %v7052_v55, %v4271_v54  ;;  %v4040_v61 = vmul.f32 1.442695, %v3986_v32 }
 0x3cb   : > { %v5083_v40 = vpop.eup %5082  ;;  %v3877_v4 = vpop.f32.mrf.mxu2 }
 0x3cc   : > { %4344 = vst.msk [vmem:[%s6780_s20 + $0x78] sm:$0xff] %vm4328_vm2, %v4307_v10  ;;  %v4093_v43 = vadd.f32 1.0, %v5083_v40  ;;  %5086 = vpow2.f32 %v4040_v61  ;;  %v3878_v37 = vadd.f32 %v3877_v4, %v7048_v51 }
 0x3ce   : > { %v4129_v63 = vmul.f32 %v4093_v43, %v4093_v43  ;;  %v3951_v22 = vadd.f32 %v7030_v29, %v3878_v37 }
 0x3cf   : > { %v5085_v13 = vpop.eup %5084 }
 0x3d0   : > { %v4272_v14 = vmul.f32 %v5085_v13, %v4164_v62  ;;  %v4201_v30 = vadd.f32 1.0, %v4129_v63  ;;  %v3987_v6 = vmin.f32 %v3951_v22, 20.0  ;;  %v4167_v17 = vmul.f32 2.0, %v3951_v22 }
 0x3d1   : > { %v3656_v31 = vpop.f32.mrf.mxu1 }
 0x3d2   : > { %v5087_v55 = vpop.eup %5086  ;;  %v4308_v53 = vsub.f32 %v7068_v25, %v4272_v14  ;;  %5088 = vrcp.f32 %v4201_v30  ;;  %v4042_v24 = vmul.f32 1.442695, %v3987_v6 }
 0x3d3   : > { %v4094_v9 = vadd.f32 1.0, %v5087_v55  ;;  %v3880_v58 = vpop.f32.mrf.mxu2 }
 0x3d4   : > { %4345 = vst.msk [vmem:[%s6780_s20 + $0x80] sm:$0xff] %vm4328_vm2, %v4308_v53  ;;  %5090 = vpow2.f32 %v4042_v24  ;;  %v3881_v51 = vadd.f32 %v3880_v58, %v7064_v38 }
 0x3d5   : > { %v4130_v21 = vmul.f32 %v4094_v9, %v4094_v9 }
 0x3d6   : > { %v7110_v12 = vadd.f32 %v7030_v29, %v3881_v51 }
 0x3d7   : > { %v4202_v59 = vadd.f32 1.0, %v4130_v21 }
 0x3d8   : > { %v5089_v15 = vpop.eup %5088  ;;  %v3988_v25 = vmin.f32 %v7110_v12, 20.0 }
 0x3d9   : > { %v4273_v7 = vmul.f32 %v5089_v15, %v4165_v5  ;;  %5092 = vrcp.f32 %v4202_v59  ;;  %v3659_v60 = vpop.f32.mrf.mxu1 }
 0x3da   : > { %v5091_v46 = vpop.eup %5090  ;;  %v4044_v49 = vmul.f32 1.442695, %v3988_v25 }
 0x3db   : > { %v4309_v48 = vsub.f32 %v7083_v47, %v4273_v7  ;;  %v4095_v42 = vadd.f32 1.0, %v5091_v46  ;;  %v3883_v52 = vpop.f32.mrf.mxu2 }
 0x3dc   : > { %5094 = vpow2.f32 %v4044_v49  ;;  %v3884_v38 = vadd.f32 %v3883_v52, %v7080_v23 }
 0x3dd   : > { %4346 = vst.msk [vmem:[%s6780_s20 + $0x88] sm:$0xff] %vm4328_vm2, %v4309_v48  ;;  %v4131_v34 = vmul.f32 %v4095_v42, %v4095_v42 }
 0x3de   : > { %v3953_v41 = vadd.f32 %v7030_v29, %v3884_v38 }
 0x3df   : > { %v5093_v27 = vpop.eup %5092  ;;  %v4203_v8 = vadd.f32 1.0, %v4131_v34 }
 0x3e0   : > { %v4274_v39 = vmul.f32 %v5093_v27, %v4166_v26  ;;  %v3989_v16 = vmin.f32 %v3953_v41, 20.0  ;;  %v4169_v55 = vmul.f32 2.0, %v3953_v41 }
 0x3e1   : > { %5096 = vrcp.f32 %v4203_v8  ;;  %v3662_v43 = vpop.f32.mrf.mxu1 }
 0x3e2   : > { %v5095_v47 = vpop.eup %5094  ;;  %v4310_v28 = vsub.f32 %v7094_v45, %v4274_v39  ;;  %v4046_v20 = vmul.f32 1.442695, %v3989_v16 }
 0x3e3   : > { %v4096_v33 = vadd.f32 1.0, %v5095_v47  ;;  %v3886_v23 = vpop.f32.mrf.mxu2 }
 0x3e4   : > { %4347 = vst.msk [vmem:[%s6780_s20 + $0x90] sm:$0xff] %vm4328_vm2, %v4310_v28  ;;  %5098 = vpow2.f32 %v4046_v20  ;;  %v3887_v2 = vadd.f32 %v3886_v23, %v3650_v0  ;;  %v4168_v0 = vmul.f32 2.0, %v7110_v12 }
 0x3e5   : > { %v4132_v3 = vmul.f32 %v4096_v33, %v4096_v33 }
 0x3e6   : > { %v3954_v18 = vadd.f32 %v7030_v29, %v3887_v2 }
 0x3e7   : > { %v5097_v1 = vpop.eup %5096  ;;  %v4204_v56 = vadd.f32 1.0, %v4132_v3 }
 0x3e8   : > { %v4275_v36 = vmul.f32 %v5097_v1, %v4167_v17  ;;  %v3990_v19 = vmin.f32 %v3954_v18, 20.0  ;;  %v4170_v7 = vmul.f32 2.0, %v3954_v18 }
 0x3e9   : > { %5100 = vrcp.f32 %v4204_v56 }
 0x3ea   : > { %v5099_v57 = vpop.eup %5098  ;;  %v4311_v45 = vsub.f32 %v3951_v22, %v4275_v36  ;;  %v4048_v44 = vmul.f32 1.442695, %v3990_v19  ;;  %v3665_v21 = vpop.f32.mrf.mxu1 }
 0x3eb   : > { %v4097_v50 = vadd.f32 1.0, %v5099_v57 }
 0x3ec   : > { %4348 = vst.msk [vmem:[%s6780_s20 + $0x98] sm:$0xff] %vm4328_vm2, %v4311_v45  ;;  %5102 = vpow2.f32 %v4048_v44  ;;  %v3889_v11 = vpop.f32.mrf.mxu2 }
 0x3ed   : > { %v4133_v54 = vmul.f32 %v4097_v50, %v4097_v50  ;;  %v3890_v32 = vadd.f32 %v3889_v11, %v3653_v35 }
 0x3ef   : > { %v5101_v10 = vpop.eup %5100  ;;  %v4205_v61 = vadd.f32 1.0, %v4133_v54  ;;  %v3955_v40 = vadd.f32 %v7030_v29, %v3890_v32 }
 0x3f0   : > { %v4276_v4 = vmul.f32 %v5101_v10, %v4168_v0 }
 0x3f1   : > { %5104 = vrcp.f32 %v4205_v61  ;;  %v3991_v37 = vmin.f32 %v3955_v40, 20.0  ;;  %v4171_v47 = vmul.f32 2.0, %v3955_v40 }
 0x3f2   : > { %v5103_v62 = vpop.eup %5102  ;;  %v4312_v63 = vsub.f32 %v7110_v12, %v4276_v4  ;;  %v3668_v8 = vpop.f32.mrf.mxu1 }
 0x3f3   : > { %v4098_v22 = vadd.f32 1.0, %v5103_v62  ;;  %v4050_v13 = vmul.f32 1.442695, %v3991_v37 }
 0x3f4   : > { %4349 = vst.msk [vmem:[%s6780_s20 + $0xa0] sm:$0xff] %vm4328_vm2, %v4312_v63  ;;  %v3892_v14 = vpop.f32.mrf.mxu2 }
 0x3f5   : > { %v4134_v30 = vmul.f32 %v4098_v22, %v4098_v22  ;;  %5106 = vpow2.f32 %v4050_v13  ;;  %v3893_v6 = vadd.f32 %v3892_v14, %v3656_v31 }
 0x3f7   : > { %v5105_v53 = vpop.eup %5104  ;;  %v4206_v24 = vadd.f32 1.0, %v4134_v30  ;;  %v3956_v35 = vadd.f32 %v7030_v29, %v3893_v6 }
 0x3f8   : > { %v4277_v9 = vmul.f32 %v5105_v53, %v4169_v55 }
 0x3f9   : > { %5108 = vrcp.f32 %v4206_v24  ;;  %v3992_v58 = vmin.f32 %v3956_v35, 20.0  ;;  %v4172_v57 = vmul.f32 2.0, %v3956_v35 }
 0x3fa   : > { %v4313_v51 = vsub.f32 %v3953_v41, %v4277_v9  ;;  %v3671_v19 = vpop.f32.mrf.mxu1 }
 0x3fb   : > { %v5107_v12 = vpop.eup %5106  ;;  %v4052_v5 = vmul.f32 1.442695, %v3992_v58 }
 0x3fc   : > { %4350 = vst.msk [vmem:[%s6780_s20 + $0xa8] sm:$0xff] %vm4328_vm2, %v4313_v51  ;;  %v4099_v59 = vadd.f32 1.0, %v5107_v12  ;;  %v3895_v15 = vpop.f32.mrf.mxu2 }
 0x3fd   : > { %5110 = vpow2.f32 %v4052_v5  ;;  %v3896_v25 = vadd.f32 %v3895_v15, %v3659_v60 }
 0x3fe   : > { %v4135_v46 = vmul.f32 %v4099_v59, %v4099_v59 }
 0x3ff   : > { %v5109_v49 = vpop.eup %5108  ;;  %v3957_v48 = vadd.f32 %v7030_v29, %v3896_v25 }
 0x400   : > { %v4278_v42 = vmul.f32 %v5109_v49, %v4170_v7  ;;  %v4207_v52 = vadd.f32 1.0, %v4135_v46 }
 0x401   : > { %v3993_v38 = vmin.f32 %v3957_v48, 20.0  ;;  %v4173_v37 = vmul.f32 2.0, %v3957_v48 }
 0x402   : > { %v4314_v31 = vsub.f32 %v3954_v18, %v4278_v42  ;;  %5112 = vrcp.f32 %v4207_v52  ;;  %v3674_v13 = vpop.f32.mrf.mxu1 }
 0x403   : > { %v5111_v34 = vpop.eup %5110  ;;  %v4054_v26 = vmul.f32 1.442695, %v3993_v38 }
 0x404   : > { %4351 = vst.msk [vmem:[%s6780_s20 + $0xb0] sm:$0xff] %vm4328_vm2, %v4314_v31  ;;  %v4100_v41 = vadd.f32 1.0, %v5111_v34  ;;  %v3898_v27 = vpop.f32.mrf.mxu2 }
 0x405   : > { %5114 = vpow2.f32 %v4054_v26  ;;  %v3899_v39 = vadd.f32 %v3898_v27, %v3662_v43 }
 0x406   : > { %v4136_v16 = vmul.f32 %v4100_v41, %v4100_v41 }
 0x407   : > { %v7138_v28 = vadd.f32 %v7030_v29, %v3899_v39 }
 0x408   : > { %v5113_v20 = vpop.eup %5112  ;;  %v4208_v33 = vadd.f32 1.0, %v4136_v16 }
 0x409   : > { %v4279_v23 = vmul.f32 %v5113_v20, %v4171_v47  ;;  %v3994_v2 = vmin.f32 %v7138_v28, 20.0  ;;  %v4174_v51 = vmul.f32 2.0, %v7138_v28 }
 0x40a   : > { %5116 = vrcp.f32 %v4208_v33  ;;  %v3677_v25 = vpop.f32.mrf.mxu1 }
 0x40b   : > { %v5115_v3 = vpop.eup %5114  ;;  %v4315_v17 = vsub.f32 %v3955_v40, %v4279_v23  ;;  %v4056_v18 = vmul.f32 1.442695, %v3994_v2 }
 0x40c   : > { %v4101_v60 = vadd.f32 1.0, %v5115_v3  ;;  %v3901_v1 = vpop.f32.mrf.mxu2 }
 0x40d   : > { %4352 = vst.msk [vmem:[%s6780_s20 + $0xb8] sm:$0xff] %vm4328_vm2, %v4315_v17  ;;  %5118 = vpow2.f32 %v4056_v18  ;;  %v3902_v56 = vadd.f32 %v3901_v1, %v3665_v21 }
 0x40e   : > { %v4137_v36 = vmul.f32 %v4101_v60, %v4101_v60 }
 0x40f   : > { %v7144_v45 = vadd.f32 %v7030_v29, %v3902_v56 }
 0x410   : > { %v5117_v44 = vpop.eup %5116  ;;  %v4209_v50 = vadd.f32 1.0, %v4137_v36 }
 0x411   : > { %v4280_v11 = vmul.f32 %v5117_v44, %v4172_v57  ;;  %v3995_v54 = vmin.f32 %v7144_v45, 20.0  ;;  %v4175_v31 = vmul.f32 2.0, %v7144_v45 }
 0x412   : > { %5120 = vrcp.f32 %v4209_v50  ;;  %v3680_v33 = vpop.f32.mrf.mxu1 }
 0x413   : > { %v5119_v32 = vpop.eup %5118  ;;  %v4316_v0 = vsub.f32 %v3956_v35, %v4280_v11  ;;  %v4058_v10 = vmul.f32 1.442695, %v3995_v54 }
 0x414   : > { %v4102_v61 = vadd.f32 1.0, %v5119_v32  ;;  %v3904_v40 = vpop.f32.mrf.mxu2 }
 0x415   : > { %4353 = vst.msk [vmem:[%s6780_s20 + $0xc0] sm:$0xff] %vm4328_vm2, %v4316_v0  ;;  %5122 = vpow2.f32 %v4058_v10  ;;  %v3905_v4 = vadd.f32 %v3904_v40, %v3668_v8 }
 0x416   : > { %v4138_v43 = vmul.f32 %v4102_v61, %v4102_v61 }
 0x417   : > { %v7150_v62 = vadd.f32 %v7030_v29, %v3905_v4 }
 0x418   : > { %v5121_v63 = vpop.eup %5120  ;;  %v4210_v22 = vadd.f32 1.0, %v4138_v43 }
 0x419   : > { %v4281_v14 = vmul.f32 %v5121_v63, %v4173_v37  ;;  %v3996_v30 = vmin.f32 %v7150_v62, 20.0  ;;  %v4176_v3 = vmul.f32 2.0, %v7150_v62 }
 0x41a   : > { %5124 = vrcp.f32 %v4210_v22  ;;  %v3683_v54 = vpop.f32.mrf.mxu1 }
 0x41b   : > { %v5123_v6 = vpop.eup %5122  ;;  %v4317_v55 = vsub.f32 %v3957_v48, %v4281_v14  ;;  %v4060_v53 = vmul.f32 1.442695, %v3996_v30 }
 0x41c   : > { %v4103_v24 = vadd.f32 1.0, %v5123_v6  ;;  %v3907_v35 = vpop.f32.mrf.mxu2 }
 0x41d   : > { %4354 = vst.msk [vmem:[%s6780_s20 + $0xc8] sm:$0xff] %vm4328_vm2, %v4317_v55  ;;  %5126 = vpow2.f32 %v4060_v53  ;;  %v3908_v9 = vadd.f32 %v3907_v35, %v3671_v19 }
 0x41e   : > { %v4139_v58 = vmul.f32 %v4103_v24, %v4103_v24 }
 0x41f   : > { %v7157_v21 = vadd.f32 %v7030_v29, %v3908_v9 }
 0x420   : > { %v5125_v12 = vpop.eup %5124  ;;  %v4211_v5 = vadd.f32 1.0, %v4139_v58 }
 0x421   : > { %v4282_v59 = vmul.f32 %v5125_v12, %v4174_v51  ;;  %v3997_v15 = vmin.f32 %v7157_v21, 20.0  ;;  %v4177_v32 = vmul.f32 2.0, %v7157_v21 }
 0x422   : > { %5128 = vrcp.f32 %v4211_v5  ;;  %v3686_v24 = vpop.f32.mrf.mxu1 }
 0x423   : > { %v5127_v7 = vpop.eup %5126  ;;  %v4318_v46 = vsub.f32 %v7138_v28, %v4282_v59  ;;  %v4062_v49 = vmul.f32 1.442695, %v3997_v15 }
 0x424   : > { %v4104_v48 = vadd.f32 1.0, %v5127_v7  ;;  %v3910_v42 = vpop.f32.mrf.mxu2 }
 0x425   : > { %4355 = vst.msk [vmem:[%s6780_s20 + $0xd0] sm:$0xff] %vm4328_vm2, %v4318_v46  ;;  %5130 = vpow2.f32 %v4062_v49  ;;  %v3911_v52 = vadd.f32 %v3910_v42, %v3674_v13 }
 0x426   : > { %v4140_v38 = vmul.f32 %v4104_v48, %v4104_v48 }
 0x427   : > { %v7165_v34 = vadd.f32 %v7030_v29, %v3911_v52 }
 0x428   : > { %v5129_v26 = vpop.eup %5128  ;;  %v4212_v41 = vadd.f32 1.0, %v4140_v38 }
 0x429   : > { %v4283_v27 = vmul.f32 %v5129_v26, %v4175_v31  ;;  %v3998_v8 = vmin.f32 %v7165_v34, 20.0  ;;  %v4178_v30 = vmul.f32 2.0, %v7165_v34 }
 0x42a   : > { %5132 = vrcp.f32 %v4212_v41  ;;  %v3689_v52 = vpop.f32.mrf.mxu1 }
 0x42b   : > { %v5131_v39 = vpop.eup %5130  ;;  %v4319_v16 = vsub.f32 %v7144_v45, %v4283_v27  ;;  %v4064_v47 = vmul.f32 1.442695, %v3998_v8 }
 0x42c   : > { %v4105_v28 = vadd.f32 1.0, %v5131_v39  ;;  %v3913_v20 = vpop.f32.mrf.mxu2 }
 0x42d   : > { %4356 = vst.msk [vmem:[%s6780_s20 + $0xd8] sm:$0xff] %vm4328_vm2, %v4319_v16  ;;  %5134 = vpow2.f32 %v4064_v47  ;;  %v3914_v23 = vadd.f32 %v3913_v20, %v3677_v25 }
 0x42e   : > { %v4141_v2 = vmul.f32 %v4105_v28, %v4105_v28 }
 0x42f   : > { %v7173_v17 = vadd.f32 %v7030_v29, %v3914_v23 }
 0x430   : > { %v5133_v18 = vpop.eup %5132  ;;  %v4213_v60 = vadd.f32 1.0, %v4141_v2 }
 0x431   : > { %v4284_v1 = vmul.f32 %v5133_v18, %v4176_v3  ;;  %v3999_v56 = vmin.f32 %v7173_v17, 20.0  ;;  %v4179_v25 = vmul.f32 2.0, %v7173_v17 }
 0x432   : > { %5136 = vrcp.f32 %v4213_v60 }
 0x433   : > { %v5135_v36 = vpop.eup %5134  ;;  %v4320_v19 = vsub.f32 %v7150_v62, %v4284_v1  ;;  %v4066_v57 = vmul.f32 1.442695, %v3999_v56 }
 0x434   : > { %v4106_v45 = vadd.f32 1.0, %v5135_v36  ;;  %v3916_v44 = vpop.f32.mrf.mxu2 }
 0x435   : > { %4357 = vst.msk [vmem:[%s6780_s20 + $0xe0] sm:$0xff] %vm4328_vm2, %v4320_v19  ;;  %5138 = vpow2.f32 %v4066_v57  ;;  %v3917_v50 = vadd.f32 %v3916_v44, %v3680_v33 }
 0x436   : > { %v4142_v11 = vmul.f32 %v4106_v45, %v4106_v45 }
 0x437   : > { %v3964_v0 = vadd.f32 %v7030_v29, %v3917_v50 }
 0x438   : > { %v5137_v10 = vpop.eup %5136  ;;  %v4214_v61 = vadd.f32 1.0, %v4142_v11 }
 0x439   : > { %v4285_v40 = vmul.f32 %v5137_v10, %v4177_v32  ;;  %v4000_v4 = vmin.f32 %v3964_v0, 20.0  ;;  %v4180_v39 = vmul.f32 2.0, %v3964_v0 }
 0x43a   : > { %5140 = vrcp.f32 %v4214_v61 }
 0x43b   : > { %v5139_v43 = vpop.eup %5138  ;;  %v4321_v37 = vsub.f32 %v7157_v21, %v4285_v40  ;;  %v4068_v62 = vmul.f32 1.442695, %v4000_v4 }
 0x43c   : > { %v4107_v63 = vadd.f32 1.0, %v5139_v43  ;;  %v3919_v22 = vpop.f32.mrf.mxu2 }
 0x43d   : > { %4358 = vst.msk [vmem:[%s6780_s20 + $0xe8] sm:$0xff] %vm4328_vm2, %v4321_v37  ;;  %5142 = vpow2.f32 %v4068_v62  ;;  %v3920_v13 = vadd.f32 %v3919_v22, %v3683_v54 }
 0x43e   : > { %v4143_v14 = vmul.f32 %v4107_v63, %v4107_v63 }
 0x43f   : > { %v3965_v6 = vadd.f32 %v7030_v29, %v3920_v13 }
 0x440   : > { %v5141_v55 = vpop.eup %5140  ;;  %v4215_v53 = vadd.f32 1.0, %v4143_v14 }
 0x441   : > { %v4286_v35 = vmul.f32 %v5141_v55, %v4178_v30  ;;  %v4001_v9 = vmin.f32 %v3965_v6, 20.0  ;;  %v4181_v60 = vmul.f32 2.0, %v3965_v6 }
 0x442   : > { %5144 = vrcp.f32 %v4215_v53 }
 0x443   : > { %v5143_v58 = vpop.eup %5142  ;;  %v4322_v51 = vsub.f32 %v7165_v34, %v4286_v35  ;;  %v4070_v21 = vmul.f32 1.442695, %v4001_v9 }
 0x444   : > { %v4108_v12 = vadd.f32 1.0, %v5143_v58  ;;  %v3922_v5 = vpop.f32.mrf.mxu2 }
 0x445   : > { %4359 = vst.msk [vmem:[%s6780_s20 + $0xf0] sm:$0xff] %vm4328_vm2, %v4322_v51  ;;  %5146 = vpow2.f32 %v4070_v21  ;;  %v3923_v59 = vadd.f32 %v3922_v5, %v3686_v24 }
 0x446   : > { %v4144_v15 = vmul.f32 %v4108_v12, %v4108_v12 }
 0x447   : > { %v3966_v7 = vadd.f32 %v7030_v29, %v3923_v59 }
 0x448   : > { %v5145_v46 = vpop.eup %5144  ;;  %v4216_v49 = vadd.f32 1.0, %v4144_v15 }
 0x449   : > { %v4287_v48 = vmul.f32 %v5145_v46, %v4179_v25  ;;  %v4002_v42 = vmin.f32 %v3966_v7, 20.0  ;;  %v4182_v44 = vmul.f32 2.0, %v3966_v7 }
 0x44a   : > { %5148 = vrcp.f32 %v4216_v49 }
 0x44b   : > { %v5147_v38 = vpop.eup %5146  ;;  %v4323_v31 = vsub.f32 %v7173_v17, %v4287_v48  ;;  %v4072_v34 = vmul.f32 1.442695, %v4002_v42 }
 0x44c   : > { %v4109_v26 = vadd.f32 1.0, %v5147_v38  ;;  %v3925_v41 = vpop.f32.mrf.mxu2 }
 0x44d   : > { %4360 = vst.msk [vmem:[%s6780_s20 + $0xf8] sm:$0xff] %vm4328_vm2, %v4323_v31  ;;  %5150 = vpow2.f32 %v4072_v34  ;;  %v3926_v27 = vadd.f32 %v3925_v41, %v3689_v52 }
 0x44e   : > { %v4145_v8 = vmul.f32 %v4109_v26, %v4109_v26 }
 0x44f   : > { %v3967_v16 = vadd.f32 %v7030_v29, %v3926_v27 }
 0x450   : > { %v5149_v47 = vpop.eup %5148  ;;  %v4217_v28 = vadd.f32 1.0, %v4145_v8 }
 0x451   : > { %v4288_v20 = vmul.f32 %v5149_v47, %v4180_v39  ;;  %v4003_v33 = vmin.f32 %v3967_v16, 20.0 }
 0x452   : > { %5152 = vrcp.f32 %v4217_v28 }
 0x453   : > { %v5151_v23 = vpop.eup %5150  ;;  %v4324_v2 = vsub.f32 %v3964_v0, %v4288_v20  ;;  %v4074_v3 = vmul.f32 1.442695, %v4003_v33  ;;  %v4183_v0 = vmul.f32 2.0, %v3967_v16 }
 0x454   : > { %v4110_v17 = vadd.f32 1.0, %v5151_v23 }
 0x455   : > { %4361 = vst.msk [vmem:[%s6780_s20 + $0x100] sm:$0xff] %vm4328_vm2, %v4324_v2  ;;  %5154 = vpow2.f32 %v4074_v3 }
 0x456   : > { %v4146_v18 = vmul.f32 %v4110_v17, %v4110_v17 }
 0x458   : > { %v5153_v1 = vpop.eup %5152  ;;  %v4218_v56 = vadd.f32 1.0, %v4146_v18 }
 0x459   : > { %v4289_v36 = vmul.f32 %v5153_v1, %v4181_v60 }
 0x45a   : > { %5156 = vrcp.f32 %v4218_v56 }
 0x45b   : > { %v5155_v29 = vpop.eup %5154  ;;  %v4325_v19 = vsub.f32 %v3965_v6, %v4289_v36 }
 0x45c   : > { %v4111_v57 = vadd.f32 1.0, %v5155_v29 }
 0x45d   : > { %4362 = vst.msk [vmem:[%s6780_s20 + $0x108] sm:$0xff] %vm4328_vm2, %v4325_v19 }
 0x45e   : > { %v4147_v45 = vmul.f32 %v4111_v57, %v4111_v57 }
 0x460   : > { %v5157_v50 = vpop.eup %5156  ;;  %v4219_v11 = vadd.f32 1.0, %v4147_v45 }
 0x461   : > { %v4290_v54 = vmul.f32 %v5157_v50, %v4182_v44 }
 0x462   : > { %5158 = vrcp.f32 %v4219_v11 }
 0x463   : > { %v4326_v32 = vsub.f32 %v3966_v7, %v4290_v54 }
 0x465   : > { %4363 = vst.msk [vmem:[%s6780_s20 + $0x110] sm:$0xff] %vm4328_vm2, %v4326_v32 }
 0x468   : > { %v5159_v10 = vpop.eup %5158 }
 0x469   : > { %v4291_v61 = vmul.f32 %v5159_v10, %v4183_v0 }
 0x46b   : > { %v4327_v40 = vsub.f32 %v3967_v16, %v4291_v61 }
 0x46d   : > { %4364 = vst.msk [vmem:[%s6780_s20 + $0x118] sm:$0xff] %vm4328_vm2, %v4327_v40 }
 0x46e PF: > { %s17_s24 = sadd.s32 1, %s5169_s24  }
 0x46f   : > { %p14_p4 = scmp.ge.s32.totalorder %s17_s24, 4  }
 0x471   :  { %16 = sbr.rel (!%p14_p4) target bundleno = 1 (0x1), region = 89 }

</bundles_post_ra>
